<compile_context>
chip_gen: v7x
topology: tpu7x:2x2x1
jax: 0.10.0
libtpu: 0.0.40
codegen_flags: <defaults>
</compile_context>

<pallas_src>
import jax
import jax.numpy as jnp
from jax.experimental import pallas as pl
from jax.experimental.pallas import tpu as pltpu

BN_EPS = 1e-5


# --------------------------------------------------------------------------- #
# Fused kernel
# --------------------------------------------------------------------------- #
def make_decoder_kernel(cins, couts, N, H, W):
    """Kernel refs, in order:
      x_ref                      (N, H, W*cin0)        bf16 raw (3-ch) input, lane-flat
      per conv layer i:
        t_ref_i                  (3, W*cin, W*cout)    bf16 block-banded Toeplitz weights
        fold_ref_i               (W*cout, cout)        f32  lane->channel fold matrix
        exp_ref_i                (cout, W*cout)        f32  channel->lane expand matrix
        g_ref_i, b_ref_i         (1, cout)             f32  BN affine params
      wl_ref                     (M, M)                f32  linear weight (in, out)
      bl_ref                     (1, M)                f32  linear bias
      o_ref                      (N, M)                f32  output
      xh_ref   (scratch)         (N, H+2, W*cin0)      bf16 input H-halo buffer
      act_ref  (scratch)         (N, H+2, W*cmid)      bf16 activation H-halo buffer
    """
    n_layers = len(couts)
    cin0 = cins[0]
    cmid = couts[0]                        # every intermediate layer emits cmid channels
    inv_cnt = 1.0 / float(N * H * W)

    def kernel(*refs):
        x_ref = refs[0]
        layer_refs = refs[1:1 + 5 * n_layers]
        wl_ref = refs[1 + 5 * n_layers]
        bl_ref = refs[2 + 5 * n_layers]
        o_ref = refs[3 + 5 * n_layers]
        xh_ref = refs[4 + 5 * n_layers]
        act_ref = refs[5 + 5 * n_layers]

        # Stage the raw 3-channel input into its tiny H-halo buffer and zero ONLY
        # the 1-row top/bottom halos (interiors are written before being read).
        zx = jnp.zeros((N, 1, W * cin0), jnp.bfloat16)
        xh_ref[:, 0:1, :] = zx
        xh_ref[:, H + 1:H + 2, :] = zx
        xh_ref[:, 1:H + 1, :] = x_ref[...]
        za = jnp.zeros((N, 1, W * cmid), jnp.bfloat16)
        act_ref[:, 0:1, :] = za
        act_ref[:, H + 1:H + 2, :] = za

        src = xh_ref
        y = None
        for li in range(n_layers):                 # static unroll over layers
            cin, cout = cins[li], couts[li]
            t_ref = layer_refs[5 * li + 0]
            fold_ref = layer_refs[5 * li + 1]
            exp_ref = layer_refs[5 * li + 2]
            g_ref = layer_refs[5 * li + 3]
            b_ref = layer_refs[5 * li + 4]

            # 3x3 "same" conv == 3 matmuls against block-banded row-Toeplitz
            # weights; the dw shifts and the W zero-padding live in t_ref, so no
            # per-tap slicing / reshaping / lane-concat relayouts are needed.
            acc = None
            for dh in range(3):                    # static unroll over kernel rows
                xs = src[:, dh:dh + H, :].reshape(N * H, W * cin)
                p = jnp.dot(xs, t_ref[dh], preferred_element_type=jnp.float32)
                acc = p if acc is None else acc + p
            # Conv bias intentionally omitted: it cancels exactly under
            # training-mode BatchNorm (it only shifts the mean that is
            # immediately subtracted).

            # BatchNorm2d (training mode, biased variance), two-pass for accuracy.
            # fold/expand are 0/1 constant matrices -> tiny MXU matmuls instead of
            # lane-changing reshapes or tiled broadcasts.
            s_row = jnp.sum(acc, axis=0, keepdims=True)                   # (1, W*cout)
            mean_c = jnp.dot(s_row, fold_ref[...],
                             preferred_element_type=jnp.float32) * inv_cnt  # (1, cout)
            mean_t = jnp.dot(mean_c, exp_ref[...],
                             preferred_element_type=jnp.float32)          # (1, W*cout)
            d = acc - mean_t
            sq_row = jnp.sum(d * d, axis=0, keepdims=True)
            var_c = jnp.dot(sq_row, fold_ref[...],
                            preferred_element_type=jnp.float32) * inv_cnt
            scale_c = g_ref[...] * jax.lax.rsqrt(var_c + BN_EPS)           # (1, cout)
            scale_t = jnp.dot(scale_c, exp_ref[...],
                              preferred_element_type=jnp.float32)
            beta_t = jnp.dot(b_ref[...], exp_ref[...],
                             preferred_element_type=jnp.float32)
            y = jnp.maximum(d * scale_t + beta_t, 0.0)                     # (N*H, W*cout)

            if li + 1 < n_layers:
                # Single f32->bf16 cast at writeback; lane-dense full-width store
                # into the (still zero-halo'd) activation buffer for the next layer.
                act_ref[:, 1:H + 1, :] = y.astype(jnp.bfloat16).reshape(N, H, W * cout)
                src = act_ref

        # AdaptiveAvgPool2d((1,1)) + squeeze + Linear + Sigmoid on the in-VMEM
        # value of the last (message_length-channel) layer.
        M = couts[-1]
        last_fold = layer_refs[5 * (n_layers - 1) + 1]                     # (W*M, M)
        per_n = jnp.sum(y.reshape(N, H, W * M), axis=1)                    # (N, W*M)
        pooled = jnp.dot(per_n, last_fold[...],
                         preferred_element_type=jnp.float32) * (1.0 / (H * W))  # (N, M)
        z = jnp.dot(pooled, wl_ref[...],
                    preferred_element_type=jnp.float32) + bl_ref[...]
        o_ref[...] = jax.nn.sigmoid(z)

    return kernel


# --------------------------------------------------------------------------- #
# Wrapper
# --------------------------------------------------------------------------- #
def decoder_sigmoid_forward(image_nchw, conv_params, lin_params):
    """image_nchw: (N, 3, H, W) like the PyTorch module; returns (N, message_length)."""
    N, cin0, H, W = image_nchw.shape
    # NCHW -> NHWC -> lane-flattened (N, H, W*C).  Raw 3 channels, no channel pad.
    x = jnp.transpose(image_nchw, (0, 2, 3, 1)).reshape(N, H, W * cin0)
    x = x.astype(jnp.bfloat16)

    cins = [w.shape[2] for (w, _, _, _) in conv_params]
    couts = [w.shape[3] for (w, _, _, _) in conv_params]
    n_layers = len(conv_params)
    cmid = couts[0]
    assert cins[0] == cin0
    assert all(c == cmid for c in couts[:-1]), couts
    assert all(cins[i + 1] == couts[i] for i in range(n_layers - 1))

    kernel_args = [x]
    in_specs = [pl.BlockSpec(x.shape, lambda: (0, 0, 0))]
    for (w, _b, gamma, beta) in conv_params:
        cin, cout = w.shape[2], w.shape[3]
        # Block-banded row-Toeplitz weights:
        #   T[dh][wi*cin+ci, wo*cout+co] = w[dh, wi-wo+1, ci, co]  (0 outside the band)
        # which folds the dw shifts and the W zero-padding of the 'same' conv into
        # the weight, so the kernel never slices/relayouts along W.
        t = jnp.stack([
            sum(jnp.kron(jnp.eye(W, k=1 - dw, dtype=jnp.float32), w[dh, dw])
                for dw in range(3))
            for dh in range(3)
        ]).astype(jnp.bfloat16)                                      # (3, W*cin, W*cout)
        fold = jnp.tile(jnp.eye(cout, dtype=jnp.float32), (W, 1))    # (W*cout, cout)
        expand = jnp.tile(jnp.eye(cout, dtype=jnp.float32), (1, W))  # (cout, W*cout)
        g2 = gamma.reshape(1, cout).astype(jnp.float32)
        b2 = beta.reshape(1, cout).astype(jnp.float32)
        kernel_args += [t, fold, expand, g2, b2]
        in_specs += [
            pl.BlockSpec(t.shape, lambda: (0, 0, 0)),
            pl.BlockSpec(fold.shape, lambda: (0, 0)),
            pl.BlockSpec(expand.shape, lambda: (0, 0)),
            pl.BlockSpec(g2.shape, lambda: (0, 0)),
            pl.BlockSpec(b2.shape, lambda: (0, 0)),
        ]

    w_lin, b_lin = lin_params
    M = couts[-1]
    w_lin = w_lin.astype(jnp.float32)
    b_lin2 = b_lin.reshape(1, M).astype(jnp.float32)
    kernel_args += [w_lin, b_lin2]
    in_specs += [pl.BlockSpec(w_lin.shape, lambda: (0, 0)),
                 pl.BlockSpec(b_lin2.shape, lambda: (0, 0))]

    kernel = make_decoder_kernel(cins, couts, N, H, W)

    # TODO(synk): for non-toy N*H*W, tile W (band weights per W-tile with a 2-column
    # halo) and add a row/batch grid axis marked "parallel" plus a cross-tile
    # sum/sumsq pass for BN so v7x's 2 TensorCores are used and per-tile working
    # sets stay under its 64 MiB VMEM; at these sizes one gridless call is fine.
    out = pl.pallas_call(
        kernel,
        out_shape=jax.ShapeDtypeStruct((N, M), jnp.float32),
        in_specs=in_specs,
        out_specs=pl.BlockSpec((N, M), lambda: (0, 0)),
        scratch_shapes=[
            pltpu.VMEM((N, H + 2, W * cin0), jnp.bfloat16),   # input H-halo buffer
            pltpu.VMEM((N, H + 2, W * cmid), jnp.bfloat16),   # activation H-halo buffer
        ],
        compiler_params=pltpu.CompilerParams(vmem_limit_bytes=32 * 1024 * 1024),
    )(*kernel_args)
    return out


# --------------------------------------------------------------------------- #
# Pure-JAX reference (mirrors the PyTorch module in training mode)
# --------------------------------------------------------------------------- #
def decoder_reference(image_nchw, conv_params, lin_params):
    x = image_nchw.astype(jnp.float32)
    for (w, b, gamma, beta) in conv_params:
        y = jax.lax.conv_general_dilated(
            x, w, window_strides=(1, 1), padding=((1, 1), (1, 1)),
            dimension_numbers=("NCHW", "HWIO", "NCHW"))
        y = y + b[None, :, None, None]
        mean = jnp.mean(y, axis=(0, 2, 3), keepdims=True)
        var = jnp.mean((y - mean) ** 2, axis=(0, 2, 3), keepdims=True)
        y = (y - mean) * jax.lax.rsqrt(var + BN_EPS)
        y = y * gamma[None, :, None, None] + beta[None, :, None, None]
        x = jnp.maximum(y, 0.0)
    pooled = jnp.mean(x, axis=(2, 3))      # AdaptiveAvgPool2d((1,1)) + squeeze
    w_lin, b_lin = lin_params              # stored as (in, out)
    return jax.nn.sigmoid(pooled @ w_lin + b_lin)


# --------------------------------------------------------------------------- #
# Deterministic parameter init (shapes follow Decoder_sigmoid.__init__)
# --------------------------------------------------------------------------- #
def init_params(key, decoder_channels, decoder_blocks, message_length):
    specs = ([(3, decoder_channels)]
             + [(decoder_channels, decoder_channels)] * (decoder_blocks - 1)
             + [(decoder_channels, message_length)])
    conv_params = []
    for (cin, cout) in specs:
        key, k1, k2 = jax.random.split(key, 3)
        bound = 1.0 / float(cin * 9) ** 0.5  # PyTorch-style kaiming_uniform bound
        w = jax.random.uniform(k1, (3, 3, cin, cout), jnp.float32, -bound, bound)
        b = jax.random.uniform(k2, (cout,), jnp.float32, -bound, bound)
        gamma = jnp.ones((cout,), jnp.float32)   # BatchNorm2d default init
        beta = jnp.zeros((cout,), jnp.float32)
        conv_params.append((w, b, gamma, beta))

    key, k1, k2 = jax.random.split(key, 3)
    lb = 1.0 / float(message_length) ** 0.5
    # stored as (in, out) so both kernel and reference do pooled @ w_lin (== x @ W.T)
    w_lin = jax.random.uniform(k1, (message_length, message_length), jnp.float32, -lb, lb)
    b_lin = jax.random.uniform(k2, (message_length,), jnp.float32, -lb, lb)
    return conv_params, (w_lin, b_lin)


# --------------------------------------------------------------------------- #
if __name__ == "__main__":
    key = jax.random.PRNGKey(0)
    key, kx = jax.random.split(key)

    # Small, module-consistent shapes: batch=2, 3-channel 16x16 image,
    # decoder_channels=32, decoder_blocks=3, message_length=8.
    decoder_channels, decoder_blocks, message_length = 32, 3, 8
    conv_params, lin_params = init_params(key, decoder_channels, decoder_blocks,
                                          message_length)

    image_with_wm = jax.random.normal(kx, (2, 3, 16, 16), jnp.float32)  # NCHW

    out = decoder_sigmoid_forward(image_with_wm, conv_params, lin_params)
    out = jax.block_until_ready(out)

    ref = decoder_reference(image_with_wm, conv_params, lin_params)
    ref = jax.block_until_ready(ref)

    assert out.shape == (2, message_length), out.shape
    assert out.dtype == jnp.float32
    assert bool(jnp.all((out >= 0.0) & (out <= 1.0)))  # sigmoid range sanity check
    max_err = float(jnp.max(jnp.abs(out - ref)))       # bf16 matmul operands -> loose tol
    assert max_err < 5e-2, f"max abs err vs reference: {max_err}"
    print("KERNEL_OK")
</pallas_src>

<mosaic_0001>
module attributes {stable_mosaic.version = 11 : i64} {
  func.func @kernel(%arg0: memref<2x16x48xbf16, #tpu.memory_space<vmem>>, %arg1: memref<3x48x512xbf16, #tpu.memory_space<vmem>>, %arg2: memref<512x32xf32, #tpu.memory_space<vmem>>, %arg3: memref<32x512xf32, #tpu.memory_space<vmem>>, %arg4: memref<1x32xf32, #tpu.memory_space<vmem>>, %arg5: memref<1x32xf32, #tpu.memory_space<vmem>>, %arg6: memref<3x512x512xbf16, #tpu.memory_space<vmem>>, %arg7: memref<512x32xf32, #tpu.memory_space<vmem>>, %arg8: memref<32x512xf32, #tpu.memory_space<vmem>>, %arg9: memref<1x32xf32, #tpu.memory_space<vmem>>, %arg10: memref<1x32xf32, #tpu.memory_space<vmem>>, %arg11: memref<3x512x512xbf16, #tpu.memory_space<vmem>>, %arg12: memref<512x32xf32, #tpu.memory_space<vmem>>, %arg13: memref<32x512xf32, #tpu.memory_space<vmem>>, %arg14: memref<1x32xf32, #tpu.memory_space<vmem>>, %arg15: memref<1x32xf32, #tpu.memory_space<vmem>>, %arg16: memref<3x512x128xbf16, #tpu.memory_space<vmem>>, %arg17: memref<128x8xf32, #tpu.memory_space<vmem>>, %arg18: memref<8x128xf32, #tpu.memory_space<vmem>>, %arg19: memref<1x8xf32, #tpu.memory_space<vmem>>, %arg20: memref<1x8xf32, #tpu.memory_space<vmem>>, %arg21: memref<8x8xf32, #tpu.memory_space<vmem>>, %arg22: memref<1x8xf32, #tpu.memory_space<vmem>>, %arg23: memref<2x8xf32, #tpu.memory_space<vmem>>, %arg24: memref<2x18x48xbf16, #tpu.memory_space<vmem>>, %arg25: memref<2x18x512xbf16, #tpu.memory_space<vmem>>) attributes {dimension_semantics = [], scalar_prefetch = 0 : i64, scratch_operands = 2 : i64, tpu.core_type = #tpu.core_type<tc>} {
    %cst = arith.constant 0.000000e+00 : bf16
    %0 = vector.broadcast %cst : bf16 to vector<2x1x48xbf16>
    %c0 = arith.constant 0 : index
    %c0_0 = arith.constant 0 : index
    %c0_1 = arith.constant 0 : index
    %1 = vector.load %arg24[%c0, %c0_0, %c0_1] : memref<2x18x48xbf16, #tpu.memory_space<vmem>>, vector<2x1x48xbf16>
    tpu.vector_store %arg24[%c0, %c0_0, %c0_1], %0 {strides = array<i32>} : memref<2x18x48xbf16, #tpu.memory_space<vmem>>, vector<2x1x48xbf16>,
    %c0_2 = arith.constant 0 : index
    %c17 = arith.constant 17 : index
    %c0_3 = arith.constant 0 : index
    %2 = vector.load %arg24[%c0_2, %c17, %c0_3] : memref<2x18x48xbf16, #tpu.memory_space<vmem>>, vector<2x1x48xbf16>
    tpu.vector_store %arg24[%c0_2, %c17, %c0_3], %0 {strides = array<i32>} : memref<2x18x48xbf16, #tpu.memory_space<vmem>>, vector<2x1x48xbf16>,
    %c0_4 = arith.constant 0 : index
    %c0_5 = arith.constant 0 : index
    %c0_6 = arith.constant 0 : index
    %3 = vector.load %arg0[%c0_4, %c0_5, %c0_6] : memref<2x16x48xbf16, #tpu.memory_space<vmem>>, vector<2x16x48xbf16>
    %c0_7 = arith.constant 0 : index
    %c1 = arith.constant 1 : index
    %c0_8 = arith.constant 0 : index
    %4 = vector.load %arg24[%c0_7, %c1, %c0_8] : memref<2x18x48xbf16, #tpu.memory_space<vmem>>, vector<2x16x48xbf16>
    tpu.vector_store %arg24[%c0_7, %c1, %c0_8], %3 {strides = array<i32>} : memref<2x18x48xbf16, #tpu.memory_space<vmem>>, vector<2x16x48xbf16>,
    %cst_9 = arith.constant 0.000000e+00 : bf16
    %5 = vector.broadcast %cst_9 : bf16 to vector<2x1x512xbf16>
    %c0_10 = arith.constant 0 : index
    %c0_11 = arith.constant 0 : index
    %c0_12 = arith.constant 0 : index
    %6 = vector.load %arg25[%c0_10, %c0_11, %c0_12] : memref<2x18x512xbf16, #tpu.memory_space<vmem>>, vector<2x1x512xbf16>
    tpu.vector_store %arg25[%c0_10, %c0_11, %c0_12], %5 {strides = array<i32>} : memref<2x18x512xbf16, #tpu.memory_space<vmem>>, vector<2x1x512xbf16>,
    %c0_13 = arith.constant 0 : index
    %c17_14 = arith.constant 17 : index
    %c0_15 = arith.constant 0 : index
    %7 = vector.load %arg25[%c0_13, %c17_14, %c0_15] : memref<2x18x512xbf16, #tpu.memory_space<vmem>>, vector<2x1x512xbf16>
    tpu.vector_store %arg25[%c0_13, %c17_14, %c0_15], %5 {strides = array<i32>} : memref<2x18x512xbf16, #tpu.memory_space<vmem>>, vector<2x1x512xbf16>,
    %c0_16 = arith.constant 0 : index
    %c0_17 = arith.constant 0 : index
    %c0_18 = arith.constant 0 : index
    %8 = vector.load %arg24[%c0_16, %c0_17, %c0_18] : memref<2x18x48xbf16, #tpu.memory_space<vmem>>, vector<2x16x48xbf16>
    %9 = vector.shape_cast %8 : vector<2x16x48xbf16> to vector<32x48xbf16>
    %c0_19 = arith.constant 0 : index
    %c0_20 = arith.constant 0 : index
    %c0_21 = arith.constant 0 : index
    %10 = vector.load %arg1[%c0_19, %c0_20, %c0_21] : memref<3x48x512xbf16, #tpu.memory_space<vmem>>, vector<1x48x512xbf16>
    %11 = vector.shape_cast %10 : vector<1x48x512xbf16> to vector<48x512xbf16>
    %cst_22 = arith.constant dense<0.000000e+00> : vector<32x512xf32>
    %12 = tpu.matmul %9, %11, %cst_22 {dimension_numbers = #tpu.dot_dimension_numbers<[1], [0], [0], [1], [0, 0, 1, 1], [], []>} : vector<32x48xbf16>, vector<48x512xbf16>, vector<32x512xf32> -> vector<32x512xf32>
    %c0_23 = arith.constant 0 : index
    %c1_24 = arith.constant 1 : index
    %c0_25 = arith.constant 0 : index
    %13 = vector.load %arg24[%c0_23, %c1_24, %c0_25] : memref<2x18x48xbf16, #tpu.memory_space<vmem>>, vector<2x16x48xbf16>
    %14 = vector.shape_cast %13 : vector<2x16x48xbf16> to vector<32x48xbf16>
    %c1_26 = arith.constant 1 : index
    %c0_27 = arith.constant 0 : index
    %c0_28 = arith.constant 0 : index
    %15 = vector.load %arg1[%c1_26, %c0_27, %c0_28] : memref<3x48x512xbf16, #tpu.memory_space<vmem>>, vector<1x48x512xbf16>
    %16 = vector.shape_cast %15 : vector<1x48x512xbf16> to vector<48x512xbf16>
    %cst_29 = arith.constant dense<0.000000e+00> : vector<32x512xf32>
    %17 = tpu.matmul %14, %16, %cst_29 {dimension_numbers = #tpu.dot_dimension_numbers<[1], [0], [0], [1], [0, 0, 1, 1], [], []>} : vector<32x48xbf16>, vector<48x512xbf16>, vector<32x512xf32> -> vector<32x512xf32>
    %18 = arith.addf %12, %17 : vector<32x512xf32>
    %c0_30 = arith.constant 0 : index
    %c2 = arith.constant 2 : index
    %c0_31 = arith.constant 0 : index
    %19 = vector.load %arg24[%c0_30, %c2, %c0_31] : memref<2x18x48xbf16, #tpu.memory_space<vmem>>, vector<2x16x48xbf16>
    %20 = vector.shape_cast %19 : vector<2x16x48xbf16> to vector<32x48xbf16>
    %c2_32 = arith.constant 2 : index
    %c0_33 = arith.constant 0 : index
    %c0_34 = arith.constant 0 : index
    %21 = vector.load %arg1[%c2_32, %c0_33, %c0_34] : memref<3x48x512xbf16, #tpu.memory_space<vmem>>, vector<1x48x512xbf16>
    %22 = vector.shape_cast %21 : vector<1x48x512xbf16> to vector<48x512xbf16>
    %cst_35 = arith.constant dense<0.000000e+00> : vector<32x512xf32>
    %23 = tpu.matmul %20, %22, %cst_35 {dimension_numbers = #tpu.dot_dimension_numbers<[1], [0], [0], [1], [0, 0, 1, 1], [], []>} : vector<32x48xbf16>, vector<48x512xbf16>, vector<32x512xf32> -> vector<32x512xf32>
    %24 = arith.addf %18, %23 : vector<32x512xf32>
    %cst_36 = arith.constant dense<0.000000e+00> : vector<512xf32>
    %25 = vector.multi_reduction <add>, %24, %cst_36 [0] : vector<32x512xf32> to vector<512xf32>
    %26 = vector.shape_cast %25 : vector<512xf32> to vector<1x512xf32>
    %c0_37 = arith.constant 0 : index
    %c0_38 = arith.constant 0 : index
    %27 = vector.load %arg2[%c0_37, %c0_38] : memref<512x32xf32, #tpu.memory_space<vmem>>, vector<512x32xf32>
    %cst_39 = arith.constant dense<0.000000e+00> : vector<1x32xf32>
    %28 = tpu.matmul %26, %27, %cst_39 {dimension_numbers = #tpu.dot_dimension_numbers<[1], [0], [0], [1], [0, 0, 1, 1], [], []>} : vector<1x512xf32>, vector<512x32xf32>, vector<1x32xf32> -> vector<1x32xf32>
    %cst_40 = arith.constant 0.001953125 : f32
    %29 = vector.broadcast %cst_40 : f32 to vector<1x32xf32>
    %30 = arith.mulf %28, %29 : vector<1x32xf32>
    %c0_41 = arith.constant 0 : index
    %c0_42 = arith.constant 0 : index
    %31 = vector.load %arg3[%c0_41, %c0_42] : memref<32x512xf32, #tpu.memory_space<vmem>>, vector<32x512xf32>
    %cst_43 = arith.constant dense<0.000000e+00> : vector<1x512xf32>
    %32 = tpu.matmul %30, %31, %cst_43 {dimension_numbers = #tpu.dot_dimension_numbers<[1], [0], [0], [1], [0, 0, 1, 1], [], []>} : vector<1x32xf32>, vector<32x512xf32>, vector<1x512xf32> -> vector<1x512xf32>
    %33 = vector.broadcast %32 : vector<1x512xf32> to vector<32x512xf32>
    %34 = arith.subf %24, %33 : vector<32x512xf32>
    %35 = arith.mulf %34, %34 : vector<32x512xf32>
    %cst_44 = arith.constant dense<0.000000e+00> : vector<512xf32>
    %36 = vector.multi_reduction <add>, %35, %cst_44 [0] : vector<32x512xf32> to vector<512xf32>
    %37 = vector.shape_cast %36 : vector<512xf32> to vector<1x512xf32>
    %c0_45 = arith.constant 0 : index
    %c0_46 = arith.constant 0 : index
    %38 = vector.load %arg2[%c0_45, %c0_46] : memref<512x32xf32, #tpu.memory_space<vmem>>, vector<512x32xf32>
    %cst_47 = arith.constant dense<0.000000e+00> : vector<1x32xf32>
    %39 = tpu.matmul %37, %38, %cst_47 {dimension_numbers = #tpu.dot_dimension_numbers<[1], [0], [0], [1], [0, 0, 1, 1], [], []>} : vector<1x512xf32>, vector<512x32xf32>, vector<1x32xf32> -> vector<1x32xf32>
    %cst_48 = arith.constant 0.001953125 : f32
    %40 = vector.broadcast %cst_48 : f32 to vector<1x32xf32>
    %41 = arith.mulf %39, %40 : vector<1x32xf32>
    %c0_49 = arith.constant 0 : index
    %c0_50 = arith.constant 0 : index
    %42 = vector.load %arg4[%c0_49, %c0_50] : memref<1x32xf32, #tpu.memory_space<vmem>>, vector<1x32xf32>
    %cst_51 = arith.constant 9.99999974E-6 : f32
    %43 = vector.broadcast %cst_51 : f32 to vector<1x32xf32>
    %44 = arith.addf %41, %43 : vector<1x32xf32>
    %45 = math.rsqrt %44 : vector<1x32xf32>
    %46 = arith.mulf %42, %45 : vector<1x32xf32>
    %c0_52 = arith.constant 0 : index
    %c0_53 = arith.constant 0 : index
    %47 = vector.load %arg3[%c0_52, %c0_53] : memref<32x512xf32, #tpu.memory_space<vmem>>, vector<32x512xf32>
    %cst_54 = arith.constant dense<0.000000e+00> : vector<1x512xf32>
    %48 = tpu.matmul %46, %47, %cst_54 {dimension_numbers = #tpu.dot_dimension_numbers<[1], [0], [0], [1], [0, 0, 1, 1], [], []>} : vector<1x32xf32>, vector<32x512xf32>, vector<1x512xf32> -> vector<1x512xf32>
    %c0_55 = arith.constant 0 : index
    %c0_56 = arith.constant 0 : index
    %49 = vector.load %arg5[%c0_55, %c0_56] : memref<1x32xf32, #tpu.memory_space<vmem>>, vector<1x32xf32>
    %c0_57 = arith.constant 0 : index
    %c0_58 = arith.constant 0 : index
    %50 = vector.load %arg3[%c0_57, %c0_58] : memref<32x512xf32, #tpu.memory_space<vmem>>, vector<32x512xf32>
    %cst_59 = arith.constant dense<0.000000e+00> : vector<1x512xf32>
    %51 = tpu.matmul %49, %50, %cst_59 {dimension_numbers = #tpu.dot_dimension_numbers<[1], [0], [0], [1], [0, 0, 1, 1], [], []>} : vector<1x32xf32>, vector<32x512xf32>, vector<1x512xf32> -> vector<1x512xf32>
    %52 = vector.broadcast %48 : vector<1x512xf32> to vector<32x512xf32>
    %53 = arith.mulf %34, %52 : vector<32x512xf32>
    %54 = vector.broadcast %51 : vector<1x512xf32> to vector<32x512xf32>
    %55 = arith.addf %53, %54 : vector<32x512xf32>
    %cst_60 = arith.constant 0.000000e+00 : f32
    %56 = vector.broadcast %cst_60 : f32 to vector<32x512xf32>
    %57 = arith.maximumf %55, %56 : vector<32x512xf32>
    %58 = arith.truncf %57 : vector<32x512xf32> to vector<32x512xbf16>
    %59 = vector.shape_cast %58 : vector<32x512xbf16> to vector<2x16x512xbf16>
    %c0_61 = arith.constant 0 : index
    %c1_62 = arith.constant 1 : index
    %c0_63 = arith.constant 0 : index
    %60 = vector.load %arg25[%c0_61, %c1_62, %c0_63] : memref<2x18x512xbf16, #tpu.memory_space<vmem>>, vector<2x16x512xbf16>
    tpu.vector_store %arg25[%c0_61, %c1_62, %c0_63], %59 {strides = array<i32>} : memref<2x18x512xbf16, #tpu.memory_space<vmem>>, vector<2x16x512xbf16>,
    %c0_64 = arith.constant 0 : index
    %c0_65 = arith.constant 0 : index
    %c0_66 = arith.constant 0 : index
    %61 = vector.load %arg25[%c0_64, %c0_65, %c0_66] : memref<2x18x512xbf16, #tpu.memory_space<vmem>>, vector<2x16x512xbf16>
    %62 = vector.shape_cast %61 : vector<2x16x512xbf16> to vector<32x512xbf16>
    %c0_67 = arith.constant 0 : index
    %c0_68 = arith.constant 0 : index
    %c0_69 = arith.constant 0 : index
    %63 = vector.load %arg6[%c0_67, %c0_68, %c0_69] : memref<3x512x512xbf16, #tpu.memory_space<vmem>>, vector<1x512x512xbf16>
    %64 = vector.shape_cast %63 : vector<1x512x512xbf16> to vector<512x512xbf16>
    %cst_70 = arith.constant dense<0.000000e+00> : vector<32x512xf32>
    %65 = tpu.matmul %62, %64, %cst_70 {dimension_numbers = #tpu.dot_dimension_numbers<[1], [0], [0], [1], [0, 0, 1, 1], [], []>} : vector<32x512xbf16>, vector<512x512xbf16>, vector<32x512xf32> -> vector<32x512xf32>
    %c0_71 = arith.constant 0 : index
    %c1_72 = arith.constant 1 : index
    %c0_73 = arith.constant 0 : index
    %66 = vector.load %arg25[%c0_71, %c1_72, %c0_73] : memref<2x18x512xbf16, #tpu.memory_space<vmem>>, vector<2x16x512xbf16>
    %67 = vector.shape_cast %66 : vector<2x16x512xbf16> to vector<32x512xbf16>
    %c1_74 = arith.constant 1 : index
    %c0_75 = arith.constant 0 : index
    %c0_76 = arith.constant 0 : index
    %68 = vector.load %arg6[%c1_74, %c0_75, %c0_76] : memref<3x512x512xbf16, #tpu.memory_space<vmem>>, vector<1x512x512xbf16>
    %69 = vector.shape_cast %68 : vector<1x512x512xbf16> to vector<512x512xbf16>
    %cst_77 = arith.constant dense<0.000000e+00> : vector<32x512xf32>
    %70 = tpu.matmul %67, %69, %cst_77 {dimension_numbers = #tpu.dot_dimension_numbers<[1], [0], [0], [1], [0, 0, 1, 1], [], []>} : vector<32x512xbf16>, vector<512x512xbf16>, vector<32x512xf32> -> vector<32x512xf32>
    %71 = arith.addf %65, %70 : vector<32x512xf32>
    %c0_78 = arith.constant 0 : index
    %c2_79 = arith.constant 2 : index
    %c0_80 = arith.constant 0 : index
    %72 = vector.load %arg25[%c0_78, %c2_79, %c0_80] : memref<2x18x512xbf16, #tpu.memory_space<vmem>>, vector<2x16x512xbf16>
    %73 = vector.shape_cast %72 : vector<2x16x512xbf16> to vector<32x512xbf16>
    %c2_81 = arith.constant 2 : index
    %c0_82 = arith.constant 0 : index
    %c0_83 = arith.constant 0 : index
    %74 = vector.load %arg6[%c2_81, %c0_82, %c0_83] : memref<3x512x512xbf16, #tpu.memory_space<vmem>>, vector<1x512x512xbf16>
    %75 = vector.shape_cast %74 : vector<1x512x512xbf16> to vector<512x512xbf16>
    %cst_84 = arith.constant dense<0.000000e+00> : vector<32x512xf32>
    %76 = tpu.matmul %73, %75, %cst_84 {dimension_numbers = #tpu.dot_dimension_numbers<[1], [0], [0], [1], [0, 0, 1, 1], [], []>} : vector<32x512xbf16>, vector<512x512xbf16>, vector<32x512xf32> -> vector<32x512xf32>
    %77 = arith.addf %71, %76 : vector<32x512xf32>
    %cst_85 = arith.constant dense<0.000000e+00> : vector<512xf32>
    %78 = vector.multi_reduction <add>, %77, %cst_85 [0] : vector<32x512xf32> to vector<512xf32>
    %79 = vector.shape_cast %78 : vector<512xf32> to vector<1x512xf32>
    %c0_86 = arith.constant 0 : index
    %c0_87 = arith.constant 0 : index
    %80 = vector.load %arg7[%c0_86, %c0_87] : memref<512x32xf32, #tpu.memory_space<vmem>>, vector<512x32xf32>
    %cst_88 = arith.constant dense<0.000000e+00> : vector<1x32xf32>
    %81 = tpu.matmul %79, %80, %cst_88 {dimension_numbers = #tpu.dot_dimension_numbers<[1], [0], [0], [1], [0, 0, 1, 1], [], []>} : vector<1x512xf32>, vector<512x32xf32>, vector<1x32xf32> -> vector<1x32xf32>
    %cst_89 = arith.constant 0.001953125 : f32
    %82 = vector.broadcast %cst_89 : f32 to vector<1x32xf32>
    %83 = arith.mulf %81, %82 : vector<1x32xf32>
    %c0_90 = arith.constant 0 : index
    %c0_91 = arith.constant 0 : index
    %84 = vector.load %arg8[%c0_90, %c0_91] : memref<32x512xf32, #tpu.memory_space<vmem>>, vector<32x512xf32>
    %cst_92 = arith.constant dense<0.000000e+00> : vector<1x512xf32>
    %85 = tpu.matmul %83, %84, %cst_92 {dimension_numbers = #tpu.dot_dimension_numbers<[1], [0], [0], [1], [0, 0, 1, 1], [], []>} : vector<1x32xf32>, vector<32x512xf32>, vector<1x512xf32> -> vector<1x512xf32>
    %86 = vector.broadcast %85 : vector<1x512xf32> to vector<32x512xf32>
    %87 = arith.subf %77, %86 : vector<32x512xf32>
    %88 = arith.mulf %87, %87 : vector<32x512xf32>
    %cst_93 = arith.constant dense<0.000000e+00> : vector<512xf32>
    %89 = vector.multi_reduction <add>, %88, %cst_93 [0] : vector<32x512xf32> to vector<512xf32>
    %90 = vector.shape_cast %89 : vector<512xf32> to vector<1x512xf32>
    %c0_94 = arith.constant 0 : index
    %c0_95 = arith.constant 0 : index
    %91 = vector.load %arg7[%c0_94, %c0_95] : memref<512x32xf32, #tpu.memory_space<vmem>>, vector<512x32xf32>
    %cst_96 = arith.constant dense<0.000000e+00> : vector<1x32xf32>
    %92 = tpu.matmul %90, %91, %cst_96 {dimension_numbers = #tpu.dot_dimension_numbers<[1], [0], [0], [1], [0, 0, 1, 1], [], []>} : vector<1x512xf32>, vector<512x32xf32>, vector<1x32xf32> -> vector<1x32xf32>
    %cst_97 = arith.constant 0.001953125 : f32
    %93 = vector.broadcast %cst_97 : f32 to vector<1x32xf32>
    %94 = arith.mulf %92, %93 : vector<1x32xf32>
    %c0_98 = arith.constant 0 : index
    %c0_99 = arith.constant 0 : index
    %95 = vector.load %arg9[%c0_98, %c0_99] : memref<1x32xf32, #tpu.memory_space<vmem>>, vector<1x32xf32>
    %cst_100 = arith.constant 9.99999974E-6 : f32
    %96 = vector.broadcast %cst_100 : f32 to vector<1x32xf32>
    %97 = arith.addf %94, %96 : vector<1x32xf32>
    %98 = math.rsqrt %97 : vector<1x32xf32>
    %99 = arith.mulf %95, %98 : vector<1x32xf32>
    %c0_101 = arith.constant 0 : index
    %c0_102 = arith.constant 0 : index
    %100 = vector.load %arg8[%c0_101, %c0_102] : memref<32x512xf32, #tpu.memory_space<vmem>>, vector<32x512xf32>
    %cst_103 = arith.constant dense<0.000000e+00> : vector<1x512xf32>
    %101 = tpu.matmul %99, %100, %cst_103 {dimension_numbers = #tpu.dot_dimension_numbers<[1], [0], [0], [1], [0, 0, 1, 1], [], []>} : vector<1x32xf32>, vector<32x512xf32>, vector<1x512xf32> -> vector<1x512xf32>
    %c0_104 = arith.constant 0 : index
    %c0_105 = arith.constant 0 : index
    %102 = vector.load %arg10[%c0_104, %c0_105] : memref<1x32xf32, #tpu.memory_space<vmem>>, vector<1x32xf32>
    %c0_106 = arith.constant 0 : index
    %c0_107 = arith.constant 0 : index
    %103 = vector.load %arg8[%c0_106, %c0_107] : memref<32x512xf32, #tpu.memory_space<vmem>>, vector<32x512xf32>
    %cst_108 = arith.constant dense<0.000000e+00> : vector<1x512xf32>
    %104 = tpu.matmul %102, %103, %cst_108 {dimension_numbers = #tpu.dot_dimension_numbers<[1], [0], [0], [1], [0, 0, 1, 1], [], []>} : vector<1x32xf32>, vector<32x512xf32>, vector<1x512xf32> -> vector<1x512xf32>
    %105 = vector.broadcast %101 : vector<1x512xf32> to vector<32x512xf32>
    %106 = arith.mulf %87, %105 : vector<32x512xf32>
    %107 = vector.broadcast %104 : vector<1x512xf32> to vector<32x512xf32>
    %108 = arith.addf %106, %107 : vector<32x512xf32>
    %cst_109 = arith.constant 0.000000e+00 : f32
    %109 = vector.broadcast %cst_109 : f32 to vector<32x512xf32>
    %110 = arith.maximumf %108, %109 : vector<32x512xf32>
    %111 = arith.truncf %110 : vector<32x512xf32> to vector<32x512xbf16>
    %112 = vector.shape_cast %111 : vector<32x512xbf16> to vector<2x16x512xbf16>
    %c0_110 = arith.constant 0 : index
    %c1_111 = arith.constant 1 : index
    %c0_112 = arith.constant 0 : index
    %113 = vector.load %arg25[%c0_110, %c1_111, %c0_112] : memref<2x18x512xbf16, #tpu.memory_space<vmem>>, vector<2x16x512xbf16>
    tpu.vector_store %arg25[%c0_110, %c1_111, %c0_112], %112 {strides = array<i32>} : memref<2x18x512xbf16, #tpu.memory_space<vmem>>, vector<2x16x512xbf16>,
    %c0_113 = arith.constant 0 : index
    %c0_114 = arith.constant 0 : index
    %c0_115 = arith.constant 0 : index
    %114 = vector.load %arg25[%c0_113, %c0_114, %c0_115] : memref<2x18x512xbf16, #tpu.memory_space<vmem>>, vector<2x16x512xbf16>
    %115 = vector.shape_cast %114 : vector<2x16x512xbf16> to vector<32x512xbf16>
    %c0_116 = arith.constant 0 : index
    %c0_117 = arith.constant 0 : index
    %c0_118 = arith.constant 0 : index
    %116 = vector.load %arg11[%c0_116, %c0_117, %c0_118] : memref<3x512x512xbf16, #tpu.memory_space<vmem>>, vector<1x512x512xbf16>
    %117 = vector.shape_cast %116 : vector<1x512x512xbf16> to vector<512x512xbf16>
    %cst_119 = arith.constant dense<0.000000e+00> : vector<32x512xf32>
    %118 = tpu.matmul %115, %117, %cst_119 {dimension_numbers = #tpu.dot_dimension_numbers<[1], [0], [0], [1], [0, 0, 1, 1], [], []>} : vector<32x512xbf16>, vector<512x512xbf16>, vector<32x512xf32> -> vector<32x512xf32>
    %c0_120 = arith.constant 0 : index
    %c1_121 = arith.constant 1 : index
    %c0_122 = arith.constant 0 : index
    %119 = vector.load %arg25[%c0_120, %c1_121, %c0_122] : memref<2x18x512xbf16, #tpu.memory_space<vmem>>, vector<2x16x512xbf16>
    %120 = vector.shape_cast %119 : vector<2x16x512xbf16> to vector<32x512xbf16>
    %c1_123 = arith.constant 1 : index
    %c0_124 = arith.constant 0 : index
    %c0_125 = arith.constant 0 : index
    %121 = vector.load %arg11[%c1_123, %c0_124, %c0_125] : memref<3x512x512xbf16, #tpu.memory_space<vmem>>, vector<1x512x512xbf16>
    %122 = vector.shape_cast %121 : vector<1x512x512xbf16> to vector<512x512xbf16>
    %cst_126 = arith.constant dense<0.000000e+00> : vector<32x512xf32>
    %123 = tpu.matmul %120, %122, %cst_126 {dimension_numbers = #tpu.dot_dimension_numbers<[1], [0], [0], [1], [0, 0, 1, 1], [], []>} : vector<32x512xbf16>, vector<512x512xbf16>, vector<32x512xf32> -> vector<32x512xf32>
    %124 = arith.addf %118, %123 : vector<32x512xf32>
    %c0_127 = arith.constant 0 : index
    %c2_128 = arith.constant 2 : index
    %c0_129 = arith.constant 0 : index
    %125 = vector.load %arg25[%c0_127, %c2_128, %c0_129] : memref<2x18x512xbf16, #tpu.memory_space<vmem>>, vector<2x16x512xbf16>
    %126 = vector.shape_cast %125 : vector<2x16x512xbf16> to vector<32x512xbf16>
    %c2_130 = arith.constant 2 : index
    %c0_131 = arith.constant 0 : index
    %c0_132 = arith.constant 0 : index
    %127 = vector.load %arg11[%c2_130, %c0_131, %c0_132] : memref<3x512x512xbf16, #tpu.memory_space<vmem>>, vector<1x512x512xbf16>
    %128 = vector.shape_cast %127 : vector<1x512x512xbf16> to vector<512x512xbf16>
    %cst_133 = arith.constant dense<0.000000e+00> : vector<32x512xf32>
    %129 = tpu.matmul %126, %128, %cst_133 {dimension_numbers = #tpu.dot_dimension_numbers<[1], [0], [0], [1], [0, 0, 1, 1], [], []>} : vector<32x512xbf16>, vector<512x512xbf16>, vector<32x512xf32> -> vector<32x512xf32>
    %130 = arith.addf %124, %129 : vector<32x512xf32>
    %cst_134 = arith.constant dense<0.000000e+00> : vector<512xf32>
    %131 = vector.multi_reduction <add>, %130, %cst_134 [0] : vector<32x512xf32> to vector<512xf32>
    %132 = vector.shape_cast %131 : vector<512xf32> to vector<1x512xf32>
    %c0_135 = arith.constant 0 : index
    %c0_136 = arith.constant 0 : index
    %133 = vector.load %arg12[%c0_135, %c0_136] : memref<512x32xf32, #tpu.memory_space<vmem>>, vector<512x32xf32>
    %cst_137 = arith.constant dense<0.000000e+00> : vector<1x32xf32>
    %134 = tpu.matmul %132, %133, %cst_137 {dimension_numbers = #tpu.dot_dimension_numbers<[1], [0], [0], [1], [0, 0, 1, 1], [], []>} : vector<1x512xf32>, vector<512x32xf32>, vector<1x32xf32> -> vector<1x32xf32>
    %cst_138 = arith.constant 0.001953125 : f32
    %135 = vector.broadcast %cst_138 : f32 to vector<1x32xf32>
    %136 = arith.mulf %134, %135 : vector<1x32xf32>
    %c0_139 = arith.constant 0 : index
    %c0_140 = arith.constant 0 : index
    %137 = vector.load %arg13[%c0_139, %c0_140] : memref<32x512xf32, #tpu.memory_space<vmem>>, vector<32x512xf32>
    %cst_141 = arith.constant dense<0.000000e+00> : vector<1x512xf32>
    %138 = tpu.matmul %136, %137, %cst_141 {dimension_numbers = #tpu.dot_dimension_numbers<[1], [0], [0], [1], [0, 0, 1, 1], [], []>} : vector<1x32xf32>, vector<32x512xf32>, vector<1x512xf32> -> vector<1x512xf32>
    %139 = vector.broadcast %138 : vector<1x512xf32> to vector<32x512xf32>
    %140 = arith.subf %130, %139 : vector<32x512xf32>
    %141 = arith.mulf %140, %140 : vector<32x512xf32>
    %cst_142 = arith.constant dense<0.000000e+00> : vector<512xf32>
    %142 = vector.multi_reduction <add>, %141, %cst_142 [0] : vector<32x512xf32> to vector<512xf32>
    %143 = vector.shape_cast %142 : vector<512xf32> to vector<1x512xf32>
    %c0_143 = arith.constant 0 : index
    %c0_144 = arith.constant 0 : index
    %144 = vector.load %arg12[%c0_143, %c0_144] : memref<512x32xf32, #tpu.memory_space<vmem>>, vector<512x32xf32>
    %cst_145 = arith.constant dense<0.000000e+00> : vector<1x32xf32>
    %145 = tpu.matmul %143, %144, %cst_145 {dimension_numbers = #tpu.dot_dimension_numbers<[1], [0], [0], [1], [0, 0, 1, 1], [], []>} : vector<1x512xf32>, vector<512x32xf32>, vector<1x32xf32> -> vector<1x32xf32>
    %cst_146 = arith.constant 0.001953125 : f32
    %146 = vector.broadcast %cst_146 : f32 to vector<1x32xf32>
    %147 = arith.mulf %145, %146 : vector<1x32xf32>
    %c0_147 = arith.constant 0 : index
    %c0_148 = arith.constant 0 : index
    %148 = vector.load %arg14[%c0_147, %c0_148] : memref<1x32xf32, #tpu.memory_space<vmem>>, vector<1x32xf32>
    %cst_149 = arith.constant 9.99999974E-6 : f32
    %149 = vector.broadcast %cst_149 : f32 to vector<1x32xf32>
    %150 = arith.addf %147, %149 : vector<1x32xf32>
    %151 = math.rsqrt %150 : vector<1x32xf32>
    %152 = arith.mulf %148, %151 : vector<1x32xf32>
    %c0_150 = arith.constant 0 : index
    %c0_151 = arith.constant 0 : index
    %153 = vector.load %arg13[%c0_150, %c0_151] : memref<32x512xf32, #tpu.memory_space<vmem>>, vector<32x512xf32>
    %cst_152 = arith.constant dense<0.000000e+00> : vector<1x512xf32>
    %154 = tpu.matmul %152, %153, %cst_152 {dimension_numbers = #tpu.dot_dimension_numbers<[1], [0], [0], [1], [0, 0, 1, 1], [], []>} : vector<1x32xf32>, vector<32x512xf32>, vector<1x512xf32> -> vector<1x512xf32>
    %c0_153 = arith.constant 0 : index
    %c0_154 = arith.constant 0 : index
    %155 = vector.load %arg15[%c0_153, %c0_154] : memref<1x32xf32, #tpu.memory_space<vmem>>, vector<1x32xf32>
    %c0_155 = arith.constant 0 : index
    %c0_156 = arith.constant 0 : index
    %156 = vector.load %arg13[%c0_155, %c0_156] : memref<32x512xf32, #tpu.memory_space<vmem>>, vector<32x512xf32>
    %cst_157 = arith.constant dense<0.000000e+00> : vector<1x512xf32>
    %157 = tpu.matmul %155, %156, %cst_157 {dimension_numbers = #tpu.dot_dimension_numbers<[1], [0], [0], [1], [0, 0, 1, 1], [], []>} : vector<1x32xf32>, vector<32x512xf32>, vector<1x512xf32> -> vector<1x512xf32>
    %158 = vector.broadcast %154 : vector<1x512xf32> to vector<32x512xf32>
    %159 = arith.mulf %140, %158 : vector<32x512xf32>
    %160 = vector.broadcast %157 : vector<1x512xf32> to vector<32x512xf32>
    %161 = arith.addf %159, %160 : vector<32x512xf32>
    %cst_158 = arith.constant 0.000000e+00 : f32
    %162 = vector.broadcast %cst_158 : f32 to vector<32x512xf32>
    %163 = arith.maximumf %161, %162 : vector<32x512xf32>
    %164 = arith.truncf %163 : vector<32x512xf32> to vector<32x512xbf16>
    %165 = vector.shape_cast %164 : vector<32x512xbf16> to vector<2x16x512xbf16>
    %c0_159 = arith.constant 0 : index
    %c1_160 = arith.constant 1 : index
    %c0_161 = arith.constant 0 : index
    %166 = vector.load %arg25[%c0_159, %c1_160, %c0_161] : memref<2x18x512xbf16, #tpu.memory_space<vmem>>, vector<2x16x512xbf16>
    tpu.vector_store %arg25[%c0_159, %c1_160, %c0_161], %165 {strides = array<i32>} : memref<2x18x512xbf16, #tpu.memory_space<vmem>>, vector<2x16x512xbf16>,
    %c0_162 = arith.constant 0 : index
    %c0_163 = arith.constant 0 : index
    %c0_164 = arith.constant 0 : index
    %167 = vector.load %arg25[%c0_162, %c0_163, %c0_164] : memref<2x18x512xbf16, #tpu.memory_space<vmem>>, vector<2x16x512xbf16>
    %168 = vector.shape_cast %167 : vector<2x16x512xbf16> to vector<32x512xbf16>
    %c0_165 = arith.constant 0 : index
    %c0_166 = arith.constant 0 : index
    %c0_167 = arith.constant 0 : index
    %169 = vector.load %arg16[%c0_165, %c0_166, %c0_167] : memref<3x512x128xbf16, #tpu.memory_space<vmem>>, vector<1x512x128xbf16>
    %170 = vector.shape_cast %169 : vector<1x512x128xbf16> to vector<512x128xbf16>
    %cst_168 = arith.constant dense<0.000000e+00> : vector<32x128xf32>
    %171 = tpu.matmul %168, %170, %cst_168 {dimension_numbers = #tpu.dot_dimension_numbers<[1], [0], [0], [1], [0, 0, 1, 1], [], []>} : vector<32x512xbf16>, vector<512x128xbf16>, vector<32x128xf32> -> vector<32x128xf32>
    %c0_169 = arith.constant 0 : index
    %c1_170 = arith.constant 1 : index
    %c0_171 = arith.constant 0 : index
    %172 = vector.load %arg25[%c0_169, %c1_170, %c0_171] : memref<2x18x512xbf16, #tpu.memory_space<vmem>>, vector<2x16x512xbf16>
    %173 = vector.shape_cast %172 : vector<2x16x512xbf16> to vector<32x512xbf16>
    %c1_172 = arith.constant 1 : index
    %c0_173 = arith.constant 0 : index
    %c0_174 = arith.constant 0 : index
    %174 = vector.load %arg16[%c1_172, %c0_173, %c0_174] : memref<3x512x128xbf16, #tpu.memory_space<vmem>>, vector<1x512x128xbf16>
    %175 = vector.shape_cast %174 : vector<1x512x128xbf16> to vector<512x128xbf16>
    %cst_175 = arith.constant dense<0.000000e+00> : vector<32x128xf32>
    %176 = tpu.matmul %173, %175, %cst_175 {dimension_numbers = #tpu.dot_dimension_numbers<[1], [0], [0], [1], [0, 0, 1, 1], [], []>} : vector<32x512xbf16>, vector<512x128xbf16>, vector<32x128xf32> -> vector<32x128xf32>
    %177 = arith.addf %171, %176 : vector<32x128xf32>
    %c0_176 = arith.constant 0 : index
    %c2_177 = arith.constant 2 : index
    %c0_178 = arith.constant 0 : index
    %178 = vector.load %arg25[%c0_176, %c2_177, %c0_178] : memref<2x18x512xbf16, #tpu.memory_space<vmem>>, vector<2x16x512xbf16>
    %179 = vector.shape_cast %178 : vector<2x16x512xbf16> to vector<32x512xbf16>
    %c2_179 = arith.constant 2 : index
    %c0_180 = arith.constant 0 : index
    %c0_181 = arith.constant 0 : index
    %180 = vector.load %arg16[%c2_179, %c0_180, %c0_181] : memref<3x512x128xbf16, #tpu.memory_space<vmem>>, vector<1x512x128xbf16>
    %181 = vector.shape_cast %180 : vector<1x512x128xbf16> to vector<512x128xbf16>
    %cst_182 = arith.constant dense<0.000000e+00> : vector<32x128xf32>
    %182 = tpu.matmul %179, %181, %cst_182 {dimension_numbers = #tpu.dot_dimension_numbers<[1], [0], [0], [1], [0, 0, 1, 1], [], []>} : vector<32x512xbf16>, vector<512x128xbf16>, vector<32x128xf32> -> vector<32x128xf32>
    %183 = arith.addf %177, %182 : vector<32x128xf32>
    %cst_183 = arith.constant dense<0.000000e+00> : vector<128xf32>
    %184 = vector.multi_reduction <add>, %183, %cst_183 [0] : vector<32x128xf32> to vector<128xf32>
    %185 = vector.shape_cast %184 : vector<128xf32> to vector<1x128xf32>
    %c0_184 = arith.constant 0 : index
    %c0_185 = arith.constant 0 : index
    %186 = vector.load %arg17[%c0_184, %c0_185] : memref<128x8xf32, #tpu.memory_space<vmem>>, vector<128x8xf32>
    %cst_186 = arith.constant dense<0.000000e+00> : vector<1x8xf32>
    %187 = tpu.matmul %185, %186, %cst_186 {dimension_numbers = #tpu.dot_dimension_numbers<[1], [0], [0], [1], [0, 0, 1, 1], [], []>} : vector<1x128xf32>, vector<128x8xf32>, vector<1x8xf32> -> vector<1x8xf32>
    %cst_187 = arith.constant 0.001953125 : f32
    %188 = vector.broadcast %cst_187 : f32 to vector<1x8xf32>
    %189 = arith.mulf %187, %188 : vector<1x8xf32>
    %c0_188 = arith.constant 0 : index
    %c0_189 = arith.constant 0 : index
    %190 = vector.load %arg18[%c0_188, %c0_189] : memref<8x128xf32, #tpu.memory_space<vmem>>, vector<8x128xf32>
    %cst_190 = arith.constant dense<0.000000e+00> : vector<1x128xf32>
    %191 = tpu.matmul %189, %190, %cst_190 {dimension_numbers = #tpu.dot_dimension_numbers<[1], [0], [0], [1], [0, 0, 1, 1], [], []>} : vector<1x8xf32>, vector<8x128xf32>, vector<1x128xf32> -> vector<1x128xf32>
    %192 = vector.broadcast %191 : vector<1x128xf32> to vector<32x128xf32>
    %193 = arith.subf %183, %192 : vector<32x128xf32>
    %194 = arith.mulf %193, %193 : vector<32x128xf32>
    %cst_191 = arith.constant dense<0.000000e+00> : vector<128xf32>
    %195 = vector.multi_reduction <add>, %194, %cst_191 [0] : vector<32x128xf32> to vector<128xf32>
    %196 = vector.shape_cast %195 : vector<128xf32> to vector<1x128xf32>
    %c0_192 = arith.constant 0 : index
    %c0_193 = arith.constant 0 : index
    %197 = vector.load %arg17[%c0_192, %c0_193] : memref<128x8xf32, #tpu.memory_space<vmem>>, vector<128x8xf32>
    %cst_194 = arith.constant dense<0.000000e+00> : vector<1x8xf32>
    %198 = tpu.matmul %196, %197, %cst_194 {dimension_numbers = #tpu.dot_dimension_numbers<[1], [0], [0], [1], [0, 0, 1, 1], [], []>} : vector<1x128xf32>, vector<128x8xf32>, vector<1x8xf32> -> vector<1x8xf32>
    %cst_195 = arith.constant 0.001953125 : f32
    %199 = vector.broadcast %cst_195 : f32 to vector<1x8xf32>
    %200 = arith.mulf %198, %199 : vector<1x8xf32>
    %c0_196 = arith.constant 0 : index
    %c0_197 = arith.constant 0 : index
    %201 = vector.load %arg19[%c0_196, %c0_197] : memref<1x8xf32, #tpu.memory_space<vmem>>, vector<1x8xf32>
    %cst_198 = arith.constant 9.99999974E-6 : f32
    %202 = vector.broadcast %cst_198 : f32 to vector<1x8xf32>
    %203 = arith.addf %200, %202 : vector<1x8xf32>
    %204 = math.rsqrt %203 : vector<1x8xf32>
    %205 = arith.mulf %201, %204 : vector<1x8xf32>
    %c0_199 = arith.constant 0 : index
    %c0_200 = arith.constant 0 : index
    %206 = vector.load %arg18[%c0_199, %c0_200] : memref<8x128xf32, #tpu.memory_space<vmem>>, vector<8x128xf32>
    %cst_201 = arith.constant dense<0.000000e+00> : vector<1x128xf32>
    %207 = tpu.matmul %205, %206, %cst_201 {dimension_numbers = #tpu.dot_dimension_numbers<[1], [0], [0], [1], [0, 0, 1, 1], [], []>} : vector<1x8xf32>, vector<8x128xf32>, vector<1x128xf32> -> vector<1x128xf32>
    %c0_202 = arith.constant 0 : index
    %c0_203 = arith.constant 0 : index
    %208 = vector.load %arg20[%c0_202, %c0_203] : memref<1x8xf32, #tpu.memory_space<vmem>>, vector<1x8xf32>
    %c0_204 = arith.constant 0 : index
    %c0_205 = arith.constant 0 : index
    %209 = vector.load %arg18[%c0_204, %c0_205] : memref<8x128xf32, #tpu.memory_space<vmem>>, vector<8x128xf32>
    %cst_206 = arith.constant dense<0.000000e+00> : vector<1x128xf32>
    %210 = tpu.matmul %208, %209, %cst_206 {dimension_numbers = #tpu.dot_dimension_numbers<[1], [0], [0], [1], [0, 0, 1, 1], [], []>} : vector<1x8xf32>, vector<8x128xf32>, vector<1x128xf32> -> vector<1x128xf32>
    %211 = vector.broadcast %207 : vector<1x128xf32> to vector<32x128xf32>
    %212 = arith.mulf %193, %211 : vector<32x128xf32>
    %213 = vector.broadcast %210 : vector<1x128xf32> to vector<32x128xf32>
    %214 = arith.addf %212, %213 : vector<32x128xf32>
    %cst_207 = arith.constant 0.000000e+00 : f32
    %215 = vector.broadcast %cst_207 : f32 to vector<32x128xf32>
    %216 = arith.maximumf %214, %215 : vector<32x128xf32>
    %217 = vector.shape_cast %216 : vector<32x128xf32> to vector<2x16x128xf32>
    %cst_208 = arith.constant dense<0.000000e+00> : vector<2x128xf32>
    %218 = vector.multi_reduction <add>, %217, %cst_208 [1] : vector<2x16x128xf32> to vector<2x128xf32>
    %c0_209 = arith.constant 0 : index
    %c0_210 = arith.constant 0 : index
    %219 = vector.load %arg17[%c0_209, %c0_210] : memref<128x8xf32, #tpu.memory_space<vmem>>, vector<128x8xf32>
    %cst_211 = arith.constant dense<0.000000e+00> : vector<2x8xf32>
    %220 = tpu.matmul %218, %219, %cst_211 {dimension_numbers = #tpu.dot_dimension_numbers<[1], [0], [0], [1], [0, 0, 1, 1], [], []>} : vector<2x128xf32>, vector<128x8xf32>, vector<2x8xf32> -> vector<2x8xf32>
    %cst_212 = arith.constant 3.906250e-03 : f32
    %221 = vector.broadcast %cst_212 : f32 to vector<2x8xf32>
    %222 = arith.mulf %220, %221 : vector<2x8xf32>
    %c0_213 = arith.constant 0 : index
    %c0_214 = arith.constant 0 : index
    %223 = vector.load %arg21[%c0_213, %c0_214] : memref<8x8xf32, #tpu.memory_space<vmem>>, vector<8x8xf32>
    %cst_215 = arith.constant dense<0.000000e+00> : vector<2x8xf32>
    %224 = tpu.matmul %222, %223, %cst_215 {dimension_numbers = #tpu.dot_dimension_numbers<[1], [0], [0], [1], [0, 0, 1, 1], [], []>} : vector<2x8xf32>, vector<8x8xf32>, vector<2x8xf32> -> vector<2x8xf32>
    %c0_216 = arith.constant 0 : index
    %c0_217 = arith.constant 0 : index
    %225 = vector.load %arg22[%c0_216, %c0_217] : memref<1x8xf32, #tpu.memory_space<vmem>>, vector<1x8xf32>
    %226 = vector.broadcast %225 : vector<1x8xf32> to vector<2x8xf32>
    %227 = arith.addf %224, %226 : vector<2x8xf32>
    %228 = arith.negf %227 : vector<2x8xf32>
    %229 = math.exp %228 : vector<2x8xf32>
    %cst_218 = arith.constant 1.000000e+00 : f32
    %230 = vector.broadcast %cst_218 : f32 to vector<2x8xf32>
    %231 = arith.addf %230, %229 : vector<2x8xf32>
    %232 = arith.divf %230, %231 : vector<2x8xf32>
    %c0_219 = arith.constant 0 : index
    %c0_220 = arith.constant 0 : index
    %233 = vector.load %arg23[%c0_219, %c0_220] : memref<2x8xf32, #tpu.memory_space<vmem>>, vector<2x8xf32>
    tpu.vector_store %arg23[%c0_219, %c0_220], %232 {strides = array<i32>} : memref<2x8xf32, #tpu.memory_space<vmem>>, vector<2x8xf32>,
    return
  }
}

</mosaic_0001>

<bundles_post_ra>
// kernel: tpu_custom_call.1
= control target key start
LH: loop header
LB: loop body
LE: loop exit
PB: predicated region body
PF: predicated region fallthrough
CT: control target
= control target key end

     0   :  { %s20211_s0 = inlined_call_operand.hbm [shape: bf16[2,16,48], index: 0, kind: input, shape index: {}]   ;;  %s20212_s1 = inlined_call_operand.hbm [shape: bf16[3,48,512], index: 1, kind: input, shape index: {}]   ;;  %s20213_s2 = inlined_call_operand.vmem [shape: f32[512,32], index: 2, kind: input, shape index: {}]   ;;  %s20214_s3 = inlined_call_operand.hbm [shape: f32[32,512], index: 3, kind: input, shape index: {}]   ;;  %s20215_s4 = inlined_call_operand.hbm [shape: f32[1,32], index: 4, kind: input, shape index: {}]   ;;  %s20216_s5 = inlined_call_operand.hbm [shape: f32[1,32], index: 5, kind: input, shape index: {}]   ;;  %s20217_s6 = inlined_call_operand.hbm [shape: bf16[3,512,512], index: 6, kind: input, shape index: {}]   ;;  %s20218_s7 = inlined_call_operand.vmem [shape: f32[512,32], index: 7, kind: input, shape index: {}]   ;;  %s20219_s8 = inlined_call_operand.hbm [shape: f32[32,512], index: 8, kind: input, shape index: {}]   ;;  %s20220_s9 = inlined_call_operand.hbm [shape: f32[1,32], index: 9, kind: input, shape index: {}]   ;;  %s20221_s10 = inlined_call_operand.hbm [shape: f32[1,32], index: 10, kind: input, shape index: {}]   ;;  %s20222_s11 = inlined_call_operand.hbm [shape: bf16[3,512,512], index: 11, kind: input, shape index: {}]   ;;  %s20223_s12 = inlined_call_operand.vmem [shape: f32[512,32], index: 12, kind: input, shape index: {}]   ;;  %s20224_s13 = inlined_call_operand.hbm [shape: f32[32,512], index: 13, kind: input, shape index: {}]   ;;  %s20225_s14 = inlined_call_operand.hbm [shape: f32[1,32], index: 14, kind: input, shape index: {}]   ;;  %s20226_s15 = inlined_call_operand.hbm [shape: f32[1,32], index: 15, kind: input, shape index: {}]   ;;  %s20227_s16 = inlined_call_operand.hbm [shape: bf16[3,512,128], index: 16, kind: input, shape index: {}]   ;;  %s20228_s17 = inlined_call_operand.vmem [shape: f32[128,8], index: 17, kind: input, shape index: {}]   ;;  %s20229_s18 = inlined_call_operand.hbm [shape: f32[8,128], index: 18, kind: input, shape index: {}]   ;;  %s20230_s19 = inlined_call_operand.hbm [shape: f32[1,8], index: 19, kind: input, shape index: {}]   ;;  %s20231_s20 = inlined_call_operand.hbm [shape: f32[1,8], index: 20, kind: input, shape index: {}]   ;;  %s20232_s21 = inlined_call_operand.hbm [shape: f32[8,8], index: 21, kind: input, shape index: {}]   ;;  %s20233_s22 = inlined_call_operand.hbm [shape: f32[1,8], index: 22, kind: input, shape index: {}]   ;;  %s20234_s23 = inlined_call_operand.hbm [shape: f32[2,8], index: 23, kind: output, shape index: {}]  }
   0x1   :  { %20303 = sst [smem:[#allocation64_spill]] %s20211_s0 }
   0x2   :  { %20304 = sst [smem:[#allocation65_spill]] %s20212_s1 }
   0x3   :  { %20305 = sst [smem:[#allocation66_spill]] %s20213_s2 }
   0x4   :  { %20306 = sst [smem:[#allocation67_spill]] %s20214_s3 }
   0x5   :  { %20307 = sst [smem:[#allocation68_spill]] %s20215_s4 }
   0x6   :  { %20308 = sst [smem:[#allocation69_spill]] %s20216_s5 }
   0x7   :  { %20309 = sst [smem:[#allocation70_spill]] %s20217_s6 }
   0x8   :  { %20310 = sst [smem:[#allocation71_spill]] %s20218_s7 }
   0x9   :  { %20311 = sst [smem:[#allocation72_spill]] %s20223_s12 }
   0xa   :  { %20312 = sst [smem:[#allocation73_spill]] %s20228_s17 }
   0xb   :  { %20313 = sst [smem:[#allocation74_spill]] %s20234_s23 }
   0xc   :  { %28 = vsyncpa [#allocation5], 0 }
   0xd   :  { %29 = vsyncpa [#allocation8], 0 }
   0xe   :  { %30 = vsyncpa [#allocation11], 0 }
   0xf   :  { %31 = vsyncpa [#allocation14], 0 }
  0x10   :  { %32 = vsyncpa [#allocation17], 0 }
  0x11   :  { %33 = vsyncpa [#allocation20], 0 }
  0x12   :  { %34 = vsyncpa [#allocation23], 0 }
  0x13   :  { %35 = vsyncpa [#allocation26], 0 }
  0x14   :  { %36 = vsyncpa [#allocation29], 0 }
  0x15   :  { %37 = vsyncpa [#allocation32], 0 }
  0x16   :  { %38 = vsyncpa [#allocation6], 0  ;;  %s17384_s4 = smov [#allocation7]   ;;  %s20314_s5 = sld [smem:[#allocation65_spill]] }
  0x17   :  { %s56_s30 = sshll.u32 %s17384_s4, 4  ;;  %s57_s30 = int_to_ptr.vmem [resolvable:$true] %s56_s30 }
  0x1c   :  { %s16922_s1 = scalar_lea.hbm %s20314_s5, 4608 }
  0x1d   :  { %p16923_p0 = scmp.ne.s32.totalorder %s20314_s5, %s16922_s1  ;;  %p16926_p1 = scmp.lt.u32.totalorder %s16922_s1, %s20314_s5 }
  0x1f   :  { %p16928_p2 = pnand %p16926_p1, %p16923_p0 }
  0x21   :  { %16931 = shalt.err (!%p16928_p2)
}
  0x22   :  { %s16932_s7 = scalar_lea.vmem %s57_s30, 4608  ;;  %p16937_p4 = scmp.lt.s32.totalorder %s57_s30, %s57_s30 }
  0x23   :  { %p16933_p3 = scmp.ne.s32.totalorder %s57_s30, %s16932_s7  ;;  %p16938_p5 = scmp.lt.s32.totalorder %s16932_s7, %s16932_s7 }
  0x25   :  { %p16939_p6 = por %p16938_p5, %p16937_p4 }
  0x27   :  { %p16940_p7 = pnand %p16939_p6, %p16933_p3 }
  0x29   :  { %16943 = shalt.err (!%p16940_p7)
}
  0x2a   :  { %s17385_s28 = smov 256   ;;  %s17386_s29 = smov 16  }
  0x2b   :  { %62 = dma.hbm_to_vmem [thread:$0]  %s20314_s5, 4608, %s57_s30, [#allocation8], %s17385_s28, %s17385_s28, %s17386_s29  }
  0x2c   :  { %s17387_s4 = smov [#allocation10]   ;;  %s17388_s25 = smov [#allocation13]  }
  0x2d   :  { %s83_s24 = sshll.u32 %s17387_s4, 4  ;;  %s102_s1 = sshll.u32 %s17388_s25, 4  ;;  %s84_s24 = int_to_ptr.vmem [resolvable:$true] %s83_s24  ;;  %s103_s1 = int_to_ptr.vmem [resolvable:$true] %s102_s1 }
  0x2e   :  { %s20315_s6 = sld [smem:[#allocation68_spill]] }
  0x34   :  { %s16944_s27 = scalar_lea.hbm %s20315_s6, 16 }
  0x35   :  { %p16945_p8 = scmp.ne.s32.totalorder %s20315_s6, %s16944_s27  ;;  %p16948_p9 = scmp.lt.u32.totalorder %s16944_s27, %s20315_s6 }
  0x37   :  { %p16950_p10 = pnand %p16948_p9, %p16945_p8 }
  0x39   :  { %16953 = shalt.err (!%p16950_p10)
}
  0x3a   :  { %s16954_s30 = scalar_lea.vmem %s84_s24, 16  ;;  %s16958_s5 = scalar_lea.vmem %s84_s24, 32 }
  0x3b   :  { %p16955_p11 = scmp.ne.s32.totalorder %s84_s24, %s16954_s30  ;;  %p16959_p12 = scmp.lt.s32.totalorder %s84_s24, %s84_s24 }
  0x3c   :  { %p16960_p13 = scmp.lt.s32.totalorder %s16958_s5, %s16954_s30 }
  0x3e   :  { %p16961_p0 = por %p16960_p13, %p16959_p12 }
  0x40   :  { %p16962_p1 = pnand %p16961_p0, %p16955_p11 }
  0x42   :  { %16965 = shalt.err (!%p16962_p1)
}
  0x43   :  { %86 = dma.hbm_to_vmem [thread:$0]  %s20315_s6, 16, %s84_s24, [#allocation11]  }
  0x44   :  { %s20316_s25 = sld [smem:[#allocation70_spill]] }
  0x4a   :  { %s16966_s12 = scalar_lea.hbm %s20316_s25, 49152 }
  0x4b   :  { %p16967_p2 = scmp.ne.s32.totalorder %s20316_s25, %s16966_s12  ;;  %p16970_p3 = scmp.lt.u32.totalorder %s16966_s12, %s20316_s25 }
  0x4d   :  { %p16972_p4 = pnand %p16970_p3, %p16967_p2 }
  0x4f   :  { %16975 = shalt.err (!%p16972_p4)
}
  0x50   :  { %s16976_s7 = scalar_lea.vmem %s103_s1, 49152  ;;  %p16981_p6 = scmp.lt.s32.totalorder %s103_s1, %s103_s1 }
  0x51   :  { %p16977_p5 = scmp.ne.s32.totalorder %s103_s1, %s16976_s7  ;;  %p16982_p7 = scmp.lt.s32.totalorder %s16976_s7, %s16976_s7 }
  0x53   :  { %p16983_p8 = por %p16982_p7, %p16981_p6 }
  0x55   :  { %p16984_p9 = pnand %p16983_p8, %p16977_p5 }
  0x57   :  { %16987 = shalt.err (!%p16984_p9)
}
  0x58   :  { %108 = dma.hbm_to_vmem [thread:$0]  %s20316_s25, 49152, %s103_s1, [#allocation14], %s17385_s28, %s17385_s28, %s17386_s29  }
  0x59   :  { %s17389_s30 = smov [#allocation16]   ;;  %s17390_s3 = smov [#allocation19]  }
  0x5a   :  { %s129_s5 = sshll.u32 %s17389_s30, 4  ;;  %s148_s0 = sshll.u32 %s17390_s3, 4  ;;  %s130_s5 = int_to_ptr.vmem [resolvable:$true] %s129_s5  ;;  %s149_s0 = int_to_ptr.vmem [resolvable:$true] %s148_s0 }
  0x5b   :  { %s16988_s12 = scalar_lea.hbm %s20220_s9, 16 }
  0x5c   :  { %p16989_p10 = scmp.ne.s32.totalorder %s20220_s9, %s16988_s12  ;;  %p16992_p11 = scmp.lt.u32.totalorder %s16988_s12, %s20220_s9 }
  0x5e   :  { %p16994_p12 = pnand %p16992_p11, %p16989_p10 }
  0x60   :  { %16997 = shalt.err (!%p16994_p12)
}
  0x61   :  { %s16998_s1 = scalar_lea.vmem %s130_s5, 16  ;;  %s17002_s25 = scalar_lea.vmem %s130_s5, 32 }
  0x62   :  { %p16999_p13 = scmp.ne.s32.totalorder %s130_s5, %s16998_s1  ;;  %p17003_p0 = scmp.lt.s32.totalorder %s130_s5, %s130_s5 }
  0x63   :  { %p17004_p1 = scmp.lt.s32.totalorder %s17002_s25, %s16998_s1 }
  0x65   :  { %p17005_p2 = por %p17004_p1, %p17003_p0 }
  0x67   :  { %p17006_p3 = pnand %p17005_p2, %p16999_p13 }
  0x69   :  { %17009 = shalt.err (!%p17006_p3)
}
  0x6a   :  { %132 = dma.hbm_to_vmem [thread:$0]  %s20220_s9, 16, %s130_s5, [#allocation17]  }
  0x6b   :  { %s17010_s3 = scalar_lea.hbm %s20222_s11, 49152 }
  0x6c   :  { %p17011_p4 = scmp.ne.s32.totalorder %s20222_s11, %s17010_s3  ;;  %p17014_p5 = scmp.lt.u32.totalorder %s17010_s3, %s20222_s11 }
  0x6e   :  { %p17016_p6 = pnand %p17014_p5, %p17011_p4 }
  0x70   :  { %17019 = shalt.err (!%p17016_p6)
}
  0x71   :  { %s17020_s26 = scalar_lea.vmem %s149_s0, 49152  ;;  %p17025_p8 = scmp.lt.s32.totalorder %s149_s0, %s149_s0 }
  0x72   :  { %p17021_p7 = scmp.ne.s32.totalorder %s149_s0, %s17020_s26  ;;  %p17026_p9 = scmp.lt.s32.totalorder %s17020_s26, %s17020_s26 }
  0x74   :  { %p17027_p10 = por %p17026_p9, %p17025_p8 }
  0x76   :  { %p17028_p11 = pnand %p17027_p10, %p17021_p7 }
  0x78   :  { %17031 = shalt.err (!%p17028_p11)
}
  0x79   :  { %154 = dma.hbm_to_vmem [thread:$0]  %s20222_s11, 49152, %s149_s0, [#allocation20], %s17385_s28, %s17385_s28, %s17386_s29  }
  0x7a   :  { %s17391_s2 = smov [#allocation22]   ;;  %s17032_s7 = scalar_lea.hbm %s20225_s14, 16 }
  0x7b   :  { %s175_s27 = sshll.u32 %s17391_s2, 4  ;;  %p17033_p12 = scmp.ne.s32.totalorder %s20225_s14, %s17032_s7  ;;  %s176_s27 = int_to_ptr.vmem [resolvable:$true] %s175_s27 }
  0x7c   :  { %p17036_p13 = scmp.lt.u32.totalorder %s17032_s7, %s20225_s14 }
  0x7e   :  { %p17038_p0 = pnand %p17036_p13, %p17033_p12 }
  0x80   :  { %17041 = shalt.err (!%p17038_p0)
}
  0x81   :  { %s17042_s23 = scalar_lea.vmem %s176_s27, 16  ;;  %s17046_s11 = scalar_lea.vmem %s176_s27, 32 }
  0x82   :  { %p17043_p1 = scmp.ne.s32.totalorder %s176_s27, %s17042_s23  ;;  %p17047_p2 = scmp.lt.s32.totalorder %s176_s27, %s176_s27 }
  0x83   :  { %p17048_p3 = scmp.lt.s32.totalorder %s17046_s11, %s17042_s23 }
  0x85   :  { %p17049_p4 = por %p17048_p3, %p17047_p2 }
  0x87   :  { %p17050_p5 = pnand %p17049_p4, %p17043_p1 }
  0x89   :  { %17053 = shalt.err (!%p17050_p5)
}
  0x8a   :  { %178 = dma.hbm_to_vmem [thread:$0]  %s20225_s14, 16, %s176_s27, [#allocation23]  }
  0x8b   :  { %s17392_s0 = smov [#allocation25]   ;;  %s17393_s12 = smov [#allocation28]  }
  0x8c   :  { %s194_s4 = sshll.u32 %s17392_s0, 4  ;;  %s219_s17 = sshll.u32 %s17393_s12, 4  ;;  %s195_s4 = int_to_ptr.vmem [resolvable:$true] %s194_s4  ;;  %s17615_s17 = int_to_ptr.vmem [resolvable:$true] %s219_s17 }
  0x8d   :  { %s17054_s5 = scalar_lea.hbm %s20227_s16, 12288 }
  0x8e   :  { %p17055_p6 = scmp.ne.s32.totalorder %s20227_s16, %s17054_s5  ;;  %p17058_p7 = scmp.lt.u32.totalorder %s17054_s5, %s20227_s16 }
  0x90   :  { %p17060_p8 = pnand %p17058_p7, %p17055_p6 }
  0x92   :  { %17063 = shalt.err (!%p17060_p8)
}
  0x93   :  { %s17064_s14 = scalar_lea.vmem %s195_s4, 12288  ;;  %p17069_p10 = scmp.lt.s32.totalorder %s195_s4, %s195_s4 }
  0x94   :  { %p17065_p9 = scmp.ne.s32.totalorder %s195_s4, %s17064_s14  ;;  %p17070_p11 = scmp.lt.s32.totalorder %s17064_s14, %s17064_s14 }
  0x96   :  { %p17071_p12 = por %p17070_p11, %p17069_p10 }
  0x98   :  { %p17072_p13 = pnand %p17071_p12, %p17065_p9 }
  0x9a   :  { %17075 = shalt.err (!%p17072_p13)
}
  0x9b   :  { %s17394_s27 = smov 64   ;;  %s17395_s24 = smov 4  }
  0x9c   :  { %200 = dma.hbm_to_vmem [thread:$0]  %s20227_s16, 12288, %s195_s4, [#allocation26], %s17394_s27, %s17394_s27, %s17395_s24  }
  0x9d   :  { %s17076_s11 = scalar_lea.hbm %s20230_s19, 16 }
  0x9e   :  { %p17077_p0 = scmp.ne.s32.totalorder %s20230_s19, %s17076_s11  ;;  %p17080_p1 = scmp.lt.u32.totalorder %s17076_s11, %s20230_s19 }
  0xa0   :  { %p17082_p2 = pnand %p17080_p1, %p17077_p0 }
  0xa2   :  { %17085 = shalt.err (!%p17082_p2)
}
  0xa3   :  { %s17086_s26 = scalar_lea.vmem %s17615_s17, 16  ;;  %s17090_s16 = scalar_lea.vmem %s17615_s17, 32 }
  0xa4   :  { %p17087_p3 = scmp.ne.s32.totalorder %s17615_s17, %s17086_s26  ;;  %p17091_p4 = scmp.lt.s32.totalorder %s17615_s17, %s17615_s17 }
  0xa5   :  { %p17092_p5 = scmp.lt.s32.totalorder %s17090_s16, %s17086_s26 }
  0xa7   :  { %p17093_p6 = por %p17092_p5, %p17091_p4 }
  0xa9   :  { %p17094_p7 = pnand %p17093_p6, %p17087_p3 }
  0xab   :  { %17097 = shalt.err (!%p17094_p7)
}
  0xac   :  { %222 = dma.hbm_to_vmem [thread:$0]  %s20230_s19, 16, %s17615_s17, [#allocation29]  }
  0xad   :  { %s17396_s5 = smov [#allocation31]   ;;  %s17397_s1 = smov [#allocation4]  }
  0xae   :  { %s239_s2 = sshll.u32 %s17396_s5, 4  ;;  %s44_s25 = sshll.u32 %s17397_s1, 4  ;;  %s240_s2 = int_to_ptr.vmem [resolvable:$true] %s239_s2  ;;  %s17650_s25 = int_to_ptr.vmem [resolvable:$true] %s44_s25 }
  0xaf   :  { %s17098_s6 = scalar_lea.hbm %s20232_s21, 128 }
  0xb0   :  { %p17099_p8 = scmp.ne.s32.totalorder %s20232_s21, %s17098_s6  ;;  %p17102_p9 = scmp.lt.u32.totalorder %s17098_s6, %s20232_s21 }
  0xb2   :  { %p17104_p10 = pnand %p17102_p9, %p17099_p8 }
  0xb4   :  { %17107 = shalt.err (!%p17104_p10)
}
  0xb5   :  { %s17108_s19 = scalar_lea.vmem %s240_s2, 128  ;;  %p17113_p12 = scmp.lt.s32.totalorder %s240_s2, %s240_s2 }
  0xb6   :  { %p17109_p11 = scmp.ne.s32.totalorder %s240_s2, %s17108_s19  ;;  %p17114_p13 = scmp.lt.s32.totalorder %s17108_s19, %s17108_s19 }
  0xb8   :  { %p17115_p0 = por %p17114_p13, %p17113_p12 }
  0xba   :  { %p17116_p1 = pnand %p17115_p0, %p17109_p11 }
  0xbc   :  { %17119 = shalt.err (!%p17116_p1)
}
  0xbd   :  { %242 = dma.hbm_to_vmem [thread:$0]  %s20232_s21, 128, %s240_s2, [#allocation32]  }
  0xbe   :  { %s20317_s12 = sld [smem:[#allocation64_spill]] }
  0xc4   :  { %s17120_s26 = scalar_lea.hbm %s20317_s12, 256 }
  0xc5   :  { %p17121_p2 = scmp.ne.s32.totalorder %s20317_s12, %s17120_s26  ;;  %p17124_p3 = scmp.lt.u32.totalorder %s17120_s26, %s20317_s12 }
  0xc7   :  { %p17126_p4 = pnand %p17124_p3, %p17121_p2 }
  0xc9   :  { %17129 = shalt.err (!%p17126_p4)
}
  0xca   :  { %s17130_s1 = scalar_lea.vmem %s17650_s25, 256  ;;  %p17135_p6 = scmp.lt.s32.totalorder %s17650_s25, %s17650_s25 }
  0xcb   :  { %p17131_p5 = scmp.ne.s32.totalorder %s17650_s25, %s17130_s1  ;;  %p17136_p7 = scmp.lt.s32.totalorder %s17130_s1, %s17130_s1 }
  0xcd   :  { %p17137_p8 = por %p17136_p7, %p17135_p6 }
  0xcf   :  { %p17138_p9 = pnand %p17137_p8, %p17131_p5 }
  0xd1   :  { %17141 = shalt.err (!%p17138_p9)
}
  0xd2   :  { %50 = dma.hbm_to_vmem [thread:$0]  %s20317_s12, 256, %s17650_s25, [#allocation5], %s17394_s27, %s17394_s27, %s17395_s24  }
  0xd3   :  { %s17398_s7 = smov [#allocation9]   ;;  %s20318_s3 = sld [smem:[#allocation67_spill]] }
  0xd4   :  { %s70_s14 = sshll.u32 %s17398_s7, 4  ;;  %s71_s14 = int_to_ptr.vmem [resolvable:$true] %s70_s14 }
  0xd9   :  { %s17142_s23 = scalar_lea.hbm %s20318_s3, 2048 }
  0xda   :  { %p17143_p10 = scmp.ne.s32.totalorder %s20318_s3, %s17142_s23  ;;  %p17146_p11 = scmp.lt.u32.totalorder %s17142_s23, %s20318_s3 }
  0xdc   :  { %p17148_p12 = pnand %p17146_p11, %p17143_p10 }
  0xde   :  { %17151 = shalt.err (!%p17148_p12)
}
  0xdf   :  { %s17152_s29 = scalar_lea.vmem %s71_s14, 2048  ;;  %p17157_p0 = scmp.lt.s32.totalorder %s71_s14, %s71_s14 }
  0xe0   :  { %p17153_p13 = scmp.ne.s32.totalorder %s71_s14, %s17152_s29  ;;  %p17158_p1 = scmp.lt.s32.totalorder %s17152_s29, %s17152_s29 }
  0xe2   :  { %p17159_p2 = por %p17158_p1, %p17157_p0 }
  0xe4   :  { %p17160_p3 = pnand %p17159_p2, %p17153_p13 }
  0xe6   :  { %17163 = shalt.err (!%p17160_p3)
}
  0xe7   :  { %s17399_s27 = smov 512   ;;  %s17400_s24 = smov 32  }
  0xe8   :  { %76 = dma.hbm_to_vmem [thread:$0]  %s20318_s3, 2048, %s71_s14, [#allocation8], %s17399_s27, %s17399_s27, %s17400_s24  }
  0xe9   :  { %s17401_s12 = smov [#allocation12]   ;;  %s17402_s16 = smov [#allocation15]  }
  0xea   :  { %s93_s26 = sshll.u32 %s17401_s12, 4  ;;  %s116_s4 = sshll.u32 %s17402_s16, 4  ;;  %s94_s26 = int_to_ptr.vmem [resolvable:$true] %s93_s26  ;;  %s117_s4 = int_to_ptr.vmem [resolvable:$true] %s116_s4 }
  0xeb   :  { %s20319_s1 = sld [smem:[#allocation69_spill]] }
  0xf1   :  { %s17164_s21 = scalar_lea.hbm %s20319_s1, 16 }
  0xf2   :  { %p17165_p4 = scmp.ne.s32.totalorder %s20319_s1, %s17164_s21  ;;  %p17168_p5 = scmp.lt.u32.totalorder %s17164_s21, %s20319_s1 }
  0xf4   :  { %p17170_p6 = pnand %p17168_p5, %p17165_p4 }
  0xf6   :  { %17173 = shalt.err (!%p17170_p6)
}
  0xf7   :  { %s17174_s14 = scalar_lea.vmem %s94_s26, 16  ;;  %s17178_s3 = scalar_lea.vmem %s94_s26, 32 }
  0xf8   :  { %p17175_p7 = scmp.ne.s32.totalorder %s94_s26, %s17174_s14  ;;  %p17179_p8 = scmp.lt.s32.totalorder %s94_s26, %s94_s26 }
  0xf9   :  { %p17180_p9 = scmp.lt.s32.totalorder %s17178_s3, %s17174_s14 }
  0xfb   :  { %p17181_p10 = por %p17180_p9, %p17179_p8 }
  0xfd   :  { %p17182_p11 = pnand %p17181_p10, %p17175_p7 }
  0xff   :  { %17185 = shalt.err (!%p17182_p11)
}
 0x100   :  { %96 = dma.hbm_to_vmem [thread:$0]  %s20319_s1, 16, %s94_s26, [#allocation11]  }
 0x101   :  { %s17186_s28 = scalar_lea.hbm %s20219_s8, 2048 }
 0x102   :  { %p17187_p12 = scmp.ne.s32.totalorder %s20219_s8, %s17186_s28  ;;  %p17190_p13 = scmp.lt.u32.totalorder %s17186_s28, %s20219_s8 }
 0x104   :  { %p17192_p0 = pnand %p17190_p13, %p17187_p12 }
 0x106   :  { %17195 = shalt.err (!%p17192_p0)
}
 0x107   :  { %s17196_s16 = scalar_lea.vmem %s117_s4, 2048  ;;  %p17201_p2 = scmp.lt.s32.totalorder %s117_s4, %s117_s4 }
 0x108   :  { %p17197_p1 = scmp.ne.s32.totalorder %s117_s4, %s17196_s16  ;;  %p17202_p3 = scmp.lt.s32.totalorder %s17196_s16, %s17196_s16 }
 0x10a   :  { %p17203_p4 = por %p17202_p3, %p17201_p2 }
 0x10c   :  { %p17204_p5 = pnand %p17203_p4, %p17197_p1 }
 0x10e   :  { %17207 = shalt.err (!%p17204_p5)
}
 0x10f   :  { %122 = dma.hbm_to_vmem [thread:$0]  %s20219_s8, 2048, %s117_s4, [#allocation14], %s17399_s27, %s17399_s27, %s17400_s24  }
 0x110   :  { %s17403_s5 = smov [#allocation18]   ;;  %s17404_s21 = smov [#allocation21]  }
 0x111   :  { %s139_s1 = sshll.u32 %s17403_s5, 4  ;;  %s162_s2 = sshll.u32 %s17404_s21, 4  ;;  %s140_s1 = int_to_ptr.vmem [resolvable:$true] %s139_s1  ;;  %s163_s2 = int_to_ptr.vmem [resolvable:$true] %s162_s2 }
 0x112   :  { %s17208_s30 = scalar_lea.hbm %s20221_s10, 16 }
 0x113   :  { %p17209_p6 = scmp.ne.s32.totalorder %s20221_s10, %s17208_s30  ;;  %p17212_p7 = scmp.lt.u32.totalorder %s17208_s30, %s20221_s10 }
 0x115   :  { %p17214_p8 = pnand %p17212_p7, %p17209_p6 }
 0x117   :  { %17217 = shalt.err (!%p17214_p8)
}
 0x118   :  { %s17218_s8 = scalar_lea.vmem %s140_s1, 16  ;;  %s17222_s4 = scalar_lea.vmem %s140_s1, 32 }
 0x119   :  { %p17219_p9 = scmp.ne.s32.totalorder %s140_s1, %s17218_s8  ;;  %p17223_p10 = scmp.lt.s32.totalorder %s140_s1, %s140_s1 }
 0x11a   :  { %p17224_p11 = scmp.lt.s32.totalorder %s17222_s4, %s17218_s8 }
 0x11c   :  { %p17225_p12 = por %p17224_p11, %p17223_p10 }
 0x11e   :  { %p17226_p13 = pnand %p17225_p12, %p17219_p9 }
 0x120   :  { %17229 = shalt.err (!%p17226_p13)
}
 0x121   :  { %142 = dma.hbm_to_vmem [thread:$0]  %s20221_s10, 16, %s140_s1, [#allocation17]  }
 0x122   :  { %s17230_s25 = scalar_lea.hbm %s20224_s13, 2048 }
 0x123   :  { %p17231_p0 = scmp.ne.s32.totalorder %s20224_s13, %s17230_s25  ;;  %p17234_p1 = scmp.lt.u32.totalorder %s17230_s25, %s20224_s13 }
 0x125   :  { %p17236_p2 = pnand %p17234_p1, %p17231_p0 }
 0x127   :  { %17239 = shalt.err (!%p17236_p2)
}
 0x128   :  { %s17240_s9 = scalar_lea.vmem %s163_s2, 2048  ;;  %p17245_p4 = scmp.lt.s32.totalorder %s163_s2, %s163_s2 }
 0x129   :  { %p17241_p3 = scmp.ne.s32.totalorder %s163_s2, %s17240_s9  ;;  %p17246_p5 = scmp.lt.s32.totalorder %s17240_s9, %s17240_s9 }
 0x12b   :  { %p17247_p6 = por %p17246_p5, %p17245_p4 }
 0x12d   :  { %p17248_p7 = pnand %p17247_p6, %p17241_p3 }
 0x12f   :  { %17251 = shalt.err (!%p17248_p7)
}
 0x130   :  { %168 = dma.hbm_to_vmem [thread:$0]  %s20224_s13, 2048, %s163_s2, [#allocation20], %s17399_s27, %s17399_s27, %s17400_s24  }
 0x131   :  { %s17405_s1 = smov [#allocation24]   ;;  %s17406_s7 = smov [#allocation27]  }
 0x132   :  { %s185_s21 = sshll.u32 %s17405_s1, 4  ;;  %s209_s6 = sshll.u32 %s17406_s7, 4  ;;  %s186_s21 = int_to_ptr.vmem [resolvable:$true] %s185_s21  ;;  %s210_s6 = int_to_ptr.vmem [resolvable:$true] %s209_s6 }
 0x133   :  { %s17252_s3 = scalar_lea.hbm %s20226_s15, 16 }
 0x134   :  { %p17253_p8 = scmp.ne.s32.totalorder %s20226_s15, %s17252_s3  ;;  %p17256_p9 = scmp.lt.u32.totalorder %s17252_s3, %s20226_s15 }
 0x136   :  { %p17258_p10 = pnand %p17256_p9, %p17253_p8 }
 0x138   :  { %17261 = shalt.err (!%p17258_p10)
}
 0x139   :  { %s17262_s13 = scalar_lea.vmem %s186_s21, 16  ;;  %s17266_s27 = scalar_lea.vmem %s186_s21, 32 }
 0x13a   :  { %p17263_p11 = scmp.ne.s32.totalorder %s186_s21, %s17262_s13  ;;  %p17267_p12 = scmp.lt.s32.totalorder %s186_s21, %s186_s21 }
 0x13b   :  { %p17268_p13 = scmp.lt.s32.totalorder %s17266_s27, %s17262_s13 }
 0x13d   :  { %p17269_p0 = por %p17268_p13, %p17267_p12 }
 0x13f   :  { %p17270_p1 = pnand %p17269_p0, %p17263_p11 }
 0x141   :  { %17273 = shalt.err (!%p17270_p1)
}
 0x142   :  { %188 = dma.hbm_to_vmem [thread:$0]  %s20226_s15, 16, %s186_s21, [#allocation23]  }
 0x143   :  { %s17274_s28 = scalar_lea.hbm %s20229_s18, 128 }
 0x144   :  { %p17275_p2 = scmp.ne.s32.totalorder %s20229_s18, %s17274_s28  ;;  %p17278_p3 = scmp.lt.u32.totalorder %s17274_s28, %s20229_s18 }
 0x146   :  { %p17280_p4 = pnand %p17278_p3, %p17275_p2 }
 0x148   :  { %17283 = shalt.err (!%p17280_p4)
}
 0x149   :  { %s17284_s16 = scalar_lea.vmem %s210_s6, 128  ;;  %p17289_p6 = scmp.lt.s32.totalorder %s210_s6, %s210_s6 }
 0x14a   :  { %p17285_p5 = scmp.ne.s32.totalorder %s210_s6, %s17284_s16  ;;  %p17290_p7 = scmp.lt.s32.totalorder %s17284_s16, %s17284_s16 }
 0x14c   :  { %p17291_p8 = por %p17290_p7, %p17289_p6 }
 0x14e   :  { %p17292_p9 = pnand %p17291_p8, %p17285_p5 }
 0x150   :  { %17295 = shalt.err (!%p17292_p9)
}
 0x151   :  { %212 = dma.hbm_to_vmem [thread:$0]  %s20229_s18, 128, %s210_s6, [#allocation26]  }
 0x152   :  { %s17407_s9 = smov [#allocation30]   ;;  %s17408_s5 = smov [#allocation33]  }
 0x153   :  { %s229_s10 = sshll.u32 %s17407_s9, 4  ;;  %s249_s1 = sshll.u32 %s17408_s5, 4  ;;  %s230_s10 = int_to_ptr.vmem [resolvable:$true] %s229_s10  ;;  %s250_s1 = int_to_ptr.vmem [resolvable:$true] %s249_s1 }
 0x154   :  { %s17296_s30 = scalar_lea.hbm %s20231_s20, 16 }
 0x155   :  { %p17297_p10 = scmp.ne.s32.totalorder %s20231_s20, %s17296_s30  ;;  %p17300_p11 = scmp.lt.u32.totalorder %s17296_s30, %s20231_s20 }
 0x157   :  { %p17302_p12 = pnand %p17300_p11, %p17297_p10 }
 0x159   :  { %17305 = shalt.err (!%p17302_p12)
}
 0x15a   :  { %s17306_s18 = scalar_lea.vmem %s230_s10, 16  ;;  %s17310_s6 = scalar_lea.vmem %s230_s10, 32 }
 0x15b   :  { %p17307_p13 = scmp.ne.s32.totalorder %s230_s10, %s17306_s18  ;;  %p17311_p0 = scmp.lt.s32.totalorder %s230_s10, %s230_s10 }
 0x15c   :  { %p17312_p1 = scmp.lt.s32.totalorder %s17310_s6, %s17306_s18 }
 0x15e   :  { %p17313_p2 = por %p17312_p1, %p17311_p0 }
 0x160   :  { %p17314_p3 = pnand %p17313_p2, %p17307_p13 }
 0x162   :  { %17317 = shalt.err (!%p17314_p3)
}
 0x163   :  { %232 = dma.hbm_to_vmem [thread:$0]  %s20231_s20, 16, %s230_s10, [#allocation29]  }
 0x164   :  { %s17318_s24 = scalar_lea.hbm %s20233_s22, 16 }
 0x165   :  { %p17319_p4 = scmp.ne.s32.totalorder %s20233_s22, %s17318_s24  ;;  %p17322_p5 = scmp.lt.u32.totalorder %s17318_s24, %s20233_s22 }
 0x167   :  { %p17324_p6 = pnand %p17322_p5, %p17319_p4 }
 0x169   :  { %17327 = shalt.err (!%p17324_p6)
}
 0x16a   :  { %s17328_s29 = scalar_lea.vmem %s250_s1, 16  ;;  %s17332_s25 = scalar_lea.vmem %s250_s1, 32 }
 0x16b   :  { %p17329_p7 = scmp.ne.s32.totalorder %s250_s1, %s17328_s29  ;;  %p17333_p8 = scmp.lt.s32.totalorder %s250_s1, %s250_s1 }
 0x16c   :  { %p17334_p9 = scmp.lt.s32.totalorder %s17332_s25, %s17328_s29 }
 0x16e   :  { %p17335_p10 = por %p17334_p9, %p17333_p8 }
 0x170   :  { %p17336_p11 = pnand %p17335_p10, %p17329_p7 }
 0x172   :  { %17339 = shalt.err (!%p17336_p11)
}
 0x173   :  { %252 = dma.hbm_to_vmem [thread:$0]  %s20233_s22, 16, %s250_s1, [#allocation32]  }
 0x174   :  { %17362 = dma.done.wait [#allocation5], 256  }
 0x175   :  { %17363 = vsyncadd [#allocation5], 4294967040 }
 0x176   :  { %17364 = dma.done.wait [#allocation8], 6656  }
 0x177   :  { %17365 = vsyncadd [#allocation8], 4294960640 }
 0x178   :  { %17366 = dma.done.wait [#allocation11], 32  }
 0x179   :  { %17367 = vsyncadd [#allocation11], 4294967264 }
 0x17a   :  { %17368 = dma.done.wait [#allocation14], 51200  }
 0x17b   :  { %17369 = vsyncadd [#allocation14], 4294916096 }
 0x17c   :  { %17370 = dma.done.wait [#allocation17], 32  }
 0x17d   :  { %17371 = vsyncadd [#allocation17], 4294967264 }
 0x17e   :  { %17372 = dma.done.wait [#allocation20], 51200  }
 0x17f   :  { %17373 = vsyncadd [#allocation20], 4294916096 }
 0x180   :  { %17374 = dma.done.wait [#allocation23], 32  }
 0x181   :  { %17375 = vsyncadd [#allocation23], 4294967264 }
 0x182   :  { %17376 = dma.done.wait [#allocation26], 12416  }
 0x183   :  { %17377 = vsyncadd [#allocation26], 4294954880 }
 0x184   :  { %17378 = dma.done.wait [#allocation29], 32  }
 0x185   :  { %17379 = vsyncadd [#allocation29], 4294967264 }
 0x186   :  { %17380 = dma.done.wait [#allocation32], 144  }
 0x187   :  { %17381 = vsyncadd [#allocation32], 4294967152  ;;  %v17409_v0 = vmov 0   ;;  %vm311_vm0 = vcmask 385024   ;;  %vm312_vm1 = vsmask.f32 256 }
 0x188   :  { %612 = vmatprep.mubr.bf16.mxu0 %v17409_v0  ;;  %665 = vmatprep.mubr.bf16.mxu1 %v17409_v0  ;;  %v15599_v1 = vld [vmem:[#allocation7 + $0x64] ss:$16 sps:$4 sm:$0xff]   ;;  %vm17805_vm2 = vmand %vm311_vm0, %vm312_vm1  ;;  %v15601_v3 = vld [vmem:[#allocation7 + $0x6c] ss:$16 sps:$4 sm:$0xff]   ;;  %vm320_vm3 = vsmask.f32 7938 }
 0x189   :  { %580 = vmatprep.subr.bf16.mxu0 %v15599_v1  ;;  %v15603_v4 = vld [vmem:[#allocation7 + $0x60] ss:$16 sps:$4 sm:$0xff]   ;;  %v15604_v5 = vld [vmem:[#allocation7 + $0x68] ss:$16 sps:$4 sm:$0xff]   ;;  %633 = vmatprep.subr.bf16.mxu1 %v15601_v3  ;;  %v15605_v6 = vld [vmem:[#allocation7 + $0x84] ss:$16 sps:$4 sm:$0xff]  }
 0x18a   :  { %581 = vmatpush1.bf16.msra.mxu0 %v15603_v4  ;;  %634 = vmatpush1.bf16.msra.mxu1 %v15604_v5  ;;  %v15607_v7 = vld [vmem:[#allocation7 + $0x8c] ss:$16 sps:$4 sm:$0xff]   ;;  %v15609_v8 = vld [vmem:[#allocation7 + $0x80] ss:$16 sps:$4 sm:$0xff]   ;;  %v15610_v9 = vld [vmem:[#allocation7 + $0x88] ss:$16 sps:$4 sm:$0xff]  }
 0x18b   :  { %582 = vmatprep.subr.bf16.mxu0 %v15605_v6  ;;  %635 = vmatprep.subr.bf16.mxu1 %v15607_v7  ;;  %v15611_v10 = vld [vmem:[#allocation7 + $0xa4] ss:$16 sps:$4 sm:$0xff]   ;;  %v15613_v11 = vld [vmem:[#allocation7 + $0xac] ss:$16 sps:$4 sm:$0xff]   ;;  %v15615_v12 = vld [vmem:[#allocation7 + $0xa0] ss:$16 sps:$4 sm:$0xff]  }
 0x18c   :  { %vm17811_vm4 = vmand %vm311_vm0, %vm320_vm3  ;;  %v15616_v14 = vld [vmem:[#allocation7 + $0xa8] ss:$16 sps:$4 sm:$0xff]   ;;  %v15619_v15 = vld [vmem:[#allocation7 + $0x4] ss:$16 sps:$4 sm:$0xff]   ;;  %vm332_vm5 = vsmask.f32 4368 }
 0x18d   :  { %v15622_v16 = vld [vmem:[#allocation7 + $0xc] ss:$16 sps:$4 sm:$0xff]   ;;  %v314_v17 = vld [vmem:[#allocation2] sm:$0x1]  ;;  %v317_v19 = vld [vmem:[#allocation2 + $0xc] sm:$0x1] }
 0x18e   :  { %583 = vmatpush1.bf16.msra.mxu0 %v15609_v8  ;;  %636 = vmatpush1.bf16.msra.mxu1 %v15610_v9  ;;  %v315_v18 = vsel %vm17805_vm2, 0, %v314_v17  ;;  %v322_v20 = vld [vmem:[#allocation2 + $0x8] sm:$0x1]  ;;  %v318_v21 = vsel %vm17805_vm2, 0, %v317_v19  ;;  %v328_v23 = vld [vmem:[#allocation4] sm:$0xf]  ;;  %vm17823_vm7 = vmor %vm312_vm1, %vm332_vm5 }
 0x18f   :  { %584 = vmatprep.subr.bf16.mxu0 %v15611_v10  ;;  %637 = vmatprep.subr.bf16.mxu1 %v15613_v11  ;;  %316 = vst [vmem:[#allocation2] sm:$0x1] %v315_v18  ;;  %v323_v22 = vsel %vm17811_vm4, 0, %v322_v20  ;;  %v329_v24 = vld [vmem:[#allocation4 + $0x4] sm:$0xf]  ;;  %v335_v26 = vshrl.u32 %v328_v23, 16 }
 0x190   :  { %319 = vst [vmem:[#allocation2 + $0xc] sm:$0x1] %v318_v21  ;;  %324 = vst [vmem:[#allocation2 + $0x8] sm:$0x1] %v323_v22  ;;  %v330_v25 = vld [vmem:[#allocation4 + $0x8] sm:$0xf] }
 0x191   :  { %v338_v27 = vshll.u32 %v328_v23, 16  ;;  %v343_v28 = vshrl.u32 %v329_v24, 16  ;;  %v346_v29 = vshll.u32 %v329_v24, 16  ;;  %v352_v30 = vshrl.u32 %v330_v25, 16  ;;  %v325_v41 = vld [vmem:[#allocation2 + $0x14] sm:$0x1] }
 0x192   :  { %585 = vmatpush1.bf16.msra.mxu0 %v15615_v12  ;;  %638 = vmatpush1.bf16.msra.mxu1 %v15616_v14  ;;  %v355_v31 = vshll.u32 %v330_v25, 16  ;;  %vm374_vm6 = vcmask 388096   ;;  %v337_v32 = vrot.slane %v335_v26, 7  ;;  %v20324_v34 = vmov 0  ;;  %v331_v42 = vld [vmem:[#allocation4 + $0xc] sm:$0xf] }
 0x193   :  { %762 = vmatprep.subr.bf16.mxu0 %v15619_v15  ;;  %815 = vmatprep.subr.bf16.mxu1 %v15622_v16  ;;  %v345_v33 = vrot.slane %v343_v28, 7  ;;  %v20325_v34 = vsel %vm17823_vm7, 4294967295, %v20324_v34  ;;  %v354_v35 = vrot.slane %v352_v30, 7  ;;  %vm17829_vm8 = vmand %vm374_vm6, %vm320_vm3  ;;  %v326_v44 = vsel %vm17811_vm4, 0, %v325_v41  ;;  %v15617_v30 = vld [vmem:[#allocation7] ss:$16 sps:$4 sm:$0xff]  }
 0x194   :  { %20326 = vst [vmem:[#allocation46_spill] sm:$0xff] %v20325_v34  ;;  %v340_v36 = vor.u32 %v338_v27, %v337_v32  ;;  %v341_v37 = vrot.slane %v337_v32, 4  ;;  %v360_v45 = vshrl.u32 %v331_v42, 16  ;;  %327 = vst [vmem:[#allocation2 + $0x14] sm:$0x1] %v326_v44  ;;  %v363_v49 = vshll.u32 %v331_v42, 16 }
 0x195   :  { %v348_v38 = vor.u32 %v346_v29, %v345_v33  ;;  %v350_v39 = vrot.slane %v345_v33, 4  ;;  %v357_v43 = vor.u32 %v355_v31, %v354_v35  ;;  %v358_v48 = vrot.slane %v354_v35, 4  ;;  %v15620_v31 = vld [vmem:[#allocation7 + $0x8] ss:$16 sps:$4 sm:$0xff]   ;;  %v15623_v40 = vld [vmem:[#allocation7 + $0x20] ss:$16 sps:$4 sm:$0xff]  }
 0x196   :  { %v376_v47 = vld [vmem:[#allocation2] sm:$0xf]  ;;  %v362_v53 = vrot.slane %v360_v45, 7  ;;  %vm443_vm9 = vsmask.f32 3328  ;;  %v20329_v16 = vmov 0 }
 0x197   :  { %v349_v46 = vsel %vm17823_vm7, %v341_v37, %v348_v38  ;;  %v377_v50 = vsel %vm17829_vm8, %v340_v36, %v376_v47  ;;  %v381_v51 = vld [vmem:[#allocation2 + $0x8] sm:$0x1]  ;;  %v384_v52 = vld [vmem:[#allocation2 + $0xc] sm:$0xf]  ;;  %vm444_vm10 = vsmask.f32 7440 }
 0x198   :  { %380 = vst.msk [vmem:[#allocation2 + $0x4] sm:$0xf] %vm374_vm6, %v349_v46  ;;  %378 = vst [vmem:[#allocation2] sm:$0xf] %v377_v50  ;;  %v382_v54 = vsel %vm17805_vm2, %v350_v39, %v381_v51  ;;  %v385_v55 = vsel %vm17829_vm8, %v357_v43, %v384_v52  ;;  %v365_v56 = vor.u32 %v363_v49, %v362_v53  ;;  %v367_v57 = vrot.slane %v362_v53, 4  ;;  %s20335_s16 = sld [smem:[#allocation66_spill]] }
 0x199   :  { %383 = vst [vmem:[#allocation2 + $0x8] sm:$0x1] %v382_v54  ;;  %386 = vst [vmem:[#allocation2 + $0xc] sm:$0xf] %v385_v55  ;;  %vm573_vm12 = vcmask 392192   ;;  %vm874_vm13 = vcmask 1042432  }
 0x19a   :  { %v366_v58 = vsel %vm17823_vm7, %v358_v48, %v365_v56  ;;  %vm17867_vm11 = vmor %vm443_vm9, %vm444_vm10  ;;  %v15625_v36 = vld [vmem:[#allocation7 + $0x24] ss:$16 sps:$4 sm:$0xff]   ;;  %v15628_v37 = vld [vmem:[#allocation7 + $0x2c] ss:$16 sps:$4 sm:$0xff]   ;;  %vm875_vm14 = vcmask 1046532   ;;  %vm1355_vm0 = vcmask 261120  }
 0x19b   :  { %387 = vst.msk [vmem:[#allocation2 + $0x10] sm:$0xf] %vm374_vm6, %v366_v58  ;;  %v388_v59 = vld [vmem:[#allocation2 + $0x14] sm:$0x1]  ;;  %v20330_v16 = vsel %vm17867_vm11, 4294967295, %v20329_v16  ;;  %vm17894_vm15 = vmor %vm874_vm13, %vm875_vm14  ;;  %vm393_vm4 = vcmask 1044484  }
 0x19c   :  { %v389_v61 = vsel %vm17805_vm2, %v367_v57, %v388_v59  ;;  %20331 = vst [vmem:[#allocation47_spill] sm:$0xff] %v20330_v16  ;;  %v15626_v41 = vld [vmem:[#allocation7 + $0x28] ss:$16 sps:$4 sm:$0xff]   ;;  %v15631_v43 = vld [vmem:[#allocation7 + $0x44] ss:$16 sps:$4 sm:$0xff]   ;;  %v20332_v57 = vmov 0 }
 0x19d   :  { %390 = vst [vmem:[#allocation2 + $0x14] sm:$0x1] %v389_v61  ;;  %v15634_v44 = vld [vmem:[#allocation7 + $0x4c] ss:$16 sps:$4 sm:$0xff]   ;;  %v15629_v47 = vld [vmem:[#allocation7 + $0x40] ss:$16 sps:$4 sm:$0xff]  }
 0x19e   :  { %v15632_v48 = vld [vmem:[#allocation7 + $0x48] ss:$16 sps:$4 sm:$0xff]   ;;  %v15637_v50 = vld [vmem:[#allocation7 + $0xc4] ss:$16 sps:$4 sm:$0xff]   ;;  %v15640_v51 = vld [vmem:[#allocation7 + $0xcc] ss:$16 sps:$4 sm:$0xff]  }
 0x19f   :  { %v17847_v60 = vld [vmem:[#allocation2 + $0x4] sm:$0xf]  ;;  %v17851_v62 = vld [vmem:[#allocation2] sm:$0xf]  ;;  %v15635_v52 = vld [vmem:[#allocation7 + $0xc0] ss:$16 sps:$4 sm:$0xff]  }
 0x1a0   :  { %v456_v63 = vshll.u32 %v17847_v60, 16  ;;  %v460_v1 = vshrl.u32 %v17847_v60, 16  ;;  %v17855_v3 = vld [vmem:[#allocation2 + $0x8] sm:$0x1]  ;;  %v447_v4 = vshrl.u32 %v17851_v62, 16  ;;  %v450_v5 = vshll.u32 %v17851_v62, 16 }
 0x1a1   :  { %v17859_v6 = vld [vmem:[#allocation2 + $0xc] sm:$0xf]  ;;  %v466_v2 = vshll.u32 %v17855_v3, 16  ;;  %v15638_v53 = vld [vmem:[#allocation7 + $0xc8] ss:$16 sps:$4 sm:$0xff]   ;;  %v12947_v54 = vcombine.low %v17851_v62, %v17847_v60  ;;  %v20333_v57 = vsel %vm17894_vm15, 4294967295, %v20332_v57 }
 0x1a2   :  { %v458_v7 = vrot.slane %v456_v63, 5  ;;  %v462_v8 = vrot.slane %v460_v1, 4  ;;  %v449_v9 = vrot.slane %v447_v4, 4  ;;  %v452_v10 = vrot.slane %v450_v5, 5  ;;  %v17864_v15 = vld [vmem:[#allocation2 + $0x10] sm:$0xf] }
 0x1a3   :  { %v471_v11 = vshrl.u32 %v17859_v6, 16  ;;  %v474_v12 = vshll.u32 %v17859_v6, 16  ;;  %v468_v14 = vrot.slane %v466_v2, 5  ;;  %v480_v20 = vshll.u32 %v17864_v15, 16  ;;  %v15643_v55 = vld [vmem:[#allocation7 + $0xe4] ss:$16 sps:$4 sm:$0xff]  }
 0x1a4   :  { %v463_v13 = vor.u32 %v462_v8, %v458_v7  ;;  %v453_v17 = vor.u32 %v452_v10, %v449_v9  ;;  %v484_v22 = vshrl.u32 %v17864_v15, 16  ;;  %v17873_v24 = vld [vmem:[#allocation2 + $0x14] sm:$0x1]  ;;  %20334 = vst [vmem:[#allocation48_spill] sm:$0xff] %v20333_v57  ;;  %v15641_v58 = vld [vmem:[#allocation7 + $0xe0] ss:$16 sps:$4 sm:$0xff]   ;;  %v12948_v9 = vcombine.low %v17859_v6, %v17864_v15 }
 0x1a5   :  { %v473_v18 = vrot.slane %v471_v11, 4  ;;  %v476_v19 = vrot.slane %v474_v12, 5  ;;  %v482_v26 = vrot.slane %v480_v20, 5  ;;  %v490_v29 = vshll.u32 %v17873_v24, 16  ;;  %v15646_v56 = vld [vmem:[#allocation7 + $0xec] ss:$16 sps:$4 sm:$0xff]  }
 0x1a6   :  { %v464_v21 = vrot.slane %v463_v13, 4  ;;  %v454_v23 = vrot.slane %v453_v17, 4  ;;  %v486_v28 = vrot.slane %v484_v22, 4  ;;  %v15644_v59 = vld [vmem:[#allocation7 + $0xe8] ss:$16 sps:$4 sm:$0xff]   ;;  %v879_v4 = vrot.slane %v17847_v60, 5 }
 0x1a7   :  { %v477_v25 = vor.u32 %v476_v19, %v473_v18  ;;  %v492_v39 = vrot.slane %v490_v29, 5  ;;  %v15650_v61 = vld [vmem:[#allocation7 + $0x104] ss:$16 sps:$4 sm:$0xff]   ;;  %v15653_v63 = vld [vmem:[#allocation7 + $0x10c] ss:$16 sps:$4 sm:$0xff]   ;;  %v882_v10 = vrot.slane %v17855_v3, 5 }
 0x1a8   :  { %v469_v27 = vsel %vm17867_vm11, %v464_v21, %v468_v14  ;;  %v459_v32 = vsel %vm17867_vm11, %v454_v23, %v458_v7  ;;  %v487_v38 = vor.u32 %v486_v28, %v482_v26  ;;  %v868_v1 = vld [vmem:[#allocation2] sm:$0xe]  ;;  %v1151_v5 = vld [vmem:[%s20335_s16 + $0x88] sm:$0xff]  ;;  %v881_v12 = vrot.slane %v879_v4, 4  ;;  %v1153_v23 = vld [vmem:[%s20335_s16 + $0x98] sm:$0xff]  ;;  %s20371_s7 = sld [smem:[#allocation71_spill]] }
 0x1a9   :  { %v478_v33 = vrot.slane %v477_v25, 4  ;;  %v12929_v35 = vcombine.low %v459_v32, %v469_v27  ;;  %v1150_v62 = vld [vmem:[%s20335_s16 + $0x80] sm:$0xff]  ;;  %v1183_v60 = vld [vmem:[%s20335_s16 + $0x188] sm:$0xff]  ;;  %v12965_v11 = vrot.slane %v868_v1, 9  ;;  %v886_v18 = vrot.slane %v17864_v15, 5  ;;  %v1152_v15 = vld [vmem:[%s20335_s16 + $0x90] sm:$0xff] }
 0x1aa   :  { %v488_v42 = vrot.slane %v487_v38, 4  ;;  %v1182_v7 = vld [vmem:[%s20335_s16 + $0x180] sm:$0xff]  ;;  %v15648_v8 = vld [vmem:[#allocation7 + $0x100] ss:$16 sps:$4 sm:$0xff]   ;;  %v17918_v13 = vpack.c.bf16 %v1151_v5, %v1150_v62  ;;  %v869_v17 = vld [vmem:[#allocation2 + $0xc] sm:$0xe]  ;;  %v883_v6 = vsel %vm17894_vm15, %v881_v12, %v882_v10 }
 0x1ab   :  { %12943 = vmatmul.mubr.msk.bf16.vlgmr.msra.gmra.mrb[0].mxu0 %vm573_vm12, %v12929_v35  ;;  %12945 = vmatmul.mubr.msk.bf16.vlgmr.msra.gmra.mrb[0].mxu1 %vm573_vm12, %v12929_v35  ;;  %v483_v45 = vsel %vm17867_vm11, %v478_v33, %v482_v26  ;;  %v15651_v2 = vld [vmem:[#allocation7 + $0x108] ss:$16 sps:$4 sm:$0xff]   ;;  %v17920_v14 = vpack.c.bf16 %v1183_v60, %v1182_v7  ;;  %v880_v3 = vsel %vm17894_vm15, %v12965_v11, %v879_v4  ;;  %v1135_v20 = vld [vmem:[%s20335_s16 + $0x8] sm:$0xff]  ;;  %v1185_v26 = vld [vmem:[%s20335_s16 + $0x198] sm:$0xff]  ;;  %v12966_v28 = vrot.slane %v869_v17, 9  ;;  %s20402_s8 = sld [smem:[#allocation72_spill]] }
 0x1ac   :  { %763 = vmatpush1.bf16.msra.mxu0 %v15617_v30  ;;  %816 = vmatpush1.bf16.msra.mxu1 %v15620_v31  ;;  %v493_v46 = vsel %vm17867_vm11, %v488_v42, %v492_v39  ;;  %v1134_v19 = vld [vmem:[%s20335_s16] sm:$0xff]  ;;  %v1167_v22 = vld [vmem:[%s20335_s16 + $0x108] sm:$0xff]  ;;  %v1184_v25 = vld [vmem:[%s20335_s16 + $0x190] sm:$0xff]  ;;  %v12967_v27 = vcombine.low %v880_v3, %v883_v6  ;;  %v888_v29 = vrot.slane %v886_v18, 4  ;;  %v889_v30 = vrot.slane %v17873_v24, 5  ;;  %s20434_s28 = sld [smem:[#allocation73_spill]] }
 0x1ad   :  { %764 = vmatprep.subr.bf16.mxu0 %v15625_v36  ;;  %817 = vmatprep.subr.bf16.mxu1 %v15628_v37  ;;  %v12930_v49 = vcombine.low %v483_v45, %v493_v46  ;;  %v1166_v21 = vld [vmem:[%s20335_s16 + $0x100] sm:$0xff]  ;;  %v17958_v31 = vpack.c.bf16 %v1135_v20, %v1134_v19  ;;  %v17962_v33 = vpack.c.bf16 %v1153_v23, %v1152_v15  ;;  %v1137_v38 = vld [vmem:[%s20335_s16 + $0x18] sm:$0xff]  ;;  %v1168_v39 = vld [vmem:[%s20335_s16 + $0x110] sm:$0xff]  ;;  %vm391_vm2 = vcmask 1040384  }
 0x1ae   :  { %622 = vmatprep.mubr.bf16.mxu0 %v17409_v0  ;;  %675 = vmatprep.mubr.bf16.mxu1 %v17409_v0  ;;  %v17960_v32 = vpack.c.bf16 %v1167_v22, %v1166_v21  ;;  %v17964_v35 = vpack.c.bf16 %v1185_v26, %v1184_v25  ;;  %v887_v36 = vsel %vm17894_vm15, %v12966_v28, %v886_v18  ;;  %v1186_v45 = vld [vmem:[%s20335_s16 + $0x1a0] sm:$0xff]  ;;  %v1141_v1 = vld [vmem:[%s20335_s16 + $0x38] sm:$0xff]  ;;  %v1172_v5 = vld [vmem:[%s20335_s16 + $0x130] sm:$0xff]  ;;  %vm394_vm5 = vsmask.f32 4352 }
 0x1af   :  { %v890_v24 = vsel %vm17894_vm15, %v888_v29, %v889_v30  ;;  %v1173_v7 = vld [vmem:[%s20335_s16 + $0x138] sm:$0xff]  ;;  %v1191_v11 = vld [vmem:[%s20335_s16 + $0x1c8] sm:$0xff]  ;;  %v1142_v12 = vld [vmem:[%s20335_s16 + $0x40] sm:$0xff]  ;;  %vm410_vm9 = vsmask.f32 7954  ;;  %vm2221_vm14 = vcmask 1043456  }
 0x1b0   :  { %765 = vmatpush1.bf16.msra.mxu0 %v15623_v40  ;;  %818 = vmatpush1.bf16.msra.mxu1 %v15626_v41  ;;  %v12968_v37 = vcombine.low %v887_v36, %v890_v24  ;;  %v1169_v41 = vld [vmem:[%s20335_s16 + $0x118] sm:$0xff]  ;;  %v18065_v60 = vpack.c.bf16 %v1173_v7, %v1172_v5  ;;  %v1143_v17 = vld [vmem:[%s20335_s16 + $0x48] sm:$0xff]  ;;  %v1174_v18 = vld [vmem:[%s20335_s16 + $0x140] sm:$0xff] }
 0x1b1   :  { %766 = vmatprep.subr.bf16.mxu0 %v15631_v43  ;;  %819 = vmatprep.subr.bf16.mxu1 %v15634_v44  ;;  %v17994_v42 = vpack.c.bf16 %v1169_v41, %v1168_v39  ;;  %v1154_v43 = vld [vmem:[%s20335_s16 + $0xa0] sm:$0xff]  ;;  %v1155_v44 = vld [vmem:[%s20335_s16 + $0xa8] sm:$0xff]  ;;  %v18092_v6 = vpack.c.bf16 %v1143_v17, %v1142_v12  ;;  %v1160_v21 = vld [vmem:[%s20335_s16 + $0xd0] sm:$0xff] }
 0x1b2   :  { %v18007_v46 = vpack.c.bf16 %v1155_v44, %v1154_v43  ;;  %v1175_v19 = vld [vmem:[%s20335_s16 + $0x148] sm:$0xff]  ;;  %v1161_v22 = vld [vmem:[%s20335_s16 + $0xd8] sm:$0xff]  ;;  %v1192_v15 = vld [vmem:[%s20335_s16 + $0x1d0] sm:$0xff] }
 0x1b3   :  { %12944 = vmatmul.mubr.msk.bf16.gmra.mrb[4].mxu0 %vm573_vm12, %v12930_v49  ;;  %12946 = vmatmul.mubr.msk.bf16.gmra.mrb[4].mxu1 %vm573_vm12, %v12930_v49  ;;  %v1139_v49 = vld [vmem:[%s20335_s16 + $0x28] sm:$0xff]  ;;  %v18101_v20 = vpack.c.bf16 %v1175_v19, %v1174_v18  ;;  %v18115_v23 = vpack.c.bf16 %v1161_v22, %v1160_v21  ;;  %v1193_v25 = vld [vmem:[%s20335_s16 + $0x1d8] sm:$0xff]  ;;  %v1144_v26 = vld [vmem:[%s20335_s16 + $0x50] sm:$0xff] }
 0x1b4   :  { %767 = vmatpush1.bf16.msra.mxu0 %v15629_v47  ;;  %820 = vmatpush1.bf16.msra.mxu1 %v15632_v48  ;;  %v1187_v47 = vld [vmem:[%s20335_s16 + $0x1a8] sm:$0xff]  ;;  %v1138_v48 = vld [vmem:[%s20335_s16 + $0x20] sm:$0xff]  ;;  %v18126_v28 = vpack.c.bf16 %v1193_v25, %v1192_v15  ;;  %v1176_v30 = vld [vmem:[%s20335_s16 + $0x150] sm:$0xff] }
 0x1b5   :  { %794 = vmatprep.mubr.bf16.mxu0 %v17409_v0  ;;  %847 = vmatprep.mubr.bf16.mxu1 %v17409_v0  ;;  %v1177_v36 = vld [vmem:[%s20335_s16 + $0x158] sm:$0xff]  ;;  %v1195_v41 = vld [vmem:[%s20335_s16 + $0x1e8] sm:$0xff]  ;;  %v1146_v43 = vld [vmem:[%s20335_s16 + $0x60] sm:$0xff] }
 0x1b6   :  { %976 = vmatprep.subr.bf16.mxu0 %v15637_v50  ;;  %1029 = vmatprep.subr.bf16.mxu1 %v15640_v51  ;;  %v18018_v50 = vpack.c.bf16 %v1187_v47, %v1186_v45  ;;  %v18020_v51 = vpack.c.bf16 %v1139_v49, %v1138_v48  ;;  %v18137_v24 = vpack.c.bf16 %v1177_v36, %v1176_v30  ;;  %v1147_v44 = vld [vmem:[%s20335_s16 + $0x68] sm:$0xff]  ;;  %v1178_v48 = vld [vmem:[%s20335_s16 + $0x160] sm:$0xff]  ;;  %v1344_v12 = vld [vmem:[#allocation9 + $0x28] sm:$0xff] }
 0x1b7   :  { %v18164_v47 = vpack.c.bf16 %v1147_v44, %v1146_v43  ;;  %v1179_v49 = vld [vmem:[%s20335_s16 + $0x168] sm:$0xff]  ;;  %vm392_vm6 = vmand %vm391_vm2, %vm312_vm1 }
 0x1b8   :  { %vm395_vm8 = vmand %vm393_vm4, %vm394_vm5 }
 0x1b9   :  { %vm18434_vm10 = vmor %vm395_vm8, %vm392_vm6 }
 0x1ba   :  { %vm411_vm1 = vmand %vm393_vm4, %vm410_vm9 }
 0x1bb   :  { %12961 = vmatmul.mubr.msk.bf16.vlgmr.msra.gmra.mrb[0].mxu0 %vm573_vm12, %v12947_v54  ;;  %12963 = vmatmul.mubr.msk.bf16.vlgmr.msra.gmra.mrb[0].mxu1 %vm573_vm12, %v12947_v54  ;;  %vm18475_vm4 = vmand %vm2221_vm14, %vm320_vm3 }
 0x1bc   :  { %977 = vmatpush1.bf16.msra.mxu0 %v15635_v52  ;;  %1030 = vmatpush1.bf16.msra.mxu1 %v15638_v53  ;;  %v1170_v52 = vld [vmem:[%s20335_s16 + $0x120] sm:$0xff]  ;;  %v1171_v53 = vld [vmem:[%s20335_s16 + $0x128] sm:$0xff] }
 0x1bd   :  { %978 = vmatprep.subr.bf16.mxu0 %v15643_v55  ;;  %1031 = vmatprep.subr.bf16.mxu1 %v15646_v56  ;;  %v18029_v54 = vpack.c.bf16 %v1171_v53, %v1170_v52  ;;  %v1156_v55 = vld [vmem:[%s20335_s16 + $0xb0] sm:$0xff]  ;;  %v1157_v56 = vld [vmem:[%s20335_s16 + $0xb8] sm:$0xff]  ;;  %v18173_v52 = vpack.c.bf16 %v1179_v49, %v1178_v48 }
 0x1be   :  { %804 = vmatprep.mubr.bf16.mxu0 %v17409_v0  ;;  %857 = vmatprep.mubr.bf16.mxu1 %v17409_v0  ;;  %v1164_v53 = vld [vmem:[%s20335_s16 + $0xf0] sm:$0xff] }
 0x1c0   :  { %979 = vmatpush1.bf16.msra.mxu0 %v15641_v58  ;;  %1032 = vmatpush1.bf16.msra.mxu1 %v15644_v59  ;;  %v1188_v58 = vld [vmem:[%s20335_s16 + $0x1b0] sm:$0xff]  ;;  %v18043_v59 = vpack.c.bf16 %v1157_v56, %v1156_v55  ;;  %v1165_v55 = vld [vmem:[%s20335_s16 + $0xf8] sm:$0xff] }
 0x1c1   :  { %980 = vmatprep.subr.bf16.mxu0 %v15650_v61  ;;  %1033 = vmatprep.subr.bf16.mxu1 %v15653_v63  ;;  %v1189_v61 = vld [vmem:[%s20335_s16 + $0x1b8] sm:$0xff]  ;;  %v1140_v63 = vld [vmem:[%s20335_s16 + $0x30] sm:$0xff] }
 0x1c2   :  { %v18054_v4 = vpack.c.bf16 %v1189_v61, %v1188_v58  ;;  %v18056_v62 = vpack.c.bf16 %v1141_v1, %v1140_v63  ;;  %v1196_v56 = vld [vmem:[%s20335_s16 + $0x1f0] sm:$0xff]  ;;  %v18187_v58 = vpack.c.bf16 %v1165_v55, %v1164_v53  ;;  %v1197_v61 = vld [vmem:[%s20335_s16 + $0x1f8] sm:$0xff] }
 0x1c3   :  { %12962 = vmatmul.mubr.msk.bf16.gmra.mrb[4].mxu0 %vm573_vm12, %v12948_v9  ;;  %12964 = vmatmul.mubr.msk.bf16.gmra.mrb[4].mxu1 %vm573_vm12, %v12948_v9  ;;  %v1190_v9 = vld [vmem:[%s20335_s16 + $0x1c0] sm:$0xff]  ;;  %v1148_v63 = vld [vmem:[%s20335_s16 + $0x70] sm:$0xff]  ;;  %v1149_v1 = vld [vmem:[%s20335_s16 + $0x78] sm:$0xff]  ;;  %v18198_v5 = vpack.c.bf16 %v1197_v61, %v1196_v56 }
 0x1c4   :  { %981 = vmatpush1.bf16.msra.mxu0 %v15648_v8  ;;  %1034 = vmatpush1.bf16.msra.mxu1 %v15651_v2  ;;  %v1158_v8 = vld [vmem:[%s20335_s16 + $0xc0] sm:$0xff]  ;;  %v1159_v2 = vld [vmem:[%s20335_s16 + $0xc8] sm:$0xff]  ;;  %v18090_v3 = vpack.c.bf16 %v1191_v11, %v1190_v9  ;;  %v18200_v7 = vpack.c.bf16 %v1149_v1, %v1148_v63  ;;  %v1340_v11 = vld [vmem:[#allocation9 + $0x8] sm:$0xff] }
 0x1c5   :  { %1008 = vmatprep.mubr.bf16.mxu0 %v17409_v0  ;;  %1061 = vmatprep.mubr.bf16.mxu1 %v17409_v0  ;;  %v18079_v10 = vpack.c.bf16 %v1159_v2, %v1158_v8  ;;  %v1180_v8 = vld [vmem:[%s20335_s16 + $0x170] sm:$0xff]  ;;  %v1181_v2 = vld [vmem:[%s20335_s16 + $0x178] sm:$0xff]  ;;  %v18215_v17 = vpack.c.bf16 %v1344_v12, %v1340_v11 }
 0x1c6   :  { %14778 = vmatprep.subr.bf16.mxu0 %v17918_v13  ;;  %14810 = vmatprep.subr.bf16.mxu1 %v17920_v14  ;;  %v18209_v9 = vpack.c.bf16 %v1181_v2, %v1180_v8 }
 0x1cb   :  { %12981 = vmatmul.mubr.msk.bf16.vlgmr.msra.gmra.mrb[0].mxu0 %vm573_vm12, %v12967_v27  ;;  %12983 = vmatmul.mubr.msk.bf16.vlgmr.msra.gmra.mrb[0].mxu1 %vm573_vm12, %v12967_v27  ;;  %v1145_v27 = vld [vmem:[%s20335_s16 + $0x58] sm:$0xff] }
 0x1cc   :  { %1018 = vmatprep.mubr.bf16.mxu0 %v17409_v0  ;;  %1071 = vmatprep.mubr.bf16.mxu1 %v17409_v0  ;;  %v1136_v0 = vld [vmem:[%s20335_s16 + $0x10] sm:$0xff]  ;;  %v18128_v29 = vpack.c.bf16 %v1145_v27, %v1144_v26 }
 0x1cd   :  { %14780 = vmatpush3.bf16.msra.mxu0 %v17958_v31  ;;  %14812 = vmatpush3.bf16.msra.mxu1 %v17960_v32  ;;  %v17989_v40 = vpack.c.bf16 %v1137_v38, %v1136_v0  ;;  %v1163_v0 = vld [vmem:[%s20335_s16 + $0xe8] sm:$0xff]  ;;  %v1194_v38 = vld [vmem:[%s20335_s16 + $0x1e0] sm:$0xff] }
 0x1ce   :  { %14782 = vmatprep.subr.bf16.mxu0 %v17962_v33  ;;  %14814 = vmatprep.subr.bf16.mxu1 %v17964_v35  ;;  %v18162_v45 = vpack.c.bf16 %v1195_v41, %v1194_v38 }
 0x1d1   :  { %14784 = vmatpush3.bf16.msra.mxu0 %v17989_v40  ;;  %14816 = vmatpush3.bf16.msra.mxu1 %v17994_v42 }
 0x1d2   :  { %14786 = vmatprep.subr.bf16.mxu0 %v18007_v46  ;;  %14818 = vmatprep.subr.bf16.mxu1 %v18018_v50 }
 0x1d3   :  { %12982 = vmatmul.mubr.msk.bf16.gmra.mrb[4].mxu0 %vm573_vm12, %v12968_v37  ;;  %12984 = vmatmul.mubr.msk.bf16.gmra.mrb[4].mxu1 %vm573_vm12, %v12968_v37  ;;  %v1162_v37 = vld [vmem:[%s20335_s16 + $0xe0] sm:$0xff]  ;;  %vm409_vm12 = vmand %vm391_vm2, %vm320_vm3  ;;  %vm2223_vm2 = vcmask 1047556  }
 0x1d4   :  { %v18151_v39 = vpack.c.bf16 %v1163_v0, %v1162_v37  ;;  %vm412_vm13 = vmor %vm411_vm1, %vm409_vm12 }
 0x1d5   :  { %14788 = vmatpush3.bf16.msra.mxu0 %v18020_v51  ;;  %14820 = vmatpush3.bf16.msra.mxu1 %v18029_v54  ;;  %vm2224_vm5 = vmand %vm2223_vm2, %vm410_vm9 }
 0x1d6   :  { %14790 = vmatprep.subr.bf16.mxu0 %v18043_v59  ;;  %14822 = vmatprep.subr.bf16.mxu1 %v18054_v4  ;;  %vm18487_vm3 = vmor %vm2224_vm5, %vm18475_vm4 }
 0x1d9   :  { %14792 = vmatpush3.bf16.msra.mxu0 %v18056_v62  ;;  %14824 = vmatpush3.bf16.msra.mxu1 %v18065_v60 }
 0x1da   :  { %14794 = vmatprep.subr.bf16.mxu0 %v18079_v10  ;;  %14826 = vmatprep.subr.bf16.mxu1 %v18090_v3 }
 0x1dd   :  { %14796 = vmatpush3.bf16.msra.mxu0 %v18092_v6  ;;  %14828 = vmatpush3.bf16.msra.mxu1 %v18101_v20 }
 0x1de   :  { %14798 = vmatprep.subr.bf16.mxu0 %v18115_v23  ;;  %14830 = vmatprep.subr.bf16.mxu1 %v18126_v28 }
 0x1e1   :  { %14800 = vmatpush3.bf16.msra.mxu0 %v18128_v29  ;;  %14832 = vmatpush3.bf16.msra.mxu1 %v18137_v24 }
 0x1e2   :  { %14802 = vmatprep.subr.bf16.mxu0 %v18151_v39  ;;  %14834 = vmatprep.subr.bf16.mxu1 %v18162_v45 }
 0x1e5   :  { %14804 = vmatpush3.bf16.msra.mxu0 %v18164_v47  ;;  %14836 = vmatpush3.bf16.msra.mxu1 %v18173_v52 }
 0x1e6   :  { %14806 = vmatprep.subr.bf16.mxu0 %v18187_v58  ;;  %14838 = vmatprep.subr.bf16.mxu1 %v18198_v5 }
 0x1e9   :  { %14808 = vmatpush3.bf16.msra.mxu0 %v18200_v7  ;;  %14840 = vmatpush3.bf16.msra.mxu1 %v18209_v9 }
 0x1ea   :  { %14858 = vmatprep.subr.bf16.mxu0 %v17918_v13  ;;  %14842 = vmatprep.subr.bf16.mxu1 %v18215_v17 }
 0x29e   :  { %v18218_v18 = vpop.f32.mrb[0].mxu0  ;;  %v18220_v19 = vpop.f32.mrb[0].mxu1 }
 0x29f   :  { %20336 = vst [vmem:[#allocation49_spill] sm:$0xff] %v18220_v19  ;;  %v18222_v21 = vpop.f32.mrb[1].mxu0  ;;  %v18224_v22 = vpop.f32.mrb[1].mxu1 }
 0x2a0   :  { %20337 = vst [vmem:[#allocation50_spill] sm:$0xff] %v18222_v21  ;;  %20338 = vst [vmem:[#allocation51_spill] sm:$0xff] %v18224_v22  ;;  %v18226_v15 = vpop.f32.mrb[2].mxu0  ;;  %v18228_v25 = vpop.f32.mrb[2].mxu1 }
 0x2a1   :  { %20339 = vst [vmem:[#allocation52_spill] sm:$0xff] %v18228_v25  ;;  %v1098_v13 = vadd.f32 %v18226_v15, %v18218_v18  ;;  %v1116_v26 = vadd.f32 %v18228_v25, %v18220_v19  ;;  %v18234_v27 = vpop.f32.mrb[3].mxu0  ;;  %v18236_v30 = vpop.f32.mrb[3].mxu1 }
 0x2a2   :  { %20340 = vst [vmem:[#allocation53_spill] sm:$0xff] %v18234_v27  ;;  %20341 = vst [vmem:[#allocation54_spill] sm:$0xff] %v18236_v30  ;;  %v1107_v36 = vadd.f32 %v18234_v27, %v18222_v21  ;;  %v1125_v37 = vadd.f32 %v18236_v30, %v18224_v22 }
 0x2a6   :  { %v18242_v0 = vpop.f32.mrb[4].mxu0  ;;  %v18244_v38 = vpop.f32.mrb[4].mxu1 }
 0x2a7   :  { %20342 = vst [vmem:[#allocation55_spill] sm:$0xff] %v18244_v38  ;;  %v1099_v41 = vadd.f32 %v1098_v13, %v18242_v0  ;;  %v1117_v43 = vadd.f32 %v1116_v26, %v18244_v38  ;;  %v18248_v44 = vpop.f32.mrb[5].mxu0  ;;  %v18250_v48 = vpop.f32.mrb[5].mxu1 }
 0x2a8   :  { %20343 = vst [vmem:[#allocation56_spill] sm:$0xff] %v18248_v44  ;;  %20344 = vst [vmem:[#allocation57_spill] sm:$0xff] %v18250_v48  ;;  %v1108_v49 = vadd.f32 %v1107_v36, %v18248_v44  ;;  %v1126_v53 = vadd.f32 %v1125_v37, %v18250_v48  ;;  %v18254_v55 = vpop.f32.mrb[6].mxu0  ;;  %v18256_v56 = vpop.f32.mrb[6].mxu1 }
 0x2a9   :  { %20345 = vst [vmem:[#allocation58_spill] sm:$0xff] %v18256_v56  ;;  %v1100_v61 = vadd.f32 %v1099_v41, %v18254_v55  ;;  %v1118_v63 = vadd.f32 %v1117_v43, %v18256_v56  ;;  %v18260_v1 = vpop.f32.mrb[7].mxu0  ;;  %v18262_v8 = vpop.f32.mrb[7].mxu1 }
 0x2aa   :  { %20346 = vst [vmem:[#allocation59_spill] sm:$0xff] %v18260_v1  ;;  %20347 = vst [vmem:[#allocation60_spill] sm:$0xff] %v18262_v8  ;;  %v1109_v2 = vadd.f32 %v1108_v49, %v18260_v1  ;;  %v1127_v11 = vadd.f32 %v1126_v53, %v18262_v8 }
 0x2ab   :  { %v1101_v12 = vrot.slane %v1100_v61, 4  ;;  %v1119_v13 = vrot.slane %v1118_v63, 4 }
 0x2ac   :  { %v1110_v26 = vrot.slane %v1109_v2, 4  ;;  %v1128_v36 = vrot.slane %v1127_v11, 4 }
 0x2ad   :  { %v1102_v37 = vadd.f32 %v1101_v12, %v1100_v61  ;;  %v1120_v57 = vadd.f32 %v1119_v13, %v1118_v63  ;;  %v1353_v61 = vld [vmem:[#allocation9 + $0x70] sm:$0xff] }
 0x2ae   :  { %v1111_v16 = vadd.f32 %v1110_v26, %v1109_v2  ;;  %v1129_v34 = vadd.f32 %v1128_v36, %v1127_v11 }
 0x2af   :  { %v1103_v48 = vrot.slane %v1102_v37, 2  ;;  %v1121_v41 = vrot.slane %v1120_v57, 2 }
 0x2b0   :  { %v1112_v30 = vrot.slane %v1111_v16, 2  ;;  %v1130_v43 = vrot.slane %v1129_v34, 2 }
 0x2b1   :  { %v1104_v22 = vadd.f32 %v1103_v48, %v1102_v37  ;;  %v1122_v56 = vadd.f32 %v1121_v41, %v1120_v57 }
 0x2b2   :  { %v1113_v38 = vadd.f32 %v1112_v30, %v1111_v16  ;;  %v1131_v25 = vadd.f32 %v1130_v43, %v1129_v34  ;;  %v1339_v34 = vld [vmem:[#allocation9] sm:$0xff] }
 0x2b3   :  { %v1105_v19 = vrot.slane %v1104_v22, 1  ;;  %v1123_v49 = vrot.slane %v1122_v56, 1  ;;  %v1343_v16 = vld [vmem:[#allocation9 + $0x20] sm:$0xff] }
 0x2b4   :  { %v1114_v1 = vrot.slane %v1113_v38, 1  ;;  %v1132_v53 = vrot.slane %v1131_v25, 1  ;;  %v18282_v57 = vpack.c.bf16 %v1343_v16, %v1339_v34 }
 0x2b5   :  { %v1106_v27 = vadd.f32 %v1105_v19, %v1104_v22  ;;  %v1124_v21 = vadd.f32 %v1123_v49, %v1122_v56  ;;  %v1345_v22 = vld [vmem:[#allocation9 + $0x30] sm:$0xff] }
 0x2b6   :  { %v1115_v8 = vadd.f32 %v1114_v1, %v1113_v38  ;;  %v1133_v44 = vadd.f32 %v1132_v53, %v1131_v25  ;;  %v1350_v25 = vld [vmem:[#allocation9 + $0x58] sm:$0xff]  ;;  %v1349_v56 = vld [vmem:[#allocation9 + $0x50] sm:$0xff] }
 0x2b7   :  { %v18301_v63 = vpack.c.bf16 %v1353_v61, %v1349_v56 }
 0x2b8   :  { %1262 = vmatprep.mubr.f32.mxu0 %v1115_v8  ;;  %1332 = vmatprep.mubr.f32.mxu1 %v1133_v44 }
 0x2b9   :  { %1263 = vmatmul.mubr.f32.vlgmr.msra.gmra.mrb[8].mxu0 %v1106_v27  ;;  %1333 = vmatmul.mubr.f32.vlgmr.msra.gmra.mrb[8].mxu1 %v1124_v21  ;;  %v1341_v21 = vld [vmem:[#allocation9 + $0x10] sm:$0xff]  ;;  %v1354_v27 = vld [vmem:[#allocation9 + $0x78] sm:$0xff] }
 0x2ba   :  { %14860 = vmatpush3.bf16.msra.mxu0 %v17958_v31  ;;  %14844 = vmatpush1.bf16.msra.mxu1 %v18282_v57  ;;  %v1348_v31 = vld [vmem:[#allocation9 + $0x48] sm:$0xff]  ;;  %v18295_v38 = vpack.c.bf16 %v1345_v22, %v1341_v21  ;;  %v18297_v48 = vpack.c.bf16 %v1354_v27, %v1350_v25  ;;  %v20358_v21 = vld [vmem:[#allocation57_spill] sm:$0xff] }
 0x2bb   :  { %14862 = vmatprep.subr.bf16.mxu0 %v17962_v33  ;;  %v1352_v33 = vld [vmem:[#allocation9 + $0x68] sm:$0xff] }
 0x2be   :  { %14864 = vmatpush3.bf16.msra.mxu0 %v17989_v40  ;;  %v18285_v40 = vpack.c.bf16 %v1352_v33, %v1348_v31  ;;  %v20352_v31 = vld [vmem:[#allocation49_spill] sm:$0xff] }
 0x2bf   :  { %14866 = vmatprep.subr.bf16.mxu0 %v18007_v46  ;;  %v1347_v46 = vld [vmem:[#allocation9 + $0x40] sm:$0xff] }
 0x2c0   :  { %14846 = vmatprep.subr.bf16.mxu1 %v18285_v40 }
 0x2c2   :  { %14868 = vmatpush3.bf16.msra.mxu0 %v18020_v51  ;;  %v1351_v51 = vld [vmem:[#allocation9 + $0x60] sm:$0xff] }
 0x2c3   :  { %14870 = vmatprep.subr.bf16.mxu0 %v18043_v59  ;;  %v18287_v59 = vpack.c.bf16 %v1351_v51, %v1347_v46  ;;  %v20353_v46 = vld [vmem:[#allocation52_spill] sm:$0xff] }
 0x2c5   :  { %14848 = vmatpush1.bf16.msra.mxu1 %v18287_v59 }
 0x2c6   :  { %14872 = vmatpush3.bf16.msra.mxu0 %v18056_v62  ;;  %v1342_v62 = vld [vmem:[#allocation9 + $0x18] sm:$0xff] }
 0x2c7   :  { %14874 = vmatprep.subr.bf16.mxu0 %v18079_v10  ;;  %v1346_v10 = vld [vmem:[#allocation9 + $0x38] sm:$0xff] }
 0x2ca   :  { %14876 = vmatpush3.bf16.msra.mxu0 %v18092_v6  ;;  %v18291_v6 = vpack.c.bf16 %v1346_v10, %v1342_v62  ;;  %v20354_v62 = vld [vmem:[#allocation55_spill] sm:$0xff] }
 0x2cb   :  { %14878 = vmatprep.subr.bf16.mxu0 %v18115_v23  ;;  %v20264_v23 = vmov 0.0  }
 0x2cc   :  { %1423 = vmatprep.mubr.f32.mxu1 %v20264_v23  ;;  %14850 = vmatprep.subr.bf16.mxu1 %v18291_v6 }
 0x2ce   :  { %14880 = vmatpush3.bf16.msra.mxu0 %v18128_v29 }
 0x2cf   :  { %14882 = vmatprep.subr.bf16.mxu0 %v18151_v39 }
 0x2d2   :  { %14884 = vmatpush3.bf16.msra.mxu0 %v18164_v47 }
 0x2d3   :  { %14886 = vmatprep.subr.bf16.mxu0 %v18187_v58 }
 0x2d6   :  { %14888 = vmatpush3.bf16.msra.mxu0 %v18200_v7 }
 0x2d7   :  { %14922 = vmatprep.subr.bf16.mxu0 %v18215_v17 }
 0x38c   :  { %v14037_v29 = vpop.f32.mrb[8].mxu0  ;;  %v14072_v39 = vpop.f32.mrb[8].mxu1 }
 0x38d   :  { %v14038_v47 = vpop.f32.mrb[9].mxu0  ;;  %v14073_v58 = vpop.f32.mrb[9].mxu1 }
 0x38e   :  { %v14039_v7 = vadd.f32 %v14038_v47, %v14037_v29  ;;  %v14074_v19 = vadd.f32 %v14073_v58, %v14072_v39  ;;  %v20355_v29 = vld [vmem:[#allocation58_spill] sm:$0xff]  ;;  %v20356_v47 = vld [vmem:[#allocation51_spill] sm:$0xff] }
 0x390   :  { %v1335_v30 = vadd.f32 %v14074_v19, %v14039_v7  ;;  %v20357_v7 = vld [vmem:[#allocation54_spill] sm:$0xff] }
 0x392   :  { %v1338_v44 = vmul.f32 0.001953125, %v1335_v30 }
 0x394   :  { %12985 = vmatmul.mubr.msk.f32.vlgmr.msra.gmra.mrb[10].mxu1 %vm1355_vm0, %v1338_v44 }
 0x395   :  { %14852 = vmatpush1.bf16.msra.mxu1 %v18295_v38  ;;  %1494 = vmatprep.mubr.f32.mxu1 %v20264_v23 }
 0x396   :  { %14854 = vmatprep.subr.bf16.mxu1 %v18297_v48 }
 0x399   :  { %14856 = vmatpush1.bf16.msra.mxu1 %v18301_v63 }
 0x39a   :  { %14890 = vmatprep.subr.bf16.mxu1 %v17920_v14  ;;  %v1501_v14 = vlaneseq }
 0x39c   :  { %12986 = vmatmul.mubr.msk.f32.vlgmr.msra.gmra.mrb[12].mxu1 %vm1355_vm0, %v1338_v44  ;;  %v20359_v44 = vld [vmem:[#allocation60_spill] sm:$0xff] }
 0x39d   :  { %14892 = vmatpush3.bf16.msra.mxu1 %v17960_v32  ;;  %v1502_v32 = vshrl.u32 %v1501_v14, 7 }
 0x39e   :  { %14894 = vmatprep.subr.bf16.mxu1 %v17964_v35 }
 0x39f   :  { %v18324_v35 = vsub.s32 0, %v1502_v32 }
 0x3a1   :  { %14896 = vmatpush3.bf16.msra.mxu1 %v17994_v42 }
 0x3a2   :  { %14898 = vmatprep.subr.bf16.mxu1 %v18018_v50 }
 0x3a5   :  { %14900 = vmatpush3.bf16.msra.mxu1 %v18029_v54 }
 0x3a6   :  { %14902 = vmatprep.subr.bf16.mxu1 %v18054_v4 }
 0x3a9   :  { %14904 = vmatpush3.bf16.msra.mxu1 %v18065_v60 }
 0x3aa   :  { %14906 = vmatprep.subr.bf16.mxu1 %v18090_v3 }
 0x3ad   :  { %14908 = vmatpush3.bf16.msra.mxu1 %v18101_v20 }
 0x3ae   :  { %14910 = vmatprep.subr.bf16.mxu1 %v18126_v28 }
 0x3b1   :  { %14912 = vmatpush3.bf16.msra.mxu1 %v18137_v24  ;;  %v20348_v24 = vld [vmem:[#allocation50_spill] sm:$0xff] }
 0x3b2   :  { %14914 = vmatprep.subr.bf16.mxu1 %v18162_v45 }
 0x3b5   :  { %14916 = vmatpush3.bf16.msra.mxu1 %v18173_v52  ;;  %v20349_v52 = vld [vmem:[#allocation53_spill] sm:$0xff] }
 0x3b6   :  { %14918 = vmatprep.subr.bf16.mxu1 %v18198_v5 }
 0x3b9   :  { %14920 = vmatpush3.bf16.msra.mxu1 %v18209_v9  ;;  %v20350_v9 = vld [vmem:[#allocation56_spill] sm:$0xff] }
 0x3ba   :  { %14930 = vmatprep.subr.bf16.mxu1 %v18291_v6 }
 0x467   :  { %v1425_v42 = vpop.f32.mrb[10].mxu1 }
 0x468   :  { %v1504_v50 = vrot.slane %v1425_v42, %v18324_v35  ;;  %v1427_v54 = vpop.f32.mrb[11].mxu1 }
 0x469   :  { %v1508_v4 = vrot.slane %v1427_v54, %v18324_v35 }
 0x46a   :  { %v18329_v60 = vsub.f32 %v18218_v18, %v1504_v50  ;;  %v18332_v3 = vsub.f32 %v18226_v15, %v1504_v50  ;;  %v18335_v20 = vsub.f32 %v18242_v0, %v1504_v50  ;;  %v18338_v28 = vsub.f32 %v18254_v55, %v1504_v50  ;;  %v20351_v18 = vld [vmem:[#allocation59_spill] sm:$0xff] }
 0x46b   :  { %v18341_v45 = vsub.f32 %v20348_v24, %v1508_v4  ;;  %v18344_v5 = vsub.f32 %v20349_v52, %v1508_v4  ;;  %v18347_v1 = vsub.f32 %v20350_v9, %v1508_v4  ;;  %v18350_v8 = vsub.f32 %v20351_v18, %v1508_v4 }
 0x46c   :  { %v1533_v15 = vmul.f32 %v18329_v60, %v18329_v60  ;;  %v1537_v0 = vmul.f32 %v18332_v3, %v18332_v3  ;;  %v1541_v11 = vmul.f32 %v18335_v20, %v18335_v20  ;;  %v1545_v37 = vmul.f32 %v18338_v28, %v18338_v28 }
 0x46d   :  { %v1534_v55 = vmul.f32 %v18341_v45, %v18341_v45  ;;  %v1538_v2 = vmul.f32 %v18344_v5, %v18344_v5  ;;  %v1542_v13 = vmul.f32 %v18347_v1, %v18347_v1  ;;  %v1546_v25 = vmul.f32 %v18350_v8, %v18350_v8 }
 0x46e   :  { %v1549_v12 = vadd.f32 %v1537_v0, %v1533_v15 }
 0x46f   :  { %v1558_v26 = vadd.f32 %v1538_v2, %v1534_v55  ;;  %v1496_v36 = vpop.f32.mrb[12].mxu1 }
 0x470   :  { %v1550_v41 = vadd.f32 %v1549_v12, %v1541_v11  ;;  %v1512_v43 = vrot.slane %v1496_v36, %v18324_v35  ;;  %v1498_v49 = vpop.f32.mrb[13].mxu1 }
 0x471   :  { %v1516_v53 = vrot.slane %v1498_v49, %v18324_v35  ;;  %v1559_v34 = vadd.f32 %v1558_v26, %v1542_v13 }
 0x472   :  { %v1551_v16 = vadd.f32 %v1550_v41, %v1545_v37  ;;  %v18369_v33 = vsub.f32 %v20352_v31, %v1512_v43  ;;  %v18372_v51 = vsub.f32 %v20353_v46, %v1512_v43  ;;  %v18375_v10 = vsub.f32 %v20354_v62, %v1512_v43 }
 0x473   :  { %v18378_v39 = vsub.f32 %v20355_v29, %v1512_v43  ;;  %v18381_v58 = vsub.f32 %v20356_v47, %v1516_v53  ;;  %v18384_v19 = vsub.f32 %v20357_v7, %v1516_v53  ;;  %v18387_v22 = vsub.f32 %v20358_v21, %v1516_v53 }
 0x474   :  { %v1535_v27 = vmul.f32 %v18369_v33, %v18369_v33  ;;  %v1539_v30 = vmul.f32 %v18372_v51, %v18372_v51  ;;  %v18396_v56 = vsub.f32 %v20359_v44, %v1516_v53  ;;  %v1543_v32 = vmul.f32 %v18375_v10, %v18375_v10 }
 0x475   :  { %v1536_v61 = vmul.f32 %v18381_v58, %v18381_v58  ;;  %v1540_v14 = vmul.f32 %v18384_v19, %v18384_v19  ;;  %v1560_v50 = vadd.f32 %v1559_v34, %v1546_v25  ;;  %v1552_v54 = vrot.slane %v1551_v16, 4 }
 0x476   :  { %v1567_v42 = vadd.f32 %v1539_v30, %v1535_v27  ;;  %v1544_v4 = vmul.f32 %v18387_v22, %v18387_v22  ;;  %v1547_v52 = vmul.f32 %v18378_v39, %v18378_v39  ;;  %v1548_v0 = vmul.f32 %v18396_v56, %v18396_v56 }
 0x477   :  { %v1576_v24 = vadd.f32 %v1540_v14, %v1536_v61  ;;  %v1561_v18 = vrot.slane %v1560_v50, 4  ;;  %v1553_v15 = vadd.f32 %v1552_v54, %v1551_v16 }
 0x478   :  { %v1568_v9 = vadd.f32 %v1567_v42, %v1543_v32 }
 0x479   :  { %v1577_v55 = vadd.f32 %v1576_v24, %v1544_v4  ;;  %v1562_v11 = vadd.f32 %v1561_v18, %v1560_v50  ;;  %v1554_v12 = vrot.slane %v1553_v15, 2 }
 0x47a   :  { %v1569_v2 = vadd.f32 %v1568_v9, %v1547_v52  ;;  %v1726_v52 = vld [vmem:[#allocation10] sm:$0x1] }
 0x47b   :  { %v1578_v13 = vadd.f32 %v1577_v55, %v1548_v0  ;;  %v1563_v26 = vrot.slane %v1562_v11, 2  ;;  %v1555_v36 = vadd.f32 %v1554_v12, %v1553_v15  ;;  %v1875_v15 = vld [vmem:[#allocation12] sm:$0x1]  ;;  %v15654_v0 = vld [vmem:[#allocation13 + $0x400] ss:$16 sps:$4 sm:$0xff]  }
 0x47c   :  { %v1570_v37 = vrot.slane %v1569_v2, 4  ;;  %v15657_v55 = vld [vmem:[#allocation13 + $0x408] ss:$16 sps:$4 sm:$0xff]   ;;  %v15674_v12 = vld [vmem:[#allocation13 + $0x464] ss:$16 sps:$4 sm:$0xff]  }
 0x47d   :  { %v1579_v41 = vrot.slane %v1578_v13, 4  ;;  %v1564_v43 = vadd.f32 %v1563_v26, %v1562_v11  ;;  %v1556_v53 = vrot.slane %v1555_v36, 1  ;;  %v15669_v11 = vld [vmem:[#allocation13 + $0x448] ss:$16 sps:$4 sm:$0xff]   ;;  %v15672_v26 = vld [vmem:[#allocation13 + $0x460] ss:$16 sps:$4 sm:$0xff]  }
 0x47e   :  { %v1571_v49 = vadd.f32 %v1570_v37, %v1569_v2  ;;  %v15671_v2 = vld [vmem:[#allocation13 + $0x44c] ss:$16 sps:$4 sm:$0xff]   ;;  %v15680_v37 = vld [vmem:[#allocation13 + $0x484] ss:$16 sps:$4 sm:$0xff]  }
 0x47f   :  { %v1580_v34 = vadd.f32 %v1579_v41, %v1578_v13  ;;  %v1565_v31 = vrot.slane %v1564_v43, 1  ;;  %v1557_v47 = vadd.f32 %v1556_v53, %v1555_v36  ;;  %v15677_v13 = vld [vmem:[#allocation13 + $0x46c] ss:$16 sps:$4 sm:$0xff]   ;;  %v15675_v36 = vld [vmem:[#allocation13 + $0x468] ss:$16 sps:$4 sm:$0xff]  }
 0x480   :  { %v1572_v46 = vrot.slane %v1571_v49, 2  ;;  %v15683_v41 = vld [vmem:[#allocation13 + $0x48c] ss:$16 sps:$4 sm:$0xff]   ;;  %v15686_v53 = vld [vmem:[#allocation13 + $0x4a4] ss:$16 sps:$4 sm:$0xff]  }
 0x481   :  { %v1581_v62 = vrot.slane %v1580_v34, 2  ;;  %v1566_v16 = vadd.f32 %v1565_v31, %v1564_v43  ;;  %v15678_v43 = vld [vmem:[#allocation13 + $0x480] ss:$16 sps:$4 sm:$0xff]  }
 0x482   :  { %v1573_v29 = vadd.f32 %v1572_v46, %v1571_v49  ;;  %v15681_v49 = vld [vmem:[#allocation13 + $0x488] ss:$16 sps:$4 sm:$0xff]   ;;  %v15684_v31 = vld [vmem:[#allocation13 + $0x4a0] ss:$16 sps:$4 sm:$0xff]  }
 0x483   :  { %v1582_v7 = vadd.f32 %v1581_v62, %v1580_v34  ;;  %1649 = vmatprep.mubr.f32.mxu0 %v1566_v16  ;;  %v15689_v34 = vld [vmem:[#allocation13 + $0x4ac] ss:$16 sps:$4 sm:$0xff]   ;;  %v15687_v46 = vld [vmem:[#allocation13 + $0x4a8] ss:$16 sps:$4 sm:$0xff]   ;;  %v15692_v62 = vld [vmem:[#allocation13 + $0x4c4] ss:$16 sps:$4 sm:$0xff]  }
 0x484   :  { %v1574_v21 = vrot.slane %v1573_v29, 1  ;;  %1650 = vmatmul.mubr.f32.vlgmr.msra.gmra.mrb[10].mxu0 %v1557_v47  ;;  %v15695_v16 = vld [vmem:[#allocation13 + $0x4cc] ss:$16 sps:$4 sm:$0xff]   ;;  %v15693_v47 = vld [vmem:[#allocation13 + $0x4c8] ss:$16 sps:$4 sm:$0xff]  }
 0x485   :  { %v1583_v25 = vrot.slane %v1582_v7, 1  ;;  %14924 = vmatpush1.bf16.msra.mxu0 %v18282_v57  ;;  %1797 = vmatprep.mubr.f32.mxu0 %v20264_v23 }
 0x486   :  { %14926 = vmatprep.subr.bf16.mxu0 %v18285_v40  ;;  %v1575_v30 = vadd.f32 %v1574_v21, %v1573_v29  ;;  %v15690_v29 = vld [vmem:[#allocation13 + $0x4c0] ss:$16 sps:$4 sm:$0xff]   ;;  %v15701_v21 = vld [vmem:[#allocation13 + $0x4ec] ss:$16 sps:$4 sm:$0xff]  }
 0x487   :  { %v1584_v27 = vadd.f32 %v1583_v25, %v1582_v7  ;;  %v15698_v7 = vld [vmem:[#allocation13 + $0x4e4] ss:$16 sps:$4 sm:$0xff]   ;;  %v15696_v25 = vld [vmem:[#allocation13 + $0x4e0] ss:$16 sps:$4 sm:$0xff]  }
 0x489   :  { %1719 = vmatprep.mubr.f32.mxu1 %v1584_v27  ;;  %14928 = vmatpush1.bf16.msra.mxu0 %v18287_v59  ;;  %v15699_v27 = vld [vmem:[#allocation13 + $0x4e8] ss:$16 sps:$4 sm:$0xff]  }
 0x48a   :  { %1720 = vmatmul.mubr.f32.vlgmr.msra.gmra.mrb[14].mxu1 %v1575_v30  ;;  %14938 = vmatprep.subr.bf16.mxu0 %v18215_v17  ;;  %v15656_v17 = vld [vmem:[#allocation13 + $0x404] ss:$16 sps:$4 sm:$0xff]   ;;  %v397_v30 = vld [vmem:[#allocation3] sm:$0x11] }
 0x48b   :  { %14932 = vmatpush1.bf16.msra.mxu1 %v18295_v38  ;;  %1868 = vmatprep.mubr.f32.mxu1 %v20264_v23 }
 0x48c   :  { %14934 = vmatprep.subr.bf16.mxu1 %v18297_v48 }
 0x48f   :  { %14936 = vmatpush1.bf16.msra.mxu1 %v18301_v63 }
 0x490   :  { %14946 = vmatprep.subr.bf16.mxu1 %v18291_v6  ;;  %v15659_v6 = vld [vmem:[#allocation13 + $0x40c] ss:$16 sps:$4 sm:$0xff]  }
 0x557   :  { %v14107_v44 = vpop.f32.mrb[10].mxu0 }
 0x558   :  { %v14108_v61 = vpop.f32.mrb[11].mxu0 }
 0x559   :  { %v14109_v14 = vadd.f32 %v14108_v61, %v14107_v44  ;;  %v403_v44 = vld [vmem:[#allocation3 + $0x30] sm:$0x11]  ;;  %v20360_v61 = vmov 0 }
 0x55a   :  { %v20361_v61 = vsel %vm18434_vm10, 4294967295, %v20360_v61 }
 0x55b   :  { %20362 = vst [vmem:[#allocation50_spill] sm:$0xff] %v20361_v61 }
 0x55d   :  { %v14142_v32 = vpop.f32.mrb[14].mxu1 }
 0x55e   :  { %v14143_v42 = vpop.f32.mrb[15].mxu1 }
 0x55f   :  { %v14144_v50 = vadd.f32 %v14143_v42, %v14142_v32  ;;  %v404_v32 = vsel %vm18434_vm10, 0, %v403_v44  ;;  %v413_v42 = vld [vmem:[#allocation3 + $0x20] sm:$0x11] }
 0x560   :  { %405 = vst [vmem:[#allocation3 + $0x30] sm:$0x11] %v404_v32  ;;  %v15744_v44 = vld [vmem:[#allocation13 + $0x5e0] ss:$16 sps:$4 sm:$0xff]   ;;  %v15752_v32 = vld [vmem:[#allocation13 + $0x604] ss:$16 sps:$4 sm:$0xff]  }
 0x561   :  { %v1722_v54 = vadd.f32 %v14144_v50, %v14109_v14  ;;  %v398_v14 = vsel %vm18434_vm10, 0, %v397_v30  ;;  %v419_v50 = vld [vmem:[#allocation3 + $0x50] sm:$0x11] }
 0x562   :  { %399 = vst [vmem:[#allocation3] sm:$0x11] %v398_v14  ;;  %v15749_v30 = vld [vmem:[#allocation13 + $0x5ec] ss:$16 sps:$4 sm:$0xff]   ;;  %v15747_v14 = vld [vmem:[#allocation13 + $0x5e8] ss:$16 sps:$4 sm:$0xff]  }
 0x563   :  { %v1725_v4 = vmul.f32 0.001953125, %v1722_v54  ;;  %v400_v54 = vld [vmem:[#allocation3 + $0x8] sm:$0x11] }
 0x565   :  { %v1727_v24 = vadd.f32 1e-05, %v1725_v4  ;;  %v406_v4 = vld [vmem:[#allocation3 + $0x38] sm:$0x11] }
 0x567   :  { %16902 = vrsqrt.f32 %v1727_v24  ;;  %v401_v24 = vsel %vm18434_vm10, 0, %v400_v54 }
 0x568   :  { %402 = vst [vmem:[#allocation3 + $0x8] sm:$0x11] %v401_v24 }
 0x571   :  { %v16903_v9 = vpop.eup %16902 }
 0x572   :  { %v1729_v18 = vmul.f32 %v16903_v9, %v1726_v52  ;;  %v407_v52 = vsel %vm18434_vm10, 0, %v406_v4  ;;  %v416_v9 = vld [vmem:[#allocation3 + $0x28] sm:$0x11] }
 0x573   :  { %408 = vst [vmem:[#allocation3 + $0x38] sm:$0x11] %v407_v52 }
 0x574   :  { %12987 = vmatmul.mubr.msk.f32.vlgmr.msra.gmra.mrb[12].mxu0 %vm1355_vm0, %v1729_v18  ;;  %12988 = vmatmul.mubr.msk.f32.vlgmr.msra.gmra.mrb[16].mxu1 %vm1355_vm0, %v1729_v18  ;;  %v422_v18 = vld [vmem:[#allocation3 + $0x58] sm:$0x11] }
 0x575   :  { %14940 = vmatpush1.bf16.msra.mxu0 %v18282_v57  ;;  %14948 = vmatpush1.bf16.msra.mxu1 %v18295_v38  ;;  %v15662_v57 = vld [vmem:[#allocation13 + $0x424] ss:$16 sps:$4 sm:$0xff]   ;;  %v15665_v38 = vld [vmem:[#allocation13 + $0x42c] ss:$16 sps:$4 sm:$0xff]  }
 0x576   :  { %14942 = vmatprep.subr.bf16.mxu0 %v18285_v40  ;;  %14950 = vmatprep.subr.bf16.mxu1 %v18297_v48  ;;  %v15660_v40 = vld [vmem:[#allocation13 + $0x420] ss:$16 sps:$4 sm:$0xff]   ;;  %v15663_v48 = vld [vmem:[#allocation13 + $0x428] ss:$16 sps:$4 sm:$0xff]  }
 0x577   :  { %1943 = vmatprep.mubr.f32.mxu0 %v20264_v23  ;;  %2014 = vmatprep.mubr.f32.mxu1 %v20264_v23 }
 0x579   :  { %14944 = vmatpush1.bf16.msra.mxu0 %v18287_v59  ;;  %14952 = vmatpush1.bf16.msra.mxu1 %v18301_v63  ;;  %v15668_v59 = vld [vmem:[#allocation13 + $0x444] ss:$16 sps:$4 sm:$0xff]   ;;  %v15666_v63 = vld [vmem:[#allocation13 + $0x440] ss:$16 sps:$4 sm:$0xff]  }
 0x57a   :  { %3291 = vmatprep.subr.bf16.mxu0 %v15656_v17  ;;  %3397 = vmatprep.subr.bf16.mxu1 %v15659_v6  ;;  %v414_v17 = vsel %vm412_vm13, 0, %v413_v42  ;;  %v420_v6 = vsel %vm412_vm13, 0, %v419_v50  ;;  %v15755_v42 = vld [vmem:[#allocation13 + $0x60c] ss:$16 sps:$4 sm:$0xff]  }
 0x57b   :  { %415 = vst [vmem:[#allocation3 + $0x20] sm:$0x11] %v414_v17  ;;  %421 = vst [vmem:[#allocation3 + $0x50] sm:$0x11] %v420_v6 }
 0x57c   :  { %12989 = vmatmul.mubr.msk.f32.vlgmr.msra.gmra.mrb[14].mxu0 %vm1355_vm0, %v1875_v15  ;;  %12990 = vmatmul.mubr.msk.f32.vlgmr.msra.gmra.mrb[18].mxu1 %vm1355_vm0, %v1875_v15  ;;  %v417_v15 = vsel %vm412_vm13, 0, %v416_v9 }
 0x57d   :  { %3292 = vmatpush1.bf16.msra.mxu0 %v15654_v0  ;;  %3398 = vmatpush1.bf16.msra.mxu1 %v15657_v55  ;;  %v423_v0 = vsel %vm412_vm13, 0, %v422_v18  ;;  %v15702_v55 = vld [vmem:[#allocation13 + $0x500] ss:$16 sps:$4 sm:$0xff]   ;;  %418 = vst [vmem:[#allocation3 + $0x28] sm:$0x11] %v417_v15 }
 0x57e   :  { %3293 = vmatprep.subr.bf16.mxu0 %v15662_v57  ;;  %3399 = vmatprep.subr.bf16.mxu1 %v15665_v38  ;;  %424 = vst [vmem:[#allocation3 + $0x58] sm:$0x11] %v423_v0  ;;  %v15704_v57 = vld [vmem:[#allocation13 + $0x504] ss:$16 sps:$4 sm:$0xff]   ;;  %v15705_v38 = vld [vmem:[#allocation13 + $0x508] ss:$16 sps:$4 sm:$0xff]  }
 0x581   :  { %3294 = vmatpush1.bf16.msra.mxu0 %v15660_v40  ;;  %3400 = vmatpush1.bf16.msra.mxu1 %v15663_v48  ;;  %v15707_v40 = vld [vmem:[#allocation13 + $0x50c] ss:$16 sps:$4 sm:$0xff]   ;;  %v15710_v48 = vld [vmem:[#allocation13 + $0x524] ss:$16 sps:$4 sm:$0xff]  }
 0x582   :  { %3295 = vmatprep.subr.bf16.mxu0 %v15668_v59  ;;  %3401 = vmatprep.subr.bf16.mxu1 %v15671_v2  ;;  %v15713_v59 = vld [vmem:[#allocation13 + $0x52c] ss:$16 sps:$4 sm:$0xff]   ;;  %v15708_v2 = vld [vmem:[#allocation13 + $0x520] ss:$16 sps:$4 sm:$0xff]  }
 0x585   :  { %3296 = vmatpush1.bf16.msra.mxu0 %v15666_v63  ;;  %3402 = vmatpush1.bf16.msra.mxu1 %v15669_v11  ;;  %v15711_v63 = vld [vmem:[#allocation13 + $0x528] ss:$16 sps:$4 sm:$0xff]   ;;  %v15716_v11 = vld [vmem:[#allocation13 + $0x544] ss:$16 sps:$4 sm:$0xff]  }
 0x586   :  { %3297 = vmatprep.subr.bf16.mxu0 %v15674_v12  ;;  %3403 = vmatprep.subr.bf16.mxu1 %v15677_v13  ;;  %v15719_v12 = vld [vmem:[#allocation13 + $0x54c] ss:$16 sps:$4 sm:$0xff]   ;;  %v15714_v13 = vld [vmem:[#allocation13 + $0x540] ss:$16 sps:$4 sm:$0xff]  }
 0x589   :  { %3298 = vmatpush1.bf16.msra.mxu0 %v15672_v26  ;;  %3404 = vmatpush1.bf16.msra.mxu1 %v15675_v36  ;;  %v15717_v26 = vld [vmem:[#allocation13 + $0x548] ss:$16 sps:$4 sm:$0xff]   ;;  %v15722_v36 = vld [vmem:[#allocation13 + $0x564] ss:$16 sps:$4 sm:$0xff]  }
 0x58a   :  { %3299 = vmatprep.subr.bf16.mxu0 %v15680_v37  ;;  %3405 = vmatprep.subr.bf16.mxu1 %v15683_v41  ;;  %v15725_v37 = vld [vmem:[#allocation13 + $0x56c] ss:$16 sps:$4 sm:$0xff]   ;;  %v15720_v41 = vld [vmem:[#allocation13 + $0x560] ss:$16 sps:$4 sm:$0xff]  }
 0x58d   :  { %3300 = vmatpush1.bf16.msra.mxu0 %v15678_v43  ;;  %3406 = vmatpush1.bf16.msra.mxu1 %v15681_v49  ;;  %v15723_v43 = vld [vmem:[#allocation13 + $0x568] ss:$16 sps:$4 sm:$0xff]   ;;  %v15728_v49 = vld [vmem:[#allocation13 + $0x584] ss:$16 sps:$4 sm:$0xff]  }
 0x58e   :  { %3301 = vmatprep.subr.bf16.mxu0 %v15686_v53  ;;  %3407 = vmatprep.subr.bf16.mxu1 %v15689_v34  ;;  %v15731_v53 = vld [vmem:[#allocation13 + $0x58c] ss:$16 sps:$4 sm:$0xff]   ;;  %v15726_v34 = vld [vmem:[#allocation13 + $0x580] ss:$16 sps:$4 sm:$0xff]  }
 0x591   :  { %3302 = vmatpush1.bf16.msra.mxu0 %v15684_v31  ;;  %3408 = vmatpush1.bf16.msra.mxu1 %v15687_v46  ;;  %v15729_v31 = vld [vmem:[#allocation13 + $0x588] ss:$16 sps:$4 sm:$0xff]   ;;  %v15734_v46 = vld [vmem:[#allocation13 + $0x5a4] ss:$16 sps:$4 sm:$0xff]  }
 0x592   :  { %3303 = vmatprep.subr.bf16.mxu0 %v15692_v62  ;;  %3409 = vmatprep.subr.bf16.mxu1 %v15695_v16  ;;  %v15737_v62 = vld [vmem:[#allocation13 + $0x5ac] ss:$16 sps:$4 sm:$0xff]   ;;  %v15732_v16 = vld [vmem:[#allocation13 + $0x5a0] ss:$16 sps:$4 sm:$0xff]  }
 0x595   :  { %3304 = vmatpush1.bf16.msra.mxu0 %v15690_v29  ;;  %3410 = vmatpush1.bf16.msra.mxu1 %v15693_v47  ;;  %v15735_v29 = vld [vmem:[#allocation13 + $0x5a8] ss:$16 sps:$4 sm:$0xff]   ;;  %v15740_v47 = vld [vmem:[#allocation13 + $0x5c4] ss:$16 sps:$4 sm:$0xff]  }
 0x596   :  { %3305 = vmatprep.subr.bf16.mxu0 %v15698_v7  ;;  %3411 = vmatprep.subr.bf16.mxu1 %v15701_v21  ;;  %v15743_v7 = vld [vmem:[#allocation13 + $0x5cc] ss:$16 sps:$4 sm:$0xff]   ;;  %v15738_v21 = vld [vmem:[#allocation13 + $0x5c0] ss:$16 sps:$4 sm:$0xff]  }
 0x599   :  { %3306 = vmatpush1.bf16.msra.mxu0 %v15696_v25  ;;  %3412 = vmatpush1.bf16.msra.mxu1 %v15699_v27  ;;  %v15741_v25 = vld [vmem:[#allocation13 + $0x5c8] ss:$16 sps:$4 sm:$0xff]   ;;  %v15746_v27 = vld [vmem:[#allocation13 + $0x5e4] ss:$16 sps:$4 sm:$0xff]  }
 0x59a   :  { %3307 = vmatprep.subr.bf16.mxu0 %v15704_v57  ;;  %3413 = vmatprep.subr.bf16.mxu1 %v15707_v40 }
 0x59d   :  { %3308 = vmatpush1.bf16.msra.mxu0 %v15702_v55  ;;  %3414 = vmatpush1.bf16.msra.mxu1 %v15705_v38 }
 0x59e   :  { %3309 = vmatprep.subr.bf16.mxu0 %v15710_v48  ;;  %3415 = vmatprep.subr.bf16.mxu1 %v15713_v59 }
 0x5a1   :  { %3310 = vmatpush1.bf16.msra.mxu0 %v15708_v2  ;;  %3416 = vmatpush1.bf16.msra.mxu1 %v15711_v63 }
 0x5a2   :  { %3311 = vmatprep.subr.bf16.mxu0 %v15716_v11  ;;  %3417 = vmatprep.subr.bf16.mxu1 %v15719_v12 }
 0x5a5   :  { %3312 = vmatpush1.bf16.msra.mxu0 %v15714_v13  ;;  %3418 = vmatpush1.bf16.msra.mxu1 %v15717_v26 }
 0x5a6   :  { %3313 = vmatprep.subr.bf16.mxu0 %v15722_v36  ;;  %3419 = vmatprep.subr.bf16.mxu1 %v15725_v37 }
 0x5a9   :  { %3314 = vmatpush1.bf16.msra.mxu0 %v15720_v41  ;;  %3420 = vmatpush1.bf16.msra.mxu1 %v15723_v43 }
 0x5aa   :  { %3315 = vmatprep.subr.bf16.mxu0 %v15728_v49  ;;  %3421 = vmatprep.subr.bf16.mxu1 %v15731_v53 }
 0x5ad   :  { %3316 = vmatpush1.bf16.msra.mxu0 %v15726_v34  ;;  %3422 = vmatpush1.bf16.msra.mxu1 %v15729_v31 }
 0x5ae   :  { %3317 = vmatprep.subr.bf16.mxu0 %v15734_v46  ;;  %3423 = vmatprep.subr.bf16.mxu1 %v15737_v62 }
 0x5b1   :  { %3318 = vmatpush1.bf16.msra.mxu0 %v15732_v16  ;;  %3424 = vmatpush1.bf16.msra.mxu1 %v15735_v29 }
 0x5b2   :  { %3319 = vmatprep.subr.bf16.mxu0 %v15740_v47  ;;  %3425 = vmatprep.subr.bf16.mxu1 %v15743_v7 }
 0x5b5   :  { %3320 = vmatpush1.bf16.msra.mxu0 %v15738_v21  ;;  %3426 = vmatpush1.bf16.msra.mxu1 %v15741_v25 }
 0x5b6   :  { %3321 = vmatprep.subr.bf16.mxu0 %v15746_v27  ;;  %3427 = vmatprep.subr.bf16.mxu1 %v15749_v30 }
 0x5b9   :  { %3322 = vmatpush1.bf16.msra.mxu0 %v15744_v44  ;;  %3428 = vmatpush1.bf16.msra.mxu1 %v15747_v14 }
 0x5ba   :  { %3344 = vmatprep.subr.bf16.mxu0 %v15752_v32  ;;  %3450 = vmatprep.subr.bf16.mxu1 %v15755_v42 }
 0x647   :  { %v1799_v50 = vpop.f32.mrb[12].mxu0  ;;  %v1870_v54 = vpop.f32.mrb[16].mxu1 }
 0x648   :  { %v1801_v4 = vpop.f32.mrb[13].mxu0  ;;  %v1872_v24 = vpop.f32.mrb[17].mxu1  ;;  %v2024_v52 = vrot.slane %v1799_v50, %v18324_v35  ;;  %v2032_v9 = vrot.slane %v1870_v54, %v18324_v35 }
 0x649   :  { %v2028_v18 = vrot.slane %v1801_v4, %v18324_v35  ;;  %v2036_v17 = vrot.slane %v1872_v24, %v18324_v35 }
 0x64a   :  { %v2037_v6 = vmul.f32 %v2024_v52, %v18329_v60  ;;  %v2041_v15 = vmul.f32 %v2024_v52, %v18332_v3  ;;  %v2045_v0 = vmul.f32 %v2024_v52, %v18335_v20  ;;  %v2049_v55 = vmul.f32 %v2024_v52, %v18338_v28 }
 0x64b   :  { %v2039_v57 = vmul.f32 %v2032_v9, %v18369_v33  ;;  %v2043_v38 = vmul.f32 %v2032_v9, %v18372_v51  ;;  %v2047_v40 = vmul.f32 %v2032_v9, %v18375_v10  ;;  %v2051_v48 = vmul.f32 %v2032_v9, %v18378_v39 }
 0x64c   :  { %v2038_v59 = vmul.f32 %v2028_v18, %v18341_v45  ;;  %v2042_v2 = vmul.f32 %v2028_v18, %v18344_v5  ;;  %v2046_v60 = vmul.f32 %v2028_v18, %v18347_v1  ;;  %v2050_v3 = vmul.f32 %v2028_v18, %v18350_v8 }
 0x64d   :  { %v2040_v28 = vmul.f32 %v2036_v17, %v18381_v58  ;;  %v2044_v33 = vmul.f32 %v2036_v17, %v18384_v19  ;;  %v2048_v45 = vmul.f32 %v2036_v17, %v18387_v22  ;;  %v2052_v5 = vmul.f32 %v2036_v17, %v18396_v56 }
 0x64f   :  { %v1945_v63 = vpop.f32.mrb[14].mxu0  ;;  %v2016_v20 = vpop.f32.mrb[18].mxu1 }
 0x650   :  { %v2056_v51 = vrot.slane %v1945_v63, %v18324_v35  ;;  %v2064_v10 = vrot.slane %v2016_v20, %v18324_v35  ;;  %v1947_v11 = vpop.f32.mrb[15].mxu0  ;;  %v2018_v39 = vpop.f32.mrb[19].mxu1 }
 0x651   :  { %v2060_v1 = vrot.slane %v1947_v11, %v18324_v35  ;;  %v2068_v8 = vrot.slane %v2018_v39, %v18324_v35  ;;  %v20365_v39 = vmov 0 }
 0x652   :  { %v2069_v12 = vadd.f32 %v2056_v51, %v2037_v6  ;;  %v2073_v58 = vadd.f32 %v2056_v51, %v2041_v15  ;;  %v2077_v13 = vadd.f32 %v2056_v51, %v2045_v0  ;;  %v2081_v19 = vadd.f32 %v2056_v51, %v2049_v55 }
 0x653   :  { %v2071_v26 = vadd.f32 %v2064_v10, %v2039_v57  ;;  %v2075_v36 = vadd.f32 %v2064_v10, %v2043_v38  ;;  %v2079_v37 = vadd.f32 %v2064_v10, %v2047_v40  ;;  %v2083_v41 = vadd.f32 %v2064_v10, %v2051_v48 }
 0x654   :  { %v2085_v43 = vmax.f32 %v2069_v12, 0.0  ;;  %v2089_v49 = vmax.f32 %v2073_v58, 0.0  ;;  %v2093_v53 = vmax.f32 %v2077_v13, 0.0  ;;  %v2097_v34 = vmax.f32 %v2081_v19, 0.0  ;;  %v2240_v19 = vld [vmem:[#allocation3 + $0x30] sm:$0xff] }
 0x655   :  { %v2087_v22 = vmax.f32 %v2071_v26, 0.0  ;;  %v2091_v31 = vmax.f32 %v2075_v36, 0.0  ;;  %v2095_v56 = vmax.f32 %v2079_v37, 0.0  ;;  %v2099_v46 = vmax.f32 %v2083_v41, 0.0  ;;  %v2248_v26 = vld [vmem:[#allocation3 + $0x50] sm:$0x11] }
 0x656   :  { %v2070_v62 = vadd.f32 %v2060_v1, %v2038_v59  ;;  %v2074_v16 = vadd.f32 %v2060_v1, %v2042_v2  ;;  %v2078_v29 = vadd.f32 %v2060_v1, %v2046_v60  ;;  %v2082_v47 = vadd.f32 %v2060_v1, %v2050_v3 }
 0x657   :  { %v2072_v7 = vadd.f32 %v2068_v8, %v2040_v28  ;;  %v2076_v21 = vadd.f32 %v2068_v8, %v2044_v33  ;;  %v2080_v25 = vadd.f32 %v2068_v8, %v2048_v45  ;;  %v2084_v27 = vadd.f32 %v2068_v8, %v2052_v5  ;;  %v2226_v28 = vld [vmem:[#allocation3] sm:$0xff] }
 0x658   :  { %v2086_v30 = vmax.f32 %v2070_v62, 0.0  ;;  %v2090_v44 = vmax.f32 %v2074_v16, 0.0  ;;  %v2094_v14 = vmax.f32 %v2078_v29, 0.0  ;;  %v2098_v32 = vmax.f32 %v2082_v47, 0.0  ;;  %v2234_v45 = vld [vmem:[#allocation3 + $0x20] sm:$0x11] }
 0x659   :  { %v2088_v42 = vmax.f32 %v2072_v7, 0.0  ;;  %v2092_v50 = vmax.f32 %v2076_v21, 0.0  ;;  %v2096_v54 = vmax.f32 %v2080_v25, 0.0  ;;  %v2100_v4 = vmax.f32 %v2084_v27, 0.0  ;;  %v2229_v29 = vld [vmem:[#allocation3 + $0x8] sm:$0xff] }
 0x65a   :  { %v13981_v24 = vpack.c.bf16 %v2086_v30, %v2085_v43  ;;  %v13983_v52 = vpack.c.bf16 %v2090_v44, %v2089_v49  ;;  %v13985_v9 = vpack.c.bf16 %v2094_v14, %v2093_v53  ;;  %v13987_v18 = vpack.c.bf16 %v2098_v32, %v2097_v34  ;;  %v2237_v27 = vld [vmem:[#allocation3 + $0x28] sm:$0x11] }
 0x65b   :  { %v13982_v6 = vpack.c.bf16 %v2088_v42, %v2087_v22  ;;  %v13984_v15 = vpack.c.bf16 %v2092_v50, %v2091_v31  ;;  %v18479_v0 = vpack.c.bf16 %v2096_v54, %v2095_v56  ;;  %v18481_v55 = vpack.c.bf16 %v2100_v4, %v2099_v46 }
 0x65c   :  { %v2142_v57 = vshrl.u32 %v13981_v24, 16  ;;  %v2145_v38 = vshll.u32 %v13981_v24, 16  ;;  %v2157_v40 = vshrl.u32 %v13983_v52, 16  ;;  %v2160_v48 = vshll.u32 %v13983_v52, 16 }
 0x65d   :  { %v2176_v59 = vshrl.u32 %v13985_v9, 16  ;;  %v2179_v2 = vshll.u32 %v13985_v9, 16  ;;  %v2191_v60 = vshrl.u32 %v13987_v18, 16  ;;  %v2194_v3 = vshll.u32 %v13987_v18, 16  ;;  %v2243_v18 = vld [vmem:[#allocation3 + $0x38] sm:$0xff] }
 0x65e   :  { %v2144_v63 = vrot.slane %v2142_v57, 7  ;;  %v2159_v20 = vrot.slane %v2157_v40, 7  ;;  %v2149_v33 = vshrl.u32 %v13982_v6, 16  ;;  %v2152_v51 = vshll.u32 %v13982_v6, 16 }
 0x65f   :  { %v2178_v10 = vrot.slane %v2176_v59, 7  ;;  %v2193_v11 = vrot.slane %v2191_v60, 7  ;;  %v20366_v39 = vsel %vm18487_vm3, 4294967295, %v20365_v39  ;;  %v2166_v5 = vshrl.u32 %v13984_v15, 16 }
 0x660   :  { %20367 = vst [vmem:[#allocation53_spill] sm:$0xff] %v20366_v39  ;;  %v2169_v1 = vshll.u32 %v13984_v15, 16  ;;  %v2147_v8 = vor.u32 %v2145_v38, %v2144_v63  ;;  %v2155_v12 = vrot.slane %v2144_v63, 4  ;;  %v2162_v58 = vor.u32 %v2160_v48, %v2159_v20 }
 0x661   :  { %v2173_v13 = vrot.slane %v2159_v20, 4  ;;  %v2181_v36 = vor.u32 %v2179_v2, %v2178_v10  ;;  %v2189_v37 = vrot.slane %v2178_v10, 4  ;;  %v2196_v41 = vor.u32 %v2194_v3, %v2193_v11 }
 0x662   :  { %v2207_v43 = vrot.slane %v2193_v11, 4  ;;  %v18493_v53 = vsel %vm17823_vm7, %v2155_v12, %v2162_v58  ;;  %v18497_v34 = vsel %vm18487_vm3, %v2147_v8, %v2226_v28  ;;  %v2151_v31 = vrot.slane %v2149_v33, 7 }
 0x663   :  { %v2235_v22 = vsel %vm18434_vm10, %v2173_v13, %v2234_v45  ;;  %v18503_v56 = vsel %vm17823_vm7, %v2189_v37, %v2196_v41  ;;  %2228 = vst [vmem:[#allocation3] sm:$0xff] %v18497_v34  ;;  %v18508_v46 = vsel %vm18487_vm3, %v2181_v36, %v2240_v19  ;;  %v2168_v16 = vrot.slane %v2166_v5, 7 }
 0x664   :  { %2236 = vst [vmem:[#allocation3 + $0x20] sm:$0x11] %v2235_v22  ;;  %v2249_v62 = vsel %vm18434_vm10, %v2207_v43, %v2248_v26  ;;  %2242 = vst [vmem:[#allocation3 + $0x30] sm:$0xff] %v18508_v46  ;;  %v2154_v47 = vor.u32 %v2152_v51, %v2151_v31  ;;  %v2164_v7 = vrot.slane %v2151_v31, 4  ;;  %v2183_v21 = vshrl.u32 %v18479_v0, 16 }
 0x665   :  { %2250 = vst [vmem:[#allocation3 + $0x50] sm:$0x11] %v2249_v62  ;;  %v2186_v25 = vshll.u32 %v18479_v0, 16  ;;  %v2171_v30 = vor.u32 %v2169_v1, %v2168_v16  ;;  %v2174_v44 = vrot.slane %v2168_v16, 4  ;;  %v2200_v14 = vshrl.u32 %v18481_v55, 16 }
 0x666   :  { %v2203_v32 = vshll.u32 %v18481_v55, 16  ;;  %v2185_v42 = vrot.slane %v2183_v21, 7  ;;  %v18519_v50 = vsel %vm18487_vm3, %v2154_v47, %v2229_v29  ;;  %v2395_v54 = vshrl.u32 %v18497_v34, 16  ;;  %v2251_v0 = vld [vmem:[#allocation3 + $0x58] sm:$0x11] }
 0x667   :  { %v2398_v4 = vshll.u32 %v18497_v34, 16  ;;  %v18525_v24 = vsel %vm17823_vm7, %v2164_v7, %v2171_v30  ;;  %v2202_v52 = vrot.slane %v2200_v14, 7  ;;  %2231 = vst [vmem:[#allocation3 + $0x8] sm:$0xff] %v18519_v50  ;;  %v2238_v9 = vsel %vm18434_vm10, %v2174_v44, %v2237_v27  ;;  %v15750_v30 = vld [vmem:[#allocation13 + $0x600] ss:$16 sps:$4 sm:$0xff]  }
 0x668   :  { %v2404_v17 = vshll.u32 %v18493_v53, 16  ;;  %v2188_v6 = vor.u32 %v2186_v25, %v2185_v42  ;;  %v2198_v15 = vrot.slane %v2185_v42, 4  ;;  %2239 = vst [vmem:[#allocation3 + $0x28] sm:$0x11] %v2238_v9  ;;  %v2397_v55 = vrot.slane %v2395_v54, 4 }
 0x669   :  { %v2400_v57 = vrot.slane %v2398_v4, 5  ;;  %v2205_v38 = vor.u32 %v2203_v32, %v2202_v52  ;;  %v2208_v40 = vrot.slane %v2202_v52, 4  ;;  %v2422_v59 = vshrl.u32 %v18493_v53, 16  ;;  %v15753_v44 = vld [vmem:[#allocation13 + $0x608] ss:$16 sps:$4 sm:$0xff]  }
 0x66a   :  { %v2406_v48 = vrot.slane %v2404_v17, 5  ;;  %v18534_v2 = vsel %vm18487_vm3, %v2188_v6, %v2243_v18  ;;  %v2443_v63 = vshrl.u32 %v18508_v46, 16  ;;  %v2446_v20 = vshll.u32 %v18508_v46, 16  ;;  %v15758_v9 = vld [vmem:[#allocation13 + $0x624] ss:$16 sps:$4 sm:$0xff]  }
 0x66b   :  { %v18536_v60 = vld [vmem:[#allocation3 + $0x20] sm:$0x11]  ;;  %v2401_v3 = vor.u32 %v2400_v57, %v2397_v55  ;;  %v18542_v28 = vsel %vm17823_vm7, %v2198_v15, %v2205_v38  ;;  %2245 = vst [vmem:[#allocation3 + $0x38] sm:$0xff] %v18534_v2  ;;  %v2252_v33 = vsel %vm18434_vm10, %v2208_v40, %v2251_v0  ;;  %v2424_v51 = vrot.slane %v2422_v59, 4 }
 0x66c   :  { %v2428_v10 = vshll.u32 %v18536_v60, 16  ;;  %v2392_v11 = vld [vmem:[#allocation3 + $0x50] sm:$0x11]  ;;  %2253 = vst [vmem:[#allocation3 + $0x58] sm:$0x11] %v2252_v33  ;;  %v2445_v5 = vrot.slane %v2443_v63, 4 }
 0x66d   :  { %v2402_v45 = vrot.slane %v2401_v3, 4  ;;  %v2448_v1 = vrot.slane %v2446_v20, 5  ;;  %v2452_v8 = vshll.u32 %v18503_v56, 16  ;;  %v2425_v12 = vor.u32 %v2424_v51, %v2406_v48  ;;  %v15761_v18 = vld [vmem:[#allocation13 + $0x62c] ss:$16 sps:$4 sm:$0xff]  }
 0x66e   :  { %v2430_v58 = vrot.slane %v2428_v10, 5  ;;  %v2470_v13 = vshrl.u32 %v18503_v56, 16  ;;  %v2476_v19 = vshll.u32 %v2392_v11, 16  ;;  %v2409_v43 = vshrl.u32 %v18519_v50, 16  ;;  %v15756_v63 = vld [vmem:[#allocation13 + $0x620] ss:$16 sps:$4 sm:$0xff]  }
 0x66f   :  { %v2407_v36 = vsel %vm17867_vm11, %v2402_v45, %v2406_v48  ;;  %v2449_v37 = vor.u32 %v2448_v1, %v2445_v5  ;;  %v2454_v41 = vrot.slane %v2452_v8, 5  ;;  %v2426_v22 = vrot.slane %v2425_v12, 4  ;;  %v2391_v16 = vld [vmem:[#allocation3 + $0x28] sm:$0x11]  ;;  %v15767_v12 = vld [vmem:[#allocation13 + $0x64c] ss:$16 sps:$4 sm:$0xff]  }
 0x670   :  { %v2472_v31 = vrot.slane %v2470_v13, 4  ;;  %v2478_v62 = vrot.slane %v2476_v19, 5  ;;  %v2412_v29 = vshll.u32 %v18519_v50, 16  ;;  %v2411_v7 = vrot.slane %v2409_v43, 4  ;;  %v15759_v11 = vld [vmem:[#allocation13 + $0x628] ss:$16 sps:$4 sm:$0xff]  }
 0x671   :  { %v2450_v47 = vrot.slane %v2449_v37, 4  ;;  %v2418_v21 = vshll.u32 %v18525_v24, 16  ;;  %v2432_v25 = vshrl.u32 %v18525_v24, 16  ;;  %v2431_v27 = vsel %vm17867_vm11, %v2426_v22, %v2430_v58  ;;  %v15764_v45 = vld [vmem:[#allocation13 + $0x644] ss:$16 sps:$4 sm:$0xff]  }
 0x672   :  { %v2473_v14 = vor.u32 %v2472_v31, %v2454_v41  ;;  %v2414_v32 = vrot.slane %v2412_v29, 5  ;;  %v2438_v42 = vshll.u32 %v2391_v16, 16  ;;  %v12999_v54 = vcombine.low %v2407_v36, %v2431_v27  ;;  %v15762_v16 = vld [vmem:[#allocation13 + $0x640] ss:$16 sps:$4 sm:$0xff]   ;;  %v15765_v29 = vld [vmem:[#allocation13 + $0x648] ss:$16 sps:$4 sm:$0xff]  }
 0x673   :  { %v13000_v4 = vcombine.high %v2407_v36, %v2431_v27  ;;  %v2455_v52 = vsel %vm17867_vm11, %v2450_v47, %v2454_v41  ;;  %v2420_v17 = vrot.slane %v2418_v21, 5  ;;  %v2434_v0 = vrot.slane %v2432_v25, 4  ;;  %v2393_v57 = vld [vmem:[#allocation3 + $0x58] sm:$0x11] }
 0x674   :  { %v2474_v6 = vrot.slane %v2473_v14, 4  ;;  %v2415_v15 = vor.u32 %v2414_v32, %v2411_v7  ;;  %v2440_v55 = vrot.slane %v2438_v42, 5  ;;  %v2457_v38 = vshrl.u32 %v18534_v2, 16  ;;  %v15770_v14 = vld [vmem:[#allocation13 + $0x664] ss:$16 sps:$4 sm:$0xff]  }
 0x675   :  { %3323 = vmatprep.mubr.bf16.mxu0 %v13000_v4  ;;  %3429 = vmatprep.mubr.bf16.mxu1 %v13000_v4  ;;  %v2460_v40 = vshll.u32 %v18534_v2, 16  ;;  %v2466_v48 = vshll.u32 %v18542_v28, 16  ;;  %v2480_v59 = vshrl.u32 %v18542_v28, 16  ;;  %v2435_v33 = vor.u32 %v2434_v0, %v2420_v17  ;;  %v15773_v32 = vld [vmem:[#allocation13 + $0x66c] ss:$16 sps:$4 sm:$0xff]  }
 0x676   :  { %3324 = vmatmul.mubr.bf16.vlgmr.msra.gmra.mrb[16].mxu0 %v12999_v54  ;;  %3430 = vmatmul.mubr.bf16.vlgmr.msra.gmra.mrb[20].mxu1 %v12999_v54  ;;  %v2479_v3 = vsel %vm17867_vm11, %v2474_v6, %v2478_v62  ;;  %v2416_v20 = vrot.slane %v2415_v15, 4  ;;  %v2486_v51 = vshll.u32 %v2393_v57, 16  ;;  %v2459_v1 = vrot.slane %v2457_v38, 4  ;;  %v15771_v4 = vld [vmem:[#allocation13 + $0x668] ss:$16 sps:$4 sm:$0xff]  }
 0x677   :  { %3345 = vmatpush1.bf16.msra.mxu0 %v15750_v30  ;;  %3451 = vmatpush1.bf16.msra.mxu1 %v15753_v44  ;;  %v13004_v10 = vcombine.high %v2455_v52, %v2479_v3  ;;  %v13003_v5 = vcombine.low %v2455_v52, %v2479_v3  ;;  %v2462_v8 = vrot.slane %v2460_v40, 5  ;;  %v2436_v13 = vrot.slane %v2435_v33, 4  ;;  %v15777_v6 = vld [vmem:[#allocation13 + $0x688] ss:$16 sps:$4 sm:$0xff]   ;;  %v15782_v15 = vld [vmem:[#allocation13 + $0x6a4] ss:$16 sps:$4 sm:$0xff]  }
 0x678   :  { %3346 = vmatprep.subr.bf16.mxu0 %v15758_v9  ;;  %3452 = vmatprep.subr.bf16.mxu1 %v15761_v18  ;;  %v2421_v58 = vsel %vm17867_vm11, %v2416_v20, %v2420_v17  ;;  %v2468_v19 = vrot.slane %v2466_v48, 5  ;;  %v2482_v36 = vrot.slane %v2480_v59, 4  ;;  %v2488_v41 = vrot.slane %v2486_v51, 5  ;;  %v15779_v18 = vld [vmem:[#allocation13 + $0x68c] ss:$16 sps:$4 sm:$0xff]  }
 0x679   :  { %3333 = vmatprep.mubr.bf16.mxu0 %v13004_v10  ;;  %3439 = vmatprep.mubr.bf16.mxu1 %v13004_v10  ;;  %v2463_v37 = vor.u32 %v2462_v8, %v2459_v1  ;;  %v2441_v43 = vsel %vm17867_vm11, %v2436_v13, %v2440_v55  ;;  %v18572_v31 = vcombine.high %v18508_v46, %v18503_v56  ;;  %v15774_v17 = vld [vmem:[#allocation13 + $0x680] ss:$16 sps:$4 sm:$0xff]   ;;  %v15785_v0 = vld [vmem:[#allocation13 + $0x6ac] ss:$16 sps:$4 sm:$0xff]   ;;  %v15783_v57 = vld [vmem:[#allocation13 + $0x6a8] ss:$16 sps:$4 sm:$0xff]  }
 0x67a   :  { %v2483_v22 = vor.u32 %v2482_v36, %v2468_v19  ;;  %v18576_v62 = vcombine.low %v18508_v46, %v18503_v56  ;;  %v18578_v47 = vcombine.low %v2421_v58, %v2441_v43  ;;  %v13002_v7 = vcombine.high %v2421_v58, %v2441_v43  ;;  %v15780_v55 = vld [vmem:[#allocation13 + $0x6a0] ss:$16 sps:$4 sm:$0xff]   ;;  %v15788_v38 = vld [vmem:[#allocation13 + $0x6c4] ss:$16 sps:$4 sm:$0xff]   ;;  %v15791_v40 = vld [vmem:[#allocation13 + $0x6cc] ss:$16 sps:$4 sm:$0xff]  }
 0x67b   :  { %3347 = vmatpush1.bf16.msra.mxu0 %v15756_v63  ;;  %3453 = vmatpush1.bf16.msra.mxu1 %v15759_v11  ;;  %v2464_v21 = vrot.slane %v2463_v37, 4  ;;  %v18582_v25 = vcombine.high %v18519_v50, %v18525_v24  ;;  %v18586_v30 = vcombine.low %v18519_v50, %v18525_v24  ;;  %v18590_v46 = vcombine.high %v18534_v2, %v18542_v28  ;;  %v15768_v50 = vld [vmem:[#allocation13 + $0x660] ss:$16 sps:$4 sm:$0xff]   ;;  %v15789_v59 = vld [vmem:[#allocation13 + $0x6c8] ss:$16 sps:$4 sm:$0xff]  }
 0x67c   :  { %3348 = vmatprep.subr.bf16.mxu0 %v15764_v45  ;;  %3454 = vmatprep.subr.bf16.mxu1 %v15767_v12  ;;  %v2484_v27 = vrot.slane %v2483_v22, 4  ;;  %v18594_v44 = vcombine.low %v18534_v2, %v18542_v28  ;;  %v15776_v2 = vld [vmem:[#allocation13 + $0x684] ss:$16 sps:$4 sm:$0xff]   ;;  %v15786_v48 = vld [vmem:[#allocation13 + $0x6c0] ss:$16 sps:$4 sm:$0xff]  }
 0x67d   :  { %v2469_v42 = vsel %vm17867_vm11, %v2464_v21, %v2468_v19  ;;  %v15794_v3 = vld [vmem:[#allocation13 + $0x6e4] ss:$16 sps:$4 sm:$0xff]   ;;  %v15797_v63 = vld [vmem:[#allocation13 + $0x6ec] ss:$16 sps:$4 sm:$0xff]   ;;  %v15792_v20 = vld [vmem:[#allocation13 + $0x6e0] ss:$16 sps:$4 sm:$0xff]  }
 0x67e   :  { %3334 = vmatmul.mubr.bf16.gmra.mrb[20].mxu0 %v13003_v5  ;;  %3440 = vmatmul.mubr.bf16.gmra.mrb[24].mxu1 %v13003_v5  ;;  %v2489_v54 = vsel %vm17867_vm11, %v2484_v27, %v2488_v41  ;;  %v15795_v33 = vld [vmem:[#allocation13 + $0x6e8] ss:$16 sps:$4 sm:$0xff]   ;;  %v15800_v51 = vld [vmem:[#allocation13 + $0x704] ss:$16 sps:$4 sm:$0xff]   ;;  %v15803_v10 = vld [vmem:[#allocation13 + $0x70c] ss:$16 sps:$4 sm:$0xff]  }
 0x67f   :  { %3349 = vmatpush1.bf16.msra.mxu0 %v15762_v16  ;;  %3455 = vmatpush1.bf16.msra.mxu1 %v15765_v29  ;;  %v18600_v52 = vcombine.high %v2469_v42, %v2489_v54  ;;  %v18602_v9 = vcombine.low %v2469_v42, %v2489_v54  ;;  %v15798_v11 = vld [vmem:[#allocation13 + $0x700] ss:$16 sps:$4 sm:$0xff]   ;;  %v15801_v45 = vld [vmem:[#allocation13 + $0x708] ss:$16 sps:$4 sm:$0xff]   ;;  %v15806_v5 = vld [vmem:[#allocation13 + $0x724] ss:$16 sps:$4 sm:$0xff]  }
 0x680   :  { %3376 = vmatprep.mubr.bf16.mxu0 %v13002_v7  ;;  %3482 = vmatprep.mubr.bf16.mxu1 %v13002_v7  ;;  %v15809_v1 = vld [vmem:[#allocation13 + $0x72c] ss:$16 sps:$4 sm:$0xff]   ;;  %v15804_v8 = vld [vmem:[#allocation13 + $0x720] ss:$16 sps:$4 sm:$0xff]   ;;  %v15807_v12 = vld [vmem:[#allocation13 + $0x728] ss:$16 sps:$4 sm:$0xff]  }
 0x681   :  { %3350 = vmatprep.subr.bf16.mxu0 %v15770_v14  ;;  %3456 = vmatprep.subr.bf16.mxu1 %v15773_v32  ;;  %v15812_v58 = vld [vmem:[#allocation13 + $0x744] ss:$16 sps:$4 sm:$0xff]   ;;  %v15815_v13 = vld [vmem:[#allocation13 + $0x74c] ss:$16 sps:$4 sm:$0xff]   ;;  %v15810_v19 = vld [vmem:[#allocation13 + $0x740] ss:$16 sps:$4 sm:$0xff]  }
 0x682   :  { %v15813_v36 = vld [vmem:[#allocation13 + $0x748] ss:$16 sps:$4 sm:$0xff]   ;;  %v15818_v37 = vld [vmem:[#allocation13 + $0x764] ss:$16 sps:$4 sm:$0xff]   ;;  %v15821_v41 = vld [vmem:[#allocation13 + $0x76c] ss:$16 sps:$4 sm:$0xff]  }
 0x683   :  { %3351 = vmatpush1.bf16.msra.mxu0 %v15768_v50  ;;  %3457 = vmatpush1.bf16.msra.mxu1 %v15771_v4  ;;  %v15816_v43 = vld [vmem:[#allocation13 + $0x760] ss:$16 sps:$4 sm:$0xff]   ;;  %v15819_v22 = vld [vmem:[#allocation13 + $0x768] ss:$16 sps:$4 sm:$0xff]   ;;  %v15824_v16 = vld [vmem:[#allocation13 + $0x784] ss:$16 sps:$4 sm:$0xff]  }
 0x684   :  { %3352 = vmatprep.subr.bf16.mxu0 %v15776_v2  ;;  %3458 = vmatprep.subr.bf16.mxu1 %v15779_v18  ;;  %v15827_v29 = vld [vmem:[#allocation13 + $0x78c] ss:$16 sps:$4 sm:$0xff]   ;;  %v15822_v7 = vld [vmem:[#allocation13 + $0x780] ss:$16 sps:$4 sm:$0xff]   ;;  %v15825_v21 = vld [vmem:[#allocation13 + $0x788] ss:$16 sps:$4 sm:$0xff]  }
 0x685   :  { %v15830_v27 = vld [vmem:[#allocation13 + $0x7a4] ss:$16 sps:$4 sm:$0xff]   ;;  %v15833_v14 = vld [vmem:[#allocation13 + $0x7ac] ss:$16 sps:$4 sm:$0xff]   ;;  %v15828_v32 = vld [vmem:[#allocation13 + $0x7a0] ss:$16 sps:$4 sm:$0xff]  }
 0x686   :  { %v15831_v42 = vld [vmem:[#allocation13 + $0x7a8] ss:$16 sps:$4 sm:$0xff]   ;;  %v15836_v54 = vld [vmem:[#allocation13 + $0x7c4] ss:$16 sps:$4 sm:$0xff]   ;;  %v15839_v50 = vld [vmem:[#allocation13 + $0x7cc] ss:$16 sps:$4 sm:$0xff]  }
 0x687   :  { %3353 = vmatpush1.bf16.msra.mxu0 %v15774_v17  ;;  %3459 = vmatpush1.bf16.msra.mxu1 %v15777_v6  ;;  %v15834_v4 = vld [vmem:[#allocation13 + $0x7c0] ss:$16 sps:$4 sm:$0xff]   ;;  %v15837_v2 = vld [vmem:[#allocation13 + $0x7c8] ss:$16 sps:$4 sm:$0xff]   ;;  %v15842_v18 = vld [vmem:[#allocation13 + $0x7e4] ss:$16 sps:$4 sm:$0xff]  }
 0x688   :  { %3354 = vmatprep.subr.bf16.mxu0 %v15782_v15  ;;  %3460 = vmatprep.subr.bf16.mxu1 %v15785_v0  ;;  %v15845_v17 = vld [vmem:[#allocation13 + $0x7ec] ss:$16 sps:$4 sm:$0xff]   ;;  %v15840_v6 = vld [vmem:[#allocation13 + $0x7e0] ss:$16 sps:$4 sm:$0xff]   ;;  %v15843_v15 = vld [vmem:[#allocation13 + $0x7e8] ss:$16 sps:$4 sm:$0xff]  }
 0x689   :  { %v15848_v0 = vld [vmem:[#allocation13 + $0x4] ss:$16 sps:$4 sm:$0xff]  }
 0x68b   :  { %3355 = vmatpush1.bf16.msra.mxu0 %v15780_v55  ;;  %3461 = vmatpush1.bf16.msra.mxu1 %v15783_v57  ;;  %v15851_v55 = vld [vmem:[#allocation13 + $0xc] ss:$16 sps:$4 sm:$0xff]   ;;  %v15846_v57 = vld [vmem:[#allocation13] ss:$16 sps:$4 sm:$0xff]  }
 0x68c   :  { %3356 = vmatprep.subr.bf16.mxu0 %v15788_v38  ;;  %3462 = vmatprep.subr.bf16.mxu1 %v15791_v40  ;;  %v15849_v38 = vld [vmem:[#allocation13 + $0x8] ss:$16 sps:$4 sm:$0xff]   ;;  %v15854_v40 = vld [vmem:[#allocation13 + $0x24] ss:$16 sps:$4 sm:$0xff]  }
 0x68f   :  { %3357 = vmatpush1.bf16.msra.mxu0 %v15786_v48  ;;  %3463 = vmatpush1.bf16.msra.mxu1 %v15789_v59  ;;  %v15857_v48 = vld [vmem:[#allocation13 + $0x2c] ss:$16 sps:$4 sm:$0xff]   ;;  %v15852_v59 = vld [vmem:[#allocation13 + $0x20] ss:$16 sps:$4 sm:$0xff]  }
 0x690   :  { %3358 = vmatprep.subr.bf16.mxu0 %v15794_v3  ;;  %3464 = vmatprep.subr.bf16.mxu1 %v15797_v63  ;;  %v15855_v3 = vld [vmem:[#allocation13 + $0x28] ss:$16 sps:$4 sm:$0xff]   ;;  %v15860_v63 = vld [vmem:[#allocation13 + $0x44] ss:$16 sps:$4 sm:$0xff]  }
 0x693   :  { %3359 = vmatpush1.bf16.msra.mxu0 %v15792_v20  ;;  %3465 = vmatpush1.bf16.msra.mxu1 %v15795_v33  ;;  %v15863_v20 = vld [vmem:[#allocation13 + $0x4c] ss:$16 sps:$4 sm:$0xff]   ;;  %v15858_v33 = vld [vmem:[#allocation13 + $0x40] ss:$16 sps:$4 sm:$0xff]  }
 0x694   :  { %3360 = vmatprep.subr.bf16.mxu0 %v15800_v51  ;;  %3466 = vmatprep.subr.bf16.mxu1 %v15803_v10  ;;  %v15861_v51 = vld [vmem:[#allocation13 + $0x48] ss:$16 sps:$4 sm:$0xff]   ;;  %v15866_v10 = vld [vmem:[#allocation13 + $0x64] ss:$16 sps:$4 sm:$0xff]  }
 0x697   :  { %3361 = vmatpush1.bf16.msra.mxu0 %v15798_v11  ;;  %3467 = vmatpush1.bf16.msra.mxu1 %v15801_v45  ;;  %v15869_v11 = vld [vmem:[#allocation13 + $0x6c] ss:$16 sps:$4 sm:$0xff]   ;;  %v15867_v45 = vld [vmem:[#allocation13 + $0x68] ss:$16 sps:$4 sm:$0xff]  }
 0x698   :  { %3362 = vmatprep.subr.bf16.mxu0 %v15806_v5  ;;  %3468 = vmatprep.subr.bf16.mxu1 %v15809_v1  ;;  %v15872_v5 = vld [vmem:[#allocation13 + $0x84] ss:$16 sps:$4 sm:$0xff]   ;;  %v15875_v1 = vld [vmem:[#allocation13 + $0x8c] ss:$16 sps:$4 sm:$0xff]  }
 0x69b   :  { %3363 = vmatpush1.bf16.msra.mxu0 %v15804_v8  ;;  %3469 = vmatpush1.bf16.msra.mxu1 %v15807_v12  ;;  %v15870_v8 = vld [vmem:[#allocation13 + $0x80] ss:$16 sps:$4 sm:$0xff]   ;;  %v15873_v12 = vld [vmem:[#allocation13 + $0x88] ss:$16 sps:$4 sm:$0xff]  }
 0x69c   :  { %3364 = vmatprep.subr.bf16.mxu0 %v15812_v58  ;;  %3470 = vmatprep.subr.bf16.mxu1 %v15815_v13  ;;  %v15878_v58 = vld [vmem:[#allocation13 + $0xa4] ss:$16 sps:$4 sm:$0xff]   ;;  %v15881_v13 = vld [vmem:[#allocation13 + $0xac] ss:$16 sps:$4 sm:$0xff]  }
 0x69f   :  { %3365 = vmatpush1.bf16.msra.mxu0 %v15810_v19  ;;  %3471 = vmatpush1.bf16.msra.mxu1 %v15813_v36  ;;  %v15879_v19 = vld [vmem:[#allocation13 + $0xa8] ss:$16 sps:$4 sm:$0xff]   ;;  %v15884_v36 = vld [vmem:[#allocation13 + $0xc4] ss:$16 sps:$4 sm:$0xff]  }
 0x6a0   :  { %3366 = vmatprep.subr.bf16.mxu0 %v15818_v37  ;;  %3472 = vmatprep.subr.bf16.mxu1 %v15821_v41  ;;  %v15887_v37 = vld [vmem:[#allocation13 + $0xcc] ss:$16 sps:$4 sm:$0xff]   ;;  %v15882_v41 = vld [vmem:[#allocation13 + $0xc0] ss:$16 sps:$4 sm:$0xff]  }
 0x6a3   :  { %3367 = vmatpush1.bf16.msra.mxu0 %v15816_v43  ;;  %3473 = vmatpush1.bf16.msra.mxu1 %v15819_v22  ;;  %v15885_v43 = vld [vmem:[#allocation13 + $0xc8] ss:$16 sps:$4 sm:$0xff]   ;;  %v15890_v22 = vld [vmem:[#allocation13 + $0xe4] ss:$16 sps:$4 sm:$0xff]  }
 0x6a4   :  { %3368 = vmatprep.subr.bf16.mxu0 %v15824_v16  ;;  %3474 = vmatprep.subr.bf16.mxu1 %v15827_v29  ;;  %v15893_v16 = vld [vmem:[#allocation13 + $0xec] ss:$16 sps:$4 sm:$0xff]   ;;  %v15888_v29 = vld [vmem:[#allocation13 + $0xe0] ss:$16 sps:$4 sm:$0xff]  }
 0x6a7   :  { %3369 = vmatpush1.bf16.msra.mxu0 %v15822_v7  ;;  %3475 = vmatpush1.bf16.msra.mxu1 %v15825_v21  ;;  %v15891_v7 = vld [vmem:[#allocation13 + $0xe8] ss:$16 sps:$4 sm:$0xff]   ;;  %v15896_v21 = vld [vmem:[#allocation13 + $0x104] ss:$16 sps:$4 sm:$0xff]  }
 0x6a8   :  { %3370 = vmatprep.subr.bf16.mxu0 %v15830_v27  ;;  %3476 = vmatprep.subr.bf16.mxu1 %v15833_v14  ;;  %v15899_v27 = vld [vmem:[#allocation13 + $0x10c] ss:$16 sps:$4 sm:$0xff]   ;;  %v15894_v14 = vld [vmem:[#allocation13 + $0x100] ss:$16 sps:$4 sm:$0xff]  }
 0x6ab   :  { %3371 = vmatpush1.bf16.msra.mxu0 %v15828_v32  ;;  %3477 = vmatpush1.bf16.msra.mxu1 %v15831_v42  ;;  %v15897_v32 = vld [vmem:[#allocation13 + $0x108] ss:$16 sps:$4 sm:$0xff]   ;;  %v15902_v42 = vld [vmem:[#allocation13 + $0x124] ss:$16 sps:$4 sm:$0xff]  }
 0x6ac   :  { %3372 = vmatprep.subr.bf16.mxu0 %v15836_v54  ;;  %3478 = vmatprep.subr.bf16.mxu1 %v15839_v50  ;;  %v15905_v54 = vld [vmem:[#allocation13 + $0x12c] ss:$16 sps:$4 sm:$0xff]   ;;  %v15900_v50 = vld [vmem:[#allocation13 + $0x120] ss:$16 sps:$4 sm:$0xff]  }
 0x6af   :  { %3373 = vmatpush1.bf16.msra.mxu0 %v15834_v4  ;;  %3479 = vmatpush1.bf16.msra.mxu1 %v15837_v2  ;;  %v15903_v4 = vld [vmem:[#allocation13 + $0x128] ss:$16 sps:$4 sm:$0xff]   ;;  %v15908_v2 = vld [vmem:[#allocation13 + $0x144] ss:$16 sps:$4 sm:$0xff]  }
 0x6b0   :  { %3374 = vmatprep.subr.bf16.mxu0 %v15842_v18  ;;  %3480 = vmatprep.subr.bf16.mxu1 %v15845_v17  ;;  %v15911_v18 = vld [vmem:[#allocation13 + $0x14c] ss:$16 sps:$4 sm:$0xff]   ;;  %v15906_v17 = vld [vmem:[#allocation13 + $0x140] ss:$16 sps:$4 sm:$0xff]  }
 0x6b3   :  { %3375 = vmatpush1.bf16.msra.mxu0 %v15840_v6  ;;  %3481 = vmatpush1.bf16.msra.mxu1 %v15843_v15  ;;  %v15909_v6 = vld [vmem:[#allocation13 + $0x148] ss:$16 sps:$4 sm:$0xff]   ;;  %v15914_v15 = vld [vmem:[#allocation13 + $0x164] ss:$16 sps:$4 sm:$0xff]  }
 0x6b4   :  { %4183 = vmatprep.subr.bf16.mxu0 %v15848_v0  ;;  %4289 = vmatprep.subr.bf16.mxu1 %v15851_v55  ;;  %v15917_v0 = vld [vmem:[#allocation13 + $0x16c] ss:$16 sps:$4 sm:$0xff]   ;;  %v15912_v55 = vld [vmem:[#allocation13 + $0x160] ss:$16 sps:$4 sm:$0xff]  }
 0x6b6   :  { %3377 = vmatmul.mubr.bf16.vlgmr.msra.gmra.mrb[16].mxu0 %v18578_v47  ;;  %3483 = vmatmul.mubr.bf16.vlgmr.msra.gmra.mrb[20].mxu1 %v18578_v47  ;;  %v13136_v47 = vcombine.high %v18497_v34, %v18493_v53 }
 0x6b7   :  { %3386 = vmatprep.mubr.bf16.mxu0 %v18600_v52  ;;  %3492 = vmatprep.mubr.bf16.mxu1 %v18600_v52  ;;  %v15864_v52 = vld [vmem:[#allocation13 + $0x60] ss:$16 sps:$4 sm:$0xff]  }
 0x6b8   :  { %4184 = vmatpush1.bf16.msra.mxu0 %v15846_v57  ;;  %4290 = vmatpush1.bf16.msra.mxu1 %v15849_v38  ;;  %v15915_v57 = vld [vmem:[#allocation13 + $0x168] ss:$16 sps:$4 sm:$0xff]   ;;  %v15920_v38 = vld [vmem:[#allocation13 + $0x184] ss:$16 sps:$4 sm:$0xff]  }
 0x6b9   :  { %4185 = vmatprep.subr.bf16.mxu0 %v15854_v40  ;;  %4291 = vmatprep.subr.bf16.mxu1 %v15857_v48  ;;  %v15923_v40 = vld [vmem:[#allocation13 + $0x18c] ss:$16 sps:$4 sm:$0xff]   ;;  %v15918_v48 = vld [vmem:[#allocation13 + $0x180] ss:$16 sps:$4 sm:$0xff]  }
 0x6bc   :  { %4186 = vmatpush1.bf16.msra.mxu0 %v15852_v59  ;;  %4292 = vmatpush1.bf16.msra.mxu1 %v15855_v3  ;;  %v15921_v59 = vld [vmem:[#allocation13 + $0x188] ss:$16 sps:$4 sm:$0xff]   ;;  %v15926_v3 = vld [vmem:[#allocation13 + $0x1a4] ss:$16 sps:$4 sm:$0xff]  }
 0x6bd   :  { %4187 = vmatprep.subr.bf16.mxu0 %v15860_v63  ;;  %4293 = vmatprep.subr.bf16.mxu1 %v15863_v20  ;;  %v15929_v63 = vld [vmem:[#allocation13 + $0x1ac] ss:$16 sps:$4 sm:$0xff]   ;;  %v15924_v20 = vld [vmem:[#allocation13 + $0x1a0] ss:$16 sps:$4 sm:$0xff]  }
 0x6be   :  { %3387 = vmatmul.mubr.bf16.gmra.mrb[20].mxu0 %v18602_v9  ;;  %3493 = vmatmul.mubr.bf16.gmra.mrb[24].mxu1 %v18602_v9  ;;  %v15876_v9 = vld [vmem:[#allocation13 + $0xa0] ss:$16 sps:$4 sm:$0xff]  }
 0x6bf   :  { %4215 = vmatprep.mubr.bf16.mxu0 %v13136_v47  ;;  %4321 = vmatprep.mubr.bf16.mxu1 %v13136_v47  ;;  %v15935_v47 = vld [vmem:[#allocation13 + $0x1cc] ss:$16 sps:$4 sm:$0xff]  }
 0x6c0   :  { %4188 = vmatpush1.bf16.msra.mxu0 %v15858_v33  ;;  %4294 = vmatpush1.bf16.msra.mxu1 %v15861_v51  ;;  %v15927_v33 = vld [vmem:[#allocation13 + $0x1a8] ss:$16 sps:$4 sm:$0xff]   ;;  %v15932_v51 = vld [vmem:[#allocation13 + $0x1c4] ss:$16 sps:$4 sm:$0xff]  }
 0x6c1   :  { %4189 = vmatprep.subr.bf16.mxu0 %v15866_v10  ;;  %4295 = vmatprep.subr.bf16.mxu1 %v15869_v11  ;;  %v15930_v10 = vld [vmem:[#allocation13 + $0x1c0] ss:$16 sps:$4 sm:$0xff]   ;;  %v15933_v11 = vld [vmem:[#allocation13 + $0x1c8] ss:$16 sps:$4 sm:$0xff]  }
 0x6c4   :  { %4190 = vmatpush1.bf16.msra.mxu0 %v15864_v52  ;;  %4296 = vmatpush1.bf16.msra.mxu1 %v15867_v45  ;;  %v15938_v52 = vld [vmem:[#allocation13 + $0x1e4] ss:$16 sps:$4 sm:$0xff]   ;;  %v15941_v45 = vld [vmem:[#allocation13 + $0x1ec] ss:$16 sps:$4 sm:$0xff]  }
 0x6c5   :  { %4191 = vmatprep.subr.bf16.mxu0 %v15872_v5  ;;  %4297 = vmatprep.subr.bf16.mxu1 %v15875_v1  ;;  %v15936_v5 = vld [vmem:[#allocation13 + $0x1e0] ss:$16 sps:$4 sm:$0xff]   ;;  %v15939_v1 = vld [vmem:[#allocation13 + $0x1e8] ss:$16 sps:$4 sm:$0xff]  }
 0x6c8   :  { %4192 = vmatpush1.bf16.msra.mxu0 %v15870_v8  ;;  %4298 = vmatpush1.bf16.msra.mxu1 %v15873_v12  ;;  %v15944_v8 = vld [vmem:[#allocation13 + $0x204] ss:$16 sps:$4 sm:$0xff]   ;;  %v15947_v12 = vld [vmem:[#allocation13 + $0x20c] ss:$16 sps:$4 sm:$0xff]  }
 0x6c9   :  { %4193 = vmatprep.subr.bf16.mxu0 %v15878_v58  ;;  %4299 = vmatprep.subr.bf16.mxu1 %v15881_v13  ;;  %v15942_v58 = vld [vmem:[#allocation13 + $0x200] ss:$16 sps:$4 sm:$0xff]   ;;  %v13135_v13 = vcombine.low %v18497_v34, %v18493_v53 }
 0x6ca   :  { %v15954_v34 = vld [vmem:[#allocation13 + $0x240] ss:$16 sps:$4 sm:$0xff]  }
 0x6cc   :  { %4194 = vmatpush1.bf16.msra.mxu0 %v15876_v9  ;;  %4300 = vmatpush1.bf16.msra.mxu1 %v15879_v19  ;;  %v15945_v9 = vld [vmem:[#allocation13 + $0x208] ss:$16 sps:$4 sm:$0xff]   ;;  %v15950_v19 = vld [vmem:[#allocation13 + $0x224] ss:$16 sps:$4 sm:$0xff]  }
 0x6cd   :  { %4195 = vmatprep.subr.bf16.mxu0 %v15884_v36  ;;  %4301 = vmatprep.subr.bf16.mxu1 %v15887_v37  ;;  %v15953_v36 = vld [vmem:[#allocation13 + $0x22c] ss:$16 sps:$4 sm:$0xff]   ;;  %v15948_v37 = vld [vmem:[#allocation13 + $0x220] ss:$16 sps:$4 sm:$0xff]  }
 0x6d0   :  { %4196 = vmatpush1.bf16.msra.mxu0 %v15882_v41  ;;  %4302 = vmatpush1.bf16.msra.mxu1 %v15885_v43  ;;  %v15951_v41 = vld [vmem:[#allocation13 + $0x228] ss:$16 sps:$4 sm:$0xff]   ;;  %v15956_v43 = vld [vmem:[#allocation13 + $0x244] ss:$16 sps:$4 sm:$0xff]  }
 0x6d1   :  { %4197 = vmatprep.subr.bf16.mxu0 %v15890_v22  ;;  %4303 = vmatprep.subr.bf16.mxu1 %v15893_v16  ;;  %v15959_v22 = vld [vmem:[#allocation13 + $0x24c] ss:$16 sps:$4 sm:$0xff]   ;;  %v15957_v16 = vld [vmem:[#allocation13 + $0x248] ss:$16 sps:$4 sm:$0xff]  }
 0x6d4   :  { %4198 = vmatpush1.bf16.msra.mxu0 %v15888_v29  ;;  %4304 = vmatpush1.bf16.msra.mxu1 %v15891_v7  ;;  %v15962_v29 = vld [vmem:[#allocation13 + $0x264] ss:$16 sps:$4 sm:$0xff]   ;;  %v15965_v7 = vld [vmem:[#allocation13 + $0x26c] ss:$16 sps:$4 sm:$0xff]  }
 0x6d5   :  { %4199 = vmatprep.subr.bf16.mxu0 %v15896_v21  ;;  %4305 = vmatprep.subr.bf16.mxu1 %v15899_v27  ;;  %v15963_v21 = vld [vmem:[#allocation13 + $0x268] ss:$16 sps:$4 sm:$0xff]   ;;  %v15968_v27 = vld [vmem:[#allocation13 + $0x284] ss:$16 sps:$4 sm:$0xff]  }
 0x6d8   :  { %4200 = vmatpush1.bf16.msra.mxu0 %v15894_v14  ;;  %4306 = vmatpush1.bf16.msra.mxu1 %v15897_v32  ;;  %v15971_v14 = vld [vmem:[#allocation13 + $0x28c] ss:$16 sps:$4 sm:$0xff]   ;;  %v15966_v32 = vld [vmem:[#allocation13 + $0x280] ss:$16 sps:$4 sm:$0xff]  }
 0x6d9   :  { %4201 = vmatprep.subr.bf16.mxu0 %v15902_v42  ;;  %4307 = vmatprep.subr.bf16.mxu1 %v15905_v54  ;;  %v15969_v42 = vld [vmem:[#allocation13 + $0x288] ss:$16 sps:$4 sm:$0xff]   ;;  %v15974_v54 = vld [vmem:[#allocation13 + $0x2a4] ss:$16 sps:$4 sm:$0xff]  }
 0x6dc   :  { %4202 = vmatpush1.bf16.msra.mxu0 %v15900_v50  ;;  %4308 = vmatpush1.bf16.msra.mxu1 %v15903_v4  ;;  %v15972_v50 = vld [vmem:[#allocation13 + $0x2a0] ss:$16 sps:$4 sm:$0xff]   ;;  %v15975_v4 = vld [vmem:[#allocation13 + $0x2a8] ss:$16 sps:$4 sm:$0xff]  }
 0x6dd   :  { %4203 = vmatprep.subr.bf16.mxu0 %v15908_v2  ;;  %4309 = vmatprep.subr.bf16.mxu1 %v15911_v18  ;;  %v15980_v2 = vld [vmem:[#allocation13 + $0x2c4] ss:$16 sps:$4 sm:$0xff]   ;;  %v15978_v18 = vld [vmem:[#allocation13 + $0x2c0] ss:$16 sps:$4 sm:$0xff]  }
 0x6e0   :  { %4204 = vmatpush1.bf16.msra.mxu0 %v15906_v17  ;;  %4310 = vmatpush1.bf16.msra.mxu1 %v15909_v6  ;;  %v15981_v17 = vld [vmem:[#allocation13 + $0x2c8] ss:$16 sps:$4 sm:$0xff]   ;;  %v15986_v6 = vld [vmem:[#allocation13 + $0x2e4] ss:$16 sps:$4 sm:$0xff]  }
 0x6e1   :  { %4205 = vmatprep.subr.bf16.mxu0 %v15914_v15  ;;  %4311 = vmatprep.subr.bf16.mxu1 %v15917_v0  ;;  %v15989_v15 = vld [vmem:[#allocation13 + $0x2ec] ss:$16 sps:$4 sm:$0xff]   ;;  %v15984_v0 = vld [vmem:[#allocation13 + $0x2e0] ss:$16 sps:$4 sm:$0xff]  }
 0x6e4   :  { %4206 = vmatpush1.bf16.msra.mxu0 %v15912_v55  ;;  %4312 = vmatpush1.bf16.msra.mxu1 %v15915_v57  ;;  %v15987_v55 = vld [vmem:[#allocation13 + $0x2e8] ss:$16 sps:$4 sm:$0xff]   ;;  %v15992_v57 = vld [vmem:[#allocation13 + $0x304] ss:$16 sps:$4 sm:$0xff]  }
 0x6e5   :  { %4207 = vmatprep.subr.bf16.mxu0 %v15920_v38  ;;  %4313 = vmatprep.subr.bf16.mxu1 %v15923_v40  ;;  %v15995_v38 = vld [vmem:[#allocation13 + $0x30c] ss:$16 sps:$4 sm:$0xff]   ;;  %v15990_v40 = vld [vmem:[#allocation13 + $0x300] ss:$16 sps:$4 sm:$0xff]  }
 0x6e8   :  { %4208 = vmatpush1.bf16.msra.mxu0 %v15918_v48  ;;  %4314 = vmatpush1.bf16.msra.mxu1 %v15921_v59  ;;  %v15993_v48 = vld [vmem:[#allocation13 + $0x308] ss:$16 sps:$4 sm:$0xff]   ;;  %v15998_v59 = vld [vmem:[#allocation13 + $0x324] ss:$16 sps:$4 sm:$0xff]  }
 0x6e9   :  { %4209 = vmatprep.subr.bf16.mxu0 %v15926_v3  ;;  %4315 = vmatprep.subr.bf16.mxu1 %v15929_v63  ;;  %v16001_v3 = vld [vmem:[#allocation13 + $0x32c] ss:$16 sps:$4 sm:$0xff]   ;;  %v15996_v63 = vld [vmem:[#allocation13 + $0x320] ss:$16 sps:$4 sm:$0xff]  }
 0x6ec   :  { %4210 = vmatpush1.bf16.msra.mxu0 %v15924_v20  ;;  %4316 = vmatpush1.bf16.msra.mxu1 %v15927_v33  ;;  %v15999_v20 = vld [vmem:[#allocation13 + $0x328] ss:$16 sps:$4 sm:$0xff]   ;;  %v16004_v33 = vld [vmem:[#allocation13 + $0x344] ss:$16 sps:$4 sm:$0xff]  }
 0x6ed   :  { %4211 = vmatprep.subr.bf16.mxu0 %v15932_v51  ;;  %4317 = vmatprep.subr.bf16.mxu1 %v15935_v47  ;;  %v16007_v51 = vld [vmem:[#allocation13 + $0x34c] ss:$16 sps:$4 sm:$0xff]   ;;  %v16002_v47 = vld [vmem:[#allocation13 + $0x340] ss:$16 sps:$4 sm:$0xff]  }
 0x6f0   :  { %4212 = vmatpush1.bf16.msra.mxu0 %v15930_v10  ;;  %4318 = vmatpush1.bf16.msra.mxu1 %v15933_v11  ;;  %v16005_v10 = vld [vmem:[#allocation13 + $0x348] ss:$16 sps:$4 sm:$0xff]   ;;  %v16010_v11 = vld [vmem:[#allocation13 + $0x364] ss:$16 sps:$4 sm:$0xff]  }
 0x6f1   :  { %4213 = vmatprep.subr.bf16.mxu0 %v15938_v52  ;;  %4319 = vmatprep.subr.bf16.mxu1 %v15941_v45  ;;  %v16013_v52 = vld [vmem:[#allocation13 + $0x36c] ss:$16 sps:$4 sm:$0xff]   ;;  %v16008_v45 = vld [vmem:[#allocation13 + $0x360] ss:$16 sps:$4 sm:$0xff]  }
 0x6f4   :  { %4214 = vmatpush1.bf16.msra.mxu0 %v15936_v5  ;;  %4320 = vmatpush1.bf16.msra.mxu1 %v15939_v1  ;;  %v16011_v5 = vld [vmem:[#allocation13 + $0x368] ss:$16 sps:$4 sm:$0xff]   ;;  %v16016_v1 = vld [vmem:[#allocation13 + $0x384] ss:$16 sps:$4 sm:$0xff]  }
 0x6f5   :  { %4236 = vmatprep.subr.bf16.mxu0 %v15944_v8  ;;  %4342 = vmatprep.subr.bf16.mxu1 %v15947_v12  ;;  %v16019_v8 = vld [vmem:[#allocation13 + $0x38c] ss:$16 sps:$4 sm:$0xff]   ;;  %v16014_v12 = vld [vmem:[#allocation13 + $0x380] ss:$16 sps:$4 sm:$0xff]  }
 0x6f7   :  { %4216 = vmatmul.mubr.bf16.vlgmr.msra.gmra.mrb[16].mxu0 %v13135_v13  ;;  %4322 = vmatmul.mubr.bf16.vlgmr.msra.gmra.mrb[20].mxu1 %v13135_v13  ;;  %v16022_v13 = vld [vmem:[#allocation13 + $0x3a4] ss:$16 sps:$4 sm:$0xff]  }
 0x6f8   :  { %4225 = vmatprep.mubr.bf16.mxu0 %v18572_v31  ;;  %4237 = vmatpush1.bf16.msra.mxu0 %v15942_v58  ;;  %v16017_v58 = vld [vmem:[#allocation13 + $0x388] ss:$16 sps:$4 sm:$0xff]  }
 0x6f9   :  { %4331 = vmatprep.mubr.bf16.mxu1 %v18572_v31  ;;  %4343 = vmatpush1.bf16.msra.mxu1 %v15945_v9  ;;  %v15960_v31 = vld [vmem:[#allocation13 + $0x260] ss:$16 sps:$4 sm:$0xff]   ;;  %v16025_v9 = vld [vmem:[#allocation13 + $0x3ac] ss:$16 sps:$4 sm:$0xff]  }
 0x6fa   :  { %4238 = vmatprep.subr.bf16.mxu0 %v15950_v19  ;;  %4344 = vmatprep.subr.bf16.mxu1 %v15953_v36  ;;  %v16020_v19 = vld [vmem:[#allocation13 + $0x3a0] ss:$16 sps:$4 sm:$0xff]   ;;  %v16023_v36 = vld [vmem:[#allocation13 + $0x3a8] ss:$16 sps:$4 sm:$0xff]  }
 0x6fc   :  { %4239 = vmatpush1.bf16.msra.mxu0 %v15948_v37  ;;  %v16028_v37 = vld [vmem:[#allocation13 + $0x3c4] ss:$16 sps:$4 sm:$0xff]  }
 0x6fd   :  { %4345 = vmatpush1.bf16.msra.mxu1 %v15951_v41  ;;  %4240 = vmatprep.subr.bf16.mxu0 %v15956_v43  ;;  %v16031_v41 = vld [vmem:[#allocation13 + $0x3cc] ss:$16 sps:$4 sm:$0xff]   ;;  %v16026_v43 = vld [vmem:[#allocation13 + $0x3c0] ss:$16 sps:$4 sm:$0xff]  }
 0x6fe   :  { %4346 = vmatprep.subr.bf16.mxu1 %v15959_v22  ;;  %v16029_v22 = vld [vmem:[#allocation13 + $0x3c8] ss:$16 sps:$4 sm:$0xff]  }
 0x6ff   :  { %4226 = vmatmul.mubr.bf16.gmra.mrb[20].mxu0 %v18576_v62  ;;  %4332 = vmatmul.mubr.bf16.gmra.mrb[24].mxu1 %v18576_v62  ;;  %v15977_v62 = vld [vmem:[#allocation13 + $0x2ac] ss:$16 sps:$4 sm:$0xff]  }
 0x700   :  { %4241 = vmatpush1.bf16.msra.mxu0 %v15954_v34  ;;  %4268 = vmatprep.mubr.bf16.mxu0 %v18582_v25  ;;  %v16034_v34 = vld [vmem:[#allocation13 + $0x3e4] ss:$16 sps:$4 sm:$0xff]  }
 0x701   :  { %4347 = vmatpush1.bf16.msra.mxu1 %v15957_v16  ;;  %4374 = vmatprep.mubr.bf16.mxu1 %v18582_v25  ;;  %v15983_v25 = vld [vmem:[#allocation13 + $0x2cc] ss:$16 sps:$4 sm:$0xff]  }
 0x702   :  { %4242 = vmatprep.subr.bf16.mxu0 %v15962_v29  ;;  %4348 = vmatprep.subr.bf16.mxu1 %v15965_v7  ;;  %v16037_v16 = vld [vmem:[#allocation13 + $0x3ec] ss:$16 sps:$4 sm:$0xff]   ;;  %v16032_v29 = vld [vmem:[#allocation13 + $0x3e0] ss:$16 sps:$4 sm:$0xff]   ;;  %v16035_v7 = vld [vmem:[#allocation13 + $0x3e8] ss:$16 sps:$4 sm:$0xff]  }
 0x704   :  { %4243 = vmatpush1.bf16.msra.mxu0 %v15960_v31  ;;  %v16040_v31 = vld [vmem:[#allocation13 + $0x804] ss:$16 sps:$4 sm:$0xff]  }
 0x705   :  { %4349 = vmatpush1.bf16.msra.mxu1 %v15963_v21  ;;  %4244 = vmatprep.subr.bf16.mxu0 %v15968_v27  ;;  %v16043_v21 = vld [vmem:[#allocation13 + $0x80c] ss:$16 sps:$4 sm:$0xff]  }
 0x706   :  { %4350 = vmatprep.subr.bf16.mxu1 %v15971_v14  ;;  %v4395_v27 = vld [vmem:[#allocation3] sm:$0xee] }
 0x707   :  { %v16038_v14 = vld [vmem:[#allocation13 + $0x800] ss:$16 sps:$4 sm:$0xff]  }
 0x708   :  { %4245 = vmatpush1.bf16.msra.mxu0 %v15966_v32  ;;  %v4409_v32 = vrot.slane %v18493_v53, 5  ;;  %v16047_v53 = vld [vmem:[#allocation13 + $0x828] ss:$16 sps:$4 sm:$0xff]  }
 0x709   :  { %4351 = vmatpush1.bf16.msra.mxu1 %v15969_v42  ;;  %4246 = vmatprep.subr.bf16.mxu0 %v15974_v54  ;;  %v16041_v42 = vld [vmem:[#allocation13 + $0x808] ss:$16 sps:$4 sm:$0xff]   ;;  %v16046_v54 = vld [vmem:[#allocation13 + $0x824] ss:$16 sps:$4 sm:$0xff]  }
 0x70a   :  { %4352 = vmatprep.subr.bf16.mxu1 %v15977_v62  ;;  %v16049_v62 = vld [vmem:[#allocation13 + $0x82c] ss:$16 sps:$4 sm:$0xff]  }
 0x70c   :  { %4247 = vmatpush1.bf16.msra.mxu0 %v15972_v50  ;;  %v13271_v50 = vrot.slane %v4395_v27, 9  ;;  %v16112_v27 = vld [vmem:[#allocation13 + $0x984] ss:$16 sps:$4 sm:$0xff]  }
 0x70d   :  { %4353 = vmatpush1.bf16.msra.mxu1 %v15975_v4  ;;  %4248 = vmatprep.subr.bf16.mxu0 %v15980_v2  ;;  %v4416_v4 = vrot.slane %v18536_v60, 5  ;;  %v16044_v2 = vld [vmem:[#allocation13 + $0x820] ss:$16 sps:$4 sm:$0xff]  }
 0x70e   :  { %4354 = vmatprep.subr.bf16.mxu1 %v15983_v25  ;;  %v4415_v25 = vrot.slane %v4409_v32, 4 }
 0x710   :  { %4249 = vmatpush1.bf16.msra.mxu0 %v15978_v18  ;;  %v16052_v18 = vld [vmem:[#allocation13 + $0x844] ss:$16 sps:$4 sm:$0xff]   ;;  %v18632_v60 = vsel %vm17894_vm15, %v4415_v25, %v4416_v4  ;;  %v16119_v4 = vld [vmem:[#allocation13 + $0x9a8] ss:$16 sps:$4 sm:$0xff]   ;;  %v16127_v25 = vld [vmem:[#allocation13 + $0x9cc] ss:$16 sps:$4 sm:$0xff]  }
 0x711   :  { %4355 = vmatpush1.bf16.msra.mxu1 %v15981_v17  ;;  %4250 = vmatprep.subr.bf16.mxu0 %v15986_v6  ;;  %v16055_v17 = vld [vmem:[#allocation13 + $0x84c] ss:$16 sps:$4 sm:$0xff]  }
 0x712   :  { %4356 = vmatprep.subr.bf16.mxu1 %v15989_v15  ;;  %v18628_v15 = vsel %vm17894_vm15, %v13271_v50, %v4409_v32  ;;  %v16110_v32 = vld [vmem:[#allocation13 + $0x980] ss:$16 sps:$4 sm:$0xff]  }
 0x713   :  { %v16116_v50 = vld [vmem:[#allocation13 + $0x9a0] ss:$16 sps:$4 sm:$0xff]  }
 0x714   :  { %4251 = vmatpush1.bf16.msra.mxu0 %v15984_v0  ;;  %v13276_v0 = vcombine.high %v18628_v15, %v18632_v60 }
 0x715   :  { %4357 = vmatpush1.bf16.msra.mxu1 %v15987_v55  ;;  %4252 = vmatprep.subr.bf16.mxu0 %v15992_v57  ;;  %v16058_v55 = vld [vmem:[#allocation13 + $0x864] ss:$16 sps:$4 sm:$0xff]   ;;  %v16061_v57 = vld [vmem:[#allocation13 + $0x86c] ss:$16 sps:$4 sm:$0xff]  }
 0x716   :  { %4358 = vmatprep.subr.bf16.mxu1 %v15995_v38  ;;  %v16056_v38 = vld [vmem:[#allocation13 + $0x860] ss:$16 sps:$4 sm:$0xff]  }
 0x718   :  { %4253 = vmatpush1.bf16.msra.mxu0 %v15990_v40  ;;  %v16059_v40 = vld [vmem:[#allocation13 + $0x868] ss:$16 sps:$4 sm:$0xff]  }
 0x719   :  { %4359 = vmatpush1.bf16.msra.mxu1 %v15993_v48  ;;  %4254 = vmatprep.subr.bf16.mxu0 %v15998_v59  ;;  %v16064_v48 = vld [vmem:[#allocation13 + $0x884] ss:$16 sps:$4 sm:$0xff]   ;;  %v16067_v59 = vld [vmem:[#allocation13 + $0x88c] ss:$16 sps:$4 sm:$0xff]  }
 0x71a   :  { %4360 = vmatprep.subr.bf16.mxu1 %v16001_v3  ;;  %v16062_v3 = vld [vmem:[#allocation13 + $0x880] ss:$16 sps:$4 sm:$0xff]  }
 0x71c   :  { %4255 = vmatpush1.bf16.msra.mxu0 %v15996_v63  ;;  %v16065_v63 = vld [vmem:[#allocation13 + $0x888] ss:$16 sps:$4 sm:$0xff]  }
 0x71d   :  { %4361 = vmatpush1.bf16.msra.mxu1 %v15999_v20  ;;  %4256 = vmatprep.subr.bf16.mxu0 %v16004_v33  ;;  %v16070_v20 = vld [vmem:[#allocation13 + $0x8a4] ss:$16 sps:$4 sm:$0xff]   ;;  %v16073_v33 = vld [vmem:[#allocation13 + $0x8ac] ss:$16 sps:$4 sm:$0xff]  }
 0x71e   :  { %4362 = vmatprep.subr.bf16.mxu1 %v16007_v51  ;;  %v16071_v51 = vld [vmem:[#allocation13 + $0x8a8] ss:$16 sps:$4 sm:$0xff]  }
 0x720   :  { %4257 = vmatpush1.bf16.msra.mxu0 %v16002_v47  ;;  %v16076_v47 = vld [vmem:[#allocation13 + $0x8c4] ss:$16 sps:$4 sm:$0xff]  }
 0x721   :  { %4363 = vmatpush1.bf16.msra.mxu1 %v16005_v10  ;;  %4258 = vmatprep.subr.bf16.mxu0 %v16010_v11  ;;  %v16079_v10 = vld [vmem:[#allocation13 + $0x8cc] ss:$16 sps:$4 sm:$0xff]   ;;  %v16074_v11 = vld [vmem:[#allocation13 + $0x8c0] ss:$16 sps:$4 sm:$0xff]  }
 0x722   :  { %4364 = vmatprep.subr.bf16.mxu1 %v16013_v52  ;;  %v16077_v52 = vld [vmem:[#allocation13 + $0x8c8] ss:$16 sps:$4 sm:$0xff]  }
 0x724   :  { %4259 = vmatpush1.bf16.msra.mxu0 %v16008_v45  ;;  %v16082_v45 = vld [vmem:[#allocation13 + $0x8e4] ss:$16 sps:$4 sm:$0xff]  }
 0x725   :  { %4365 = vmatpush1.bf16.msra.mxu1 %v16011_v5  ;;  %4260 = vmatprep.subr.bf16.mxu0 %v16016_v1  ;;  %v16085_v5 = vld [vmem:[#allocation13 + $0x8ec] ss:$16 sps:$4 sm:$0xff]   ;;  %v16080_v1 = vld [vmem:[#allocation13 + $0x8e0] ss:$16 sps:$4 sm:$0xff]  }
 0x726   :  { %4366 = vmatprep.subr.bf16.mxu1 %v16019_v8  ;;  %v16083_v8 = vld [vmem:[#allocation13 + $0x8e8] ss:$16 sps:$4 sm:$0xff]  }
 0x728   :  { %4261 = vmatpush1.bf16.msra.mxu0 %v16014_v12  ;;  %v16088_v12 = vld [vmem:[#allocation13 + $0x904] ss:$16 sps:$4 sm:$0xff]  }
 0x729   :  { %4367 = vmatpush1.bf16.msra.mxu1 %v16017_v58  ;;  %4262 = vmatprep.subr.bf16.mxu0 %v16022_v13  ;;  %v16091_v58 = vld [vmem:[#allocation13 + $0x90c] ss:$16 sps:$4 sm:$0xff]   ;;  %v16086_v13 = vld [vmem:[#allocation13 + $0x900] ss:$16 sps:$4 sm:$0xff]  }
 0x72a   :  { %4368 = vmatprep.subr.bf16.mxu1 %v16025_v9  ;;  %v16089_v9 = vld [vmem:[#allocation13 + $0x908] ss:$16 sps:$4 sm:$0xff]  }
 0x72c   :  { %4263 = vmatpush1.bf16.msra.mxu0 %v16020_v19  ;;  %v16094_v19 = vld [vmem:[#allocation13 + $0x924] ss:$16 sps:$4 sm:$0xff]  }
 0x72d   :  { %4369 = vmatpush1.bf16.msra.mxu1 %v16023_v36  ;;  %4264 = vmatprep.subr.bf16.mxu0 %v16028_v37  ;;  %v16097_v36 = vld [vmem:[#allocation13 + $0x92c] ss:$16 sps:$4 sm:$0xff]   ;;  %v16092_v37 = vld [vmem:[#allocation13 + $0x920] ss:$16 sps:$4 sm:$0xff]  }
 0x72e   :  { %4370 = vmatprep.subr.bf16.mxu1 %v16031_v41  ;;  %v16095_v41 = vld [vmem:[#allocation13 + $0x928] ss:$16 sps:$4 sm:$0xff]  }
 0x730   :  { %4265 = vmatpush1.bf16.msra.mxu0 %v16026_v43  ;;  %v16100_v43 = vld [vmem:[#allocation13 + $0x944] ss:$16 sps:$4 sm:$0xff]  }
 0x731   :  { %4371 = vmatpush1.bf16.msra.mxu1 %v16029_v22  ;;  %4266 = vmatprep.subr.bf16.mxu0 %v16034_v34  ;;  %v16103_v22 = vld [vmem:[#allocation13 + $0x94c] ss:$16 sps:$4 sm:$0xff]   ;;  %v16098_v34 = vld [vmem:[#allocation13 + $0x940] ss:$16 sps:$4 sm:$0xff]  }
 0x732   :  { %4372 = vmatprep.subr.bf16.mxu1 %v16037_v16  ;;  %v16101_v16 = vld [vmem:[#allocation13 + $0x948] ss:$16 sps:$4 sm:$0xff]  }
 0x734   :  { %4267 = vmatpush1.bf16.msra.mxu0 %v16032_v29  ;;  %v16106_v29 = vld [vmem:[#allocation13 + $0x964] ss:$16 sps:$4 sm:$0xff]  }
 0x735   :  { %4373 = vmatpush1.bf16.msra.mxu1 %v16035_v7  ;;  %5236 = vmatprep.subr.bf16.mxu0 %v16040_v31  ;;  %v16109_v7 = vld [vmem:[#allocation13 + $0x96c] ss:$16 sps:$4 sm:$0xff]   ;;  %v16104_v31 = vld [vmem:[#allocation13 + $0x960] ss:$16 sps:$4 sm:$0xff]  }
 0x736   :  { %5342 = vmatprep.subr.bf16.mxu1 %v16043_v21  ;;  %v16107_v21 = vld [vmem:[#allocation13 + $0x968] ss:$16 sps:$4 sm:$0xff]  }
 0x737   :  { %4269 = vmatmul.mubr.bf16.vlgmr.msra.gmra.mrb[16].mxu0 %v18586_v30 }
 0x738   :  { %4375 = vmatmul.mubr.bf16.vlgmr.msra.gmra.mrb[20].mxu1 %v18586_v30  ;;  %4278 = vmatprep.mubr.bf16.mxu0 %v18590_v46  ;;  %v16050_v30 = vld [vmem:[#allocation13 + $0x840] ss:$16 sps:$4 sm:$0xff]  }
 0x739   :  { %4384 = vmatprep.mubr.bf16.mxu1 %v18590_v46  ;;  %5237 = vmatpush1.bf16.msra.mxu0 %v16038_v14  ;;  %v16053_v46 = vld [vmem:[#allocation13 + $0x848] ss:$16 sps:$4 sm:$0xff]   ;;  %v16115_v14 = vld [vmem:[#allocation13 + $0x98c] ss:$16 sps:$4 sm:$0xff]  }
 0x73a   :  { %5343 = vmatpush1.bf16.msra.mxu1 %v16041_v42  ;;  %5238 = vmatprep.subr.bf16.mxu0 %v16046_v54  ;;  %v16113_v42 = vld [vmem:[#allocation13 + $0x988] ss:$16 sps:$4 sm:$0xff]   ;;  %v16118_v54 = vld [vmem:[#allocation13 + $0x9a4] ss:$16 sps:$4 sm:$0xff]  }
 0x73b   :  { %5344 = vmatprep.subr.bf16.mxu1 %v16049_v62  ;;  %v16121_v62 = vld [vmem:[#allocation13 + $0x9ac] ss:$16 sps:$4 sm:$0xff]  }
 0x73d   :  { %5239 = vmatpush1.bf16.msra.mxu0 %v16044_v2  ;;  %v16124_v2 = vld [vmem:[#allocation13 + $0x9c4] ss:$16 sps:$4 sm:$0xff]  }
 0x73e   :  { %5345 = vmatpush1.bf16.msra.mxu1 %v16047_v53  ;;  %5240 = vmatprep.subr.bf16.mxu0 %v16052_v18  ;;  %v16122_v53 = vld [vmem:[#allocation13 + $0x9c0] ss:$16 sps:$4 sm:$0xff]  }
 0x73f   :  { %4279 = vmatmul.mubr.bf16.gmra.mrb[20].mxu0 %v18594_v44  ;;  %5346 = vmatprep.subr.bf16.mxu1 %v16055_v17  ;;  %v4397_v18 = vld [vmem:[#allocation3 + $0x30] sm:$0xee]  ;;  %v16125_v17 = vld [vmem:[#allocation13 + $0x9c8] ss:$16 sps:$4 sm:$0xff]  }
 0x740   :  { %4385 = vmatmul.mubr.bf16.gmra.mrb[24].mxu1 %v18594_v44  ;;  %5268 = vmatprep.mubr.bf16.mxu0 %v13276_v0  ;;  %v16068_v44 = vld [vmem:[#allocation13 + $0x8a0] ss:$16 sps:$4 sm:$0xff]  }
 0x741   :  { %5241 = vmatpush1.bf16.msra.mxu0 %v16050_v30  ;;  %5374 = vmatprep.mubr.bf16.mxu1 %v13276_v0  ;;  %v16130_v30 = vld [vmem:[#allocation13 + $0x9e4] ss:$16 sps:$4 sm:$0xff]   ;;  %v16133_v0 = vld [vmem:[#allocation13 + $0x9ec] ss:$16 sps:$4 sm:$0xff]  }
 0x742   :  { %5347 = vmatpush1.bf16.msra.mxu1 %v16053_v46  ;;  %5242 = vmatprep.subr.bf16.mxu0 %v16058_v55  ;;  %v4423_v46 = vrot.slane %v18503_v56, 5  ;;  %v13273_v55 = vrot.slane %v4397_v18, 9  ;;  %v16179_v18 = vld [vmem:[#allocation13 + $0xae8] ss:$16 sps:$4 sm:$0xff]  }
 0x743   :  { %5348 = vmatprep.subr.bf16.mxu1 %v16061_v57  ;;  %v16914_v57 = vld [vmem:[#allocation3 + $0x50] sm:$0x11] }
 0x745   :  { %5243 = vmatpush1.bf16.msra.mxu0 %v16056_v38  ;;  %v4430_v38 = vrot.slane %v16914_v57, 5  ;;  %v16193_v57 = vld [vmem:[#allocation13 + $0xb2c] ss:$16 sps:$4 sm:$0xff]  }
 0x746   :  { %5349 = vmatpush1.bf16.msra.mxu1 %v16059_v40  ;;  %5244 = vmatprep.subr.bf16.mxu0 %v16064_v48  ;;  %v16128_v40 = vld [vmem:[#allocation13 + $0x9e0] ss:$16 sps:$4 sm:$0xff]   ;;  %v16131_v48 = vld [vmem:[#allocation13 + $0x9e8] ss:$16 sps:$4 sm:$0xff]  }
 0x747   :  { %5350 = vmatprep.subr.bf16.mxu1 %v16067_v59  ;;  %v16136_v59 = vld [vmem:[#allocation13 + $0xa04] ss:$16 sps:$4 sm:$0xff]  }
 0x749   :  { %5245 = vmatpush1.bf16.msra.mxu0 %v16062_v3  ;;  %v4429_v3 = vrot.slane %v4423_v46, 4 }
 0x74a   :  { %5351 = vmatpush1.bf16.msra.mxu1 %v16065_v63  ;;  %5246 = vmatprep.subr.bf16.mxu0 %v16070_v20  ;;  %v16139_v63 = vld [vmem:[#allocation13 + $0xa0c] ss:$16 sps:$4 sm:$0xff]   ;;  %v4424_v20 = vsel %vm17894_vm15, %v13273_v55, %v4423_v46  ;;  %v16182_v46 = vld [vmem:[#allocation13 + $0xb00] ss:$16 sps:$4 sm:$0xff]   ;;  %v16190_v55 = vld [vmem:[#allocation13 + $0xb24] ss:$16 sps:$4 sm:$0xff]  }
 0x74b   :  { %5352 = vmatprep.subr.bf16.mxu1 %v16073_v33  ;;  %v4431_v56 = vsel %vm17894_vm15, %v4429_v3, %v4430_v38  ;;  %v4396_v33 = vld [vmem:[#allocation3 + $0x8] sm:$0xee]  ;;  %v16188_v38 = vld [vmem:[#allocation13 + $0xb20] ss:$16 sps:$4 sm:$0xff]  }
 0x74c   :  { %v16194_v3 = vld [vmem:[#allocation13 + $0xb40] ss:$16 sps:$4 sm:$0xff]  }
 0x74d   :  { %5247 = vmatpush1.bf16.msra.mxu0 %v16068_v44  ;;  %v13275_v44 = vcombine.low %v18628_v15, %v18632_v60  ;;  %v16143_v60 = vld [vmem:[#allocation13 + $0xa28] ss:$16 sps:$4 sm:$0xff]  }
 0x74e   :  { %5353 = vmatpush1.bf16.msra.mxu1 %v16071_v51  ;;  %5248 = vmatprep.subr.bf16.mxu0 %v16076_v47  ;;  %v16134_v51 = vld [vmem:[#allocation13 + $0xa00] ss:$16 sps:$4 sm:$0xff]   ;;  %v4413_v47 = vrot.slane %v18525_v24, 5  ;;  %v16151_v24 = vld [vmem:[#allocation13 + $0xa4c] ss:$16 sps:$4 sm:$0xff]  }
 0x74f   :  { %5354 = vmatprep.subr.bf16.mxu1 %v16079_v10  ;;  %v16137_v10 = vld [vmem:[#allocation13 + $0xa08] ss:$16 sps:$4 sm:$0xff]  }
 0x750   :  { %v4418_v15 = vrot.slane %v4413_v47, 4 }
 0x751   :  { %5249 = vmatpush1.bf16.msra.mxu0 %v16074_v11  ;;  %v13280_v11 = vcombine.high %v4424_v20, %v4431_v56 }
 0x752   :  { %5355 = vmatpush1.bf16.msra.mxu1 %v16077_v52  ;;  %5250 = vmatprep.subr.bf16.mxu0 %v16082_v45  ;;  %v16142_v52 = vld [vmem:[#allocation13 + $0xa24] ss:$16 sps:$4 sm:$0xff]   ;;  %v16145_v45 = vld [vmem:[#allocation13 + $0xa2c] ss:$16 sps:$4 sm:$0xff]  }
 0x753   :  { %5356 = vmatprep.subr.bf16.mxu1 %v16085_v5  ;;  %v13272_v5 = vrot.slane %v4396_v33, 9  ;;  %v16200_v33 = vld [vmem:[#allocation13 + $0xb60] ss:$16 sps:$4 sm:$0xff]  }
 0x755   :  { %5251 = vmatpush1.bf16.msra.mxu0 %v16080_v1  ;;  %v16915_v1 = vld [vmem:[#allocation3 + $0x28] sm:$0x11] }
 0x756   :  { %5357 = vmatpush1.bf16.msra.mxu1 %v16083_v8  ;;  %5252 = vmatprep.subr.bf16.mxu0 %v16088_v12  ;;  %v4419_v8 = vrot.slane %v16915_v1, 5  ;;  %v16140_v12 = vld [vmem:[#allocation13 + $0xa20] ss:$16 sps:$4 sm:$0xff]   ;;  %v16215_v1 = vld [vmem:[#allocation13 + $0xba8] ss:$16 sps:$4 sm:$0xff]  }
 0x757   :  { %5358 = vmatprep.subr.bf16.mxu1 %v16091_v58  ;;  %v16148_v58 = vld [vmem:[#allocation13 + $0xa44] ss:$16 sps:$4 sm:$0xff]  }
 0x759   :  { %5253 = vmatpush1.bf16.msra.mxu0 %v16086_v13  ;;  %v18648_v13 = vsel %vm17894_vm15, %v13272_v5, %v4413_v47  ;;  %v16211_v47 = vld [vmem:[#allocation13 + $0xb8c] ss:$16 sps:$4 sm:$0xff]   ;;  %v16212_v5 = vld [vmem:[#allocation13 + $0xba0] ss:$16 sps:$4 sm:$0xff]  }
 0x75a   :  { %5359 = vmatpush1.bf16.msra.mxu1 %v16089_v9  ;;  %5254 = vmatprep.subr.bf16.mxu0 %v16094_v19  ;;  %v18652_v9 = vsel %vm17894_vm15, %v4418_v15, %v4419_v8  ;;  %v13279_v19 = vcombine.low %v4424_v20, %v4431_v56  ;;  %v16202_v20 = vld [vmem:[#allocation13 + $0xb64] ss:$16 sps:$4 sm:$0xff]   ;;  %v16205_v56 = vld [vmem:[#allocation13 + $0xb6c] ss:$16 sps:$4 sm:$0xff]   ;;  %v16218_v15 = vld [vmem:[#allocation13 + $0xbc0] ss:$16 sps:$4 sm:$0xff]  }
 0x75b   :  { %5360 = vmatprep.subr.bf16.mxu1 %v16097_v36  ;;  %v16146_v36 = vld [vmem:[#allocation13 + $0xa40] ss:$16 sps:$4 sm:$0xff]   ;;  %v16220_v8 = vld [vmem:[#allocation13 + $0xbc4] ss:$16 sps:$4 sm:$0xff]  }
 0x75d   :  { %5255 = vmatpush1.bf16.msra.mxu0 %v16092_v37  ;;  %v16149_v37 = vld [vmem:[#allocation13 + $0xa48] ss:$16 sps:$4 sm:$0xff]  }
 0x75e   :  { %5361 = vmatpush1.bf16.msra.mxu1 %v16095_v41  ;;  %5256 = vmatprep.subr.bf16.mxu0 %v16100_v43  ;;  %v13278_v41 = vcombine.high %v18648_v13, %v18652_v9  ;;  %v16154_v43 = vld [vmem:[#allocation13 + $0xa64] ss:$16 sps:$4 sm:$0xff]  }
 0x75f   :  { %5362 = vmatprep.subr.bf16.mxu1 %v16103_v22  ;;  %v16157_v22 = vld [vmem:[#allocation13 + $0xa6c] ss:$16 sps:$4 sm:$0xff]  }
 0x761   :  { %5257 = vmatpush1.bf16.msra.mxu0 %v16098_v34  ;;  %v16152_v34 = vld [vmem:[#allocation13 + $0xa60] ss:$16 sps:$4 sm:$0xff]  }
 0x762   :  { %5363 = vmatpush1.bf16.msra.mxu1 %v16101_v16  ;;  %5258 = vmatprep.subr.bf16.mxu0 %v16106_v29  ;;  %v16155_v16 = vld [vmem:[#allocation13 + $0xa68] ss:$16 sps:$4 sm:$0xff]   ;;  %v16160_v29 = vld [vmem:[#allocation13 + $0xa84] ss:$16 sps:$4 sm:$0xff]  }
 0x763   :  { %5364 = vmatprep.subr.bf16.mxu1 %v16109_v7  ;;  %v16163_v7 = vld [vmem:[#allocation13 + $0xa8c] ss:$16 sps:$4 sm:$0xff]  }
 0x765   :  { %5259 = vmatpush1.bf16.msra.mxu0 %v16104_v31  ;;  %v16158_v31 = vld [vmem:[#allocation13 + $0xa80] ss:$16 sps:$4 sm:$0xff]  }
 0x766   :  { %5365 = vmatpush1.bf16.msra.mxu1 %v16107_v21  ;;  %5260 = vmatprep.subr.bf16.mxu0 %v16112_v27  ;;  %v16161_v21 = vld [vmem:[#allocation13 + $0xa88] ss:$16 sps:$4 sm:$0xff]   ;;  %v16166_v27 = vld [vmem:[#allocation13 + $0xaa4] ss:$16 sps:$4 sm:$0xff]  }
 0x767   :  { %5366 = vmatprep.subr.bf16.mxu1 %v16115_v14  ;;  %v16169_v14 = vld [vmem:[#allocation13 + $0xaac] ss:$16 sps:$4 sm:$0xff]  }
 0x769   :  { %5261 = vmatpush1.bf16.msra.mxu0 %v16110_v32  ;;  %v16164_v32 = vld [vmem:[#allocation13 + $0xaa0] ss:$16 sps:$4 sm:$0xff]  }
 0x76a   :  { %5367 = vmatpush1.bf16.msra.mxu1 %v16113_v42  ;;  %5262 = vmatprep.subr.bf16.mxu0 %v16118_v54  ;;  %v16167_v42 = vld [vmem:[#allocation13 + $0xaa8] ss:$16 sps:$4 sm:$0xff]   ;;  %v16172_v54 = vld [vmem:[#allocation13 + $0xac4] ss:$16 sps:$4 sm:$0xff]  }
 0x76b   :  { %5368 = vmatprep.subr.bf16.mxu1 %v16121_v62  ;;  %v16175_v62 = vld [vmem:[#allocation13 + $0xacc] ss:$16 sps:$4 sm:$0xff]  }
 0x76d   :  { %5263 = vmatpush1.bf16.msra.mxu0 %v16116_v50  ;;  %v16170_v50 = vld [vmem:[#allocation13 + $0xac0] ss:$16 sps:$4 sm:$0xff]  }
 0x76e   :  { %5369 = vmatpush1.bf16.msra.mxu1 %v16119_v4  ;;  %5264 = vmatprep.subr.bf16.mxu0 %v16124_v2  ;;  %v16173_v4 = vld [vmem:[#allocation13 + $0xac8] ss:$16 sps:$4 sm:$0xff]   ;;  %v16178_v2 = vld [vmem:[#allocation13 + $0xae4] ss:$16 sps:$4 sm:$0xff]  }
 0x76f   :  { %5370 = vmatprep.subr.bf16.mxu1 %v16127_v25  ;;  %v16181_v25 = vld [vmem:[#allocation13 + $0xaec] ss:$16 sps:$4 sm:$0xff]  }
 0x771   :  { %5265 = vmatpush1.bf16.msra.mxu0 %v16122_v53  ;;  %v16176_v53 = vld [vmem:[#allocation13 + $0xae0] ss:$16 sps:$4 sm:$0xff]  }
 0x772   :  { %5371 = vmatpush1.bf16.msra.mxu1 %v16125_v17  ;;  %5266 = vmatprep.subr.bf16.mxu0 %v16130_v30  ;;  %v16184_v17 = vld [vmem:[#allocation13 + $0xb04] ss:$16 sps:$4 sm:$0xff]   ;;  %v16187_v30 = vld [vmem:[#allocation13 + $0xb0c] ss:$16 sps:$4 sm:$0xff]  }
 0x773   :  { %5372 = vmatprep.subr.bf16.mxu1 %v16133_v0  ;;  %v16185_v0 = vld [vmem:[#allocation13 + $0xb08] ss:$16 sps:$4 sm:$0xff]  }
 0x775   :  { %5267 = vmatpush1.bf16.msra.mxu0 %v16128_v40  ;;  %v16191_v40 = vld [vmem:[#allocation13 + $0xb28] ss:$16 sps:$4 sm:$0xff]  }
 0x776   :  { %5373 = vmatpush1.bf16.msra.mxu1 %v16131_v48  ;;  %5289 = vmatprep.subr.bf16.mxu0 %v16136_v59  ;;  %v16196_v48 = vld [vmem:[#allocation13 + $0xb44] ss:$16 sps:$4 sm:$0xff]   ;;  %v16199_v59 = vld [vmem:[#allocation13 + $0xb4c] ss:$16 sps:$4 sm:$0xff]  }
 0x777   :  { %5395 = vmatprep.subr.bf16.mxu1 %v16139_v63  ;;  %v16197_v63 = vld [vmem:[#allocation13 + $0xb48] ss:$16 sps:$4 sm:$0xff]  }
 0x778   :  { %5269 = vmatmul.mubr.bf16.vlgmr.msra.gmra.mrb[16].mxu0 %v13275_v44 }
 0x779   :  { %5375 = vmatmul.mubr.bf16.vlgmr.msra.gmra.mrb[20].mxu1 %v13275_v44  ;;  %5278 = vmatprep.mubr.bf16.mxu0 %v13280_v11  ;;  %v16203_v44 = vld [vmem:[#allocation13 + $0xb68] ss:$16 sps:$4 sm:$0xff]  }
 0x77a   :  { %5290 = vmatpush1.bf16.msra.mxu0 %v16134_v51  ;;  %5384 = vmatprep.mubr.bf16.mxu1 %v13280_v11  ;;  %v16208_v51 = vld [vmem:[#allocation13 + $0xb84] ss:$16 sps:$4 sm:$0xff]   ;;  %v16209_v11 = vld [vmem:[#allocation13 + $0xb88] ss:$16 sps:$4 sm:$0xff]  }
 0x77b   :  { %5396 = vmatpush1.bf16.msra.mxu1 %v16137_v10  ;;  %5291 = vmatprep.subr.bf16.mxu0 %v16142_v52  ;;  %v16206_v10 = vld [vmem:[#allocation13 + $0xb80] ss:$16 sps:$4 sm:$0xff]   ;;  %v16214_v52 = vld [vmem:[#allocation13 + $0xba4] ss:$16 sps:$4 sm:$0xff]  }
 0x77c   :  { %5397 = vmatprep.subr.bf16.mxu1 %v16145_v45  ;;  %v16217_v45 = vld [vmem:[#allocation13 + $0xbac] ss:$16 sps:$4 sm:$0xff]  }
 0x77e   :  { %5292 = vmatpush1.bf16.msra.mxu0 %v16140_v12  ;;  %v16223_v12 = vld [vmem:[#allocation13 + $0xbcc] ss:$16 sps:$4 sm:$0xff]  }
 0x77f   :  { %5398 = vmatpush1.bf16.msra.mxu1 %v16143_v60  ;;  %5293 = vmatprep.subr.bf16.mxu0 %v16148_v58  ;;  %v4398_v60 = vld [vmem:[#allocation3 + $0x38] sm:$0xee] }
 0x780   :  { %5279 = vmatmul.mubr.bf16.gmra.mrb[20].mxu0 %v13279_v19  ;;  %5399 = vmatprep.subr.bf16.mxu1 %v16151_v24  ;;  %v16221_v58 = vld [vmem:[#allocation13 + $0xbc8] ss:$16 sps:$4 sm:$0xff]   ;;  %v16226_v24 = vld [vmem:[#allocation13 + $0xbe4] ss:$16 sps:$4 sm:$0xff]  }
 0x781   :  { %5385 = vmatmul.mubr.bf16.gmra.mrb[24].mxu1 %v13279_v19  ;;  %5321 = vmatprep.mubr.bf16.mxu0 %v13278_v41  ;;  %v4427_v19 = vrot.slane %v18542_v28, 5  ;;  %v5549_v28 = vld [vmem:[%s20371_s7 + $0x188] sm:$0xff] }
 0x782   :  { %5294 = vmatpush1.bf16.msra.mxu0 %v16146_v36  ;;  %5427 = vmatprep.mubr.bf16.mxu1 %v13278_v41  ;;  %v16229_v36 = vld [vmem:[#allocation13 + $0xbec] ss:$16 sps:$4 sm:$0xff]  }
 0x783   :  { %5400 = vmatpush1.bf16.msra.mxu1 %v16149_v37  ;;  %5295 = vmatprep.subr.bf16.mxu0 %v16154_v43  ;;  %v5516_v37 = vld [vmem:[%s20371_s7 + $0x80] sm:$0xff]  ;;  %v5517_v41 = vld [vmem:[%s20371_s7 + $0x88] sm:$0xff]  ;;  %v13274_v43 = vrot.slane %v4398_v60, 9 }
 0x784   :  { %5401 = vmatprep.subr.bf16.mxu1 %v16157_v22  ;;  %v16916_v22 = vld [vmem:[#allocation3 + $0x58] sm:$0x11] }
 0x786   :  { %5296 = vmatpush1.bf16.msra.mxu0 %v16152_v34  ;;  %v4433_v34 = vrot.slane %v16916_v22, 5  ;;  %v5525_v22 = vld [vmem:[%s20371_s7 + $0xc8] sm:$0xff] }
 0x787   :  { %5402 = vmatpush1.bf16.msra.mxu1 %v16155_v16  ;;  %5297 = vmatprep.subr.bf16.mxu0 %v16160_v29  ;;  %v5548_v16 = vld [vmem:[%s20371_s7 + $0x180] sm:$0xff]  ;;  %v16224_v29 = vld [vmem:[#allocation13 + $0xbe0] ss:$16 sps:$4 sm:$0xff]  }
 0x788   :  { %5403 = vmatprep.subr.bf16.mxu1 %v16163_v7  ;;  %v16227_v7 = vld [vmem:[#allocation13 + $0xbe8] ss:$16 sps:$4 sm:$0xff]  }
 0x78a   :  { %5298 = vmatpush1.bf16.msra.mxu0 %v16158_v31  ;;  %v4432_v31 = vrot.slane %v4427_v19, 4 }
 0x78b   :  { %5404 = vmatpush1.bf16.msra.mxu1 %v16161_v21  ;;  %5299 = vmatprep.subr.bf16.mxu0 %v16166_v27  ;;  %v18669_v21 = vpack.c.bf16 %v5517_v41, %v5516_v37  ;;  %v18671_v27 = vpack.c.bf16 %v5549_v28, %v5548_v16  ;;  %v5539_v37 = vld [vmem:[%s20371_s7 + $0x138] sm:$0xff]  ;;  %v5557_v28 = vld [vmem:[%s20371_s7 + $0x1c8] sm:$0xff] }
 0x78c   :  { %5405 = vmatprep.subr.bf16.mxu1 %v16169_v14  ;;  %v5500_v14 = vld [vmem:[%s20371_s7] sm:$0xff] }
 0x78e   :  { %5300 = vmatpush1.bf16.msra.mxu0 %v16164_v32  ;;  %v5501_v32 = vld [vmem:[%s20371_s7 + $0x8] sm:$0xff] }
 0x78f   :  { %5406 = vmatpush1.bf16.msra.mxu1 %v16167_v42  ;;  %5301 = vmatprep.subr.bf16.mxu0 %v16172_v54  ;;  %v5532_v42 = vld [vmem:[%s20371_s7 + $0x100] sm:$0xff]  ;;  %v4428_v54 = vsel %vm17894_vm15, %v13274_v43, %v4427_v19  ;;  %v5538_v19 = vld [vmem:[%s20371_s7 + $0x130] sm:$0xff] }
 0x790   :  { %5407 = vmatprep.subr.bf16.mxu1 %v16175_v62  ;;  %v4434_v62 = vsel %vm17894_vm15, %v4432_v31, %v4433_v34  ;;  %v18803_v41 = vpack.c.bf16 %v5539_v37, %v5538_v19  ;;  %v5524_v43 = vld [vmem:[%s20371_s7 + $0xc0] sm:$0xff]  ;;  %v5563_v37 = vld [vmem:[%s20371_s7 + $0x1f8] sm:$0xff] }
 0x791   :  { %v5556_v34 = vld [vmem:[%s20371_s7 + $0x1c0] sm:$0xff]  ;;  %v18816_v16 = vpack.c.bf16 %v5525_v22, %v5524_v43  ;;  %v5514_v43 = vld [vmem:[%s20371_s7 + $0x70] sm:$0xff]  ;;  %v5515_v22 = vld [vmem:[%s20371_s7 + $0x78] sm:$0xff] }
 0x792   :  { %5302 = vmatpush1.bf16.msra.mxu0 %v16170_v50  ;;  %v5533_v50 = vld [vmem:[%s20371_s7 + $0x108] sm:$0xff]  ;;  %v18827_v31 = vpack.c.bf16 %v5557_v28, %v5556_v34  ;;  %v5546_v28 = vld [vmem:[%s20371_s7 + $0x170] sm:$0xff] }
 0x793   :  { %5408 = vmatpush1.bf16.msra.mxu1 %v16173_v4  ;;  %5303 = vmatprep.subr.bf16.mxu0 %v16178_v2  ;;  %v5518_v4 = vld [vmem:[%s20371_s7 + $0x90] sm:$0xff]  ;;  %v5519_v2 = vld [vmem:[%s20371_s7 + $0x98] sm:$0xff] }
 0x794   :  { %5409 = vmatprep.subr.bf16.mxu1 %v16181_v25  ;;  %v5550_v25 = vld [vmem:[%s20371_s7 + $0x190] sm:$0xff] }
 0x796   :  { %5304 = vmatpush1.bf16.msra.mxu0 %v16176_v53  ;;  %v5551_v53 = vld [vmem:[%s20371_s7 + $0x198] sm:$0xff] }
 0x797   :  { %5410 = vmatpush1.bf16.msra.mxu1 %v16179_v18  ;;  %5305 = vmatprep.subr.bf16.mxu0 %v16184_v17  ;;  %v13277_v18 = vcombine.low %v18648_v13, %v18652_v9  ;;  %v18704_v17 = vpack.c.bf16 %v5501_v32, %v5500_v14  ;;  %v13281_v13 = vcombine.low %v4428_v54, %v4434_v62  ;;  %v5502_v9 = vld [vmem:[%s20371_s7 + $0x10] sm:$0xff]  ;;  %v5540_v32 = vld [vmem:[%s20371_s7 + $0x140] sm:$0xff] }
 0x798   :  { %5411 = vmatprep.subr.bf16.mxu1 %v16187_v30  ;;  %v13282_v30 = vcombine.high %v4428_v54, %v4434_v62  ;;  %v5526_v54 = vld [vmem:[%s20371_s7 + $0xd0] sm:$0xff] }
 0x79a   :  { %5306 = vmatpush1.bf16.msra.mxu0 %v16182_v46  ;;  %v18707_v46 = vpack.c.bf16 %v5533_v50, %v5532_v42  ;;  %v5541_v42 = vld [vmem:[%s20371_s7 + $0x148] sm:$0xff]  ;;  %v5527_v50 = vld [vmem:[%s20371_s7 + $0xd8] sm:$0xff] }
 0x79b   :  { %5412 = vmatpush1.bf16.msra.mxu1 %v16185_v0  ;;  %5307 = vmatprep.subr.bf16.mxu0 %v16190_v55  ;;  %v18709_v0 = vpack.c.bf16 %v5519_v2, %v5518_v4  ;;  %v18711_v55 = vpack.c.bf16 %v5551_v53, %v5550_v25  ;;  %v18841_v62 = vpack.c.bf16 %v5541_v42, %v5540_v32  ;;  %v5558_v4 = vld [vmem:[%s20371_s7 + $0x1d0] sm:$0xff]  ;;  %v5559_v2 = vld [vmem:[%s20371_s7 + $0x1d8] sm:$0xff] }
 0x79c   :  { %5413 = vmatprep.subr.bf16.mxu1 %v16193_v57  ;;  %v5503_v57 = vld [vmem:[%s20371_s7 + $0x18] sm:$0xff]  ;;  %v18854_v25 = vpack.c.bf16 %v5527_v50, %v5526_v54  ;;  %v18856_v53 = vpack.c.bf16 %v5559_v2, %v5558_v4 }
 0x79e   :  { %5308 = vmatpush1.bf16.msra.mxu0 %v16188_v38  ;;  %v5534_v38 = vld [vmem:[%s20371_s7 + $0x110] sm:$0xff] }
 0x79f   :  { %5414 = vmatpush1.bf16.msra.mxu1 %v16191_v40  ;;  %5309 = vmatprep.subr.bf16.mxu0 %v16196_v48  ;;  %v18726_v40 = vpack.c.bf16 %v5503_v57, %v5502_v9  ;;  %v5535_v48 = vld [vmem:[%s20371_s7 + $0x118] sm:$0xff] }
 0x7a0   :  { %5415 = vmatprep.subr.bf16.mxu1 %v16199_v59  ;;  %v18731_v59 = vpack.c.bf16 %v5535_v48, %v5534_v38  ;;  %v5543_v57 = vld [vmem:[%s20371_s7 + $0x158] sm:$0xff]  ;;  %v5528_v38 = vld [vmem:[%s20371_s7 + $0xe0] sm:$0xff]  ;;  %v5529_v48 = vld [vmem:[%s20371_s7 + $0xe8] sm:$0xff] }
 0x7a2   :  { %5310 = vmatpush1.bf16.msra.mxu0 %v16194_v3  ;;  %v5520_v3 = vld [vmem:[%s20371_s7 + $0xa0] sm:$0xff] }
 0x7a3   :  { %5416 = vmatpush1.bf16.msra.mxu1 %v16197_v63  ;;  %5311 = vmatprep.subr.bf16.mxu0 %v16202_v20  ;;  %v5521_v63 = vld [vmem:[%s20371_s7 + $0xa8] sm:$0xff]  ;;  %v5552_v20 = vld [vmem:[%s20371_s7 + $0x1a0] sm:$0xff] }
 0x7a4   :  { %5417 = vmatprep.subr.bf16.mxu1 %v16205_v56  ;;  %v18744_v56 = vpack.c.bf16 %v5521_v63, %v5520_v3  ;;  %v18883_v63 = vpack.c.bf16 %v5529_v48, %v5528_v38 }
 0x7a6   :  { %5312 = vmatpush1.bf16.msra.mxu0 %v16200_v33  ;;  %v5553_v33 = vld [vmem:[%s20371_s7 + $0x1a8] sm:$0xff] }
 0x7a7   :  { %5418 = vmatpush1.bf16.msra.mxu1 %v16203_v44  ;;  %5313 = vmatprep.subr.bf16.mxu0 %v16208_v51  ;;  %v5504_v44 = vld [vmem:[%s20371_s7 + $0x20] sm:$0xff]  ;;  %v5505_v51 = vld [vmem:[%s20371_s7 + $0x28] sm:$0xff] }
 0x7a8   :  { %5419 = vmatprep.subr.bf16.mxu1 %v16211_v47  ;;  %v18755_v47 = vpack.c.bf16 %v5553_v33, %v5552_v20  ;;  %v5560_v20 = vld [vmem:[%s20371_s7 + $0x1e0] sm:$0xff]  ;;  %v5561_v33 = vld [vmem:[%s20371_s7 + $0x1e8] sm:$0xff] }
 0x7aa   :  { %5314 = vmatpush1.bf16.msra.mxu0 %v16206_v10  ;;  %v18757_v10 = vpack.c.bf16 %v5505_v51, %v5504_v44  ;;  %v5512_v44 = vld [vmem:[%s20371_s7 + $0x60] sm:$0xff]  ;;  %v18894_v51 = vpack.c.bf16 %v5561_v33, %v5560_v20 }
 0x7ab   :  { %5420 = vmatpush1.bf16.msra.mxu1 %v16209_v11  ;;  %5315 = vmatprep.subr.bf16.mxu0 %v16214_v52  ;;  %v5536_v11 = vld [vmem:[%s20371_s7 + $0x120] sm:$0xff]  ;;  %v5537_v52 = vld [vmem:[%s20371_s7 + $0x128] sm:$0xff] }
 0x7ac   :  { %5421 = vmatprep.subr.bf16.mxu1 %v16217_v45  ;;  %v5522_v45 = vld [vmem:[%s20371_s7 + $0xb0] sm:$0xff] }
 0x7ae   :  { %5316 = vmatpush1.bf16.msra.mxu0 %v16212_v5  ;;  %v18769_v5 = vpack.c.bf16 %v5537_v52, %v5536_v11  ;;  %v5513_v11 = vld [vmem:[%s20371_s7 + $0x68] sm:$0xff]  ;;  %v5544_v52 = vld [vmem:[%s20371_s7 + $0x160] sm:$0xff] }
 0x7af   :  { %5422 = vmatpush1.bf16.msra.mxu1 %v16215_v1  ;;  %5317 = vmatprep.subr.bf16.mxu0 %v16220_v8  ;;  %v5523_v1 = vld [vmem:[%s20371_s7 + $0xb8] sm:$0xff]  ;;  %v5554_v8 = vld [vmem:[%s20371_s7 + $0x1b0] sm:$0xff] }
 0x7b0   :  { %5423 = vmatprep.subr.bf16.mxu1 %v16223_v12  ;;  %v5555_v12 = vld [vmem:[%s20371_s7 + $0x1b8] sm:$0xff] }
 0x7b1   :  { %v18784_v60 = vpack.c.bf16 %v5555_v12, %v5554_v8  ;;  %v5530_v8 = vld [vmem:[%s20371_s7 + $0xf0] sm:$0xff]  ;;  %v5531_v12 = vld [vmem:[%s20371_s7 + $0xf8] sm:$0xff] }
 0x7b2   :  { %5318 = vmatpush1.bf16.msra.mxu0 %v16218_v15  ;;  %v18782_v15 = vpack.c.bf16 %v5523_v1, %v5522_v45  ;;  %v5545_v45 = vld [vmem:[%s20371_s7 + $0x168] sm:$0xff]  ;;  %v18906_v1 = vpack.c.bf16 %v5513_v11, %v5512_v44  ;;  %v18921_v19 = vpack.c.bf16 %v5531_v12, %v5530_v8 }
 0x7b3   :  { %5424 = vmatpush1.bf16.msra.mxu1 %v16221_v58  ;;  %5319 = vmatprep.subr.bf16.mxu0 %v16226_v24  ;;  %v5506_v58 = vld [vmem:[%s20371_s7 + $0x30] sm:$0xff]  ;;  %v5507_v24 = vld [vmem:[%s20371_s7 + $0x38] sm:$0xff] }
 0x7b4   :  { %5425 = vmatprep.subr.bf16.mxu1 %v16229_v36  ;;  %v18798_v36 = vpack.c.bf16 %v5507_v24, %v5506_v58  ;;  %v5562_v58 = vld [vmem:[%s20371_s7 + $0x1f0] sm:$0xff]  ;;  %v18919_v24 = vpack.c.bf16 %v5545_v45, %v5544_v52 }
 0x7b5   :  { %v18933_v34 = vpack.c.bf16 %v5563_v37, %v5562_v58 }
 0x7b6   :  { %5320 = vmatpush1.bf16.msra.mxu0 %v16224_v29  ;;  %v5508_v29 = vld [vmem:[%s20371_s7 + $0x40] sm:$0xff] }
 0x7b7   :  { %5426 = vmatpush1.bf16.msra.mxu1 %v16227_v7  ;;  %14954 = vmatprep.subr.bf16.mxu0 %v18669_v21  ;;  %v5509_v7 = vld [vmem:[%s20371_s7 + $0x48] sm:$0xff] }
 0x7b8   :  { %14986 = vmatprep.subr.bf16.mxu1 %v18671_v27  ;;  %v18829_v14 = vpack.c.bf16 %v5509_v7, %v5508_v29  ;;  %v5547_v29 = vld [vmem:[%s20371_s7 + $0x178] sm:$0xff]  ;;  %v18942_v7 = vpack.c.bf16 %v5515_v22, %v5514_v43 }
 0x7b9   :  { %5322 = vmatmul.mubr.bf16.vlgmr.msra.gmra.mrb[16].mxu0 %v13277_v18  ;;  %v18946_v32 = vpack.c.bf16 %v5547_v29, %v5546_v28 }
 0x7ba   :  { %5428 = vmatmul.mubr.bf16.vlgmr.msra.gmra.mrb[20].mxu1 %v13277_v18  ;;  %5331 = vmatprep.mubr.bf16.mxu0 %v13282_v30  ;;  %v5510_v18 = vld [vmem:[%s20371_s7 + $0x50] sm:$0xff] }
 0x7bb   :  { %5437 = vmatprep.mubr.bf16.mxu1 %v13282_v30  ;;  %14956 = vmatpush3.bf16.msra.mxu0 %v18704_v17  ;;  %v5511_v30 = vld [vmem:[%s20371_s7 + $0x58] sm:$0xff] }
 0x7bc   :  { %14988 = vmatpush3.bf16.msra.mxu1 %v18707_v46  ;;  %14958 = vmatprep.subr.bf16.mxu0 %v18709_v0  ;;  %v18868_v9 = vpack.c.bf16 %v5511_v30, %v5510_v18 }
 0x7bd   :  { %14990 = vmatprep.subr.bf16.mxu1 %v18711_v55 }
 0x7bf   :  { %14960 = vmatpush3.bf16.msra.mxu0 %v18726_v40 }
 0x7c0   :  { %14992 = vmatpush3.bf16.msra.mxu1 %v18731_v59  ;;  %14962 = vmatprep.subr.bf16.mxu0 %v18744_v56 }
 0x7c1   :  { %5332 = vmatmul.mubr.bf16.gmra.mrb[20].mxu0 %v13281_v13  ;;  %14994 = vmatprep.subr.bf16.mxu1 %v18755_v47 }
 0x7c2   :  { %5438 = vmatmul.mubr.bf16.gmra.mrb[24].mxu1 %v13281_v13  ;;  %v5542_v13 = vld [vmem:[%s20371_s7 + $0x150] sm:$0xff] }
 0x7c3   :  { %14964 = vmatpush3.bf16.msra.mxu0 %v18757_v10  ;;  %v18881_v3 = vpack.c.bf16 %v5543_v57, %v5542_v13 }
 0x7c4   :  { %14996 = vmatpush3.bf16.msra.mxu1 %v18769_v5  ;;  %14966 = vmatprep.subr.bf16.mxu0 %v18782_v15 }
 0x7c5   :  { %14998 = vmatprep.subr.bf16.mxu1 %v18784_v60 }
 0x7c7   :  { %14968 = vmatpush3.bf16.msra.mxu0 %v18798_v36 }
 0x7c8   :  { %15000 = vmatpush3.bf16.msra.mxu1 %v18803_v41  ;;  %14970 = vmatprep.subr.bf16.mxu0 %v18816_v16 }
 0x7c9   :  { %15002 = vmatprep.subr.bf16.mxu1 %v18827_v31 }
 0x7cb   :  { %14972 = vmatpush3.bf16.msra.mxu0 %v18829_v14 }
 0x7cc   :  { %15004 = vmatpush3.bf16.msra.mxu1 %v18841_v62  ;;  %14974 = vmatprep.subr.bf16.mxu0 %v18854_v25 }
 0x7cd   :  { %15006 = vmatprep.subr.bf16.mxu1 %v18856_v53 }
 0x7cf   :  { %14976 = vmatpush3.bf16.msra.mxu0 %v18868_v9 }
 0x7d0   :  { %15008 = vmatpush3.bf16.msra.mxu1 %v18881_v3  ;;  %14978 = vmatprep.subr.bf16.mxu0 %v18883_v63 }
 0x7d1   :  { %15010 = vmatprep.subr.bf16.mxu1 %v18894_v51 }
 0x7d3   :  { %14980 = vmatpush3.bf16.msra.mxu0 %v18906_v1 }
 0x7d4   :  { %15012 = vmatpush3.bf16.msra.mxu1 %v18919_v24  ;;  %14982 = vmatprep.subr.bf16.mxu0 %v18921_v19 }
 0x7d5   :  { %15014 = vmatprep.subr.bf16.mxu1 %v18933_v34 }
 0x7d7   :  { %14984 = vmatpush3.bf16.msra.mxu0 %v18942_v7 }
 0x7d8   :  { %15016 = vmatpush3.bf16.msra.mxu1 %v18946_v32 }
 0x88c   :  { %v18951_v42 = vpop.f32.mrb[16].mxu0 }
 0x88d   :  { %v18953_v54 = vpop.f32.mrb[20].mxu1  ;;  %v18955_v50 = vpop.f32.mrb[17].mxu0 }
 0x88e   :  { %20372 = vst [vmem:[#allocation56_spill] sm:$0xff] %v18953_v54  ;;  %20373 = vst [vmem:[#allocation59_spill] sm:$0xff] %v18955_v50  ;;  %v18957_v4 = vpop.f32.mrb[21].mxu1  ;;  %v18959_v2 = vpop.f32.mrb[18].mxu0 }
 0x88f   :  { %20374 = vst [vmem:[#allocation49_spill] sm:$0xff] %v18957_v4  ;;  %v5464_v18 = vadd.f32 %v18959_v2, %v18951_v42  ;;  %v18963_v30 = vpop.f32.mrb[22].mxu1  ;;  %v18965_v13 = vpop.f32.mrb[19].mxu0 }
 0x890   :  { %20375 = vst [vmem:[#allocation52_spill] sm:$0xff] %v18963_v30  ;;  %20376 = vst [vmem:[#allocation55_spill] sm:$0xff] %v18965_v13  ;;  %v5482_v57 = vadd.f32 %v18963_v30, %v18953_v54  ;;  %v5473_v38 = vadd.f32 %v18965_v13, %v18955_v50  ;;  %v18971_v48 = vpop.f32.mrb[23].mxu1 }
 0x891   :  { %20377 = vst [vmem:[#allocation58_spill] sm:$0xff] %v18971_v48  ;;  %v5491_v20 = vadd.f32 %v18971_v48, %v18957_v4 }
 0x894   :  { %v18975_v33 = vpop.f32.mrb[20].mxu0 }
 0x895   :  { %v5465_v44 = vadd.f32 %v5464_v18, %v18975_v33  ;;  %v18978_v11 = vpop.f32.mrb[24].mxu1  ;;  %v18980_v52 = vpop.f32.mrb[21].mxu0 }
 0x896   :  { %20378 = vst [vmem:[#allocation51_spill] sm:$0xff] %v18978_v11  ;;  %20379 = vst [vmem:[#allocation54_spill] sm:$0xff] %v18980_v52  ;;  %v5483_v45 = vadd.f32 %v5482_v57, %v18978_v11  ;;  %v5474_v8 = vadd.f32 %v5473_v38, %v18980_v52  ;;  %v18984_v12 = vpop.f32.mrb[25].mxu1  ;;  %v18986_v58 = vpop.f32.mrb[22].mxu0 }
 0x897   :  { %20380 = vst [vmem:[#allocation57_spill] sm:$0xff] %v18984_v12  ;;  %v5492_v37 = vadd.f32 %v5491_v20, %v18984_v12  ;;  %v5466_v43 = vadd.f32 %v5465_v44, %v18986_v58  ;;  %v18990_v22 = vpop.f32.mrb[26].mxu1  ;;  %v18992_v28 = vpop.f32.mrb[23].mxu0 }
 0x898   :  { %20381 = vst [vmem:[#allocation60_spill] sm:$0xff] %v18990_v22  ;;  %20382 = vst [vmem:[#allocation61_spill] sm:$0xff] %v18992_v28  ;;  %v5484_v29 = vadd.f32 %v5483_v45, %v18990_v22  ;;  %v5475_v18 = vadd.f32 %v5474_v8, %v18992_v28  ;;  %v18996_v23 = vpop.f32.mrb[27].mxu1 }
 0x899   :  { %20383 = vst [vmem:[#allocation62_spill] sm:$0xff] %v18996_v23  ;;  %v5467_v57 = vrot.slane %v5466_v43, 4  ;;  %v5493_v38 = vadd.f32 %v5492_v37, %v18996_v23 }
 0x89a   :  { %v5485_v6 = vrot.slane %v5484_v29, 4  ;;  %v5476_v26 = vrot.slane %v5475_v18, 4 }
 0x89b   :  { %v5468_v61 = vadd.f32 %v5467_v57, %v5466_v43  ;;  %v5494_v39 = vrot.slane %v5493_v38, 4 }
 0x89c   :  { %v5486_v20 = vadd.f32 %v5485_v6, %v5484_v29  ;;  %v5477_v49 = vadd.f32 %v5476_v26, %v5475_v18  ;;  %v5710_v26 = vld [vmem:[#allocation15 + $0x28] sm:$0xff]  ;;  %v5720_v29 = vld [vmem:[#allocation15 + $0x78] sm:$0xff]  ;;  %v5713_v18 = vld [vmem:[#allocation15 + $0x40] sm:$0xff] }
 0x89d   :  { %v5469_v44 = vrot.slane %v5468_v61, 2  ;;  %v5495_v12 = vadd.f32 %v5494_v39, %v5493_v38  ;;  %v20384_v39 = vmov 0.0   ;;  %v5717_v38 = vld [vmem:[#allocation15 + $0x60] sm:$0xff] }
 0x89e   :  { %v5487_v48 = vrot.slane %v5486_v20, 2  ;;  %v5478_v4 = vrot.slane %v5477_v49, 2 }
 0x89f   :  { %v5470_v52 = vadd.f32 %v5469_v44, %v5468_v61  ;;  %v5496_v13 = vrot.slane %v5495_v12, 2  ;;  %v5706_v61 = vld [vmem:[#allocation15 + $0x8] sm:$0xff]  ;;  %v5719_v44 = vld [vmem:[#allocation15 + $0x70] sm:$0xff] }
 0x8a0   :  { %v5488_v45 = vadd.f32 %v5487_v48, %v5486_v20  ;;  %v5479_v50 = vadd.f32 %v5478_v4, %v5477_v49  ;;  %v5708_v49 = vld [vmem:[#allocation15 + $0x18] sm:$0xff]  ;;  %v19001_v6 = vpack.c.bf16 %v5710_v26, %v5706_v61  ;;  %v5711_v48 = vld [vmem:[#allocation15 + $0x30] sm:$0xff] }
 0x8a1   :  { %v5471_v8 = vrot.slane %v5470_v52, 1  ;;  %v5497_v28 = vadd.f32 %v5496_v13, %v5495_v12  ;;  %v5712_v4 = vld [vmem:[#allocation15 + $0x38] sm:$0xff]  ;;  %v5715_v20 = vld [vmem:[#allocation15 + $0x50] sm:$0xff] }
 0x8a2   :  { %v5489_v22 = vrot.slane %v5488_v45, 1  ;;  %v5480_v11 = vrot.slane %v5479_v50, 1  ;;  %v19003_v13 = vpack.c.bf16 %v5712_v4, %v5708_v49  ;;  %15018 = vmatprep.subr.bf16.mxu0 %v19001_v6 }
 0x8a3   :  { %v5498_v30 = vrot.slane %v5497_v28, 1  ;;  %v5472_v23 = vadd.f32 %v5471_v8, %v5470_v52  ;;  %v5718_v52 = vld [vmem:[#allocation15 + $0x68] sm:$0xff]  ;;  %v19020_v8 = vpack.c.bf16 %v5719_v44, %v5715_v20 }
 0x8a4   :  { %v5481_v37 = vadd.f32 %v5480_v11, %v5479_v50  ;;  %v5490_v43 = vadd.f32 %v5489_v22, %v5488_v45  ;;  %15026 = vmatprep.subr.bf16.mxu1 %v19003_v13  ;;  %v5705_v50 = vld [vmem:[#allocation15] sm:$0xff]  ;;  %v5714_v11 = vld [vmem:[#allocation15 + $0x48] sm:$0xff]  ;;  %v19018_v45 = vpack.c.bf16 %v5717_v38, %v5713_v18 }
 0x8a5   :  { %v5499_v54 = vadd.f32 %v5498_v30, %v5497_v28  ;;  %v19011_v22 = vpack.c.bf16 %v5718_v52, %v5714_v11  ;;  %v5716_v28 = vld [vmem:[#allocation15 + $0x58] sm:$0xff]  ;;  %v20394_v52 = vld [vmem:[#allocation58_spill] sm:$0xff] }
 0x8a6   :  { %5628 = vmatprep.mubr.f32.mxu0 %v5481_v37  ;;  %v19014_v57 = vpack.c.bf16 %v5720_v29, %v5716_v28 }
 0x8a7   :  { %5698 = vmatprep.mubr.f32.mxu1 %v5499_v54  ;;  %5629 = vmatmul.mubr.f32.vlgmr.msra.gmra.mrb[24].mxu0 %v5472_v23  ;;  %v5709_v54 = vld [vmem:[#allocation15 + $0x20] sm:$0xff]  ;;  %v5707_v23 = vld [vmem:[#allocation15 + $0x10] sm:$0xff] }
 0x8a8   :  { %5699 = vmatmul.mubr.f32.vlgmr.msra.gmra.mrb[28].mxu1 %v5490_v43  ;;  %5788 = vmatprep.mubr.f32.mxu0 %v20384_v39  ;;  %v19007_v30 = vpack.c.bf16 %v5709_v54, %v5705_v50  ;;  %v19009_v12 = vpack.c.bf16 %v5711_v48, %v5707_v23  ;;  %v20393_v48 = vld [vmem:[#allocation49_spill] sm:$0xff] }
 0x8a9   :  { %5859 = vmatprep.mubr.f32.mxu1 %v20384_v39 }
 0x8aa   :  { %15020 = vmatpush1.bf16.msra.mxu0 %v19007_v30  ;;  %15028 = vmatpush1.bf16.msra.mxu1 %v19009_v12 }
 0x8ab   :  { %15022 = vmatprep.subr.bf16.mxu0 %v19011_v22  ;;  %15030 = vmatprep.subr.bf16.mxu1 %v19014_v57 }
 0x8ae   :  { %15024 = vmatpush1.bf16.msra.mxu0 %v19018_v45  ;;  %15032 = vmatpush1.bf16.msra.mxu1 %v19020_v8 }
 0x8af   :  { %15034 = vmatprep.subr.bf16.mxu0 %v18669_v21  ;;  %15066 = vmatprep.subr.bf16.mxu1 %v18671_v27 }
 0x97a   :  { %v14177_v37 = vpop.f32.mrb[24].mxu0 }
 0x97b   :  { %v14212_v43 = vpop.f32.mrb[28].mxu1  ;;  %v14178_v61 = vpop.f32.mrb[25].mxu0 }
 0x97c   :  { %v14179_v26 = vadd.f32 %v14178_v61, %v14177_v37  ;;  %v14213_v49 = vpop.f32.mrb[29].mxu1 }
 0x97d   :  { %v14214_v4 = vadd.f32 %v14213_v49, %v14212_v43  ;;  %v20395_v43 = vld [vmem:[#allocation57_spill] sm:$0xff] }
 0x97f   :  { %v5701_v50 = vadd.f32 %v14214_v4, %v14179_v26  ;;  %v20396_v26 = vld [vmem:[#allocation62_spill] sm:$0xff] }
 0x981   :  { %v5704_v54 = vmul.f32 0.001953125, %v5701_v50 }
 0x983   :  { %13411 = vmatmul.mubr.msk.f32.vlgmr.msra.gmra.mrb[26].mxu0 %vm1355_vm0, %v5704_v54  ;;  %13412 = vmatmul.mubr.msk.f32.vlgmr.msra.gmra.mrb[30].mxu1 %vm1355_vm0, %v5704_v54 }
 0x984   :  { %15036 = vmatpush3.bf16.msra.mxu0 %v18704_v17  ;;  %15068 = vmatpush3.bf16.msra.mxu1 %v18707_v46 }
 0x985   :  { %15038 = vmatprep.subr.bf16.mxu0 %v18709_v0  ;;  %15070 = vmatprep.subr.bf16.mxu1 %v18711_v55 }
 0x988   :  { %15040 = vmatpush3.bf16.msra.mxu0 %v18726_v40  ;;  %15072 = vmatpush3.bf16.msra.mxu1 %v18731_v59 }
 0x989   :  { %15042 = vmatprep.subr.bf16.mxu0 %v18744_v56  ;;  %15074 = vmatprep.subr.bf16.mxu1 %v18755_v47 }
 0x98c   :  { %15044 = vmatpush3.bf16.msra.mxu0 %v18757_v10  ;;  %15076 = vmatpush3.bf16.msra.mxu1 %v18769_v5 }
 0x98d   :  { %15046 = vmatprep.subr.bf16.mxu0 %v18782_v15  ;;  %15078 = vmatprep.subr.bf16.mxu1 %v18784_v60  ;;  %v20385_v15 = vld [vmem:[#allocation56_spill] sm:$0xff] }
 0x990   :  { %15048 = vmatpush3.bf16.msra.mxu0 %v18798_v36  ;;  %15080 = vmatpush3.bf16.msra.mxu1 %v18803_v41  ;;  %v20386_v36 = vld [vmem:[#allocation52_spill] sm:$0xff] }
 0x991   :  { %15050 = vmatprep.subr.bf16.mxu0 %v18816_v16  ;;  %15082 = vmatprep.subr.bf16.mxu1 %v18827_v31  ;;  %v20387_v16 = vld [vmem:[#allocation51_spill] sm:$0xff] }
 0x994   :  { %15052 = vmatpush3.bf16.msra.mxu0 %v18829_v14  ;;  %15084 = vmatpush3.bf16.msra.mxu1 %v18841_v62  ;;  %v20388_v14 = vld [vmem:[#allocation60_spill] sm:$0xff] }
 0x995   :  { %15054 = vmatprep.subr.bf16.mxu0 %v18854_v25  ;;  %15086 = vmatprep.subr.bf16.mxu1 %v18856_v53 }
 0x998   :  { %15056 = vmatpush3.bf16.msra.mxu0 %v18868_v9  ;;  %15088 = vmatpush3.bf16.msra.mxu1 %v18881_v3 }
 0x999   :  { %15058 = vmatprep.subr.bf16.mxu0 %v18883_v63  ;;  %15090 = vmatprep.subr.bf16.mxu1 %v18894_v51 }
 0x99c   :  { %15060 = vmatpush3.bf16.msra.mxu0 %v18906_v1  ;;  %15092 = vmatpush3.bf16.msra.mxu1 %v18919_v24 }
 0x99d   :  { %15062 = vmatprep.subr.bf16.mxu0 %v18921_v19  ;;  %15094 = vmatprep.subr.bf16.mxu1 %v18933_v34  ;;  %v20389_v19 = vld [vmem:[#allocation59_spill] sm:$0xff] }
 0x9a0   :  { %15064 = vmatpush3.bf16.msra.mxu0 %v18942_v7  ;;  %15096 = vmatpush3.bf16.msra.mxu1 %v18946_v32  ;;  %v20390_v7 = vld [vmem:[#allocation55_spill] sm:$0xff] }
 0x9a1   :  { %15098 = vmatprep.subr.bf16.mxu0 %v19001_v6  ;;  %15106 = vmatprep.subr.bf16.mxu1 %v19003_v13 }
 0xa56   :  { %v5790_v21 = vpop.f32.mrb[26].mxu0  ;;  %v5861_v27 = vpop.f32.mrb[30].mxu1 }
 0xa57   :  { %v5869_v17 = vrot.slane %v5790_v21, %v18324_v35  ;;  %v5877_v46 = vrot.slane %v5861_v27, %v18324_v35  ;;  %v5792_v0 = vpop.f32.mrb[27].mxu0  ;;  %v5863_v55 = vpop.f32.mrb[31].mxu1 }
 0xa58   :  { %v5873_v40 = vrot.slane %v5792_v0, %v18324_v35  ;;  %v5881_v59 = vrot.slane %v5863_v55, %v18324_v35 }
 0xa59   :  { %v19066_v56 = vsub.f32 %v18951_v42, %v5869_v17  ;;  %v19069_v47 = vsub.f32 %v18959_v2, %v5869_v17  ;;  %v19072_v10 = vsub.f32 %v18975_v33, %v5869_v17  ;;  %v19075_v5 = vsub.f32 %v18986_v58, %v5869_v17  ;;  %v20391_v42 = vld [vmem:[#allocation54_spill] sm:$0xff]  ;;  %v20392_v58 = vld [vmem:[#allocation61_spill] sm:$0xff] }
 0xa5a   :  { %v19078_v60 = vsub.f32 %v20385_v15, %v5877_v46  ;;  %v19081_v41 = vsub.f32 %v20386_v36, %v5877_v46  ;;  %v19084_v31 = vsub.f32 %v20387_v16, %v5877_v46  ;;  %v19087_v62 = vsub.f32 %v20388_v14, %v5877_v46 }
 0xa5b   :  { %v5898_v25 = vmul.f32 %v19066_v56, %v19066_v56  ;;  %v5902_v53 = vmul.f32 %v19069_v47, %v19069_v47  ;;  %v5906_v9 = vmul.f32 %v19072_v10, %v19072_v10  ;;  %v5910_v3 = vmul.f32 %v19075_v5, %v19075_v5 }
 0xa5c   :  { %v5900_v63 = vmul.f32 %v19078_v60, %v19078_v60  ;;  %v5904_v51 = vmul.f32 %v19081_v41, %v19081_v41  ;;  %v5908_v1 = vmul.f32 %v19084_v31, %v19084_v31  ;;  %v19104_v34 = vsub.f32 %v20389_v19, %v5873_v40 }
 0xa5d   :  { %v5914_v24 = vadd.f32 %v5902_v53, %v5898_v25  ;;  %v19107_v32 = vsub.f32 %v20390_v7, %v5873_v40  ;;  %v19110_v2 = vsub.f32 %v20391_v42, %v5873_v40  ;;  %v19113_v23 = vsub.f32 %v20392_v58, %v5873_v40 }
 0xa5e   :  { %v5932_v33 = vadd.f32 %v5904_v51, %v5900_v63  ;;  %v19116_v11 = vsub.f32 %v20393_v48, %v5881_v59  ;;  %v19119_v28 = vsub.f32 %v20394_v52, %v5881_v59  ;;  %v5912_v18 = vmul.f32 %v19087_v62, %v19087_v62 }
 0xa5f   :  { %v5915_v29 = vadd.f32 %v5914_v24, %v5906_v9  ;;  %v5899_v38 = vmul.f32 %v19104_v34, %v19104_v34  ;;  %v5903_v20 = vmul.f32 %v19107_v32, %v19107_v32  ;;  %v5907_v37 = vmul.f32 %v19110_v2, %v19110_v2 }
 0xa60   :  { %v5933_v44 = vadd.f32 %v5932_v33, %v5908_v1  ;;  %v19130_v61 = vsub.f32 %v20395_v43, %v5881_v59  ;;  %v19133_v49 = vsub.f32 %v20396_v26, %v5881_v59  ;;  %v5901_v54 = vmul.f32 %v19116_v11, %v19116_v11 }
 0xa61   :  { %v5916_v4 = vadd.f32 %v5915_v29, %v5910_v3  ;;  %v5923_v50 = vadd.f32 %v5903_v20, %v5899_v38  ;;  %v5905_v21 = vmul.f32 %v19119_v28, %v19119_v28  ;;  %v5911_v17 = vmul.f32 %v19113_v23, %v19113_v23 }
 0xa62   :  { %v5934_v27 = vadd.f32 %v5933_v44, %v5912_v18  ;;  %v5909_v46 = vmul.f32 %v19130_v61, %v19130_v61  ;;  %v5913_v15 = vmul.f32 %v19133_v49, %v19133_v49 }
 0xa63   :  { %v5941_v0 = vadd.f32 %v5905_v21, %v5901_v54  ;;  %v5924_v55 = vadd.f32 %v5923_v50, %v5907_v37  ;;  %v5917_v40 = vrot.slane %v5916_v4, 4 }
 0xa64   :  { %v5935_v59 = vrot.slane %v5934_v27, 4 }
 0xa65   :  { %v5925_v36 = vadd.f32 %v5924_v55, %v5911_v17  ;;  %v5942_v16 = vadd.f32 %v5941_v0, %v5909_v46  ;;  %v5918_v14 = vadd.f32 %v5917_v40, %v5916_v4  ;;  %v6091_v55 = vld [vmem:[#allocation16] sm:$0x1] }
 0xa66   :  { %v5936_v25 = vadd.f32 %v5935_v59, %v5934_v27 }
 0xa67   :  { %v5926_v53 = vrot.slane %v5925_v36, 4  ;;  %v5943_v9 = vadd.f32 %v5942_v16, %v5913_v15  ;;  %v5919_v3 = vrot.slane %v5918_v14, 2  ;;  %v6240_v15 = vld [vmem:[#allocation18] sm:$0x1]  ;;  %v16233_v16 = vld [vmem:[#allocation19 + $0x408] ss:$16 sps:$4 sm:$0xff]  }
 0xa68   :  { %v5937_v63 = vrot.slane %v5936_v25, 2 }
 0xa69   :  { %v5927_v51 = vadd.f32 %v5926_v53, %v5925_v36  ;;  %v5944_v1 = vrot.slane %v5943_v9, 4  ;;  %v5920_v24 = vadd.f32 %v5919_v3, %v5918_v14  ;;  %v16230_v36 = vld [vmem:[#allocation19 + $0x400] ss:$16 sps:$4 sm:$0xff]   ;;  %v16247_v14 = vld [vmem:[#allocation19 + $0x44c] ss:$16 sps:$4 sm:$0xff]  }
 0xa6a   :  { %v5938_v42 = vadd.f32 %v5937_v63, %v5936_v25  ;;  %v16245_v25 = vld [vmem:[#allocation19 + $0x448] ss:$16 sps:$4 sm:$0xff]   ;;  %v16250_v53 = vld [vmem:[#allocation19 + $0x464] ss:$16 sps:$4 sm:$0xff]   ;;  %v16248_v3 = vld [vmem:[#allocation19 + $0x460] ss:$16 sps:$4 sm:$0xff]  }
 0xa6b   :  { %v5928_v19 = vrot.slane %v5927_v51, 2  ;;  %v5945_v7 = vadd.f32 %v5944_v1, %v5943_v9  ;;  %v5921_v48 = vrot.slane %v5920_v24, 1  ;;  %v16253_v9 = vld [vmem:[#allocation19 + $0x46c] ss:$16 sps:$4 sm:$0xff]   ;;  %v16251_v63 = vld [vmem:[#allocation19 + $0x468] ss:$16 sps:$4 sm:$0xff]  }
 0xa6c   :  { %v5939_v18 = vrot.slane %v5938_v42, 1  ;;  %v16259_v1 = vld [vmem:[#allocation19 + $0x48c] ss:$16 sps:$4 sm:$0xff]  }
 0xa6d   :  { %v5929_v33 = vadd.f32 %v5928_v19, %v5927_v51  ;;  %v5946_v58 = vrot.slane %v5945_v7, 2  ;;  %v5922_v44 = vadd.f32 %v5921_v48, %v5920_v24  ;;  %v16256_v51 = vld [vmem:[#allocation19 + $0x484] ss:$16 sps:$4 sm:$0xff]   ;;  %v16254_v24 = vld [vmem:[#allocation19 + $0x480] ss:$16 sps:$4 sm:$0xff]  }
 0xa6e   :  { %v5940_v43 = vadd.f32 %v5939_v18, %v5938_v42  ;;  %v16257_v19 = vld [vmem:[#allocation19 + $0x488] ss:$16 sps:$4 sm:$0xff]   ;;  %v16265_v42 = vld [vmem:[#allocation19 + $0x4ac] ss:$16 sps:$4 sm:$0xff]   ;;  %v16266_v48 = vld [vmem:[#allocation19 + $0x4c0] ss:$16 sps:$4 sm:$0xff]  }
 0xa6f   :  { %v5930_v52 = vrot.slane %v5929_v33, 1  ;;  %v5947_v29 = vadd.f32 %v5946_v58, %v5945_v7  ;;  %v16262_v7 = vld [vmem:[#allocation19 + $0x4a4] ss:$16 sps:$4 sm:$0xff]   ;;  %v16263_v58 = vld [vmem:[#allocation19 + $0x4a8] ss:$16 sps:$4 sm:$0xff]  }
 0xa70   :  { %v16271_v18 = vld [vmem:[#allocation19 + $0x4cc] ss:$16 sps:$4 sm:$0xff]  }
 0xa71   :  { %v5931_v38 = vadd.f32 %v5930_v52, %v5929_v33  ;;  %v5948_v20 = vrot.slane %v5947_v29, 1  ;;  %v16260_v33 = vld [vmem:[#allocation19 + $0x4a0] ss:$16 sps:$4 sm:$0xff]   ;;  %v16268_v52 = vld [vmem:[#allocation19 + $0x4c4] ss:$16 sps:$4 sm:$0xff]  }
 0xa73   :  { %6014 = vmatprep.mubr.f32.mxu0 %v5931_v38  ;;  %v5949_v37 = vadd.f32 %v5948_v20, %v5947_v29  ;;  %v16269_v29 = vld [vmem:[#allocation19 + $0x4c8] ss:$16 sps:$4 sm:$0xff]   ;;  %v16272_v38 = vld [vmem:[#allocation19 + $0x4e0] ss:$16 sps:$4 sm:$0xff]   ;;  %v16274_v20 = vld [vmem:[#allocation19 + $0x4e4] ss:$16 sps:$4 sm:$0xff]  }
 0xa74   :  { %6015 = vmatmul.mubr.f32.vlgmr.msra.gmra.mrb[28].mxu0 %v5922_v44  ;;  %v16275_v44 = vld [vmem:[#allocation19 + $0x4e8] ss:$16 sps:$4 sm:$0xff]  }
 0xa75   :  { %6084 = vmatprep.mubr.f32.mxu1 %v5949_v37  ;;  %15100 = vmatpush1.bf16.msra.mxu0 %v19007_v30  ;;  %v16277_v37 = vld [vmem:[#allocation19 + $0x4ec] ss:$16 sps:$4 sm:$0xff]  }
 0xa76   :  { %6085 = vmatmul.mubr.f32.vlgmr.msra.gmra.mrb[32].mxu1 %v5940_v43  ;;  %15102 = vmatprep.subr.bf16.mxu0 %v19011_v22  ;;  %v16280_v43 = vld [vmem:[#allocation19 + $0x504] ss:$16 sps:$4 sm:$0xff]  }
 0xa77   :  { %15108 = vmatpush1.bf16.msra.mxu1 %v19009_v12  ;;  %6162 = vmatprep.mubr.f32.mxu0 %v20384_v39 }
 0xa78   :  { %15110 = vmatprep.subr.bf16.mxu1 %v19014_v57  ;;  %6233 = vmatprep.mubr.f32.mxu1 %v20384_v39 }
 0xa79   :  { %15104 = vmatpush1.bf16.msra.mxu0 %v19018_v45 }
 0xa7a   :  { %15114 = vmatprep.subr.bf16.mxu0 %v19001_v6  ;;  %v16232_v6 = vld [vmem:[#allocation19 + $0x404] ss:$16 sps:$4 sm:$0xff]  }
 0xa7b   :  { %15112 = vmatpush1.bf16.msra.mxu1 %v19020_v8 }
 0xa7c   :  { %15122 = vmatprep.subr.bf16.mxu1 %v19003_v13  ;;  %v16235_v13 = vld [vmem:[#allocation19 + $0x40c] ss:$16 sps:$4 sm:$0xff]  }
 0xb47   :  { %v14247_v26 = vpop.f32.mrb[28].mxu0 }
 0xb48   :  { %v14248_v4 = vpop.f32.mrb[29].mxu0 }
 0xb49   :  { %v14282_v50 = vpop.f32.mrb[32].mxu1  ;;  %v14249_v54 = vadd.f32 %v14248_v4, %v14247_v26  ;;  %v16283_v26 = vld [vmem:[#allocation19 + $0x50c] ss:$16 sps:$4 sm:$0xff]   ;;  %v16278_v4 = vld [vmem:[#allocation19 + $0x500] ss:$16 sps:$4 sm:$0xff]  }
 0xb4a   :  { %v14283_v21 = vpop.f32.mrb[33].mxu1 }
 0xb4b   :  { %v14284_v27 = vadd.f32 %v14283_v21, %v14282_v50  ;;  %v16281_v50 = vld [vmem:[#allocation19 + $0x508] ss:$16 sps:$4 sm:$0xff]   ;;  %v16289_v21 = vld [vmem:[#allocation19 + $0x52c] ss:$16 sps:$4 sm:$0xff]  }
 0xb4d   :  { %v6087_v17 = vadd.f32 %v14284_v27, %v14249_v54  ;;  %v16286_v54 = vld [vmem:[#allocation19 + $0x524] ss:$16 sps:$4 sm:$0xff]   ;;  %v16284_v27 = vld [vmem:[#allocation19 + $0x520] ss:$16 sps:$4 sm:$0xff]  }
 0xb4f   :  { %v6090_v46 = vmul.f32 0.001953125, %v6087_v17  ;;  %v16287_v17 = vld [vmem:[#allocation19 + $0x528] ss:$16 sps:$4 sm:$0xff]  }
 0xb51   :  { %v6092_v0 = vadd.f32 1e-05, %v6090_v46  ;;  %v16292_v46 = vld [vmem:[#allocation19 + $0x544] ss:$16 sps:$4 sm:$0xff]  }
 0xb53   :  { %16904 = vrsqrt.f32 %v6092_v0  ;;  %v16295_v0 = vld [vmem:[#allocation19 + $0x54c] ss:$16 sps:$4 sm:$0xff]  }
 0xb5d   :  { %v16905_v40 = vpop.eup %16904 }
 0xb5e   :  { %v6094_v59 = vmul.f32 %v16905_v40, %v6091_v55  ;;  %v16290_v55 = vld [vmem:[#allocation19 + $0x540] ss:$16 sps:$4 sm:$0xff]   ;;  %v16293_v40 = vld [vmem:[#allocation19 + $0x548] ss:$16 sps:$4 sm:$0xff]  }
 0xb60   :  { %13413 = vmatmul.mubr.msk.f32.vlgmr.msra.gmra.mrb[30].mxu0 %vm1355_vm0, %v6094_v59  ;;  %13414 = vmatmul.mubr.msk.f32.vlgmr.msra.gmra.mrb[34].mxu1 %vm1355_vm0, %v6094_v59  ;;  %v16298_v59 = vld [vmem:[#allocation19 + $0x564] ss:$16 sps:$4 sm:$0xff]  }
 0xb61   :  { %15116 = vmatpush1.bf16.msra.mxu0 %v19007_v30  ;;  %15124 = vmatpush1.bf16.msra.mxu1 %v19009_v12  ;;  %v16238_v30 = vld [vmem:[#allocation19 + $0x424] ss:$16 sps:$4 sm:$0xff]   ;;  %v16241_v12 = vld [vmem:[#allocation19 + $0x42c] ss:$16 sps:$4 sm:$0xff]  }
 0xb62   :  { %15118 = vmatprep.subr.bf16.mxu0 %v19011_v22  ;;  %15126 = vmatprep.subr.bf16.mxu1 %v19014_v57  ;;  %v16236_v22 = vld [vmem:[#allocation19 + $0x420] ss:$16 sps:$4 sm:$0xff]   ;;  %v16239_v57 = vld [vmem:[#allocation19 + $0x428] ss:$16 sps:$4 sm:$0xff]  }
 0xb63   :  { %6308 = vmatprep.mubr.f32.mxu0 %v20384_v39  ;;  %6379 = vmatprep.mubr.f32.mxu1 %v20384_v39 }
 0xb65   :  { %15120 = vmatpush1.bf16.msra.mxu0 %v19018_v45  ;;  %15128 = vmatpush1.bf16.msra.mxu1 %v19020_v8  ;;  %v16244_v45 = vld [vmem:[#allocation19 + $0x444] ss:$16 sps:$4 sm:$0xff]   ;;  %v16242_v8 = vld [vmem:[#allocation19 + $0x440] ss:$16 sps:$4 sm:$0xff]  }
 0xb66   :  { %7650 = vmatprep.subr.bf16.mxu0 %v16232_v6  ;;  %7756 = vmatprep.subr.bf16.mxu1 %v16235_v13  ;;  %v16301_v6 = vld [vmem:[#allocation19 + $0x56c] ss:$16 sps:$4 sm:$0xff]   ;;  %v16296_v13 = vld [vmem:[#allocation19 + $0x560] ss:$16 sps:$4 sm:$0xff]  }
 0xb68   :  { %13415 = vmatmul.mubr.msk.f32.vlgmr.msra.gmra.mrb[32].mxu0 %vm1355_vm0, %v6240_v15  ;;  %13416 = vmatmul.mubr.msk.f32.vlgmr.msra.gmra.mrb[36].mxu1 %vm1355_vm0, %v6240_v15  ;;  %v16299_v15 = vld [vmem:[#allocation19 + $0x568] ss:$16 sps:$4 sm:$0xff]  }
 0xb69   :  { %7651 = vmatpush1.bf16.msra.mxu0 %v16230_v36  ;;  %7757 = vmatpush1.bf16.msra.mxu1 %v16233_v16  ;;  %v16304_v36 = vld [vmem:[#allocation19 + $0x584] ss:$16 sps:$4 sm:$0xff]   ;;  %v16302_v16 = vld [vmem:[#allocation19 + $0x580] ss:$16 sps:$4 sm:$0xff]  }
 0xb6a   :  { %7652 = vmatprep.subr.bf16.mxu0 %v16238_v30  ;;  %7758 = vmatprep.subr.bf16.mxu1 %v16241_v12  ;;  %v16305_v30 = vld [vmem:[#allocation19 + $0x588] ss:$16 sps:$4 sm:$0xff]   ;;  %v16307_v12 = vld [vmem:[#allocation19 + $0x58c] ss:$16 sps:$4 sm:$0xff]  }
 0xb6d   :  { %7653 = vmatpush1.bf16.msra.mxu0 %v16236_v22  ;;  %7759 = vmatpush1.bf16.msra.mxu1 %v16239_v57  ;;  %v16310_v22 = vld [vmem:[#allocation19 + $0x5a4] ss:$16 sps:$4 sm:$0xff]   ;;  %v16313_v57 = vld [vmem:[#allocation19 + $0x5ac] ss:$16 sps:$4 sm:$0xff]  }
 0xb6e   :  { %7654 = vmatprep.subr.bf16.mxu0 %v16244_v45  ;;  %7760 = vmatprep.subr.bf16.mxu1 %v16247_v14  ;;  %v16308_v45 = vld [vmem:[#allocation19 + $0x5a0] ss:$16 sps:$4 sm:$0xff]   ;;  %v16311_v14 = vld [vmem:[#allocation19 + $0x5a8] ss:$16 sps:$4 sm:$0xff]  }
 0xb71   :  { %7655 = vmatpush1.bf16.msra.mxu0 %v16242_v8  ;;  %7761 = vmatpush1.bf16.msra.mxu1 %v16245_v25  ;;  %v16316_v8 = vld [vmem:[#allocation19 + $0x5c4] ss:$16 sps:$4 sm:$0xff]   ;;  %v16319_v25 = vld [vmem:[#allocation19 + $0x5cc] ss:$16 sps:$4 sm:$0xff]  }
 0xb72   :  { %7656 = vmatprep.subr.bf16.mxu0 %v16250_v53  ;;  %7762 = vmatprep.subr.bf16.mxu1 %v16253_v9  ;;  %v16314_v53 = vld [vmem:[#allocation19 + $0x5c0] ss:$16 sps:$4 sm:$0xff]   ;;  %v16317_v9 = vld [vmem:[#allocation19 + $0x5c8] ss:$16 sps:$4 sm:$0xff]  }
 0xb75   :  { %7657 = vmatpush1.bf16.msra.mxu0 %v16248_v3  ;;  %7763 = vmatpush1.bf16.msra.mxu1 %v16251_v63  ;;  %v16322_v3 = vld [vmem:[#allocation19 + $0x5e4] ss:$16 sps:$4 sm:$0xff]   ;;  %v16325_v63 = vld [vmem:[#allocation19 + $0x5ec] ss:$16 sps:$4 sm:$0xff]  }
 0xb76   :  { %7658 = vmatprep.subr.bf16.mxu0 %v16256_v51  ;;  %7764 = vmatprep.subr.bf16.mxu1 %v16259_v1  ;;  %v16320_v51 = vld [vmem:[#allocation19 + $0x5e0] ss:$16 sps:$4 sm:$0xff]   ;;  %v16323_v1 = vld [vmem:[#allocation19 + $0x5e8] ss:$16 sps:$4 sm:$0xff]  }
 0xb79   :  { %7659 = vmatpush1.bf16.msra.mxu0 %v16254_v24  ;;  %7765 = vmatpush1.bf16.msra.mxu1 %v16257_v19  ;;  %v16328_v24 = vld [vmem:[#allocation19 + $0x604] ss:$16 sps:$4 sm:$0xff]   ;;  %v16331_v19 = vld [vmem:[#allocation19 + $0x60c] ss:$16 sps:$4 sm:$0xff]  }
 0xb7a   :  { %7660 = vmatprep.subr.bf16.mxu0 %v16262_v7  ;;  %7766 = vmatprep.subr.bf16.mxu1 %v16265_v42 }
 0xb7d   :  { %7661 = vmatpush1.bf16.msra.mxu0 %v16260_v33  ;;  %7767 = vmatpush1.bf16.msra.mxu1 %v16263_v58 }
 0xb7e   :  { %7662 = vmatprep.subr.bf16.mxu0 %v16268_v52  ;;  %7768 = vmatprep.subr.bf16.mxu1 %v16271_v18 }
 0xb81   :  { %7663 = vmatpush1.bf16.msra.mxu0 %v16266_v48  ;;  %7769 = vmatpush1.bf16.msra.mxu1 %v16269_v29 }
 0xb82   :  { %7664 = vmatprep.subr.bf16.mxu0 %v16274_v20  ;;  %7770 = vmatprep.subr.bf16.mxu1 %v16277_v37 }
 0xb85   :  { %7665 = vmatpush1.bf16.msra.mxu0 %v16272_v38  ;;  %7771 = vmatpush1.bf16.msra.mxu1 %v16275_v44 }
 0xb86   :  { %7666 = vmatprep.subr.bf16.mxu0 %v16280_v43  ;;  %7772 = vmatprep.subr.bf16.mxu1 %v16283_v26 }
 0xb89   :  { %7667 = vmatpush1.bf16.msra.mxu0 %v16278_v4  ;;  %7773 = vmatpush1.bf16.msra.mxu1 %v16281_v50 }
 0xb8a   :  { %7668 = vmatprep.subr.bf16.mxu0 %v16286_v54  ;;  %7774 = vmatprep.subr.bf16.mxu1 %v16289_v21 }
 0xb8d   :  { %7669 = vmatpush1.bf16.msra.mxu0 %v16284_v27  ;;  %7775 = vmatpush1.bf16.msra.mxu1 %v16287_v17 }
 0xb8e   :  { %7670 = vmatprep.subr.bf16.mxu0 %v16292_v46  ;;  %7776 = vmatprep.subr.bf16.mxu1 %v16295_v0 }
 0xb91   :  { %7671 = vmatpush1.bf16.msra.mxu0 %v16290_v55  ;;  %7777 = vmatpush1.bf16.msra.mxu1 %v16293_v40 }
 0xb92   :  { %7672 = vmatprep.subr.bf16.mxu0 %v16298_v59  ;;  %7778 = vmatprep.subr.bf16.mxu1 %v16301_v6 }
 0xb95   :  { %7673 = vmatpush1.bf16.msra.mxu0 %v16296_v13  ;;  %7779 = vmatpush1.bf16.msra.mxu1 %v16299_v15 }
 0xb96   :  { %7674 = vmatprep.subr.bf16.mxu0 %v16304_v36  ;;  %7780 = vmatprep.subr.bf16.mxu1 %v16307_v12 }
 0xb99   :  { %7675 = vmatpush1.bf16.msra.mxu0 %v16302_v16  ;;  %7781 = vmatpush1.bf16.msra.mxu1 %v16305_v30 }
 0xb9a   :  { %7676 = vmatprep.subr.bf16.mxu0 %v16310_v22  ;;  %7782 = vmatprep.subr.bf16.mxu1 %v16313_v57 }
 0xb9d   :  { %7677 = vmatpush1.bf16.msra.mxu0 %v16308_v45  ;;  %7783 = vmatpush1.bf16.msra.mxu1 %v16311_v14 }
 0xb9e   :  { %7678 = vmatprep.subr.bf16.mxu0 %v16316_v8  ;;  %7784 = vmatprep.subr.bf16.mxu1 %v16319_v25 }
 0xba1   :  { %7679 = vmatpush1.bf16.msra.mxu0 %v16314_v53  ;;  %7785 = vmatpush1.bf16.msra.mxu1 %v16317_v9 }
 0xba2   :  { %7680 = vmatprep.subr.bf16.mxu0 %v16322_v3  ;;  %7786 = vmatprep.subr.bf16.mxu1 %v16325_v63 }
 0xba5   :  { %7681 = vmatpush1.bf16.msra.mxu0 %v16320_v51  ;;  %7787 = vmatpush1.bf16.msra.mxu1 %v16323_v1 }
 0xba6   :  { %7703 = vmatprep.subr.bf16.mxu0 %v16328_v24  ;;  %7809 = vmatprep.subr.bf16.mxu1 %v16331_v19 }
 0xc33   :  { %v6164_v7 = vpop.f32.mrb[30].mxu0  ;;  %v6235_v42 = vpop.f32.mrb[34].mxu1 }
 0xc34   :  { %v6166_v33 = vpop.f32.mrb[31].mxu0  ;;  %v6237_v58 = vpop.f32.mrb[35].mxu1  ;;  %v6389_v48 = vrot.slane %v6164_v7, %v18324_v35  ;;  %v6397_v52 = vrot.slane %v6235_v42, %v18324_v35 }
 0xc35   :  { %v6393_v29 = vrot.slane %v6166_v33, %v18324_v35  ;;  %v6401_v18 = vrot.slane %v6237_v58, %v18324_v35 }
 0xc36   :  { %v6402_v38 = vmul.f32 %v6389_v48, %v19066_v56  ;;  %v6406_v20 = vmul.f32 %v6389_v48, %v19069_v47  ;;  %v6410_v44 = vmul.f32 %v6389_v48, %v19072_v10  ;;  %v6414_v37 = vmul.f32 %v6389_v48, %v19075_v5 }
 0xc37   :  { %v6404_v43 = vmul.f32 %v6397_v52, %v19078_v60  ;;  %v6408_v26 = vmul.f32 %v6397_v52, %v19081_v41  ;;  %v6412_v4 = vmul.f32 %v6397_v52, %v19084_v31  ;;  %v6416_v50 = vmul.f32 %v6397_v52, %v19087_v62 }
 0xc38   :  { %v6403_v54 = vmul.f32 %v6393_v29, %v19104_v34  ;;  %v6407_v21 = vmul.f32 %v6393_v29, %v19107_v32  ;;  %v6411_v56 = vmul.f32 %v6393_v29, %v19110_v2  ;;  %v6415_v47 = vmul.f32 %v6393_v29, %v19113_v23 }
 0xc39   :  { %v6405_v5 = vmul.f32 %v6401_v18, %v19116_v11  ;;  %v6409_v60 = vmul.f32 %v6401_v18, %v19119_v28  ;;  %v6413_v34 = vmul.f32 %v6401_v18, %v19130_v61  ;;  %v6417_v32 = vmul.f32 %v6401_v18, %v19133_v49 }
 0xc3b   :  { %v6310_v27 = vpop.f32.mrb[32].mxu0  ;;  %v6381_v10 = vpop.f32.mrb[36].mxu1 }
 0xc3c   :  { %v6421_v41 = vrot.slane %v6310_v27, %v18324_v35  ;;  %v6429_v31 = vrot.slane %v6381_v10, %v18324_v35  ;;  %v6312_v17 = vpop.f32.mrb[33].mxu0  ;;  %v6383_v62 = vpop.f32.mrb[37].mxu1 }
 0xc3d   :  { %v6425_v2 = vrot.slane %v6312_v17, %v18324_v35  ;;  %v6433_v23 = vrot.slane %v6383_v62, %v18324_v35 }
 0xc3e   :  { %v6434_v46 = vadd.f32 %v6421_v41, %v6402_v38  ;;  %v6438_v0 = vadd.f32 %v6421_v41, %v6406_v20  ;;  %v6442_v55 = vadd.f32 %v6421_v41, %v6410_v44  ;;  %v6446_v11 = vadd.f32 %v6421_v41, %v6414_v37 }
 0xc3f   :  { %v6436_v40 = vadd.f32 %v6429_v31, %v6404_v43  ;;  %v6440_v28 = vadd.f32 %v6429_v31, %v6408_v26  ;;  %v6444_v59 = vadd.f32 %v6429_v31, %v6412_v4  ;;  %v6448_v6 = vadd.f32 %v6429_v31, %v6416_v50 }
 0xc40   :  { %v6450_v13 = vmax.f32 %v6434_v46, 0.0  ;;  %v6454_v15 = vmax.f32 %v6438_v0, 0.0  ;;  %v6458_v36 = vmax.f32 %v6442_v55, 0.0  ;;  %v6462_v16 = vmax.f32 %v6446_v11, 0.0  ;;  %v6593_v55 = vld [vmem:[#allocation3 + $0x20] sm:$0x11] }
 0xc41   :  { %v6452_v30 = vmax.f32 %v6436_v40, 0.0  ;;  %v6456_v61 = vmax.f32 %v6440_v28, 0.0  ;;  %v6460_v12 = vmax.f32 %v6444_v59, 0.0  ;;  %v6464_v49 = vmax.f32 %v6448_v6, 0.0  ;;  %v16917_v28 = vld [vmem:[#allocation3] sm:$0xff] }
 0xc42   :  { %v6435_v22 = vadd.f32 %v6425_v2, %v6403_v54  ;;  %v6439_v57 = vadd.f32 %v6425_v2, %v6407_v21  ;;  %v6443_v45 = vadd.f32 %v6425_v2, %v6411_v56  ;;  %v6447_v14 = vadd.f32 %v6425_v2, %v6415_v47 }
 0xc43   :  { %v6437_v8 = vadd.f32 %v6433_v23, %v6405_v5  ;;  %v6441_v25 = vadd.f32 %v6433_v23, %v6409_v60  ;;  %v6445_v53 = vadd.f32 %v6433_v23, %v6413_v34  ;;  %v6449_v9 = vadd.f32 %v6433_v23, %v6417_v32 }
 0xc44   :  { %v6451_v3 = vmax.f32 %v6435_v22, 0.0  ;;  %v6455_v63 = vmax.f32 %v6439_v57, 0.0  ;;  %v6459_v51 = vmax.f32 %v6443_v45, 0.0  ;;  %v6463_v1 = vmax.f32 %v6447_v14, 0.0 }
 0xc45   :  { %v6453_v24 = vmax.f32 %v6437_v8, 0.0  ;;  %v6457_v19 = vmax.f32 %v6441_v25, 0.0  ;;  %v6461_v7 = vmax.f32 %v6445_v53, 0.0  ;;  %v6465_v42 = vmax.f32 %v6449_v9, 0.0 }
 0xc46   :  { %v13989_v33 = vpack.c.bf16 %v6451_v3, %v6450_v13  ;;  %v13991_v58 = vpack.c.bf16 %v6455_v63, %v6454_v15  ;;  %v13993_v48 = vpack.c.bf16 %v6459_v51, %v6458_v36  ;;  %v13995_v52 = vpack.c.bf16 %v6463_v1, %v6462_v16  ;;  %v6599_v36 = vld [vmem:[#allocation3 + $0x30] sm:$0xff]  ;;  %v6588_v63 = vld [vmem:[#allocation3 + $0x8] sm:$0xff] }
 0xc47   :  { %v13990_v29 = vpack.c.bf16 %v6453_v24, %v6452_v30  ;;  %v13992_v18 = vpack.c.bf16 %v6457_v19, %v6456_v61  ;;  %v13994_v38 = vpack.c.bf16 %v6461_v7, %v6460_v12  ;;  %v19191_v20 = vpack.c.bf16 %v6465_v42, %v6464_v49  ;;  %v6607_v16 = vld [vmem:[#allocation3 + $0x50] sm:$0x11]  ;;  %v6596_v24 = vld [vmem:[#allocation3 + $0x28] sm:$0x11] }
 0xc48   :  { %v6507_v44 = vshrl.u32 %v13989_v33, 16  ;;  %v6510_v37 = vshll.u32 %v13989_v33, 16  ;;  %v6522_v43 = vshrl.u32 %v13991_v58, 16  ;;  %v6525_v26 = vshll.u32 %v13991_v58, 16 }
 0xc49   :  { %v6541_v4 = vshrl.u32 %v13993_v48, 16  ;;  %v6544_v50 = vshll.u32 %v13993_v48, 16  ;;  %v6556_v54 = vshrl.u32 %v13995_v52, 16  ;;  %v6559_v21 = vshll.u32 %v13995_v52, 16 }
 0xc4a   :  { %v6509_v56 = vrot.slane %v6507_v44, 7  ;;  %v6524_v47 = vrot.slane %v6522_v43, 7  ;;  %v6514_v27 = vshrl.u32 %v13990_v29, 16  ;;  %v6517_v10 = vshll.u32 %v13990_v29, 16 }
 0xc4b   :  { %v6543_v5 = vrot.slane %v6541_v4, 7  ;;  %v6558_v60 = vrot.slane %v6556_v54, 7  ;;  %v6531_v41 = vshrl.u32 %v13992_v18, 16  ;;  %v6534_v31 = vshll.u32 %v13992_v18, 16 }
 0xc4c   :  { %v6512_v17 = vor.u32 %v6510_v37, %v6509_v56  ;;  %v6520_v62 = vrot.slane %v6509_v56, 4  ;;  %v6527_v34 = vor.u32 %v6525_v26, %v6524_v47  ;;  %v6538_v32 = vrot.slane %v6524_v47, 4  ;;  %v6602_v37 = vld [vmem:[#allocation3 + $0x38] sm:$0xff] }
 0xc4d   :  { %v6546_v2 = vor.u32 %v6544_v50, %v6543_v5  ;;  %v6554_v23 = vrot.slane %v6543_v5, 4  ;;  %v6561_v46 = vor.u32 %v6559_v21, %v6558_v60  ;;  %v6572_v0 = vrot.slane %v6558_v60, 4  ;;  %v6610_v50 = vld [vmem:[#allocation3 + $0x58] sm:$0x11] }
 0xc4e   :  { %v19195_v40 = vsel %vm17823_vm7, %v6520_v62, %v6527_v34  ;;  %v19199_v6 = vsel %vm18487_vm3, %v6512_v17, %v16917_v28  ;;  %v6594_v15 = vsel %vm18434_vm10, %v6538_v32, %v6593_v55  ;;  %v6516_v30 = vrot.slane %v6514_v27, 7 }
 0xc4f   :  { %v19205_v61 = vsel %vm17823_vm7, %v6554_v23, %v6561_v46  ;;  %6587 = vst [vmem:[#allocation3] sm:$0xff] %v19199_v6  ;;  %6595 = vst [vmem:[#allocation3 + $0x20] sm:$0x11] %v6594_v15  ;;  %v19210_v12 = vsel %vm18487_vm3, %v6546_v2, %v6599_v36  ;;  %v6608_v49 = vsel %vm18434_vm10, %v6572_v0, %v6607_v16  ;;  %v6533_v22 = vrot.slane %v6531_v41, 7 }
 0xc50   :  { %6601 = vst [vmem:[#allocation3 + $0x30] sm:$0xff] %v19210_v12  ;;  %6609 = vst [vmem:[#allocation3 + $0x50] sm:$0x11] %v6608_v49  ;;  %v6519_v57 = vor.u32 %v6517_v10, %v6516_v30  ;;  %v6529_v45 = vrot.slane %v6516_v30, 4  ;;  %v6548_v14 = vshrl.u32 %v13994_v38, 16  ;;  %v6551_v8 = vshll.u32 %v13994_v38, 16 }
 0xc51   :  { %v6536_v25 = vor.u32 %v6534_v31, %v6533_v22  ;;  %v6539_v53 = vrot.slane %v6533_v22, 4  ;;  %v6565_v9 = vshrl.u32 %v19191_v20, 16  ;;  %v6568_v3 = vshll.u32 %v19191_v20, 16 }
 0xc52   :  { %v6550_v51 = vrot.slane %v6548_v14, 7  ;;  %v19219_v1 = vsel %vm18487_vm3, %v6519_v57, %v6588_v63  ;;  %v6754_v19 = vshrl.u32 %v19199_v6, 16  ;;  %v6757_v7 = vshll.u32 %v19199_v6, 16 }
 0xc53   :  { %v19225_v42 = vsel %vm17823_vm7, %v6529_v45, %v6536_v25  ;;  %v6567_v33 = vrot.slane %v6565_v9, 7  ;;  %6590 = vst [vmem:[#allocation3 + $0x8] sm:$0xff] %v19219_v1  ;;  %v6597_v58 = vsel %vm18434_vm10, %v6539_v53, %v6596_v24  ;;  %v6763_v48 = vshll.u32 %v19195_v40, 16  ;;  %v16326_v9 = vld [vmem:[#allocation19 + $0x600] ss:$16 sps:$4 sm:$0xff]  }
 0xc54   :  { %v6553_v52 = vor.u32 %v6551_v8, %v6550_v51  ;;  %v6563_v29 = vrot.slane %v6550_v51, 4  ;;  %6598 = vst [vmem:[#allocation3 + $0x28] sm:$0x11] %v6597_v58  ;;  %v6756_v18 = vrot.slane %v6754_v19, 4  ;;  %v6759_v38 = vrot.slane %v6757_v7, 5 }
 0xc55   :  { %v6570_v20 = vor.u32 %v6568_v3, %v6567_v33  ;;  %v6573_v44 = vrot.slane %v6567_v33, 4  ;;  %v6765_v43 = vrot.slane %v6763_v48, 5  ;;  %v6781_v26 = vshrl.u32 %v19195_v40, 16  ;;  %v16329_v3 = vld [vmem:[#allocation19 + $0x608] ss:$16 sps:$4 sm:$0xff]  }
 0xc56   :  { %v19234_v4 = vsel %vm18487_vm3, %v6553_v52, %v6602_v37  ;;  %v19236_v54 = vld [vmem:[#allocation3 + $0x20] sm:$0x11]  ;;  %v6760_v21 = vor.u32 %v6759_v38, %v6756_v18  ;;  %v6802_v56 = vshrl.u32 %v19210_v12, 16  ;;  %v6805_v47 = vshll.u32 %v19210_v12, 16  ;;  %v16334_v58 = vld [vmem:[#allocation19 + $0x624] ss:$16 sps:$4 sm:$0xff]  }
 0xc57   :  { %v19242_v27 = vsel %vm17823_vm7, %v6563_v29, %v6570_v20  ;;  %6604 = vst [vmem:[#allocation3 + $0x38] sm:$0xff] %v19234_v4  ;;  %v6611_v10 = vsel %vm18434_vm10, %v6573_v44, %v6610_v50  ;;  %v6783_v5 = vrot.slane %v6781_v26, 4  ;;  %v6787_v60 = vshll.u32 %v19236_v54, 16  ;;  %v6751_v41 = vld [vmem:[#allocation3 + $0x50] sm:$0x11] }
 0xc58   :  { %6612 = vst [vmem:[#allocation3 + $0x58] sm:$0x11] %v6611_v10  ;;  %v6761_v31 = vrot.slane %v6760_v21, 4  ;;  %v6804_v17 = vrot.slane %v6802_v56, 4  ;;  %v6807_v62 = vrot.slane %v6805_v47, 5  ;;  %v6811_v34 = vshll.u32 %v19205_v61, 16 }
 0xc59   :  { %v6784_v32 = vor.u32 %v6783_v5, %v6765_v43  ;;  %v6789_v2 = vrot.slane %v6787_v60, 5  ;;  %v6829_v23 = vshrl.u32 %v19205_v61, 16  ;;  %v6835_v46 = vshll.u32 %v6751_v41, 16  ;;  %v16337_v48 = vld [vmem:[#allocation19 + $0x62c] ss:$16 sps:$4 sm:$0xff]  }
 0xc5a   :  { %v6766_v55 = vsel %vm17867_vm11, %v6761_v31, %v6765_v43  ;;  %v6808_v28 = vor.u32 %v6807_v62, %v6804_v17  ;;  %v6813_v15 = vrot.slane %v6811_v34, 5  ;;  %v6768_v36 = vshrl.u32 %v19219_v1, 16  ;;  %v16332_v56 = vld [vmem:[#allocation19 + $0x620] ss:$16 sps:$4 sm:$0xff]   ;;  %v16335_v41 = vld [vmem:[#allocation19 + $0x628] ss:$16 sps:$4 sm:$0xff]  }
 0xc5b   :  { %v6785_v16 = vrot.slane %v6784_v32, 4  ;;  %v6831_v30 = vrot.slane %v6829_v23, 4  ;;  %v6837_v49 = vrot.slane %v6835_v46, 5  ;;  %v6750_v22 = vld [vmem:[#allocation3 + $0x28] sm:$0x11]  ;;  %v6771_v57 = vshll.u32 %v19219_v1, 16 }
 0xc5c   :  { %v6809_v45 = vrot.slane %v6808_v28, 4  ;;  %v6770_v14 = vrot.slane %v6768_v36, 4  ;;  %v6777_v8 = vshll.u32 %v19225_v42, 16  ;;  %v6791_v25 = vshrl.u32 %v19225_v42, 16  ;;  %v16340_v31 = vld [vmem:[#allocation19 + $0x644] ss:$16 sps:$4 sm:$0xff]  }
 0xc5d   :  { %v6790_v53 = vsel %vm17867_vm11, %v6785_v16, %v6789_v2  ;;  %v6832_v63 = vor.u32 %v6831_v30, %v6813_v15  ;;  %v6773_v51 = vrot.slane %v6771_v57, 5  ;;  %v6797_v24 = vshll.u32 %v6750_v22, 16  ;;  %v16343_v32 = vld [vmem:[#allocation19 + $0x64c] ss:$16 sps:$4 sm:$0xff]   ;;  %v16338_v22 = vld [vmem:[#allocation19 + $0x640] ss:$16 sps:$4 sm:$0xff]  }
 0xc5e   :  { %v13425_v19 = vcombine.low %v6766_v55, %v6790_v53  ;;  %v13426_v7 = vcombine.high %v6766_v55, %v6790_v53  ;;  %v6814_v33 = vsel %vm17867_vm11, %v6809_v45, %v6813_v15  ;;  %v6779_v52 = vrot.slane %v6777_v8, 5  ;;  %v16341_v57 = vld [vmem:[#allocation19 + $0x648] ss:$16 sps:$4 sm:$0xff]  }
 0xc5f   :  { %v6833_v29 = vrot.slane %v6832_v63, 4  ;;  %v6774_v18 = vor.u32 %v6773_v51, %v6770_v14  ;;  %v6793_v38 = vrot.slane %v6791_v25, 4  ;;  %v6799_v20 = vrot.slane %v6797_v24, 5  ;;  %v6752_v44 = vld [vmem:[#allocation3 + $0x58] sm:$0x11] }
 0xc60   :  { %7682 = vmatprep.mubr.bf16.mxu0 %v13426_v7  ;;  %7788 = vmatprep.mubr.bf16.mxu1 %v13426_v7  ;;  %v6816_v37 = vshrl.u32 %v19234_v4, 16  ;;  %v6819_v43 = vshll.u32 %v19234_v4, 16  ;;  %v6825_v26 = vshll.u32 %v19242_v27, 16  ;;  %v6839_v50 = vshrl.u32 %v19242_v27, 16  ;;  %v16346_v63 = vld [vmem:[#allocation19 + $0x664] ss:$16 sps:$4 sm:$0xff]  }
 0xc61   :  { %7683 = vmatmul.mubr.bf16.vlgmr.msra.gmra.mrb[36].mxu0 %v13425_v19  ;;  %7789 = vmatmul.mubr.bf16.vlgmr.msra.gmra.mrb[40].mxu1 %v13425_v19  ;;  %v6838_v21 = vsel %vm17867_vm11, %v6833_v29, %v6837_v49  ;;  %v6775_v47 = vrot.slane %v6774_v18, 4  ;;  %v6794_v10 = vor.u32 %v6793_v38, %v6779_v52  ;;  %v6845_v5 = vshll.u32 %v6752_v44, 16  ;;  %v16349_v51 = vld [vmem:[#allocation19 + $0x66c] ss:$16 sps:$4 sm:$0xff]   ;;  %v16347_v7 = vld [vmem:[#allocation19 + $0x668] ss:$16 sps:$4 sm:$0xff]  }
 0xc62   :  { %7704 = vmatpush1.bf16.msra.mxu0 %v16326_v9  ;;  %7810 = vmatpush1.bf16.msra.mxu1 %v16329_v3  ;;  %v13430_v60 = vcombine.high %v6814_v33, %v6838_v21  ;;  %v13429_v17 = vcombine.low %v6814_v33, %v6838_v21  ;;  %v6818_v62 = vrot.slane %v6816_v37, 4  ;;  %v6821_v34 = vrot.slane %v6819_v43, 5  ;;  %v16353_v29 = vld [vmem:[#allocation19 + $0x688] ss:$16 sps:$4 sm:$0xff]   ;;  %v16358_v18 = vld [vmem:[#allocation19 + $0x6a4] ss:$16 sps:$4 sm:$0xff]  }
 0xc63   :  { %7705 = vmatprep.subr.bf16.mxu0 %v16334_v58  ;;  %7811 = vmatprep.subr.bf16.mxu1 %v16337_v48  ;;  %v6780_v2 = vsel %vm17867_vm11, %v6775_v47, %v6779_v52  ;;  %v6795_v23 = vrot.slane %v6794_v10, 4  ;;  %v6827_v46 = vrot.slane %v6825_v26, 5  ;;  %v6841_v55 = vrot.slane %v6839_v50, 4  ;;  %v16355_v48 = vld [vmem:[#allocation19 + $0x68c] ss:$16 sps:$4 sm:$0xff]  }
 0xc64   :  { %7692 = vmatprep.mubr.bf16.mxu0 %v13430_v60  ;;  %7798 = vmatprep.mubr.bf16.mxu1 %v13430_v60  ;;  %v6822_v28 = vor.u32 %v6821_v34, %v6818_v62  ;;  %v6847_v15 = vrot.slane %v6845_v5, 5  ;;  %v19272_v30 = vcombine.high %v19210_v12, %v19205_v61  ;;  %v19276_v49 = vcombine.low %v19210_v12, %v19205_v61  ;;  %v16350_v52 = vld [vmem:[#allocation19 + $0x680] ss:$16 sps:$4 sm:$0xff]   ;;  %v16361_v38 = vld [vmem:[#allocation19 + $0x6ac] ss:$16 sps:$4 sm:$0xff]  }
 0xc65   :  { %v6800_v36 = vsel %vm17867_vm11, %v6795_v23, %v6799_v20  ;;  %v6842_v16 = vor.u32 %v6841_v55, %v6827_v46  ;;  %v19282_v25 = vcombine.high %v19219_v1, %v19225_v42  ;;  %v19286_v9 = vcombine.low %v19219_v1, %v19225_v42  ;;  %v16344_v1 = vld [vmem:[#allocation19 + $0x660] ss:$16 sps:$4 sm:$0xff]   ;;  %v16359_v44 = vld [vmem:[#allocation19 + $0x6a8] ss:$16 sps:$4 sm:$0xff]   ;;  %v16364_v37 = vld [vmem:[#allocation19 + $0x6c4] ss:$16 sps:$4 sm:$0xff]  }
 0xc66   :  { %7706 = vmatpush1.bf16.msra.mxu0 %v16332_v56  ;;  %7812 = vmatpush1.bf16.msra.mxu1 %v16335_v41  ;;  %v19278_v45 = vcombine.low %v6780_v2, %v6800_v36  ;;  %v13428_v14 = vcombine.high %v6780_v2, %v6800_v36  ;;  %v6823_v8 = vrot.slane %v6822_v28, 4  ;;  %v19290_v12 = vcombine.high %v19234_v4, %v19242_v27  ;;  %v16356_v20 = vld [vmem:[#allocation19 + $0x6a0] ss:$16 sps:$4 sm:$0xff]   ;;  %v16367_v43 = vld [vmem:[#allocation19 + $0x6cc] ss:$16 sps:$4 sm:$0xff]  }
 0xc67   :  { %7707 = vmatprep.subr.bf16.mxu0 %v16340_v31  ;;  %7813 = vmatprep.subr.bf16.mxu1 %v16343_v32  ;;  %v6843_v53 = vrot.slane %v6842_v16, 4  ;;  %v19294_v3 = vcombine.low %v19234_v4, %v19242_v27  ;;  %v16352_v4 = vld [vmem:[#allocation19 + $0x684] ss:$16 sps:$4 sm:$0xff]   ;;  %v16362_v26 = vld [vmem:[#allocation19 + $0x6c0] ss:$16 sps:$4 sm:$0xff]  }
 0xc68   :  { %v6828_v24 = vsel %vm17867_vm11, %v6823_v8, %v6827_v46  ;;  %v16365_v50 = vld [vmem:[#allocation19 + $0x6c8] ss:$16 sps:$4 sm:$0xff]   ;;  %v16370_v21 = vld [vmem:[#allocation19 + $0x6e4] ss:$16 sps:$4 sm:$0xff]   ;;  %v16373_v56 = vld [vmem:[#allocation19 + $0x6ec] ss:$16 sps:$4 sm:$0xff]  }
 0xc69   :  { %7693 = vmatmul.mubr.bf16.gmra.mrb[40].mxu0 %v13429_v17  ;;  %7799 = vmatmul.mubr.bf16.gmra.mrb[44].mxu1 %v13429_v17  ;;  %v6848_v19 = vsel %vm17867_vm11, %v6843_v53, %v6847_v15  ;;  %v16368_v47 = vld [vmem:[#allocation19 + $0x6e0] ss:$16 sps:$4 sm:$0xff]   ;;  %v16371_v10 = vld [vmem:[#allocation19 + $0x6e8] ss:$16 sps:$4 sm:$0xff]   ;;  %v16376_v5 = vld [vmem:[#allocation19 + $0x704] ss:$16 sps:$4 sm:$0xff]  }
 0xc6a   :  { %7708 = vmatpush1.bf16.msra.mxu0 %v16338_v22  ;;  %7814 = vmatpush1.bf16.msra.mxu1 %v16341_v57  ;;  %v19300_v33 = vcombine.high %v6828_v24, %v6848_v19  ;;  %v19302_v58 = vcombine.low %v6828_v24, %v6848_v19  ;;  %v16379_v60 = vld [vmem:[#allocation19 + $0x70c] ss:$16 sps:$4 sm:$0xff]   ;;  %v16374_v41 = vld [vmem:[#allocation19 + $0x700] ss:$16 sps:$4 sm:$0xff]   ;;  %v16377_v31 = vld [vmem:[#allocation19 + $0x708] ss:$16 sps:$4 sm:$0xff]  }
 0xc6b   :  { %7735 = vmatprep.mubr.bf16.mxu0 %v13428_v14  ;;  %7841 = vmatprep.mubr.bf16.mxu1 %v13428_v14  ;;  %v16382_v17 = vld [vmem:[#allocation19 + $0x724] ss:$16 sps:$4 sm:$0xff]   ;;  %v16385_v62 = vld [vmem:[#allocation19 + $0x72c] ss:$16 sps:$4 sm:$0xff]   ;;  %v16380_v34 = vld [vmem:[#allocation19 + $0x720] ss:$16 sps:$4 sm:$0xff]  }
 0xc6c   :  { %7709 = vmatprep.subr.bf16.mxu0 %v16346_v63  ;;  %7815 = vmatprep.subr.bf16.mxu1 %v16349_v51  ;;  %v16383_v32 = vld [vmem:[#allocation19 + $0x728] ss:$16 sps:$4 sm:$0xff]   ;;  %v16388_v2 = vld [vmem:[#allocation19 + $0x744] ss:$16 sps:$4 sm:$0xff]   ;;  %v16391_v23 = vld [vmem:[#allocation19 + $0x74c] ss:$16 sps:$4 sm:$0xff]  }
 0xc6d   :  { %v16386_v46 = vld [vmem:[#allocation19 + $0x740] ss:$16 sps:$4 sm:$0xff]   ;;  %v16389_v55 = vld [vmem:[#allocation19 + $0x748] ss:$16 sps:$4 sm:$0xff]   ;;  %v16394_v28 = vld [vmem:[#allocation19 + $0x764] ss:$16 sps:$4 sm:$0xff]  }
 0xc6e   :  { %7710 = vmatpush1.bf16.msra.mxu0 %v16344_v1  ;;  %7816 = vmatpush1.bf16.msra.mxu1 %v16347_v7  ;;  %v16397_v15 = vld [vmem:[#allocation19 + $0x76c] ss:$16 sps:$4 sm:$0xff]   ;;  %v16392_v36 = vld [vmem:[#allocation19 + $0x760] ss:$16 sps:$4 sm:$0xff]   ;;  %v16395_v16 = vld [vmem:[#allocation19 + $0x768] ss:$16 sps:$4 sm:$0xff]  }
 0xc6f   :  { %7711 = vmatprep.subr.bf16.mxu0 %v16352_v4  ;;  %7817 = vmatprep.subr.bf16.mxu1 %v16355_v48  ;;  %v16400_v22 = vld [vmem:[#allocation19 + $0x784] ss:$16 sps:$4 sm:$0xff]   ;;  %v16403_v57 = vld [vmem:[#allocation19 + $0x78c] ss:$16 sps:$4 sm:$0xff]   ;;  %v16398_v14 = vld [vmem:[#allocation19 + $0x780] ss:$16 sps:$4 sm:$0xff]  }
 0xc70   :  { %v16401_v8 = vld [vmem:[#allocation19 + $0x788] ss:$16 sps:$4 sm:$0xff]   ;;  %v16406_v53 = vld [vmem:[#allocation19 + $0x7a4] ss:$16 sps:$4 sm:$0xff]   ;;  %v16409_v63 = vld [vmem:[#allocation19 + $0x7ac] ss:$16 sps:$4 sm:$0xff]  }
 0xc71   :  { %v16404_v51 = vld [vmem:[#allocation19 + $0x7a0] ss:$16 sps:$4 sm:$0xff]   ;;  %v16407_v24 = vld [vmem:[#allocation19 + $0x7a8] ss:$16 sps:$4 sm:$0xff]   ;;  %v16412_v19 = vld [vmem:[#allocation19 + $0x7c4] ss:$16 sps:$4 sm:$0xff]  }
 0xc72   :  { %7712 = vmatpush1.bf16.msra.mxu0 %v16350_v52  ;;  %7818 = vmatpush1.bf16.msra.mxu1 %v16353_v29  ;;  %v16415_v1 = vld [vmem:[#allocation19 + $0x7cc] ss:$16 sps:$4 sm:$0xff]   ;;  %v16410_v7 = vld [vmem:[#allocation19 + $0x7c0] ss:$16 sps:$4 sm:$0xff]   ;;  %v16413_v4 = vld [vmem:[#allocation19 + $0x7c8] ss:$16 sps:$4 sm:$0xff]  }
 0xc73   :  { %7713 = vmatprep.subr.bf16.mxu0 %v16358_v18  ;;  %7819 = vmatprep.subr.bf16.mxu1 %v16361_v38  ;;  %v16418_v48 = vld [vmem:[#allocation19 + $0x7e4] ss:$16 sps:$4 sm:$0xff]   ;;  %v16421_v52 = vld [vmem:[#allocation19 + $0x7ec] ss:$16 sps:$4 sm:$0xff]   ;;  %v16416_v29 = vld [vmem:[#allocation19 + $0x7e0] ss:$16 sps:$4 sm:$0xff]  }
 0xc74   :  { %v16419_v18 = vld [vmem:[#allocation19 + $0x7e8] ss:$16 sps:$4 sm:$0xff]   ;;  %v16424_v38 = vld [vmem:[#allocation19 + $0x4] ss:$16 sps:$4 sm:$0xff]  }
 0xc76   :  { %7714 = vmatpush1.bf16.msra.mxu0 %v16356_v20  ;;  %7820 = vmatpush1.bf16.msra.mxu1 %v16359_v44  ;;  %v16427_v20 = vld [vmem:[#allocation19 + $0xc] ss:$16 sps:$4 sm:$0xff]   ;;  %v16422_v44 = vld [vmem:[#allocation19] ss:$16 sps:$4 sm:$0xff]  }
 0xc77   :  { %7715 = vmatprep.subr.bf16.mxu0 %v16364_v37  ;;  %7821 = vmatprep.subr.bf16.mxu1 %v16367_v43  ;;  %v16425_v37 = vld [vmem:[#allocation19 + $0x8] ss:$16 sps:$4 sm:$0xff]   ;;  %v16430_v43 = vld [vmem:[#allocation19 + $0x24] ss:$16 sps:$4 sm:$0xff]  }
 0xc7a   :  { %7716 = vmatpush1.bf16.msra.mxu0 %v16362_v26  ;;  %7822 = vmatpush1.bf16.msra.mxu1 %v16365_v50  ;;  %v16433_v26 = vld [vmem:[#allocation19 + $0x2c] ss:$16 sps:$4 sm:$0xff]   ;;  %v16428_v50 = vld [vmem:[#allocation19 + $0x20] ss:$16 sps:$4 sm:$0xff]  }
 0xc7b   :  { %7717 = vmatprep.subr.bf16.mxu0 %v16370_v21  ;;  %7823 = vmatprep.subr.bf16.mxu1 %v16373_v56  ;;  %v16431_v21 = vld [vmem:[#allocation19 + $0x28] ss:$16 sps:$4 sm:$0xff]   ;;  %v16436_v56 = vld [vmem:[#allocation19 + $0x44] ss:$16 sps:$4 sm:$0xff]  }
 0xc7e   :  { %7718 = vmatpush1.bf16.msra.mxu0 %v16368_v47  ;;  %7824 = vmatpush1.bf16.msra.mxu1 %v16371_v10  ;;  %v16439_v47 = vld [vmem:[#allocation19 + $0x4c] ss:$16 sps:$4 sm:$0xff]   ;;  %v16434_v10 = vld [vmem:[#allocation19 + $0x40] ss:$16 sps:$4 sm:$0xff]  }
 0xc7f   :  { %7719 = vmatprep.subr.bf16.mxu0 %v16376_v5  ;;  %7825 = vmatprep.subr.bf16.mxu1 %v16379_v60  ;;  %v16437_v5 = vld [vmem:[#allocation19 + $0x48] ss:$16 sps:$4 sm:$0xff]   ;;  %v16442_v60 = vld [vmem:[#allocation19 + $0x64] ss:$16 sps:$4 sm:$0xff]  }
 0xc82   :  { %7720 = vmatpush1.bf16.msra.mxu0 %v16374_v41  ;;  %7826 = vmatpush1.bf16.msra.mxu1 %v16377_v31  ;;  %v16445_v41 = vld [vmem:[#allocation19 + $0x6c] ss:$16 sps:$4 sm:$0xff]   ;;  %v16443_v31 = vld [vmem:[#allocation19 + $0x68] ss:$16 sps:$4 sm:$0xff]  }
 0xc83   :  { %7721 = vmatprep.subr.bf16.mxu0 %v16382_v17  ;;  %7827 = vmatprep.subr.bf16.mxu1 %v16385_v62  ;;  %v16448_v17 = vld [vmem:[#allocation19 + $0x84] ss:$16 sps:$4 sm:$0xff]   ;;  %v16451_v62 = vld [vmem:[#allocation19 + $0x8c] ss:$16 sps:$4 sm:$0xff]  }
 0xc86   :  { %7722 = vmatpush1.bf16.msra.mxu0 %v16380_v34  ;;  %7828 = vmatpush1.bf16.msra.mxu1 %v16383_v32  ;;  %v16446_v34 = vld [vmem:[#allocation19 + $0x80] ss:$16 sps:$4 sm:$0xff]   ;;  %v16449_v32 = vld [vmem:[#allocation19 + $0x88] ss:$16 sps:$4 sm:$0xff]  }
 0xc87   :  { %7723 = vmatprep.subr.bf16.mxu0 %v16388_v2  ;;  %7829 = vmatprep.subr.bf16.mxu1 %v16391_v23  ;;  %v16454_v2 = vld [vmem:[#allocation19 + $0xa4] ss:$16 sps:$4 sm:$0xff]   ;;  %v16457_v23 = vld [vmem:[#allocation19 + $0xac] ss:$16 sps:$4 sm:$0xff]  }
 0xc8a   :  { %7724 = vmatpush1.bf16.msra.mxu0 %v16386_v46  ;;  %7830 = vmatpush1.bf16.msra.mxu1 %v16389_v55  ;;  %v16455_v46 = vld [vmem:[#allocation19 + $0xa8] ss:$16 sps:$4 sm:$0xff]   ;;  %v16460_v55 = vld [vmem:[#allocation19 + $0xc4] ss:$16 sps:$4 sm:$0xff]  }
 0xc8b   :  { %7725 = vmatprep.subr.bf16.mxu0 %v16394_v28  ;;  %7831 = vmatprep.subr.bf16.mxu1 %v16397_v15  ;;  %v16463_v28 = vld [vmem:[#allocation19 + $0xcc] ss:$16 sps:$4 sm:$0xff]   ;;  %v16458_v15 = vld [vmem:[#allocation19 + $0xc0] ss:$16 sps:$4 sm:$0xff]  }
 0xc8e   :  { %7726 = vmatpush1.bf16.msra.mxu0 %v16392_v36  ;;  %7832 = vmatpush1.bf16.msra.mxu1 %v16395_v16  ;;  %v16461_v36 = vld [vmem:[#allocation19 + $0xc8] ss:$16 sps:$4 sm:$0xff]   ;;  %v16466_v16 = vld [vmem:[#allocation19 + $0xe4] ss:$16 sps:$4 sm:$0xff]  }
 0xc8f   :  { %7727 = vmatprep.subr.bf16.mxu0 %v16400_v22  ;;  %7833 = vmatprep.subr.bf16.mxu1 %v16403_v57  ;;  %v16469_v22 = vld [vmem:[#allocation19 + $0xec] ss:$16 sps:$4 sm:$0xff]   ;;  %v16464_v57 = vld [vmem:[#allocation19 + $0xe0] ss:$16 sps:$4 sm:$0xff]  }
 0xc92   :  { %7728 = vmatpush1.bf16.msra.mxu0 %v16398_v14  ;;  %7834 = vmatpush1.bf16.msra.mxu1 %v16401_v8  ;;  %v16467_v14 = vld [vmem:[#allocation19 + $0xe8] ss:$16 sps:$4 sm:$0xff]   ;;  %v16472_v8 = vld [vmem:[#allocation19 + $0x104] ss:$16 sps:$4 sm:$0xff]  }
 0xc93   :  { %7729 = vmatprep.subr.bf16.mxu0 %v16406_v53  ;;  %7835 = vmatprep.subr.bf16.mxu1 %v16409_v63  ;;  %v16475_v53 = vld [vmem:[#allocation19 + $0x10c] ss:$16 sps:$4 sm:$0xff]   ;;  %v16470_v63 = vld [vmem:[#allocation19 + $0x100] ss:$16 sps:$4 sm:$0xff]  }
 0xc96   :  { %7730 = vmatpush1.bf16.msra.mxu0 %v16404_v51  ;;  %7836 = vmatpush1.bf16.msra.mxu1 %v16407_v24  ;;  %v16473_v51 = vld [vmem:[#allocation19 + $0x108] ss:$16 sps:$4 sm:$0xff]   ;;  %v16478_v24 = vld [vmem:[#allocation19 + $0x124] ss:$16 sps:$4 sm:$0xff]  }
 0xc97   :  { %7731 = vmatprep.subr.bf16.mxu0 %v16412_v19  ;;  %7837 = vmatprep.subr.bf16.mxu1 %v16415_v1  ;;  %v16481_v19 = vld [vmem:[#allocation19 + $0x12c] ss:$16 sps:$4 sm:$0xff]   ;;  %v16476_v1 = vld [vmem:[#allocation19 + $0x120] ss:$16 sps:$4 sm:$0xff]  }
 0xc9a   :  { %7732 = vmatpush1.bf16.msra.mxu0 %v16410_v7  ;;  %7838 = vmatpush1.bf16.msra.mxu1 %v16413_v4  ;;  %v16479_v7 = vld [vmem:[#allocation19 + $0x128] ss:$16 sps:$4 sm:$0xff]   ;;  %v16484_v4 = vld [vmem:[#allocation19 + $0x144] ss:$16 sps:$4 sm:$0xff]  }
 0xc9b   :  { %7733 = vmatprep.subr.bf16.mxu0 %v16418_v48  ;;  %7839 = vmatprep.subr.bf16.mxu1 %v16421_v52  ;;  %v16487_v48 = vld [vmem:[#allocation19 + $0x14c] ss:$16 sps:$4 sm:$0xff]   ;;  %v16482_v52 = vld [vmem:[#allocation19 + $0x140] ss:$16 sps:$4 sm:$0xff]  }
 0xc9e   :  { %7734 = vmatpush1.bf16.msra.mxu0 %v16416_v29  ;;  %7840 = vmatpush1.bf16.msra.mxu1 %v16419_v18  ;;  %v16485_v29 = vld [vmem:[#allocation19 + $0x148] ss:$16 sps:$4 sm:$0xff]   ;;  %v16490_v18 = vld [vmem:[#allocation19 + $0x164] ss:$16 sps:$4 sm:$0xff]  }
 0xc9f   :  { %8542 = vmatprep.subr.bf16.mxu0 %v16424_v38  ;;  %8648 = vmatprep.subr.bf16.mxu1 %v16427_v20  ;;  %v16493_v38 = vld [vmem:[#allocation19 + $0x16c] ss:$16 sps:$4 sm:$0xff]   ;;  %v16488_v20 = vld [vmem:[#allocation19 + $0x160] ss:$16 sps:$4 sm:$0xff]  }
 0xca1   :  { %7736 = vmatmul.mubr.bf16.vlgmr.msra.gmra.mrb[36].mxu0 %v19278_v45  ;;  %7842 = vmatmul.mubr.bf16.vlgmr.msra.gmra.mrb[40].mxu1 %v19278_v45  ;;  %v13562_v45 = vcombine.high %v19199_v6, %v19195_v40 }
 0xca2   :  { %7745 = vmatprep.mubr.bf16.mxu0 %v19300_v33  ;;  %7851 = vmatprep.mubr.bf16.mxu1 %v19300_v33  ;;  %v16440_v33 = vld [vmem:[#allocation19 + $0x60] ss:$16 sps:$4 sm:$0xff]  }
 0xca3   :  { %8543 = vmatpush1.bf16.msra.mxu0 %v16422_v44  ;;  %8649 = vmatpush1.bf16.msra.mxu1 %v16425_v37  ;;  %v16491_v44 = vld [vmem:[#allocation19 + $0x168] ss:$16 sps:$4 sm:$0xff]   ;;  %v16496_v37 = vld [vmem:[#allocation19 + $0x184] ss:$16 sps:$4 sm:$0xff]  }
 0xca4   :  { %8544 = vmatprep.subr.bf16.mxu0 %v16430_v43  ;;  %8650 = vmatprep.subr.bf16.mxu1 %v16433_v26  ;;  %v16499_v43 = vld [vmem:[#allocation19 + $0x18c] ss:$16 sps:$4 sm:$0xff]   ;;  %v16494_v26 = vld [vmem:[#allocation19 + $0x180] ss:$16 sps:$4 sm:$0xff]  }
 0xca7   :  { %8545 = vmatpush1.bf16.msra.mxu0 %v16428_v50  ;;  %8651 = vmatpush1.bf16.msra.mxu1 %v16431_v21  ;;  %v16497_v50 = vld [vmem:[#allocation19 + $0x188] ss:$16 sps:$4 sm:$0xff]   ;;  %v16502_v21 = vld [vmem:[#allocation19 + $0x1a4] ss:$16 sps:$4 sm:$0xff]  }
 0xca8   :  { %8546 = vmatprep.subr.bf16.mxu0 %v16436_v56  ;;  %8652 = vmatprep.subr.bf16.mxu1 %v16439_v47  ;;  %v16505_v56 = vld [vmem:[#allocation19 + $0x1ac] ss:$16 sps:$4 sm:$0xff]   ;;  %v16500_v47 = vld [vmem:[#allocation19 + $0x1a0] ss:$16 sps:$4 sm:$0xff]  }
 0xca9   :  { %7746 = vmatmul.mubr.bf16.gmra.mrb[40].mxu0 %v19302_v58  ;;  %7852 = vmatmul.mubr.bf16.gmra.mrb[44].mxu1 %v19302_v58  ;;  %v16452_v58 = vld [vmem:[#allocation19 + $0xa0] ss:$16 sps:$4 sm:$0xff]  }
 0xcaa   :  { %8574 = vmatprep.mubr.bf16.mxu0 %v13562_v45  ;;  %8680 = vmatprep.mubr.bf16.mxu1 %v13562_v45  ;;  %v16511_v45 = vld [vmem:[#allocation19 + $0x1cc] ss:$16 sps:$4 sm:$0xff]  }
 0xcab   :  { %8547 = vmatpush1.bf16.msra.mxu0 %v16434_v10  ;;  %8653 = vmatpush1.bf16.msra.mxu1 %v16437_v5  ;;  %v16503_v10 = vld [vmem:[#allocation19 + $0x1a8] ss:$16 sps:$4 sm:$0xff]   ;;  %v16508_v5 = vld [vmem:[#allocation19 + $0x1c4] ss:$16 sps:$4 sm:$0xff]  }
 0xcac   :  { %8548 = vmatprep.subr.bf16.mxu0 %v16442_v60  ;;  %8654 = vmatprep.subr.bf16.mxu1 %v16445_v41  ;;  %v16506_v60 = vld [vmem:[#allocation19 + $0x1c0] ss:$16 sps:$4 sm:$0xff]   ;;  %v16509_v41 = vld [vmem:[#allocation19 + $0x1c8] ss:$16 sps:$4 sm:$0xff]  }
 0xcaf   :  { %8549 = vmatpush1.bf16.msra.mxu0 %v16440_v33  ;;  %8655 = vmatpush1.bf16.msra.mxu1 %v16443_v31  ;;  %v16514_v33 = vld [vmem:[#allocation19 + $0x1e4] ss:$16 sps:$4 sm:$0xff]   ;;  %v16517_v31 = vld [vmem:[#allocation19 + $0x1ec] ss:$16 sps:$4 sm:$0xff]  }
 0xcb0   :  { %8550 = vmatprep.subr.bf16.mxu0 %v16448_v17  ;;  %8656 = vmatprep.subr.bf16.mxu1 %v16451_v62  ;;  %v16512_v17 = vld [vmem:[#allocation19 + $0x1e0] ss:$16 sps:$4 sm:$0xff]   ;;  %v16515_v62 = vld [vmem:[#allocation19 + $0x1e8] ss:$16 sps:$4 sm:$0xff]  }
 0xcb3   :  { %8551 = vmatpush1.bf16.msra.mxu0 %v16446_v34  ;;  %8657 = vmatpush1.bf16.msra.mxu1 %v16449_v32  ;;  %v16520_v34 = vld [vmem:[#allocation19 + $0x204] ss:$16 sps:$4 sm:$0xff]   ;;  %v16523_v32 = vld [vmem:[#allocation19 + $0x20c] ss:$16 sps:$4 sm:$0xff]  }
 0xcb4   :  { %8552 = vmatprep.subr.bf16.mxu0 %v16454_v2  ;;  %8658 = vmatprep.subr.bf16.mxu1 %v16457_v23  ;;  %v16518_v2 = vld [vmem:[#allocation19 + $0x200] ss:$16 sps:$4 sm:$0xff]   ;;  %v13561_v23 = vcombine.low %v19199_v6, %v19195_v40 }
 0xcb5   :  { %v16530_v6 = vld [vmem:[#allocation19 + $0x240] ss:$16 sps:$4 sm:$0xff]  }
 0xcb7   :  { %8553 = vmatpush1.bf16.msra.mxu0 %v16452_v58  ;;  %8659 = vmatpush1.bf16.msra.mxu1 %v16455_v46  ;;  %v16521_v58 = vld [vmem:[#allocation19 + $0x208] ss:$16 sps:$4 sm:$0xff]   ;;  %v16526_v46 = vld [vmem:[#allocation19 + $0x224] ss:$16 sps:$4 sm:$0xff]  }
 0xcb8   :  { %8554 = vmatprep.subr.bf16.mxu0 %v16460_v55  ;;  %8660 = vmatprep.subr.bf16.mxu1 %v16463_v28  ;;  %v16529_v55 = vld [vmem:[#allocation19 + $0x22c] ss:$16 sps:$4 sm:$0xff]   ;;  %v16524_v28 = vld [vmem:[#allocation19 + $0x220] ss:$16 sps:$4 sm:$0xff]  }
 0xcbb   :  { %8555 = vmatpush1.bf16.msra.mxu0 %v16458_v15  ;;  %8661 = vmatpush1.bf16.msra.mxu1 %v16461_v36  ;;  %v16527_v15 = vld [vmem:[#allocation19 + $0x228] ss:$16 sps:$4 sm:$0xff]   ;;  %v16532_v36 = vld [vmem:[#allocation19 + $0x244] ss:$16 sps:$4 sm:$0xff]  }
 0xcbc   :  { %8556 = vmatprep.subr.bf16.mxu0 %v16466_v16  ;;  %8662 = vmatprep.subr.bf16.mxu1 %v16469_v22  ;;  %v16535_v16 = vld [vmem:[#allocation19 + $0x24c] ss:$16 sps:$4 sm:$0xff]   ;;  %v16533_v22 = vld [vmem:[#allocation19 + $0x248] ss:$16 sps:$4 sm:$0xff]  }
 0xcbf   :  { %8557 = vmatpush1.bf16.msra.mxu0 %v16464_v57  ;;  %8663 = vmatpush1.bf16.msra.mxu1 %v16467_v14  ;;  %v16538_v57 = vld [vmem:[#allocation19 + $0x264] ss:$16 sps:$4 sm:$0xff]   ;;  %v16541_v14 = vld [vmem:[#allocation19 + $0x26c] ss:$16 sps:$4 sm:$0xff]  }
 0xcc0   :  { %8558 = vmatprep.subr.bf16.mxu0 %v16472_v8  ;;  %8664 = vmatprep.subr.bf16.mxu1 %v16475_v53  ;;  %v16539_v8 = vld [vmem:[#allocation19 + $0x268] ss:$16 sps:$4 sm:$0xff]   ;;  %v16544_v53 = vld [vmem:[#allocation19 + $0x284] ss:$16 sps:$4 sm:$0xff]  }
 0xcc3   :  { %8559 = vmatpush1.bf16.msra.mxu0 %v16470_v63  ;;  %8665 = vmatpush1.bf16.msra.mxu1 %v16473_v51  ;;  %v16547_v63 = vld [vmem:[#allocation19 + $0x28c] ss:$16 sps:$4 sm:$0xff]   ;;  %v16542_v51 = vld [vmem:[#allocation19 + $0x280] ss:$16 sps:$4 sm:$0xff]  }
 0xcc4   :  { %8560 = vmatprep.subr.bf16.mxu0 %v16478_v24  ;;  %8666 = vmatprep.subr.bf16.mxu1 %v16481_v19  ;;  %v16545_v24 = vld [vmem:[#allocation19 + $0x288] ss:$16 sps:$4 sm:$0xff]   ;;  %v16550_v19 = vld [vmem:[#allocation19 + $0x2a4] ss:$16 sps:$4 sm:$0xff]  }
 0xcc7   :  { %8561 = vmatpush1.bf16.msra.mxu0 %v16476_v1  ;;  %8667 = vmatpush1.bf16.msra.mxu1 %v16479_v7  ;;  %v16548_v1 = vld [vmem:[#allocation19 + $0x2a0] ss:$16 sps:$4 sm:$0xff]   ;;  %v16551_v7 = vld [vmem:[#allocation19 + $0x2a8] ss:$16 sps:$4 sm:$0xff]  }
 0xcc8   :  { %8562 = vmatprep.subr.bf16.mxu0 %v16484_v4  ;;  %8668 = vmatprep.subr.bf16.mxu1 %v16487_v48  ;;  %v16556_v4 = vld [vmem:[#allocation19 + $0x2c4] ss:$16 sps:$4 sm:$0xff]   ;;  %v16554_v48 = vld [vmem:[#allocation19 + $0x2c0] ss:$16 sps:$4 sm:$0xff]  }
 0xccb   :  { %8563 = vmatpush1.bf16.msra.mxu0 %v16482_v52  ;;  %8669 = vmatpush1.bf16.msra.mxu1 %v16485_v29  ;;  %v16557_v52 = vld [vmem:[#allocation19 + $0x2c8] ss:$16 sps:$4 sm:$0xff]   ;;  %v16562_v29 = vld [vmem:[#allocation19 + $0x2e4] ss:$16 sps:$4 sm:$0xff]  }
 0xccc   :  { %8564 = vmatprep.subr.bf16.mxu0 %v16490_v18  ;;  %8670 = vmatprep.subr.bf16.mxu1 %v16493_v38  ;;  %v16565_v18 = vld [vmem:[#allocation19 + $0x2ec] ss:$16 sps:$4 sm:$0xff]   ;;  %v16560_v38 = vld [vmem:[#allocation19 + $0x2e0] ss:$16 sps:$4 sm:$0xff]  }
 0xccf   :  { %8565 = vmatpush1.bf16.msra.mxu0 %v16488_v20  ;;  %8671 = vmatpush1.bf16.msra.mxu1 %v16491_v44  ;;  %v16563_v20 = vld [vmem:[#allocation19 + $0x2e8] ss:$16 sps:$4 sm:$0xff]   ;;  %v16568_v44 = vld [vmem:[#allocation19 + $0x304] ss:$16 sps:$4 sm:$0xff]  }
 0xcd0   :  { %8566 = vmatprep.subr.bf16.mxu0 %v16496_v37  ;;  %8672 = vmatprep.subr.bf16.mxu1 %v16499_v43  ;;  %v16571_v37 = vld [vmem:[#allocation19 + $0x30c] ss:$16 sps:$4 sm:$0xff]   ;;  %v16566_v43 = vld [vmem:[#allocation19 + $0x300] ss:$16 sps:$4 sm:$0xff]  }
 0xcd3   :  { %8567 = vmatpush1.bf16.msra.mxu0 %v16494_v26  ;;  %8673 = vmatpush1.bf16.msra.mxu1 %v16497_v50  ;;  %v16569_v26 = vld [vmem:[#allocation19 + $0x308] ss:$16 sps:$4 sm:$0xff]   ;;  %v16574_v50 = vld [vmem:[#allocation19 + $0x324] ss:$16 sps:$4 sm:$0xff]  }
 0xcd4   :  { %8568 = vmatprep.subr.bf16.mxu0 %v16502_v21  ;;  %8674 = vmatprep.subr.bf16.mxu1 %v16505_v56  ;;  %v16577_v21 = vld [vmem:[#allocation19 + $0x32c] ss:$16 sps:$4 sm:$0xff]   ;;  %v16572_v56 = vld [vmem:[#allocation19 + $0x320] ss:$16 sps:$4 sm:$0xff]  }
 0xcd7   :  { %8569 = vmatpush1.bf16.msra.mxu0 %v16500_v47  ;;  %8675 = vmatpush1.bf16.msra.mxu1 %v16503_v10  ;;  %v16575_v47 = vld [vmem:[#allocation19 + $0x328] ss:$16 sps:$4 sm:$0xff]   ;;  %v16580_v10 = vld [vmem:[#allocation19 + $0x344] ss:$16 sps:$4 sm:$0xff]  }
 0xcd8   :  { %8570 = vmatprep.subr.bf16.mxu0 %v16508_v5  ;;  %8676 = vmatprep.subr.bf16.mxu1 %v16511_v45  ;;  %v16583_v5 = vld [vmem:[#allocation19 + $0x34c] ss:$16 sps:$4 sm:$0xff]   ;;  %v16578_v45 = vld [vmem:[#allocation19 + $0x340] ss:$16 sps:$4 sm:$0xff]  }
 0xcdb   :  { %8571 = vmatpush1.bf16.msra.mxu0 %v16506_v60  ;;  %8677 = vmatpush1.bf16.msra.mxu1 %v16509_v41  ;;  %v16581_v60 = vld [vmem:[#allocation19 + $0x348] ss:$16 sps:$4 sm:$0xff]   ;;  %v16586_v41 = vld [vmem:[#allocation19 + $0x364] ss:$16 sps:$4 sm:$0xff]  }
 0xcdc   :  { %8572 = vmatprep.subr.bf16.mxu0 %v16514_v33  ;;  %8678 = vmatprep.subr.bf16.mxu1 %v16517_v31  ;;  %v16589_v33 = vld [vmem:[#allocation19 + $0x36c] ss:$16 sps:$4 sm:$0xff]   ;;  %v16584_v31 = vld [vmem:[#allocation19 + $0x360] ss:$16 sps:$4 sm:$0xff]  }
 0xcdf   :  { %8573 = vmatpush1.bf16.msra.mxu0 %v16512_v17  ;;  %8679 = vmatpush1.bf16.msra.mxu1 %v16515_v62  ;;  %v16587_v17 = vld [vmem:[#allocation19 + $0x368] ss:$16 sps:$4 sm:$0xff]   ;;  %v16592_v62 = vld [vmem:[#allocation19 + $0x384] ss:$16 sps:$4 sm:$0xff]  }
 0xce0   :  { %8595 = vmatprep.subr.bf16.mxu0 %v16520_v34  ;;  %8701 = vmatprep.subr.bf16.mxu1 %v16523_v32  ;;  %v16595_v34 = vld [vmem:[#allocation19 + $0x38c] ss:$16 sps:$4 sm:$0xff]   ;;  %v16590_v32 = vld [vmem:[#allocation19 + $0x380] ss:$16 sps:$4 sm:$0xff]  }
 0xce2   :  { %8575 = vmatmul.mubr.bf16.vlgmr.msra.gmra.mrb[36].mxu0 %v13561_v23  ;;  %8681 = vmatmul.mubr.bf16.vlgmr.msra.gmra.mrb[40].mxu1 %v13561_v23  ;;  %v16598_v23 = vld [vmem:[#allocation19 + $0x3a4] ss:$16 sps:$4 sm:$0xff]  }
 0xce3   :  { %8584 = vmatprep.mubr.bf16.mxu0 %v19272_v30  ;;  %8596 = vmatpush1.bf16.msra.mxu0 %v16518_v2  ;;  %v16593_v2 = vld [vmem:[#allocation19 + $0x388] ss:$16 sps:$4 sm:$0xff]  }
 0xce4   :  { %8690 = vmatprep.mubr.bf16.mxu1 %v19272_v30  ;;  %8702 = vmatpush1.bf16.msra.mxu1 %v16521_v58  ;;  %v16536_v30 = vld [vmem:[#allocation19 + $0x260] ss:$16 sps:$4 sm:$0xff]   ;;  %v16601_v58 = vld [vmem:[#allocation19 + $0x3ac] ss:$16 sps:$4 sm:$0xff]  }
 0xce5   :  { %8597 = vmatprep.subr.bf16.mxu0 %v16526_v46  ;;  %8703 = vmatprep.subr.bf16.mxu1 %v16529_v55  ;;  %v16596_v46 = vld [vmem:[#allocation19 + $0x3a0] ss:$16 sps:$4 sm:$0xff]   ;;  %v16599_v55 = vld [vmem:[#allocation19 + $0x3a8] ss:$16 sps:$4 sm:$0xff]  }
 0xce7   :  { %8598 = vmatpush1.bf16.msra.mxu0 %v16524_v28  ;;  %v16604_v28 = vld [vmem:[#allocation19 + $0x3c4] ss:$16 sps:$4 sm:$0xff]  }
 0xce8   :  { %8704 = vmatpush1.bf16.msra.mxu1 %v16527_v15  ;;  %8599 = vmatprep.subr.bf16.mxu0 %v16532_v36  ;;  %v16607_v15 = vld [vmem:[#allocation19 + $0x3cc] ss:$16 sps:$4 sm:$0xff]   ;;  %v16602_v36 = vld [vmem:[#allocation19 + $0x3c0] ss:$16 sps:$4 sm:$0xff]  }
 0xce9   :  { %8705 = vmatprep.subr.bf16.mxu1 %v16535_v16  ;;  %v16605_v16 = vld [vmem:[#allocation19 + $0x3c8] ss:$16 sps:$4 sm:$0xff]  }
 0xcea   :  { %8585 = vmatmul.mubr.bf16.gmra.mrb[40].mxu0 %v19276_v49  ;;  %8691 = vmatmul.mubr.bf16.gmra.mrb[44].mxu1 %v19276_v49  ;;  %v16553_v49 = vld [vmem:[#allocation19 + $0x2ac] ss:$16 sps:$4 sm:$0xff]  }
 0xceb   :  { %8600 = vmatpush1.bf16.msra.mxu0 %v16530_v6  ;;  %8627 = vmatprep.mubr.bf16.mxu0 %v19282_v25  ;;  %v16610_v6 = vld [vmem:[#allocation19 + $0x3e4] ss:$16 sps:$4 sm:$0xff]  }
 0xcec   :  { %8706 = vmatpush1.bf16.msra.mxu1 %v16533_v22  ;;  %8733 = vmatprep.mubr.bf16.mxu1 %v19282_v25  ;;  %v16559_v25 = vld [vmem:[#allocation19 + $0x2cc] ss:$16 sps:$4 sm:$0xff]  }
 0xced   :  { %8601 = vmatprep.subr.bf16.mxu0 %v16538_v57  ;;  %8707 = vmatprep.subr.bf16.mxu1 %v16541_v14  ;;  %v16613_v22 = vld [vmem:[#allocation19 + $0x3ec] ss:$16 sps:$4 sm:$0xff]   ;;  %v16608_v57 = vld [vmem:[#allocation19 + $0x3e0] ss:$16 sps:$4 sm:$0xff]   ;;  %v16611_v14 = vld [vmem:[#allocation19 + $0x3e8] ss:$16 sps:$4 sm:$0xff]  }
 0xcef   :  { %8602 = vmatpush1.bf16.msra.mxu0 %v16536_v30  ;;  %v16616_v30 = vld [vmem:[#allocation19 + $0x804] ss:$16 sps:$4 sm:$0xff]  }
 0xcf0   :  { %8708 = vmatpush1.bf16.msra.mxu1 %v16539_v8  ;;  %8603 = vmatprep.subr.bf16.mxu0 %v16544_v53  ;;  %v16619_v8 = vld [vmem:[#allocation19 + $0x80c] ss:$16 sps:$4 sm:$0xff]  }
 0xcf1   :  { %8709 = vmatprep.subr.bf16.mxu1 %v16547_v63  ;;  %v8754_v53 = vld [vmem:[#allocation3] sm:$0xee]  ;;  %v16614_v63 = vld [vmem:[#allocation19 + $0x800] ss:$16 sps:$4 sm:$0xff]  }
 0xcf3   :  { %8604 = vmatpush1.bf16.msra.mxu0 %v16542_v51  ;;  %v8768_v51 = vrot.slane %v19195_v40, 5  ;;  %v16623_v40 = vld [vmem:[#allocation19 + $0x828] ss:$16 sps:$4 sm:$0xff]  }
 0xcf4   :  { %8710 = vmatpush1.bf16.msra.mxu1 %v16545_v24  ;;  %8605 = vmatprep.subr.bf16.mxu0 %v16550_v19  ;;  %v16617_v24 = vld [vmem:[#allocation19 + $0x808] ss:$16 sps:$4 sm:$0xff]   ;;  %v16622_v19 = vld [vmem:[#allocation19 + $0x824] ss:$16 sps:$4 sm:$0xff]  }
 0xcf5   :  { %8711 = vmatprep.subr.bf16.mxu1 %v16553_v49  ;;  %v16625_v49 = vld [vmem:[#allocation19 + $0x82c] ss:$16 sps:$4 sm:$0xff]  }
 0xcf7   :  { %8606 = vmatpush1.bf16.msra.mxu0 %v16548_v1  ;;  %v13697_v1 = vrot.slane %v8754_v53, 9  ;;  %v16688_v53 = vld [vmem:[#allocation19 + $0x984] ss:$16 sps:$4 sm:$0xff]  }
 0xcf8   :  { %8712 = vmatpush1.bf16.msra.mxu1 %v16551_v7  ;;  %8607 = vmatprep.subr.bf16.mxu0 %v16556_v4  ;;  %v8775_v7 = vrot.slane %v19236_v54, 5  ;;  %v16620_v4 = vld [vmem:[#allocation19 + $0x820] ss:$16 sps:$4 sm:$0xff]  }
 0xcf9   :  { %8713 = vmatprep.subr.bf16.mxu1 %v16559_v25  ;;  %v8774_v25 = vrot.slane %v8768_v51, 4 }
 0xcfb   :  { %8608 = vmatpush1.bf16.msra.mxu0 %v16554_v48  ;;  %v16628_v48 = vld [vmem:[#allocation19 + $0x844] ss:$16 sps:$4 sm:$0xff]   ;;  %v19332_v54 = vsel %vm17894_vm15, %v8774_v25, %v8775_v7  ;;  %v16695_v7 = vld [vmem:[#allocation19 + $0x9a8] ss:$16 sps:$4 sm:$0xff]   ;;  %v16703_v25 = vld [vmem:[#allocation19 + $0x9cc] ss:$16 sps:$4 sm:$0xff]  }
 0xcfc   :  { %8714 = vmatpush1.bf16.msra.mxu1 %v16557_v52  ;;  %8609 = vmatprep.subr.bf16.mxu0 %v16562_v29  ;;  %v16631_v52 = vld [vmem:[#allocation19 + $0x84c] ss:$16 sps:$4 sm:$0xff]  }
 0xcfd   :  { %8715 = vmatprep.subr.bf16.mxu1 %v16565_v18  ;;  %v19328_v18 = vsel %vm17894_vm15, %v13697_v1, %v8768_v51  ;;  %v16686_v51 = vld [vmem:[#allocation19 + $0x980] ss:$16 sps:$4 sm:$0xff]  }
 0xcfe   :  { %v16692_v1 = vld [vmem:[#allocation19 + $0x9a0] ss:$16 sps:$4 sm:$0xff]  }
 0xcff   :  { %8610 = vmatpush1.bf16.msra.mxu0 %v16560_v38  ;;  %v13702_v38 = vcombine.high %v19328_v18, %v19332_v54 }
 0xd00   :  { %8716 = vmatpush1.bf16.msra.mxu1 %v16563_v20  ;;  %8611 = vmatprep.subr.bf16.mxu0 %v16568_v44  ;;  %v16634_v20 = vld [vmem:[#allocation19 + $0x864] ss:$16 sps:$4 sm:$0xff]   ;;  %v16637_v44 = vld [vmem:[#allocation19 + $0x86c] ss:$16 sps:$4 sm:$0xff]  }
 0xd01   :  { %8717 = vmatprep.subr.bf16.mxu1 %v16571_v37  ;;  %v16632_v37 = vld [vmem:[#allocation19 + $0x860] ss:$16 sps:$4 sm:$0xff]  }
 0xd03   :  { %8612 = vmatpush1.bf16.msra.mxu0 %v16566_v43  ;;  %v16635_v43 = vld [vmem:[#allocation19 + $0x868] ss:$16 sps:$4 sm:$0xff]  }
 0xd04   :  { %8718 = vmatpush1.bf16.msra.mxu1 %v16569_v26  ;;  %8613 = vmatprep.subr.bf16.mxu0 %v16574_v50  ;;  %v16640_v26 = vld [vmem:[#allocation19 + $0x884] ss:$16 sps:$4 sm:$0xff]   ;;  %v16643_v50 = vld [vmem:[#allocation19 + $0x88c] ss:$16 sps:$4 sm:$0xff]  }
 0xd05   :  { %8719 = vmatprep.subr.bf16.mxu1 %v16577_v21  ;;  %v16638_v21 = vld [vmem:[#allocation19 + $0x880] ss:$16 sps:$4 sm:$0xff]  }
 0xd07   :  { %8614 = vmatpush1.bf16.msra.mxu0 %v16572_v56  ;;  %v16641_v56 = vld [vmem:[#allocation19 + $0x888] ss:$16 sps:$4 sm:$0xff]  }
 0xd08   :  { %8720 = vmatpush1.bf16.msra.mxu1 %v16575_v47  ;;  %8615 = vmatprep.subr.bf16.mxu0 %v16580_v10  ;;  %v16646_v47 = vld [vmem:[#allocation19 + $0x8a4] ss:$16 sps:$4 sm:$0xff]   ;;  %v16649_v10 = vld [vmem:[#allocation19 + $0x8ac] ss:$16 sps:$4 sm:$0xff]  }
 0xd09   :  { %8721 = vmatprep.subr.bf16.mxu1 %v16583_v5  ;;  %v16647_v5 = vld [vmem:[#allocation19 + $0x8a8] ss:$16 sps:$4 sm:$0xff]  }
 0xd0b   :  { %8616 = vmatpush1.bf16.msra.mxu0 %v16578_v45  ;;  %v16652_v45 = vld [vmem:[#allocation19 + $0x8c4] ss:$16 sps:$4 sm:$0xff]  }
 0xd0c   :  { %8722 = vmatpush1.bf16.msra.mxu1 %v16581_v60  ;;  %8617 = vmatprep.subr.bf16.mxu0 %v16586_v41  ;;  %v16655_v60 = vld [vmem:[#allocation19 + $0x8cc] ss:$16 sps:$4 sm:$0xff]   ;;  %v16650_v41 = vld [vmem:[#allocation19 + $0x8c0] ss:$16 sps:$4 sm:$0xff]  }
 0xd0d   :  { %8723 = vmatprep.subr.bf16.mxu1 %v16589_v33  ;;  %v16653_v33 = vld [vmem:[#allocation19 + $0x8c8] ss:$16 sps:$4 sm:$0xff]  }
 0xd0f   :  { %8618 = vmatpush1.bf16.msra.mxu0 %v16584_v31  ;;  %v16658_v31 = vld [vmem:[#allocation19 + $0x8e4] ss:$16 sps:$4 sm:$0xff]  }
 0xd10   :  { %8724 = vmatpush1.bf16.msra.mxu1 %v16587_v17  ;;  %8619 = vmatprep.subr.bf16.mxu0 %v16592_v62  ;;  %v16661_v17 = vld [vmem:[#allocation19 + $0x8ec] ss:$16 sps:$4 sm:$0xff]   ;;  %v16656_v62 = vld [vmem:[#allocation19 + $0x8e0] ss:$16 sps:$4 sm:$0xff]  }
 0xd11   :  { %8725 = vmatprep.subr.bf16.mxu1 %v16595_v34  ;;  %v16659_v34 = vld [vmem:[#allocation19 + $0x8e8] ss:$16 sps:$4 sm:$0xff]  }
 0xd13   :  { %8620 = vmatpush1.bf16.msra.mxu0 %v16590_v32  ;;  %v16664_v32 = vld [vmem:[#allocation19 + $0x904] ss:$16 sps:$4 sm:$0xff]  }
 0xd14   :  { %8726 = vmatpush1.bf16.msra.mxu1 %v16593_v2  ;;  %8621 = vmatprep.subr.bf16.mxu0 %v16598_v23  ;;  %v16667_v2 = vld [vmem:[#allocation19 + $0x90c] ss:$16 sps:$4 sm:$0xff]   ;;  %v16662_v23 = vld [vmem:[#allocation19 + $0x900] ss:$16 sps:$4 sm:$0xff]  }
 0xd15   :  { %8727 = vmatprep.subr.bf16.mxu1 %v16601_v58  ;;  %v16665_v58 = vld [vmem:[#allocation19 + $0x908] ss:$16 sps:$4 sm:$0xff]  }
 0xd17   :  { %8622 = vmatpush1.bf16.msra.mxu0 %v16596_v46  ;;  %v16670_v46 = vld [vmem:[#allocation19 + $0x924] ss:$16 sps:$4 sm:$0xff]  }
 0xd18   :  { %8728 = vmatpush1.bf16.msra.mxu1 %v16599_v55  ;;  %8623 = vmatprep.subr.bf16.mxu0 %v16604_v28  ;;  %v16673_v55 = vld [vmem:[#allocation19 + $0x92c] ss:$16 sps:$4 sm:$0xff]   ;;  %v16668_v28 = vld [vmem:[#allocation19 + $0x920] ss:$16 sps:$4 sm:$0xff]  }
 0xd19   :  { %8729 = vmatprep.subr.bf16.mxu1 %v16607_v15  ;;  %v16671_v15 = vld [vmem:[#allocation19 + $0x928] ss:$16 sps:$4 sm:$0xff]  }
 0xd1b   :  { %8624 = vmatpush1.bf16.msra.mxu0 %v16602_v36  ;;  %v16676_v36 = vld [vmem:[#allocation19 + $0x944] ss:$16 sps:$4 sm:$0xff]  }
 0xd1c   :  { %8730 = vmatpush1.bf16.msra.mxu1 %v16605_v16  ;;  %8625 = vmatprep.subr.bf16.mxu0 %v16610_v6  ;;  %v16679_v16 = vld [vmem:[#allocation19 + $0x94c] ss:$16 sps:$4 sm:$0xff]   ;;  %v16674_v6 = vld [vmem:[#allocation19 + $0x940] ss:$16 sps:$4 sm:$0xff]  }
 0xd1d   :  { %8731 = vmatprep.subr.bf16.mxu1 %v16613_v22  ;;  %v16677_v22 = vld [vmem:[#allocation19 + $0x948] ss:$16 sps:$4 sm:$0xff]  }
 0xd1f   :  { %8626 = vmatpush1.bf16.msra.mxu0 %v16608_v57  ;;  %v16682_v57 = vld [vmem:[#allocation19 + $0x964] ss:$16 sps:$4 sm:$0xff]  }
 0xd20   :  { %8732 = vmatpush1.bf16.msra.mxu1 %v16611_v14  ;;  %9595 = vmatprep.subr.bf16.mxu0 %v16616_v30  ;;  %v16685_v14 = vld [vmem:[#allocation19 + $0x96c] ss:$16 sps:$4 sm:$0xff]   ;;  %v16680_v30 = vld [vmem:[#allocation19 + $0x960] ss:$16 sps:$4 sm:$0xff]  }
 0xd21   :  { %9701 = vmatprep.subr.bf16.mxu1 %v16619_v8  ;;  %v16683_v8 = vld [vmem:[#allocation19 + $0x968] ss:$16 sps:$4 sm:$0xff]  }
 0xd22   :  { %8628 = vmatmul.mubr.bf16.vlgmr.msra.gmra.mrb[36].mxu0 %v19286_v9 }
 0xd23   :  { %8734 = vmatmul.mubr.bf16.vlgmr.msra.gmra.mrb[40].mxu1 %v19286_v9  ;;  %8637 = vmatprep.mubr.bf16.mxu0 %v19290_v12  ;;  %v16626_v9 = vld [vmem:[#allocation19 + $0x840] ss:$16 sps:$4 sm:$0xff]  }
 0xd24   :  { %8743 = vmatprep.mubr.bf16.mxu1 %v19290_v12  ;;  %9596 = vmatpush1.bf16.msra.mxu0 %v16614_v63  ;;  %v16629_v12 = vld [vmem:[#allocation19 + $0x848] ss:$16 sps:$4 sm:$0xff]   ;;  %v16691_v63 = vld [vmem:[#allocation19 + $0x98c] ss:$16 sps:$4 sm:$0xff]  }
 0xd25   :  { %9702 = vmatpush1.bf16.msra.mxu1 %v16617_v24  ;;  %9597 = vmatprep.subr.bf16.mxu0 %v16622_v19  ;;  %v16689_v24 = vld [vmem:[#allocation19 + $0x988] ss:$16 sps:$4 sm:$0xff]   ;;  %v16694_v19 = vld [vmem:[#allocation19 + $0x9a4] ss:$16 sps:$4 sm:$0xff]  }
 0xd26   :  { %9703 = vmatprep.subr.bf16.mxu1 %v16625_v49  ;;  %v16697_v49 = vld [vmem:[#allocation19 + $0x9ac] ss:$16 sps:$4 sm:$0xff]  }
 0xd28   :  { %9598 = vmatpush1.bf16.msra.mxu0 %v16620_v4  ;;  %v16700_v4 = vld [vmem:[#allocation19 + $0x9c4] ss:$16 sps:$4 sm:$0xff]  }
 0xd29   :  { %9704 = vmatpush1.bf16.msra.mxu1 %v16623_v40  ;;  %9599 = vmatprep.subr.bf16.mxu0 %v16628_v48  ;;  %v16698_v40 = vld [vmem:[#allocation19 + $0x9c0] ss:$16 sps:$4 sm:$0xff]   ;;  %v8756_v48 = vld [vmem:[#allocation3 + $0x30] sm:$0xee] }
 0xd2a   :  { %8638 = vmatmul.mubr.bf16.gmra.mrb[40].mxu0 %v19294_v3  ;;  %9705 = vmatprep.subr.bf16.mxu1 %v16631_v52  ;;  %v16701_v52 = vld [vmem:[#allocation19 + $0x9c8] ss:$16 sps:$4 sm:$0xff]  }
 0xd2b   :  { %8744 = vmatmul.mubr.bf16.gmra.mrb[44].mxu1 %v19294_v3  ;;  %9627 = vmatprep.mubr.bf16.mxu0 %v13702_v38  ;;  %v16644_v3 = vld [vmem:[#allocation19 + $0x8a0] ss:$16 sps:$4 sm:$0xff]  }
 0xd2c   :  { %9600 = vmatpush1.bf16.msra.mxu0 %v16626_v9  ;;  %9733 = vmatprep.mubr.bf16.mxu1 %v13702_v38  ;;  %v16706_v9 = vld [vmem:[#allocation19 + $0x9e4] ss:$16 sps:$4 sm:$0xff]   ;;  %v16709_v38 = vld [vmem:[#allocation19 + $0x9ec] ss:$16 sps:$4 sm:$0xff]  }
 0xd2d   :  { %9706 = vmatpush1.bf16.msra.mxu1 %v16629_v12  ;;  %9601 = vmatprep.subr.bf16.mxu0 %v16634_v20  ;;  %v8782_v12 = vrot.slane %v19205_v61, 5  ;;  %v13699_v20 = vrot.slane %v8756_v48, 9  ;;  %v16755_v48 = vld [vmem:[#allocation19 + $0xae8] ss:$16 sps:$4 sm:$0xff]  }
 0xd2e   :  { %9707 = vmatprep.subr.bf16.mxu1 %v16637_v44  ;;  %v16918_v44 = vld [vmem:[#allocation3 + $0x50] sm:$0x11] }
 0xd30   :  { %9602 = vmatpush1.bf16.msra.mxu0 %v16632_v37  ;;  %v8789_v37 = vrot.slane %v16918_v44, 5  ;;  %v16769_v44 = vld [vmem:[#allocation19 + $0xb2c] ss:$16 sps:$4 sm:$0xff]  }
 0xd31   :  { %9708 = vmatpush1.bf16.msra.mxu1 %v16635_v43  ;;  %9603 = vmatprep.subr.bf16.mxu0 %v16640_v26  ;;  %v16704_v43 = vld [vmem:[#allocation19 + $0x9e0] ss:$16 sps:$4 sm:$0xff]   ;;  %v16707_v26 = vld [vmem:[#allocation19 + $0x9e8] ss:$16 sps:$4 sm:$0xff]  }
 0xd32   :  { %9709 = vmatprep.subr.bf16.mxu1 %v16643_v50  ;;  %v16712_v50 = vld [vmem:[#allocation19 + $0xa04] ss:$16 sps:$4 sm:$0xff]  }
 0xd34   :  { %9604 = vmatpush1.bf16.msra.mxu0 %v16638_v21  ;;  %v8788_v21 = vrot.slane %v8782_v12, 4 }
 0xd35   :  { %9710 = vmatpush1.bf16.msra.mxu1 %v16641_v56  ;;  %9605 = vmatprep.subr.bf16.mxu0 %v16646_v47  ;;  %v16715_v56 = vld [vmem:[#allocation19 + $0xa0c] ss:$16 sps:$4 sm:$0xff]   ;;  %v8783_v47 = vsel %vm17894_vm15, %v13699_v20, %v8782_v12  ;;  %v16758_v12 = vld [vmem:[#allocation19 + $0xb00] ss:$16 sps:$4 sm:$0xff]   ;;  %v16766_v20 = vld [vmem:[#allocation19 + $0xb24] ss:$16 sps:$4 sm:$0xff]  }
 0xd36   :  { %9711 = vmatprep.subr.bf16.mxu1 %v16649_v10  ;;  %v8790_v61 = vsel %vm17894_vm15, %v8788_v21, %v8789_v37  ;;  %v8755_v10 = vld [vmem:[#allocation3 + $0x8] sm:$0xee] }
 0xd37   :  { %v16764_v37 = vld [vmem:[#allocation19 + $0xb20] ss:$16 sps:$4 sm:$0xff]  }
 0xd38   :  { %9606 = vmatpush1.bf16.msra.mxu0 %v16644_v3  ;;  %v13701_v3 = vcombine.low %v19328_v18, %v19332_v54  ;;  %v16719_v54 = vld [vmem:[#allocation19 + $0xa28] ss:$16 sps:$4 sm:$0xff]   ;;  %v16770_v21 = vld [vmem:[#allocation19 + $0xb40] ss:$16 sps:$4 sm:$0xff]  }
 0xd39   :  { %9712 = vmatpush1.bf16.msra.mxu1 %v16647_v5  ;;  %9607 = vmatprep.subr.bf16.mxu0 %v16652_v45  ;;  %v16710_v5 = vld [vmem:[#allocation19 + $0xa00] ss:$16 sps:$4 sm:$0xff]   ;;  %v8772_v45 = vrot.slane %v19225_v42, 5  ;;  %v16727_v42 = vld [vmem:[#allocation19 + $0xa4c] ss:$16 sps:$4 sm:$0xff]  }
 0xd3a   :  { %9713 = vmatprep.subr.bf16.mxu1 %v16655_v60  ;;  %v16713_v60 = vld [vmem:[#allocation19 + $0xa08] ss:$16 sps:$4 sm:$0xff]  }
 0xd3b   :  { %v8777_v18 = vrot.slane %v8772_v45, 4 }
 0xd3c   :  { %9608 = vmatpush1.bf16.msra.mxu0 %v16650_v41  ;;  %v13706_v41 = vcombine.high %v8783_v47, %v8790_v61 }
 0xd3d   :  { %9714 = vmatpush1.bf16.msra.mxu1 %v16653_v33  ;;  %9609 = vmatprep.subr.bf16.mxu0 %v16658_v31  ;;  %v16718_v33 = vld [vmem:[#allocation19 + $0xa24] ss:$16 sps:$4 sm:$0xff]   ;;  %v16721_v31 = vld [vmem:[#allocation19 + $0xa2c] ss:$16 sps:$4 sm:$0xff]  }
 0xd3e   :  { %9715 = vmatprep.subr.bf16.mxu1 %v16661_v17  ;;  %v13698_v17 = vrot.slane %v8755_v10, 9  ;;  %v16776_v10 = vld [vmem:[#allocation19 + $0xb60] ss:$16 sps:$4 sm:$0xff]  }
 0xd40   :  { %9610 = vmatpush1.bf16.msra.mxu0 %v16656_v62  ;;  %v16919_v62 = vld [vmem:[#allocation3 + $0x28] sm:$0x11] }
 0xd41   :  { %9716 = vmatpush1.bf16.msra.mxu1 %v16659_v34  ;;  %9611 = vmatprep.subr.bf16.mxu0 %v16664_v32  ;;  %v8778_v34 = vrot.slane %v16919_v62, 5  ;;  %v16716_v32 = vld [vmem:[#allocation19 + $0xa20] ss:$16 sps:$4 sm:$0xff]   ;;  %v16791_v62 = vld [vmem:[#allocation19 + $0xba8] ss:$16 sps:$4 sm:$0xff]  }
 0xd42   :  { %9717 = vmatprep.subr.bf16.mxu1 %v16667_v2  ;;  %v16724_v2 = vld [vmem:[#allocation19 + $0xa44] ss:$16 sps:$4 sm:$0xff]  }
 0xd44   :  { %9612 = vmatpush1.bf16.msra.mxu0 %v16662_v23  ;;  %v19348_v23 = vsel %vm17894_vm15, %v13698_v17, %v8772_v45  ;;  %v16787_v45 = vld [vmem:[#allocation19 + $0xb8c] ss:$16 sps:$4 sm:$0xff]   ;;  %v16788_v17 = vld [vmem:[#allocation19 + $0xba0] ss:$16 sps:$4 sm:$0xff]  }
 0xd45   :  { %9718 = vmatpush1.bf16.msra.mxu1 %v16665_v58  ;;  %9613 = vmatprep.subr.bf16.mxu0 %v16670_v46  ;;  %v19352_v58 = vsel %vm17894_vm15, %v8777_v18, %v8778_v34  ;;  %v13705_v46 = vcombine.low %v8783_v47, %v8790_v61  ;;  %v16778_v47 = vld [vmem:[#allocation19 + $0xb64] ss:$16 sps:$4 sm:$0xff]   ;;  %v16781_v61 = vld [vmem:[#allocation19 + $0xb6c] ss:$16 sps:$4 sm:$0xff]   ;;  %v16794_v18 = vld [vmem:[#allocation19 + $0xbc0] ss:$16 sps:$4 sm:$0xff]  }
 0xd46   :  { %9719 = vmatprep.subr.bf16.mxu1 %v16673_v55  ;;  %v16722_v55 = vld [vmem:[#allocation19 + $0xa40] ss:$16 sps:$4 sm:$0xff]   ;;  %v16796_v34 = vld [vmem:[#allocation19 + $0xbc4] ss:$16 sps:$4 sm:$0xff]  }
 0xd48   :  { %9614 = vmatpush1.bf16.msra.mxu0 %v16668_v28  ;;  %v16725_v28 = vld [vmem:[#allocation19 + $0xa48] ss:$16 sps:$4 sm:$0xff]  }
 0xd49   :  { %9720 = vmatpush1.bf16.msra.mxu1 %v16671_v15  ;;  %9615 = vmatprep.subr.bf16.mxu0 %v16676_v36  ;;  %v13704_v15 = vcombine.high %v19348_v23, %v19352_v58  ;;  %v16730_v36 = vld [vmem:[#allocation19 + $0xa64] ss:$16 sps:$4 sm:$0xff]  }
 0xd4a   :  { %9721 = vmatprep.subr.bf16.mxu1 %v16679_v16  ;;  %v16733_v16 = vld [vmem:[#allocation19 + $0xa6c] ss:$16 sps:$4 sm:$0xff]  }
 0xd4c   :  { %9616 = vmatpush1.bf16.msra.mxu0 %v16674_v6  ;;  %v16728_v6 = vld [vmem:[#allocation19 + $0xa60] ss:$16 sps:$4 sm:$0xff]  }
 0xd4d   :  { %9722 = vmatpush1.bf16.msra.mxu1 %v16677_v22  ;;  %9617 = vmatprep.subr.bf16.mxu0 %v16682_v57  ;;  %v16731_v22 = vld [vmem:[#allocation19 + $0xa68] ss:$16 sps:$4 sm:$0xff]   ;;  %v16736_v57 = vld [vmem:[#allocation19 + $0xa84] ss:$16 sps:$4 sm:$0xff]  }
 0xd4e   :  { %9723 = vmatprep.subr.bf16.mxu1 %v16685_v14  ;;  %v16739_v14 = vld [vmem:[#allocation19 + $0xa8c] ss:$16 sps:$4 sm:$0xff]  }
 0xd50   :  { %9618 = vmatpush1.bf16.msra.mxu0 %v16680_v30  ;;  %v16734_v30 = vld [vmem:[#allocation19 + $0xa80] ss:$16 sps:$4 sm:$0xff]  }
 0xd51   :  { %9724 = vmatpush1.bf16.msra.mxu1 %v16683_v8  ;;  %9619 = vmatprep.subr.bf16.mxu0 %v16688_v53  ;;  %v16737_v8 = vld [vmem:[#allocation19 + $0xa88] ss:$16 sps:$4 sm:$0xff]   ;;  %v16742_v53 = vld [vmem:[#allocation19 + $0xaa4] ss:$16 sps:$4 sm:$0xff]  }
 0xd52   :  { %9725 = vmatprep.subr.bf16.mxu1 %v16691_v63  ;;  %v16745_v63 = vld [vmem:[#allocation19 + $0xaac] ss:$16 sps:$4 sm:$0xff]  }
 0xd54   :  { %9620 = vmatpush1.bf16.msra.mxu0 %v16686_v51  ;;  %v16740_v51 = vld [vmem:[#allocation19 + $0xaa0] ss:$16 sps:$4 sm:$0xff]  }
 0xd55   :  { %9726 = vmatpush1.bf16.msra.mxu1 %v16689_v24  ;;  %9621 = vmatprep.subr.bf16.mxu0 %v16694_v19  ;;  %v16743_v24 = vld [vmem:[#allocation19 + $0xaa8] ss:$16 sps:$4 sm:$0xff]   ;;  %v16748_v19 = vld [vmem:[#allocation19 + $0xac4] ss:$16 sps:$4 sm:$0xff]  }
 0xd56   :  { %9727 = vmatprep.subr.bf16.mxu1 %v16697_v49  ;;  %v16751_v49 = vld [vmem:[#allocation19 + $0xacc] ss:$16 sps:$4 sm:$0xff]  }
 0xd58   :  { %9622 = vmatpush1.bf16.msra.mxu0 %v16692_v1  ;;  %v16746_v1 = vld [vmem:[#allocation19 + $0xac0] ss:$16 sps:$4 sm:$0xff]  }
 0xd59   :  { %9728 = vmatpush1.bf16.msra.mxu1 %v16695_v7  ;;  %9623 = vmatprep.subr.bf16.mxu0 %v16700_v4  ;;  %v16749_v7 = vld [vmem:[#allocation19 + $0xac8] ss:$16 sps:$4 sm:$0xff]   ;;  %v16754_v4 = vld [vmem:[#allocation19 + $0xae4] ss:$16 sps:$4 sm:$0xff]  }
 0xd5a   :  { %9729 = vmatprep.subr.bf16.mxu1 %v16703_v25  ;;  %v16757_v25 = vld [vmem:[#allocation19 + $0xaec] ss:$16 sps:$4 sm:$0xff]  }
 0xd5c   :  { %9624 = vmatpush1.bf16.msra.mxu0 %v16698_v40  ;;  %v16752_v40 = vld [vmem:[#allocation19 + $0xae0] ss:$16 sps:$4 sm:$0xff]  }
 0xd5d   :  { %9730 = vmatpush1.bf16.msra.mxu1 %v16701_v52  ;;  %9625 = vmatprep.subr.bf16.mxu0 %v16706_v9  ;;  %v16760_v52 = vld [vmem:[#allocation19 + $0xb04] ss:$16 sps:$4 sm:$0xff]   ;;  %v16763_v9 = vld [vmem:[#allocation19 + $0xb0c] ss:$16 sps:$4 sm:$0xff]  }
 0xd5e   :  { %9731 = vmatprep.subr.bf16.mxu1 %v16709_v38  ;;  %v16761_v38 = vld [vmem:[#allocation19 + $0xb08] ss:$16 sps:$4 sm:$0xff]  }
 0xd60   :  { %9626 = vmatpush1.bf16.msra.mxu0 %v16704_v43  ;;  %v16767_v43 = vld [vmem:[#allocation19 + $0xb28] ss:$16 sps:$4 sm:$0xff]  }
 0xd61   :  { %9732 = vmatpush1.bf16.msra.mxu1 %v16707_v26  ;;  %9648 = vmatprep.subr.bf16.mxu0 %v16712_v50  ;;  %v16772_v26 = vld [vmem:[#allocation19 + $0xb44] ss:$16 sps:$4 sm:$0xff]   ;;  %v16775_v50 = vld [vmem:[#allocation19 + $0xb4c] ss:$16 sps:$4 sm:$0xff]  }
 0xd62   :  { %9754 = vmatprep.subr.bf16.mxu1 %v16715_v56  ;;  %v16773_v56 = vld [vmem:[#allocation19 + $0xb48] ss:$16 sps:$4 sm:$0xff]  }
 0xd63   :  { %9628 = vmatmul.mubr.bf16.vlgmr.msra.gmra.mrb[36].mxu0 %v13701_v3 }
 0xd64   :  { %9734 = vmatmul.mubr.bf16.vlgmr.msra.gmra.mrb[40].mxu1 %v13701_v3  ;;  %9637 = vmatprep.mubr.bf16.mxu0 %v13706_v41  ;;  %v16779_v3 = vld [vmem:[#allocation19 + $0xb68] ss:$16 sps:$4 sm:$0xff]  }
 0xd65   :  { %9649 = vmatpush1.bf16.msra.mxu0 %v16710_v5  ;;  %9743 = vmatprep.mubr.bf16.mxu1 %v13706_v41  ;;  %v16784_v5 = vld [vmem:[#allocation19 + $0xb84] ss:$16 sps:$4 sm:$0xff]   ;;  %v16785_v41 = vld [vmem:[#allocation19 + $0xb88] ss:$16 sps:$4 sm:$0xff]  }
 0xd66   :  { %9755 = vmatpush1.bf16.msra.mxu1 %v16713_v60  ;;  %9650 = vmatprep.subr.bf16.mxu0 %v16718_v33  ;;  %v16782_v60 = vld [vmem:[#allocation19 + $0xb80] ss:$16 sps:$4 sm:$0xff]   ;;  %v16790_v33 = vld [vmem:[#allocation19 + $0xba4] ss:$16 sps:$4 sm:$0xff]  }
 0xd67   :  { %9756 = vmatprep.subr.bf16.mxu1 %v16721_v31  ;;  %v16793_v31 = vld [vmem:[#allocation19 + $0xbac] ss:$16 sps:$4 sm:$0xff]  }
 0xd69   :  { %9651 = vmatpush1.bf16.msra.mxu0 %v16716_v32  ;;  %v16799_v32 = vld [vmem:[#allocation19 + $0xbcc] ss:$16 sps:$4 sm:$0xff]  }
 0xd6a   :  { %9757 = vmatpush1.bf16.msra.mxu1 %v16719_v54  ;;  %9652 = vmatprep.subr.bf16.mxu0 %v16724_v2  ;;  %v8757_v54 = vld [vmem:[#allocation3 + $0x38] sm:$0xee]  ;;  %v16797_v2 = vld [vmem:[#allocation19 + $0xbc8] ss:$16 sps:$4 sm:$0xff]  }
 0xd6b   :  { %9638 = vmatmul.mubr.bf16.gmra.mrb[40].mxu0 %v13705_v46  ;;  %9758 = vmatprep.subr.bf16.mxu1 %v16727_v42  ;;  %v16802_v42 = vld [vmem:[#allocation19 + $0xbe4] ss:$16 sps:$4 sm:$0xff]  }
 0xd6c   :  { %9744 = vmatmul.mubr.bf16.gmra.mrb[44].mxu1 %v13705_v46  ;;  %9680 = vmatprep.mubr.bf16.mxu0 %v13704_v15  ;;  %v8786_v46 = vrot.slane %v19242_v27, 5  ;;  %v9908_v27 = vld [vmem:[%s20402_s8 + $0x188] sm:$0xff] }
 0xd6d   :  { %9653 = vmatpush1.bf16.msra.mxu0 %v16722_v55  ;;  %9786 = vmatprep.mubr.bf16.mxu1 %v13704_v15  ;;  %v16805_v55 = vld [vmem:[#allocation19 + $0xbec] ss:$16 sps:$4 sm:$0xff]  }
 0xd6e   :  { %9759 = vmatpush1.bf16.msra.mxu1 %v16725_v28  ;;  %9654 = vmatprep.subr.bf16.mxu0 %v16730_v36  ;;  %v9875_v28 = vld [vmem:[%s20402_s8 + $0x80] sm:$0xff]  ;;  %v9876_v15 = vld [vmem:[%s20402_s8 + $0x88] sm:$0xff]  ;;  %v13700_v36 = vrot.slane %v8757_v54, 9 }
 0xd6f   :  { %9760 = vmatprep.subr.bf16.mxu1 %v16733_v16  ;;  %v16920_v16 = vld [vmem:[#allocation3 + $0x58] sm:$0x11] }
 0xd71   :  { %9655 = vmatpush1.bf16.msra.mxu0 %v16728_v6  ;;  %v8792_v6 = vrot.slane %v16920_v16, 5  ;;  %v9884_v16 = vld [vmem:[%s20402_s8 + $0xc8] sm:$0xff] }
 0xd72   :  { %9761 = vmatpush1.bf16.msra.mxu1 %v16731_v22  ;;  %9656 = vmatprep.subr.bf16.mxu0 %v16736_v57  ;;  %v9907_v22 = vld [vmem:[%s20402_s8 + $0x180] sm:$0xff] }
 0xd73   :  { %9762 = vmatprep.subr.bf16.mxu1 %v16739_v14  ;;  %v16800_v57 = vld [vmem:[#allocation19 + $0xbe0] ss:$16 sps:$4 sm:$0xff]   ;;  %v16803_v14 = vld [vmem:[#allocation19 + $0xbe8] ss:$16 sps:$4 sm:$0xff]  }
 0xd75   :  { %9657 = vmatpush1.bf16.msra.mxu0 %v16734_v30  ;;  %v8791_v30 = vrot.slane %v8786_v46, 4 }
 0xd76   :  { %9763 = vmatpush1.bf16.msra.mxu1 %v16737_v8  ;;  %9658 = vmatprep.subr.bf16.mxu0 %v16742_v53  ;;  %v19369_v8 = vpack.c.bf16 %v9876_v15, %v9875_v28  ;;  %v19371_v53 = vpack.c.bf16 %v9908_v27, %v9907_v22  ;;  %v9898_v28 = vld [vmem:[%s20402_s8 + $0x138] sm:$0xff]  ;;  %v9916_v27 = vld [vmem:[%s20402_s8 + $0x1c8] sm:$0xff] }
 0xd77   :  { %9764 = vmatprep.subr.bf16.mxu1 %v16745_v63  ;;  %v9859_v63 = vld [vmem:[%s20402_s8] sm:$0xff] }
 0xd79   :  { %9659 = vmatpush1.bf16.msra.mxu0 %v16740_v51  ;;  %v9860_v51 = vld [vmem:[%s20402_s8 + $0x8] sm:$0xff] }
 0xd7a   :  { %9765 = vmatpush1.bf16.msra.mxu1 %v16743_v24  ;;  %9660 = vmatprep.subr.bf16.mxu0 %v16748_v19  ;;  %v9891_v24 = vld [vmem:[%s20402_s8 + $0x100] sm:$0xff]  ;;  %v8787_v19 = vsel %vm17894_vm15, %v13700_v36, %v8786_v46  ;;  %v9897_v46 = vld [vmem:[%s20402_s8 + $0x130] sm:$0xff] }
 0xd7b   :  { %9766 = vmatprep.subr.bf16.mxu1 %v16751_v49  ;;  %v8793_v49 = vsel %vm17894_vm15, %v8791_v30, %v8792_v6  ;;  %v19503_v15 = vpack.c.bf16 %v9898_v28, %v9897_v46  ;;  %v9883_v36 = vld [vmem:[%s20402_s8 + $0xc0] sm:$0xff]  ;;  %v9922_v28 = vld [vmem:[%s20402_s8 + $0x1f8] sm:$0xff] }
 0xd7c   :  { %v9915_v6 = vld [vmem:[%s20402_s8 + $0x1c0] sm:$0xff]  ;;  %v19516_v22 = vpack.c.bf16 %v9884_v16, %v9883_v36  ;;  %v9873_v36 = vld [vmem:[%s20402_s8 + $0x70] sm:$0xff]  ;;  %v9874_v16 = vld [vmem:[%s20402_s8 + $0x78] sm:$0xff] }
 0xd7d   :  { %9661 = vmatpush1.bf16.msra.mxu0 %v16746_v1  ;;  %v9892_v1 = vld [vmem:[%s20402_s8 + $0x108] sm:$0xff]  ;;  %v19527_v30 = vpack.c.bf16 %v9916_v27, %v9915_v6  ;;  %v9905_v27 = vld [vmem:[%s20402_s8 + $0x170] sm:$0xff] }
 0xd7e   :  { %9767 = vmatpush1.bf16.msra.mxu1 %v16749_v7  ;;  %9662 = vmatprep.subr.bf16.mxu0 %v16754_v4  ;;  %v9877_v7 = vld [vmem:[%s20402_s8 + $0x90] sm:$0xff]  ;;  %v9878_v4 = vld [vmem:[%s20402_s8 + $0x98] sm:$0xff] }
 0xd7f   :  { %9768 = vmatprep.subr.bf16.mxu1 %v16757_v25  ;;  %v9909_v25 = vld [vmem:[%s20402_s8 + $0x190] sm:$0xff] }
 0xd81   :  { %9663 = vmatpush1.bf16.msra.mxu0 %v16752_v40  ;;  %v9910_v40 = vld [vmem:[%s20402_s8 + $0x198] sm:$0xff] }
 0xd82   :  { %9769 = vmatpush1.bf16.msra.mxu1 %v16755_v48  ;;  %9664 = vmatprep.subr.bf16.mxu0 %v16760_v52  ;;  %v13703_v48 = vcombine.low %v19348_v23, %v19352_v58  ;;  %v19404_v52 = vpack.c.bf16 %v9860_v51, %v9859_v63  ;;  %v13707_v23 = vcombine.low %v8787_v19, %v8793_v49  ;;  %v9861_v58 = vld [vmem:[%s20402_s8 + $0x10] sm:$0xff]  ;;  %v9899_v51 = vld [vmem:[%s20402_s8 + $0x140] sm:$0xff] }
 0xd83   :  { %9770 = vmatprep.subr.bf16.mxu1 %v16763_v9  ;;  %v13708_v9 = vcombine.high %v8787_v19, %v8793_v49  ;;  %v9885_v19 = vld [vmem:[%s20402_s8 + $0xd0] sm:$0xff] }
 0xd85   :  { %9665 = vmatpush1.bf16.msra.mxu0 %v16758_v12  ;;  %v19407_v12 = vpack.c.bf16 %v9892_v1, %v9891_v24  ;;  %v9900_v24 = vld [vmem:[%s20402_s8 + $0x148] sm:$0xff]  ;;  %v9886_v1 = vld [vmem:[%s20402_s8 + $0xd8] sm:$0xff] }
 0xd86   :  { %9771 = vmatpush1.bf16.msra.mxu1 %v16761_v38  ;;  %9666 = vmatprep.subr.bf16.mxu0 %v16766_v20  ;;  %v19409_v38 = vpack.c.bf16 %v9878_v4, %v9877_v7  ;;  %v19411_v20 = vpack.c.bf16 %v9910_v40, %v9909_v25  ;;  %v19541_v49 = vpack.c.bf16 %v9900_v24, %v9899_v51  ;;  %v9917_v7 = vld [vmem:[%s20402_s8 + $0x1d0] sm:$0xff]  ;;  %v9918_v4 = vld [vmem:[%s20402_s8 + $0x1d8] sm:$0xff] }
 0xd87   :  { %9772 = vmatprep.subr.bf16.mxu1 %v16769_v44  ;;  %v9862_v44 = vld [vmem:[%s20402_s8 + $0x18] sm:$0xff]  ;;  %v19554_v25 = vpack.c.bf16 %v9886_v1, %v9885_v19  ;;  %v19556_v40 = vpack.c.bf16 %v9918_v4, %v9917_v7 }
 0xd89   :  { %9667 = vmatpush1.bf16.msra.mxu0 %v16764_v37  ;;  %v9893_v37 = vld [vmem:[%s20402_s8 + $0x110] sm:$0xff] }
 0xd8a   :  { %9773 = vmatpush1.bf16.msra.mxu1 %v16767_v43  ;;  %9668 = vmatprep.subr.bf16.mxu0 %v16772_v26  ;;  %v19426_v43 = vpack.c.bf16 %v9862_v44, %v9861_v58  ;;  %v9894_v26 = vld [vmem:[%s20402_s8 + $0x118] sm:$0xff] }
 0xd8b   :  { %9774 = vmatprep.subr.bf16.mxu1 %v16775_v50  ;;  %v19431_v50 = vpack.c.bf16 %v9894_v26, %v9893_v37  ;;  %v9902_v44 = vld [vmem:[%s20402_s8 + $0x158] sm:$0xff]  ;;  %v9887_v37 = vld [vmem:[%s20402_s8 + $0xe0] sm:$0xff]  ;;  %v9888_v26 = vld [vmem:[%s20402_s8 + $0xe8] sm:$0xff] }
 0xd8d   :  { %9669 = vmatpush1.bf16.msra.mxu0 %v16770_v21  ;;  %v9879_v21 = vld [vmem:[%s20402_s8 + $0xa0] sm:$0xff] }
 0xd8e   :  { %9775 = vmatpush1.bf16.msra.mxu1 %v16773_v56  ;;  %9670 = vmatprep.subr.bf16.mxu0 %v16778_v47  ;;  %v9880_v56 = vld [vmem:[%s20402_s8 + $0xa8] sm:$0xff]  ;;  %v9911_v47 = vld [vmem:[%s20402_s8 + $0x1a0] sm:$0xff] }
 0xd8f   :  { %9776 = vmatprep.subr.bf16.mxu1 %v16781_v61  ;;  %v19444_v61 = vpack.c.bf16 %v9880_v56, %v9879_v21  ;;  %v19583_v56 = vpack.c.bf16 %v9888_v26, %v9887_v37 }
 0xd91   :  { %9671 = vmatpush1.bf16.msra.mxu0 %v16776_v10  ;;  %v9912_v10 = vld [vmem:[%s20402_s8 + $0x1a8] sm:$0xff] }
 0xd92   :  { %9777 = vmatpush1.bf16.msra.mxu1 %v16779_v3  ;;  %9672 = vmatprep.subr.bf16.mxu0 %v16784_v5  ;;  %v9863_v3 = vld [vmem:[%s20402_s8 + $0x20] sm:$0xff]  ;;  %v9864_v5 = vld [vmem:[%s20402_s8 + $0x28] sm:$0xff] }
 0xd93   :  { %9778 = vmatprep.subr.bf16.mxu1 %v16787_v45  ;;  %v19455_v45 = vpack.c.bf16 %v9912_v10, %v9911_v47  ;;  %v9919_v47 = vld [vmem:[%s20402_s8 + $0x1e0] sm:$0xff]  ;;  %v9920_v10 = vld [vmem:[%s20402_s8 + $0x1e8] sm:$0xff] }
 0xd95   :  { %9673 = vmatpush1.bf16.msra.mxu0 %v16782_v60  ;;  %v19457_v60 = vpack.c.bf16 %v9864_v5, %v9863_v3  ;;  %v9871_v3 = vld [vmem:[%s20402_s8 + $0x60] sm:$0xff]  ;;  %v19594_v5 = vpack.c.bf16 %v9920_v10, %v9919_v47 }
 0xd96   :  { %9779 = vmatpush1.bf16.msra.mxu1 %v16785_v41  ;;  %9674 = vmatprep.subr.bf16.mxu0 %v16790_v33  ;;  %v9895_v41 = vld [vmem:[%s20402_s8 + $0x120] sm:$0xff]  ;;  %v9896_v33 = vld [vmem:[%s20402_s8 + $0x128] sm:$0xff] }
 0xd97   :  { %9780 = vmatprep.subr.bf16.mxu1 %v16793_v31  ;;  %v9881_v31 = vld [vmem:[%s20402_s8 + $0xb0] sm:$0xff] }
 0xd99   :  { %9675 = vmatpush1.bf16.msra.mxu0 %v16788_v17  ;;  %v19469_v17 = vpack.c.bf16 %v9896_v33, %v9895_v41  ;;  %v9872_v41 = vld [vmem:[%s20402_s8 + $0x68] sm:$0xff]  ;;  %v9903_v33 = vld [vmem:[%s20402_s8 + $0x160] sm:$0xff] }
 0xd9a   :  { %9781 = vmatpush1.bf16.msra.mxu1 %v16791_v62  ;;  %9676 = vmatprep.subr.bf16.mxu0 %v16796_v34  ;;  %v9882_v62 = vld [vmem:[%s20402_s8 + $0xb8] sm:$0xff]  ;;  %v9913_v34 = vld [vmem:[%s20402_s8 + $0x1b0] sm:$0xff] }
 0xd9b   :  { %9782 = vmatprep.subr.bf16.mxu1 %v16799_v32  ;;  %v9914_v32 = vld [vmem:[%s20402_s8 + $0x1b8] sm:$0xff] }
 0xd9c   :  { %v19484_v54 = vpack.c.bf16 %v9914_v32, %v9913_v34  ;;  %v9889_v34 = vld [vmem:[%s20402_s8 + $0xf0] sm:$0xff]  ;;  %v9890_v32 = vld [vmem:[%s20402_s8 + $0xf8] sm:$0xff] }
 0xd9d   :  { %9677 = vmatpush1.bf16.msra.mxu0 %v16794_v18  ;;  %v19482_v18 = vpack.c.bf16 %v9882_v62, %v9881_v31  ;;  %v9904_v31 = vld [vmem:[%s20402_s8 + $0x168] sm:$0xff]  ;;  %v19606_v62 = vpack.c.bf16 %v9872_v41, %v9871_v3  ;;  %v19621_v46 = vpack.c.bf16 %v9890_v32, %v9889_v34 }
 0xd9e   :  { %9783 = vmatpush1.bf16.msra.mxu1 %v16797_v2  ;;  %9678 = vmatprep.subr.bf16.mxu0 %v16802_v42  ;;  %v9865_v2 = vld [vmem:[%s20402_s8 + $0x30] sm:$0xff]  ;;  %v9866_v42 = vld [vmem:[%s20402_s8 + $0x38] sm:$0xff] }
 0xd9f   :  { %9784 = vmatprep.subr.bf16.mxu1 %v16805_v55  ;;  %v19498_v55 = vpack.c.bf16 %v9866_v42, %v9865_v2  ;;  %v9921_v2 = vld [vmem:[%s20402_s8 + $0x1f0] sm:$0xff]  ;;  %v19619_v42 = vpack.c.bf16 %v9904_v31, %v9903_v33 }
 0xda0   :  { %v19633_v6 = vpack.c.bf16 %v9922_v28, %v9921_v2 }
 0xda1   :  { %9679 = vmatpush1.bf16.msra.mxu0 %v16800_v57  ;;  %v9867_v57 = vld [vmem:[%s20402_s8 + $0x40] sm:$0xff] }
 0xda2   :  { %9785 = vmatpush1.bf16.msra.mxu1 %v16803_v14  ;;  %15130 = vmatprep.subr.bf16.mxu0 %v19369_v8  ;;  %v9868_v14 = vld [vmem:[%s20402_s8 + $0x48] sm:$0xff] }
 0xda3   :  { %15162 = vmatprep.subr.bf16.mxu1 %v19371_v53  ;;  %v19529_v63 = vpack.c.bf16 %v9868_v14, %v9867_v57  ;;  %v9906_v57 = vld [vmem:[%s20402_s8 + $0x178] sm:$0xff]  ;;  %v19642_v14 = vpack.c.bf16 %v9874_v16, %v9873_v36 }
 0xda4   :  { %9681 = vmatmul.mubr.bf16.vlgmr.msra.gmra.mrb[36].mxu0 %v13703_v48  ;;  %v19646_v51 = vpack.c.bf16 %v9906_v57, %v9905_v27 }
 0xda5   :  { %9787 = vmatmul.mubr.bf16.vlgmr.msra.gmra.mrb[40].mxu1 %v13703_v48  ;;  %9690 = vmatprep.mubr.bf16.mxu0 %v13708_v9  ;;  %v9869_v48 = vld [vmem:[%s20402_s8 + $0x50] sm:$0xff] }
 0xda6   :  { %9796 = vmatprep.mubr.bf16.mxu1 %v13708_v9  ;;  %15132 = vmatpush3.bf16.msra.mxu0 %v19404_v52  ;;  %v9870_v9 = vld [vmem:[%s20402_s8 + $0x58] sm:$0xff] }
 0xda7   :  { %15164 = vmatpush3.bf16.msra.mxu1 %v19407_v12  ;;  %15134 = vmatprep.subr.bf16.mxu0 %v19409_v38  ;;  %v19568_v58 = vpack.c.bf16 %v9870_v9, %v9869_v48 }
 0xda8   :  { %15166 = vmatprep.subr.bf16.mxu1 %v19411_v20 }
 0xdaa   :  { %15136 = vmatpush3.bf16.msra.mxu0 %v19426_v43 }
 0xdab   :  { %15168 = vmatpush3.bf16.msra.mxu1 %v19431_v50  ;;  %15138 = vmatprep.subr.bf16.mxu0 %v19444_v61 }
 0xdac   :  { %9691 = vmatmul.mubr.bf16.gmra.mrb[40].mxu0 %v13707_v23  ;;  %15170 = vmatprep.subr.bf16.mxu1 %v19455_v45 }
 0xdad   :  { %9797 = vmatmul.mubr.bf16.gmra.mrb[44].mxu1 %v13707_v23  ;;  %v9901_v23 = vld [vmem:[%s20402_s8 + $0x150] sm:$0xff] }
 0xdae   :  { %15140 = vmatpush3.bf16.msra.mxu0 %v19457_v60  ;;  %v19581_v21 = vpack.c.bf16 %v9902_v44, %v9901_v23 }
 0xdaf   :  { %15172 = vmatpush3.bf16.msra.mxu1 %v19469_v17  ;;  %15142 = vmatprep.subr.bf16.mxu0 %v19482_v18 }
 0xdb0   :  { %15174 = vmatprep.subr.bf16.mxu1 %v19484_v54 }
 0xdb2   :  { %15144 = vmatpush3.bf16.msra.mxu0 %v19498_v55 }
 0xdb3   :  { %15176 = vmatpush3.bf16.msra.mxu1 %v19503_v15  ;;  %15146 = vmatprep.subr.bf16.mxu0 %v19516_v22 }
 0xdb4   :  { %15178 = vmatprep.subr.bf16.mxu1 %v19527_v30 }
 0xdb6   :  { %15148 = vmatpush3.bf16.msra.mxu0 %v19529_v63 }
 0xdb7   :  { %15180 = vmatpush3.bf16.msra.mxu1 %v19541_v49  ;;  %15150 = vmatprep.subr.bf16.mxu0 %v19554_v25 }
 0xdb8   :  { %15182 = vmatprep.subr.bf16.mxu1 %v19556_v40 }
 0xdba   :  { %15152 = vmatpush3.bf16.msra.mxu0 %v19568_v58 }
 0xdbb   :  { %15184 = vmatpush3.bf16.msra.mxu1 %v19581_v21  ;;  %15154 = vmatprep.subr.bf16.mxu0 %v19583_v56 }
 0xdbc   :  { %15186 = vmatprep.subr.bf16.mxu1 %v19594_v5 }
 0xdbe   :  { %15156 = vmatpush3.bf16.msra.mxu0 %v19606_v62 }
 0xdbf   :  { %15188 = vmatpush3.bf16.msra.mxu1 %v19619_v42  ;;  %15158 = vmatprep.subr.bf16.mxu0 %v19621_v46 }
 0xdc0   :  { %15190 = vmatprep.subr.bf16.mxu1 %v19633_v6 }
 0xdc2   :  { %15160 = vmatpush3.bf16.msra.mxu0 %v19642_v14 }
 0xdc3   :  { %15192 = vmatpush3.bf16.msra.mxu1 %v19646_v51 }
 0xe77   :  { %v19651_v24 = vpop.f32.mrb[36].mxu0 }
 0xe78   :  { %v19653_v19 = vpop.f32.mrb[40].mxu1  ;;  %v19655_v1 = vpop.f32.mrb[37].mxu0 }
 0xe79   :  { %20403 = vst [vmem:[#allocation56_spill] sm:$0xff] %v19653_v19  ;;  %20404 = vst [vmem:[#allocation52_spill] sm:$0xff] %v19655_v1  ;;  %v19657_v7 = vpop.f32.mrb[41].mxu1  ;;  %v19659_v4 = vpop.f32.mrb[38].mxu0 }
 0xe7a   :  { %20405 = vst [vmem:[#allocation51_spill] sm:$0xff] %v19657_v7  ;;  %v9823_v48 = vadd.f32 %v19659_v4, %v19651_v24  ;;  %v19663_v9 = vpop.f32.mrb[42].mxu1  ;;  %v19665_v23 = vpop.f32.mrb[39].mxu0 }
 0xe7b   :  { %20406 = vst [vmem:[#allocation60_spill] sm:$0xff] %v19663_v9  ;;  %20407 = vst [vmem:[#allocation59_spill] sm:$0xff] %v19665_v23  ;;  %v9841_v44 = vadd.f32 %v19663_v9, %v19653_v19  ;;  %v9832_v37 = vadd.f32 %v19665_v23, %v19655_v1  ;;  %v19671_v26 = vpop.f32.mrb[43].mxu1 }
 0xe7c   :  { %20408 = vst [vmem:[#allocation55_spill] sm:$0xff] %v19671_v26  ;;  %v9850_v47 = vadd.f32 %v19671_v26, %v19657_v7 }
 0xe7f   :  { %v19675_v10 = vpop.f32.mrb[40].mxu0 }
 0xe80   :  { %v9824_v3 = vadd.f32 %v9823_v48, %v19675_v10  ;;  %v19678_v41 = vpop.f32.mrb[44].mxu1  ;;  %v19680_v33 = vpop.f32.mrb[41].mxu0 }
 0xe81   :  { %20409 = vst [vmem:[#allocation54_spill] sm:$0xff] %v19678_v41  ;;  %20410 = vst [vmem:[#allocation61_spill] sm:$0xff] %v19680_v33  ;;  %v9842_v31 = vadd.f32 %v9841_v44, %v19678_v41  ;;  %v9833_v34 = vadd.f32 %v9832_v37, %v19680_v33  ;;  %v19684_v32 = vpop.f32.mrb[45].mxu1  ;;  %v19686_v2 = vpop.f32.mrb[42].mxu0 }
 0xe82   :  { %20411 = vst [vmem:[#allocation49_spill] sm:$0xff] %v19684_v32  ;;  %20412 = vst [vmem:[#allocation58_spill] sm:$0xff] %v19686_v2  ;;  %v9851_v28 = vadd.f32 %v9850_v47, %v19684_v32  ;;  %v9825_v36 = vadd.f32 %v9824_v3, %v19686_v2  ;;  %v19690_v16 = vpop.f32.mrb[46].mxu1  ;;  %v19692_v27 = vpop.f32.mrb[43].mxu0 }
 0xe83   :  { %20413 = vst [vmem:[#allocation57_spill] sm:$0xff] %v19690_v16  ;;  %20414 = vst [vmem:[#allocation62_spill] sm:$0xff] %v19692_v27  ;;  %v9843_v57 = vadd.f32 %v9842_v31, %v19690_v16  ;;  %v9834_v48 = vadd.f32 %v9833_v34, %v19692_v27  ;;  %v19696_v29 = vpop.f32.mrb[47].mxu1 }
 0xe84   :  { %20415 = vst [vmem:[#allocation63_spill] sm:$0xff] %v19696_v29  ;;  %v9826_v44 = vrot.slane %v9825_v36, 4  ;;  %v9852_v37 = vadd.f32 %v9851_v28, %v19696_v29 }
 0xe85   :  { %v9844_v0 = vrot.slane %v9843_v57, 4  ;;  %v9835_v13 = vrot.slane %v9834_v48, 4 }
 0xe86   :  { %v9827_v59 = vadd.f32 %v9826_v44, %v9825_v36  ;;  %v9853_v11 = vrot.slane %v9852_v37, 4  ;;  %v10076_v44 = vld [vmem:[#allocation21 + $0x60] sm:$0xff] }
 0xe87   :  { %v9845_v47 = vadd.f32 %v9844_v0, %v9843_v57  ;;  %v9836_v32 = vadd.f32 %v9835_v13, %v9834_v48  ;;  %v10067_v13 = vld [vmem:[#allocation21 + $0x18] sm:$0xff]  ;;  %v10072_v57 = vld [vmem:[#allocation21 + $0x40] sm:$0xff] }
 0xe88   :  { %v9828_v3 = vrot.slane %v9827_v59, 2  ;;  %v9854_v26 = vadd.f32 %v9853_v11, %v9852_v37  ;;  %v10065_v11 = vld [vmem:[#allocation21 + $0x8] sm:$0xff]  ;;  %v10074_v37 = vld [vmem:[#allocation21 + $0x50] sm:$0xff] }
 0xe89   :  { %v9846_v7 = vrot.slane %v9845_v47, 2  ;;  %v9837_v33 = vrot.slane %v9836_v32, 2 }
 0xe8a   :  { %v9829_v23 = vadd.f32 %v9828_v3, %v9827_v59  ;;  %v9855_v1 = vrot.slane %v9854_v26, 2  ;;  %v10069_v59 = vld [vmem:[#allocation21 + $0x28] sm:$0xff]  ;;  %v19718_v3 = vpack.c.bf16 %v10076_v44, %v10072_v57 }
 0xe8b   :  { %v9847_v31 = vadd.f32 %v9846_v7, %v9845_v47  ;;  %v9838_v16 = vadd.f32 %v9837_v33, %v9836_v32  ;;  %v19701_v0 = vpack.c.bf16 %v10069_v59, %v10065_v11  ;;  %v10077_v33 = vld [vmem:[#allocation21 + $0x68] sm:$0xff]  ;;  %v10078_v47 = vld [vmem:[#allocation21 + $0x70] sm:$0xff] }
 0xe8c   :  { %v9830_v34 = vrot.slane %v9829_v23, 1  ;;  %v9856_v27 = vadd.f32 %v9855_v1, %v9854_v26  ;;  %v10071_v1 = vld [vmem:[#allocation21 + $0x38] sm:$0xff]  ;;  %v10070_v26 = vld [vmem:[#allocation21 + $0x30] sm:$0xff] }
 0xe8d   :  { %v9848_v41 = vrot.slane %v9847_v31, 1  ;;  %v9839_v9 = vrot.slane %v9838_v16, 1  ;;  %v19703_v7 = vpack.c.bf16 %v10071_v1, %v10067_v13  ;;  %15194 = vmatprep.subr.bf16.mxu0 %v19701_v0 }
 0xe8e   :  { %v9857_v19 = vrot.slane %v9856_v27, 1  ;;  %v9831_v29 = vadd.f32 %v9830_v34, %v9829_v23 }
 0xe8f   :  { %v9840_v28 = vadd.f32 %v9839_v9, %v9838_v16  ;;  %v9849_v36 = vadd.f32 %v9848_v41, %v9847_v31  ;;  %15202 = vmatprep.subr.bf16.mxu1 %v19703_v7  ;;  %v10068_v9 = vld [vmem:[#allocation21 + $0x20] sm:$0xff]  ;;  %v10073_v41 = vld [vmem:[#allocation21 + $0x48] sm:$0xff]  ;;  %v10075_v16 = vld [vmem:[#allocation21 + $0x58] sm:$0xff]  ;;  %v19720_v31 = vpack.c.bf16 %v10078_v47, %v10074_v37 }
 0xe90   :  { %v9858_v2 = vadd.f32 %v9857_v19, %v9856_v27  ;;  %v10064_v19 = vld [vmem:[#allocation21] sm:$0xff]  ;;  %v10079_v27 = vld [vmem:[#allocation21 + $0x78] sm:$0xff] }
 0xe91   :  { %9987 = vmatprep.mubr.f32.mxu0 %v9840_v28  ;;  %v19707_v23 = vpack.c.bf16 %v10068_v9, %v10064_v19  ;;  %v19714_v48 = vpack.c.bf16 %v10079_v27, %v10075_v16  ;;  %v20426_v16 = vld [vmem:[#allocation55_spill] sm:$0xff] }
 0xe92   :  { %10057 = vmatprep.mubr.f32.mxu1 %v9858_v2  ;;  %9988 = vmatmul.mubr.f32.vlgmr.msra.gmra.mrb[34].mxu0 %v9831_v29  ;;  %v10066_v29 = vld [vmem:[#allocation21 + $0x10] sm:$0xff]  ;;  %v19711_v2 = vpack.c.bf16 %v10077_v33, %v10073_v41  ;;  %v20425_v41 = vld [vmem:[#allocation51_spill] sm:$0xff] }
 0xe93   :  { %10058 = vmatmul.mubr.f32.vlgmr.msra.gmra.mrb[38].mxu1 %v9849_v36  ;;  %10147 = vmatprep.mubr.f32.mxu0 %v20384_v39  ;;  %v19709_v32 = vpack.c.bf16 %v10070_v26, %v10066_v29  ;;  %v20424_v29 = vld [vmem:[#allocation62_spill] sm:$0xff] }
 0xe94   :  { %10218 = vmatprep.mubr.f32.mxu1 %v20384_v39  ;;  %15196 = vmatpush1.bf16.msra.mxu0 %v19707_v23 }
 0xe95   :  { %15204 = vmatpush1.bf16.msra.mxu1 %v19709_v32  ;;  %15198 = vmatprep.subr.bf16.mxu0 %v19711_v2 }
 0xe96   :  { %15206 = vmatprep.subr.bf16.mxu1 %v19714_v48 }
 0xe98   :  { %15200 = vmatpush1.bf16.msra.mxu0 %v19718_v3 }
 0xe99   :  { %15208 = vmatpush1.bf16.msra.mxu1 %v19720_v31  ;;  %15210 = vmatprep.subr.bf16.mxu0 %v19369_v8 }
 0xe9a   :  { %15242 = vmatprep.subr.bf16.mxu1 %v19371_v53 }
 0xf65   :  { %v14317_v34 = vpop.f32.mrb[34].mxu0 }
 0xf66   :  { %v14352_v28 = vpop.f32.mrb[38].mxu1  ;;  %v14318_v36 = vpop.f32.mrb[35].mxu0 }
 0xf67   :  { %v14319_v11 = vadd.f32 %v14318_v36, %v14317_v34  ;;  %v14353_v59 = vpop.f32.mrb[39].mxu1  ;;  %v20427_v36 = vld [vmem:[#allocation49_spill] sm:$0xff] }
 0xf68   :  { %v14354_v13 = vadd.f32 %v14353_v59, %v14352_v28  ;;  %v20428_v59 = vld [vmem:[#allocation63_spill] sm:$0xff] }
 0xf6a   :  { %v10060_v1 = vadd.f32 %v14354_v13, %v14319_v11 }
 0xf6c   :  { %v10063_v19 = vmul.f32 0.001953125, %v10060_v1 }
 0xf6e   :  { %13837 = vmatmul.mubr.msk.f32.vlgmr.msra.gmra.mrb[44].mxu0 %vm1355_vm0, %v10063_v19  ;;  %13838 = vmatmul.mubr.msk.f32.vlgmr.msra.gmra.mrb[48].mxu1 %vm1355_vm0, %v10063_v19 }
 0xf6f   :  { %15212 = vmatpush3.bf16.msra.mxu0 %v19404_v52  ;;  %15244 = vmatpush3.bf16.msra.mxu1 %v19407_v12 }
 0xf70   :  { %15214 = vmatprep.subr.bf16.mxu0 %v19409_v38  ;;  %15246 = vmatprep.subr.bf16.mxu1 %v19411_v20 }
 0xf73   :  { %15216 = vmatpush3.bf16.msra.mxu0 %v19426_v43  ;;  %15248 = vmatpush3.bf16.msra.mxu1 %v19431_v50 }
 0xf74   :  { %15218 = vmatprep.subr.bf16.mxu0 %v19444_v61  ;;  %15250 = vmatprep.subr.bf16.mxu1 %v19455_v45 }
 0xf77   :  { %15220 = vmatpush3.bf16.msra.mxu0 %v19457_v60  ;;  %15252 = vmatpush3.bf16.msra.mxu1 %v19469_v17  ;;  %v20416_v17 = vld [vmem:[#allocation58_spill] sm:$0xff] }
 0xf78   :  { %15222 = vmatprep.subr.bf16.mxu0 %v19482_v18  ;;  %15254 = vmatprep.subr.bf16.mxu1 %v19484_v54  ;;  %v20417_v54 = vld [vmem:[#allocation56_spill] sm:$0xff] }
 0xf7b   :  { %15224 = vmatpush3.bf16.msra.mxu0 %v19498_v55  ;;  %15256 = vmatpush3.bf16.msra.mxu1 %v19503_v15  ;;  %v20418_v15 = vld [vmem:[#allocation60_spill] sm:$0xff] }
 0xf7c   :  { %15226 = vmatprep.subr.bf16.mxu0 %v19516_v22  ;;  %15258 = vmatprep.subr.bf16.mxu1 %v19527_v30  ;;  %v20419_v30 = vld [vmem:[#allocation54_spill] sm:$0xff] }
 0xf7f   :  { %15228 = vmatpush3.bf16.msra.mxu0 %v19529_v63  ;;  %15260 = vmatpush3.bf16.msra.mxu1 %v19541_v49  ;;  %v20420_v49 = vld [vmem:[#allocation57_spill] sm:$0xff] }
 0xf80   :  { %15230 = vmatprep.subr.bf16.mxu0 %v19554_v25  ;;  %15262 = vmatprep.subr.bf16.mxu1 %v19556_v40 }
 0xf83   :  { %15232 = vmatpush3.bf16.msra.mxu0 %v19568_v58  ;;  %15264 = vmatpush3.bf16.msra.mxu1 %v19581_v21 }
 0xf84   :  { %15234 = vmatprep.subr.bf16.mxu0 %v19583_v56  ;;  %15266 = vmatprep.subr.bf16.mxu1 %v19594_v5 }
 0xf87   :  { %15236 = vmatpush3.bf16.msra.mxu0 %v19606_v62  ;;  %15268 = vmatpush3.bf16.msra.mxu1 %v19619_v42 }
 0xf88   :  { %15238 = vmatprep.subr.bf16.mxu0 %v19621_v46  ;;  %15270 = vmatprep.subr.bf16.mxu1 %v19633_v6  ;;  %v20421_v6 = vld [vmem:[#allocation52_spill] sm:$0xff] }
 0xf8b   :  { %15240 = vmatpush3.bf16.msra.mxu0 %v19642_v14  ;;  %15272 = vmatpush3.bf16.msra.mxu1 %v19646_v51  ;;  %v20422_v51 = vld [vmem:[#allocation59_spill] sm:$0xff] }
 0xf8c   :  { %15274 = vmatprep.subr.bf16.mxu0 %v19701_v0  ;;  %15282 = vmatprep.subr.bf16.mxu1 %v19703_v7 }
0x1041   :  { %v10149_v8 = vpop.f32.mrb[44].mxu0  ;;  %v10220_v53 = vpop.f32.mrb[48].mxu1 }
0x1042   :  { %v10228_v52 = vrot.slane %v10149_v8, %v18324_v35  ;;  %v10236_v12 = vrot.slane %v10220_v53, %v18324_v35  ;;  %v10151_v38 = vpop.f32.mrb[45].mxu0  ;;  %v10222_v20 = vpop.f32.mrb[49].mxu1 }
0x1043   :  { %v10232_v43 = vrot.slane %v10151_v38, %v18324_v35  ;;  %v10240_v50 = vrot.slane %v10222_v20, %v18324_v35 }
0x1044   :  { %v19766_v61 = vsub.f32 %v19651_v24, %v10228_v52  ;;  %v19769_v45 = vsub.f32 %v19659_v4, %v10228_v52  ;;  %v19772_v60 = vsub.f32 %v19675_v10, %v10228_v52  ;;  %v19775_v18 = vsub.f32 %v20416_v17, %v10228_v52  ;;  %v20423_v4 = vld [vmem:[#allocation61_spill] sm:$0xff] }
0x1045   :  { %v19778_v55 = vsub.f32 %v20417_v54, %v10236_v12  ;;  %v19781_v22 = vsub.f32 %v20418_v15, %v10236_v12  ;;  %v19784_v63 = vsub.f32 %v20419_v30, %v10236_v12  ;;  %v19787_v25 = vsub.f32 %v20420_v49, %v10236_v12 }
0x1046   :  { %v10257_v40 = vmul.f32 %v19766_v61, %v19766_v61  ;;  %v10261_v58 = vmul.f32 %v19769_v45, %v19769_v45  ;;  %v10265_v21 = vmul.f32 %v19772_v60, %v19772_v60  ;;  %v10269_v56 = vmul.f32 %v19775_v18, %v19775_v18 }
0x1047   :  { %v10259_v5 = vmul.f32 %v19778_v55, %v19778_v55  ;;  %v10263_v62 = vmul.f32 %v19781_v22, %v19781_v22  ;;  %v10267_v42 = vmul.f32 %v19784_v63, %v19784_v63  ;;  %v19804_v14 = vsub.f32 %v20421_v6, %v10232_v43 }
0x1048   :  { %v10273_v46 = vadd.f32 %v10261_v58, %v10257_v40  ;;  %v19807_v24 = vsub.f32 %v20422_v51, %v10232_v43  ;;  %v19810_v10 = vsub.f32 %v20423_v4, %v10232_v43  ;;  %v19813_v26 = vsub.f32 %v20424_v29, %v10232_v43 }
0x1049   :  { %v10291_v9 = vadd.f32 %v10263_v62, %v10259_v5  ;;  %v19816_v33 = vsub.f32 %v20425_v41, %v10240_v50  ;;  %v19819_v27 = vsub.f32 %v20426_v16, %v10240_v50  ;;  %v10271_v44 = vmul.f32 %v19787_v25, %v19787_v25 }
0x104a   :  { %v10274_v57 = vadd.f32 %v10273_v46, %v10265_v21  ;;  %v10258_v37 = vmul.f32 %v19804_v14, %v19804_v14  ;;  %v10262_v47 = vmul.f32 %v19807_v24, %v19807_v24  ;;  %v10266_v28 = vmul.f32 %v19810_v10, %v19810_v10 }
0x104b   :  { %v10292_v34 = vadd.f32 %v10291_v9, %v10267_v42  ;;  %v19830_v11 = vsub.f32 %v20427_v36, %v10240_v50  ;;  %v19833_v13 = vsub.f32 %v20428_v59, %v10240_v50  ;;  %v10260_v8 = vmul.f32 %v19816_v33, %v19816_v33 }
0x104c   :  { %v10275_v1 = vadd.f32 %v10274_v57, %v10269_v56  ;;  %v10282_v19 = vadd.f32 %v10262_v47, %v10258_v37  ;;  %v10264_v53 = vmul.f32 %v19819_v27, %v19819_v27  ;;  %v10270_v12 = vmul.f32 %v19813_v26, %v19813_v26 }
0x104d   :  { %v10293_v52 = vadd.f32 %v10292_v34, %v10271_v44  ;;  %v10268_v38 = vmul.f32 %v19830_v11, %v19830_v11  ;;  %v10272_v54 = vmul.f32 %v19833_v13, %v19833_v13 }
0x104e   :  { %v10300_v20 = vadd.f32 %v10264_v53, %v10260_v8  ;;  %v10283_v43 = vadd.f32 %v10282_v19, %v10266_v28  ;;  %v10276_v17 = vrot.slane %v10275_v1, 4 }
0x104f   :  { %v10294_v50 = vrot.slane %v10293_v52, 4 }
0x1050   :  { %v10284_v15 = vadd.f32 %v10283_v43, %v10270_v12  ;;  %v10301_v30 = vadd.f32 %v10300_v20, %v10268_v38  ;;  %v10277_v49 = vadd.f32 %v10276_v17, %v10275_v1  ;;  %v10450_v43 = vld [vmem:[#allocation22] sm:$0x1] }
0x1051   :  { %v10295_v40 = vadd.f32 %v10294_v50, %v10293_v52 }
0x1052   :  { %v10285_v58 = vrot.slane %v10284_v15, 4  ;;  %v10302_v21 = vadd.f32 %v10301_v30, %v10272_v54  ;;  %v10278_v56 = vrot.slane %v10277_v49, 2  ;;  %v16809_v54 = vld [vmem:[#allocation25 + $0x180] sm:$0xff]   ;;  %v16813_v30 = vld [vmem:[#allocation25 + $0x188] sm:$0xff]  }
0x1053   :  { %v10296_v5 = vrot.slane %v10295_v40, 2 }
0x1054   :  { %v10286_v62 = vadd.f32 %v10285_v58, %v10284_v15  ;;  %v10303_v42 = vrot.slane %v10302_v21, 4  ;;  %v10279_v46 = vadd.f32 %v10278_v56, %v10277_v49  ;;  %v16812_v15 = vld [vmem:[#allocation25 + $0x108] sm:$0xff]   ;;  %v16816_v49 = vld [vmem:[#allocation25 + $0x110] sm:$0xff]   ;;  %v16818_v58 = vld [vmem:[#allocation25 + $0x158] sm:$0xff]  }
0x1055   :  { %v10297_v4 = vadd.f32 %v10296_v5, %v10295_v40  ;;  %v16817_v40 = vld [vmem:[#allocation25 + $0x190] sm:$0xff]   ;;  %v16820_v56 = vld [vmem:[#allocation25 + $0x118] sm:$0xff]  }
0x1056   :  { %v10287_v6 = vrot.slane %v10286_v62, 2  ;;  %v10304_v51 = vadd.f32 %v10303_v42, %v10302_v21  ;;  %v10280_v41 = vrot.slane %v10279_v46, 1  ;;  %v16819_v21 = vld [vmem:[#allocation25 + $0x1d8] sm:$0xff]   ;;  %v16823_v42 = vld [vmem:[#allocation25 + $0x1e0] sm:$0xff]  }
0x1057   :  { %v10298_v44 = vrot.slane %v10297_v4, 1  ;;  %v16821_v5 = vld [vmem:[#allocation25 + $0x198] sm:$0xff]  }
0x1058   :  { %v10288_v9 = vadd.f32 %v10287_v6, %v10286_v62  ;;  %v10305_v29 = vrot.slane %v10304_v51, 2  ;;  %v10281_v34 = vadd.f32 %v10280_v41, %v10279_v46  ;;  %v16822_v62 = vld [vmem:[#allocation25 + $0x160] sm:$0xff]   ;;  %v16830_v41 = vld [vmem:[#allocation25 + $0x170] sm:$0xff]  }
0x1059   :  { %v10299_v36 = vadd.f32 %v10298_v44, %v10297_v4  ;;  %v16824_v46 = vld [vmem:[#allocation25 + $0x120] sm:$0xff]   ;;  %v16827_v4 = vld [vmem:[#allocation25 + $0x1e8] sm:$0xff]   ;;  %v16833_v44 = vld [vmem:[#allocation25 + $0x1b0] sm:$0xff]  }
0x105a   :  { %v10289_v16 = vrot.slane %v10288_v9, 1  ;;  %v10306_v57 = vadd.f32 %v10305_v29, %v10304_v51  ;;  %v16825_v6 = vld [vmem:[#allocation25 + $0x1a0] sm:$0xff]   ;;  %v16826_v51 = vld [vmem:[#allocation25 + $0x168] sm:$0xff]  }
0x105b   :  { %v16829_v29 = vld [vmem:[#allocation25 + $0x1a8] sm:$0xff]  }
0x105c   :  { %v10290_v37 = vadd.f32 %v10289_v16, %v10288_v9  ;;  %v10307_v47 = vrot.slane %v10306_v57, 1  ;;  %v16828_v9 = vld [vmem:[#allocation25 + $0x128] sm:$0xff]   ;;  %v16831_v16 = vld [vmem:[#allocation25 + $0x1f0] sm:$0xff]  }
0x105e   :  { %10373 = vmatprep.mubr.f32.mxu0 %v10290_v37  ;;  %v10308_v28 = vadd.f32 %v10307_v47, %v10306_v57  ;;  %v16832_v57 = vld [vmem:[#allocation25 + $0x130] sm:$0xff]   ;;  %v16834_v37 = vld [vmem:[#allocation25 + $0x178] sm:$0xff]  }
0x105f   :  { %10374 = vmatmul.mubr.f32.vlgmr.msra.gmra.mrb[46].mxu0 %v10281_v34  ;;  %v16835_v47 = vld [vmem:[#allocation25 + $0x1f8] sm:$0xff]  }
0x1060   :  { %10443 = vmatprep.mubr.f32.mxu1 %v10308_v28  ;;  %15276 = vmatpush1.bf16.msra.mxu0 %v19707_v23  ;;  %v16836_v34 = vld [vmem:[#allocation25 + $0x138] sm:$0xff]  }
0x1061   :  { %10444 = vmatmul.mubr.f32.vlgmr.msra.gmra.mrb[50].mxu1 %v10299_v36  ;;  %15278 = vmatprep.subr.bf16.mxu0 %v19711_v2  ;;  %v16837_v28 = vld [vmem:[#allocation25 + $0x1b8] sm:$0xff]   ;;  %v16838_v36 = vld [vmem:[#allocation25 + $0x40] sm:$0xff]  }
0x1062   :  { %15284 = vmatpush1.bf16.msra.mxu1 %v19709_v32  ;;  %10521 = vmatprep.mubr.f32.mxu0 %v20384_v39 }
0x1063   :  { %15286 = vmatprep.subr.bf16.mxu1 %v19714_v48  ;;  %10592 = vmatprep.mubr.f32.mxu1 %v20384_v39 }
0x1064   :  { %15280 = vmatpush1.bf16.msra.mxu0 %v19718_v3 }
0x1065   :  { %15290 = vmatprep.subr.bf16.mxu0 %v19701_v0  ;;  %v10599_v0 = vld [vmem:[#allocation24] sm:$0x1] }
0x1066   :  { %15288 = vmatpush1.bf16.msra.mxu1 %v19720_v31 }
0x1067   :  { %15298 = vmatprep.subr.bf16.mxu1 %v19703_v7  ;;  %v16806_v7 = vld [vmem:[#allocation25 + $0x140] sm:$0xff]  }
0x1132   :  { %v14387_v59 = vpop.f32.mrb[46].mxu0 }
0x1133   :  { %v14388_v1 = vpop.f32.mrb[47].mxu0 }
0x1134   :  { %v14422_v19 = vpop.f32.mrb[50].mxu1  ;;  %v14389_v8 = vadd.f32 %v14388_v1, %v14387_v59  ;;  %v16839_v59 = vld [vmem:[#allocation25 + $0xc0] sm:$0xff]  }
0x1135   :  { %v14423_v53 = vpop.f32.mrb[51].mxu1 }
0x1136   :  { %v14424_v52 = vadd.f32 %v14423_v53, %v14422_v19 }
0x1138   :  { %v10446_v12 = vadd.f32 %v14424_v52, %v14389_v8 }
0x113a   :  { %v10449_v38 = vmul.f32 0.001953125, %v10446_v12 }
0x113c   :  { %v10451_v20 = vadd.f32 1e-05, %v10449_v38 }
0x113e   :  { %16906 = vrsqrt.f32 %v10451_v20 }
0x1148   :  { %v16907_v17 = vpop.eup %16906 }
0x1149   :  { %v10453_v50 = vmul.f32 %v16907_v17, %v10450_v43 }
0x114b   :  { %13839 = vmatmul.mubr.msk.f32.vlgmr.msra.gmra.mrb[48].mxu0 %vm1355_vm0, %v10453_v50  ;;  %13840 = vmatmul.mubr.msk.f32.vlgmr.msra.gmra.mrb[52].mxu1 %vm1355_vm0, %v10453_v50 }
0x114c   :  { %15292 = vmatpush1.bf16.msra.mxu0 %v19707_v23  ;;  %15300 = vmatpush1.bf16.msra.mxu1 %v19709_v32  ;;  %v16807_v23 = vld [vmem:[#allocation25 + $0x1c0] sm:$0xff]  }
0x114d   :  { %15294 = vmatprep.subr.bf16.mxu0 %v19711_v2  ;;  %15302 = vmatprep.subr.bf16.mxu1 %v19714_v48  ;;  %v16808_v32 = vld [vmem:[#allocation25 + $0x100] sm:$0xff]   ;;  %v16810_v2 = vld [vmem:[#allocation25 + $0x148] sm:$0xff]  }
0x114e   :  { %10667 = vmatprep.mubr.f32.mxu0 %v20384_v39  ;;  %10738 = vmatprep.mubr.f32.mxu1 %v20384_v39  ;;  %v16811_v48 = vld [vmem:[#allocation25 + $0x1c8] sm:$0xff]  }
0x1150   :  { %15296 = vmatpush1.bf16.msra.mxu0 %v19718_v3  ;;  %15304 = vmatpush1.bf16.msra.mxu1 %v19720_v31  ;;  %v16814_v3 = vld [vmem:[#allocation25 + $0x150] sm:$0xff]  }
0x1151   :  { %14425 = vmatprep.subr.bf16.mxu0 %v16806_v7  ;;  %14453 = vmatprep.subr.bf16.mxu1 %v16807_v23  ;;  %v16815_v31 = vld [vmem:[#allocation25 + $0x1d0] sm:$0xff]  }
0x1153   :  { %13841 = vmatmul.mubr.msk.f32.vlgmr.msra.gmra.mrb[50].mxu0 %vm1355_vm0, %v10599_v0  ;;  %13842 = vmatmul.mubr.msk.f32.vlgmr.msra.gmra.mrb[54].mxu1 %vm1355_vm0, %v10599_v0  ;;  %vm12903_vm0 = vcmask 58368  }
0x1154   :  { %14426 = vmatpush3.bf16.msra.mxu0 %v16808_v32  ;;  %14454 = vmatpush3.bf16.msra.mxu1 %v16809_v54 }
0x1155   :  { %14427 = vmatprep.subr.bf16.mxu0 %v16810_v2  ;;  %14455 = vmatprep.subr.bf16.mxu1 %v16811_v48 }
0x1158   :  { %14428 = vmatpush3.bf16.msra.mxu0 %v16812_v15  ;;  %14456 = vmatpush3.bf16.msra.mxu1 %v16813_v30 }
0x1159   :  { %14429 = vmatprep.subr.bf16.mxu0 %v16814_v3  ;;  %14457 = vmatprep.subr.bf16.mxu1 %v16815_v31 }
0x115c   :  { %14430 = vmatpush3.bf16.msra.mxu0 %v16816_v49  ;;  %14458 = vmatpush3.bf16.msra.mxu1 %v16817_v40 }
0x115d   :  { %14431 = vmatprep.subr.bf16.mxu0 %v16818_v58  ;;  %14459 = vmatprep.subr.bf16.mxu1 %v16819_v21 }
0x1160   :  { %14432 = vmatpush3.bf16.msra.mxu0 %v16820_v56  ;;  %14460 = vmatpush3.bf16.msra.mxu1 %v16821_v5 }
0x1161   :  { %14433 = vmatprep.subr.bf16.mxu0 %v16822_v62  ;;  %14461 = vmatprep.subr.bf16.mxu1 %v16823_v42 }
0x1164   :  { %14434 = vmatpush3.bf16.msra.mxu0 %v16824_v46  ;;  %14462 = vmatpush3.bf16.msra.mxu1 %v16825_v6 }
0x1165   :  { %14435 = vmatprep.subr.bf16.mxu0 %v16826_v51  ;;  %14463 = vmatprep.subr.bf16.mxu1 %v16827_v4 }
0x1168   :  { %14436 = vmatpush3.bf16.msra.mxu0 %v16828_v9  ;;  %14464 = vmatpush3.bf16.msra.mxu1 %v16829_v29 }
0x1169   :  { %14437 = vmatprep.subr.bf16.mxu0 %v16830_v41  ;;  %14465 = vmatprep.subr.bf16.mxu1 %v16831_v16 }
0x116c   :  { %14438 = vmatpush3.bf16.msra.mxu0 %v16832_v57  ;;  %14466 = vmatpush3.bf16.msra.mxu1 %v16833_v44 }
0x116d   :  { %14439 = vmatprep.subr.bf16.mxu0 %v16834_v37  ;;  %14467 = vmatprep.subr.bf16.mxu1 %v16835_v47 }
0x1170   :  { %14440 = vmatpush3.bf16.msra.mxu0 %v16836_v34  ;;  %14468 = vmatpush3.bf16.msra.mxu1 %v16837_v28 }
0x1171   :  { %14481 = vmatprep.subr.bf16.mxu0 %v16838_v36  ;;  %14509 = vmatprep.subr.bf16.mxu1 %v16839_v59 }
0x121e   :  { %v10523_v1 = vpop.f32.mrb[48].mxu0  ;;  %v10594_v19 = vpop.f32.mrb[52].mxu1 }
0x121f   :  { %v10525_v8 = vpop.f32.mrb[49].mxu0  ;;  %v10596_v53 = vpop.f32.mrb[53].mxu1  ;;  %v10748_v52 = vrot.slane %v10523_v1, %v18324_v35  ;;  %v10756_v12 = vrot.slane %v10594_v19, %v18324_v35 }
0x1220   :  { %v10752_v38 = vrot.slane %v10525_v8, %v18324_v35  ;;  %v10760_v20 = vrot.slane %v10596_v53, %v18324_v35 }
0x1221   :  { %v10761_v43 = vmul.f32 %v10748_v52, %v19766_v61  ;;  %v10765_v17 = vmul.f32 %v10748_v52, %v19769_v45  ;;  %v10769_v50 = vmul.f32 %v10748_v52, %v19772_v60  ;;  %v10773_v0 = vmul.f32 %v10748_v52, %v19775_v18 }
0x1222   :  { %v10763_v7 = vmul.f32 %v10756_v12, %v19778_v55  ;;  %v10767_v23 = vmul.f32 %v10756_v12, %v19781_v22  ;;  %v10771_v32 = vmul.f32 %v10756_v12, %v19784_v63  ;;  %v10775_v54 = vmul.f32 %v10756_v12, %v19787_v25 }
0x1223   :  { %v10762_v2 = vmul.f32 %v10752_v38, %v19804_v14  ;;  %v10766_v48 = vmul.f32 %v10752_v38, %v19807_v24  ;;  %v10770_v61 = vmul.f32 %v10752_v38, %v19810_v10  ;;  %v10774_v45 = vmul.f32 %v10752_v38, %v19813_v26 }
0x1224   :  { %v10764_v18 = vmul.f32 %v10760_v20, %v19816_v33  ;;  %v10768_v55 = vmul.f32 %v10760_v20, %v19819_v27  ;;  %v10772_v14 = vmul.f32 %v10760_v20, %v19830_v11  ;;  %v10776_v24 = vmul.f32 %v10760_v20, %v19833_v13 }
0x1226   :  { %v10669_v15 = vpop.f32.mrb[50].mxu0  ;;  %v10740_v60 = vpop.f32.mrb[54].mxu1 }
0x1227   :  { %v10780_v22 = vrot.slane %v10669_v15, %v18324_v35  ;;  %v10788_v63 = vrot.slane %v10740_v60, %v18324_v35  ;;  %v10671_v30 = vpop.f32.mrb[51].mxu0  ;;  %v10742_v25 = vpop.f32.mrb[55].mxu1 }
0x1228   :  { %v10784_v10 = vrot.slane %v10671_v30, %v18324_v35  ;;  %v10792_v26 = vrot.slane %v10742_v25, %v18324_v35 }
0x1229   :  { %v10793_v3 = vadd.f32 %v10780_v22, %v10761_v43  ;;  %v10797_v31 = vadd.f32 %v10780_v22, %v10765_v17  ;;  %v10801_v49 = vadd.f32 %v10780_v22, %v10769_v50  ;;  %v10805_v33 = vadd.f32 %v10780_v22, %v10773_v0 }
0x122a   :  { %v10795_v40 = vadd.f32 %v10788_v63, %v10763_v7  ;;  %v10799_v27 = vadd.f32 %v10788_v63, %v10767_v23  ;;  %v10803_v58 = vadd.f32 %v10788_v63, %v10771_v32  ;;  %v10807_v21 = vadd.f32 %v10788_v63, %v10775_v54 }
0x122b   :  { %v10809_v56 = vmax.f32 %v10793_v3, 0.0  ;;  %v10813_v5 = vmax.f32 %v10797_v31, 0.0  ;;  %v10817_v62 = vmax.f32 %v10801_v49, 0.0  ;;  %v10821_v42 = vmax.f32 %v10805_v33, 0.0  ;;  %v10952_v49 = vld [vmem:[#allocation3 + $0x20] sm:$0x11] }
0x122c   :  { %v10811_v46 = vmax.f32 %v10795_v40, 0.0  ;;  %v10815_v11 = vmax.f32 %v10799_v27, 0.0  ;;  %v10819_v6 = vmax.f32 %v10803_v58, 0.0  ;;  %v10823_v13 = vmax.f32 %v10807_v21, 0.0  ;;  %v16921_v27 = vld [vmem:[#allocation3] sm:$0xff] }
0x122d   :  { %v10794_v51 = vadd.f32 %v10784_v10, %v10762_v2  ;;  %v10798_v4 = vadd.f32 %v10784_v10, %v10766_v48  ;;  %v10802_v9 = vadd.f32 %v10784_v10, %v10770_v61  ;;  %v10806_v29 = vadd.f32 %v10784_v10, %v10774_v45 }
0x122e   :  { %v10796_v41 = vadd.f32 %v10792_v26, %v10764_v18  ;;  %v10800_v16 = vadd.f32 %v10792_v26, %v10768_v55  ;;  %v10804_v57 = vadd.f32 %v10792_v26, %v10772_v14  ;;  %v10808_v44 = vadd.f32 %v10792_v26, %v10776_v24 }
0x122f   :  { %v10810_v37 = vmax.f32 %v10794_v51, 0.0  ;;  %v10814_v47 = vmax.f32 %v10798_v4, 0.0  ;;  %v10818_v34 = vmax.f32 %v10802_v9, 0.0  ;;  %v10822_v28 = vmax.f32 %v10806_v29, 0.0 }
0x1230   :  { %v10812_v36 = vmax.f32 %v10796_v41, 0.0  ;;  %v10816_v59 = vmax.f32 %v10800_v16, 0.0  ;;  %v10820_v1 = vmax.f32 %v10804_v57, 0.0  ;;  %v10824_v19 = vmax.f32 %v10808_v44, 0.0 }
0x1231   :  { %v13997_v8 = vpack.c.bf16 %v10810_v37, %v10809_v56  ;;  %v13999_v53 = vpack.c.bf16 %v10814_v47, %v10813_v5  ;;  %v14001_v52 = vpack.c.bf16 %v10818_v34, %v10817_v62  ;;  %v14003_v12 = vpack.c.bf16 %v10822_v28, %v10821_v42  ;;  %v10958_v62 = vld [vmem:[#allocation3 + $0x30] sm:$0xff]  ;;  %v10947_v47 = vld [vmem:[#allocation3 + $0x8] sm:$0xff] }
0x1232   :  { %v13998_v38 = vpack.c.bf16 %v10812_v36, %v10811_v46  ;;  %v14000_v20 = vpack.c.bf16 %v10816_v59, %v10815_v11  ;;  %v14002_v43 = vpack.c.bf16 %v10820_v1, %v10819_v6  ;;  %v19891_v17 = vpack.c.bf16 %v10824_v19, %v10823_v13  ;;  %v10966_v42 = vld [vmem:[#allocation3 + $0x50] sm:$0x11]  ;;  %v10955_v36 = vld [vmem:[#allocation3 + $0x28] sm:$0x11] }
0x1233   :  { %v10866_v50 = vshrl.u32 %v13997_v8, 16  ;;  %v10869_v0 = vshll.u32 %v13997_v8, 16  ;;  %v10881_v7 = vshrl.u32 %v13999_v53, 16  ;;  %v10884_v23 = vshll.u32 %v13999_v53, 16 }
0x1234   :  { %v10900_v32 = vshrl.u32 %v14001_v52, 16  ;;  %v10903_v54 = vshll.u32 %v14001_v52, 16  ;;  %v10915_v2 = vshrl.u32 %v14003_v12, 16  ;;  %v10918_v48 = vshll.u32 %v14003_v12, 16 }
0x1235   :  { %v10868_v61 = vrot.slane %v10866_v50, 7  ;;  %v10883_v45 = vrot.slane %v10881_v7, 7  ;;  %v10873_v15 = vshrl.u32 %v13998_v38, 16  ;;  %v10876_v60 = vshll.u32 %v13998_v38, 16 }
0x1236   :  { %v10902_v18 = vrot.slane %v10900_v32, 7  ;;  %v10917_v55 = vrot.slane %v10915_v2, 7  ;;  %v10890_v22 = vshrl.u32 %v14000_v20, 16  ;;  %v10893_v63 = vshll.u32 %v14000_v20, 16 }
0x1237   :  { %v10871_v30 = vor.u32 %v10869_v0, %v10868_v61  ;;  %v10879_v25 = vrot.slane %v10868_v61, 4  ;;  %v10886_v14 = vor.u32 %v10884_v23, %v10883_v45  ;;  %v10897_v24 = vrot.slane %v10883_v45, 4  ;;  %v10961_v0 = vld [vmem:[#allocation3 + $0x38] sm:$0xff] }
0x1238   :  { %v10905_v10 = vor.u32 %v10903_v54, %v10902_v18  ;;  %v10913_v26 = vrot.slane %v10902_v18, 4  ;;  %v10920_v3 = vor.u32 %v10918_v48, %v10917_v55  ;;  %v10931_v31 = vrot.slane %v10917_v55, 4  ;;  %v10969_v54 = vld [vmem:[#allocation3 + $0x58] sm:$0x11] }
0x1239   :  { %v19895_v40 = vsel %vm17823_vm7, %v10879_v25, %v10886_v14  ;;  %v19899_v21 = vsel %vm18487_vm3, %v10871_v30, %v16921_v27  ;;  %v10953_v5 = vsel %vm18434_vm10, %v10897_v24, %v10952_v49  ;;  %v10875_v46 = vrot.slane %v10873_v15, 7 }
0x123a   :  { %v19905_v11 = vsel %vm17823_vm7, %v10913_v26, %v10920_v3  ;;  %10946 = vst [vmem:[#allocation3] sm:$0xff] %v19899_v21  ;;  %10954 = vst [vmem:[#allocation3 + $0x20] sm:$0x11] %v10953_v5  ;;  %v19910_v6 = vsel %vm18487_vm3, %v10905_v10, %v10958_v62  ;;  %v10967_v13 = vsel %vm18434_vm10, %v10931_v31, %v10966_v42  ;;  %v10892_v51 = vrot.slane %v10890_v22, 7  ;;  %v16855_v3 = vld [vmem:[#allocation25 + $0xe0] sm:$0xff]  }
0x123b   :  { %10960 = vst [vmem:[#allocation3 + $0x30] sm:$0xff] %v19910_v6  ;;  %10968 = vst [vmem:[#allocation3 + $0x50] sm:$0x11] %v10967_v13  ;;  %v10878_v4 = vor.u32 %v10876_v60, %v10875_v46  ;;  %v10888_v9 = vrot.slane %v10875_v46, 4  ;;  %v10907_v29 = vshrl.u32 %v14002_v43, 16  ;;  %v10910_v41 = vshll.u32 %v14002_v43, 16 }
0x123c   :  { %v10895_v16 = vor.u32 %v10893_v63, %v10892_v51  ;;  %v10898_v57 = vrot.slane %v10892_v51, 4  ;;  %v10924_v44 = vshrl.u32 %v19891_v17, 16  ;;  %v10927_v37 = vshll.u32 %v19891_v17, 16 }
0x123d   :  { %v10909_v34 = vrot.slane %v10907_v29, 7  ;;  %v19919_v28 = vsel %vm18487_vm3, %v10878_v4, %v10947_v47  ;;  %v11049_v59 = vshrl.u32 %v19899_v21, 16  ;;  %v11052_v1 = vshll.u32 %v19899_v21, 16 }
0x123e   :  { %v19925_v19 = vsel %vm17823_vm7, %v10888_v9, %v10895_v16  ;;  %v10926_v8 = vrot.slane %v10924_v44, 7  ;;  %10949 = vst [vmem:[#allocation3 + $0x8] sm:$0xff] %v19919_v28  ;;  %v10956_v53 = vsel %vm18434_vm10, %v10898_v57, %v10955_v36  ;;  %v11058_v52 = vshll.u32 %v19895_v40, 16  ;;  %v16840_v36 = vld [vmem:[#allocation25] sm:$0xff]  }
0x123f   :  { %v10912_v12 = vor.u32 %v10910_v41, %v10909_v34  ;;  %v10922_v38 = vrot.slane %v10909_v34, 4  ;;  %10957 = vst [vmem:[#allocation3 + $0x28] sm:$0x11] %v10956_v53  ;;  %v11051_v20 = vrot.slane %v11049_v59, 4  ;;  %v11054_v43 = vrot.slane %v11052_v1, 5 }
0x1240   :  { %v10929_v17 = vor.u32 %v10927_v37, %v10926_v8  ;;  %v10932_v50 = vrot.slane %v10926_v8, 4  ;;  %v11060_v7 = vrot.slane %v11058_v52, 5  ;;  %v11076_v23 = vshrl.u32 %v19895_v40, 16 }
0x1241   :  { %v19934_v32 = vsel %vm18487_vm3, %v10912_v12, %v10961_v0  ;;  %v19936_v2 = vld [vmem:[#allocation3 + $0x20] sm:$0x11]  ;;  %v11055_v48 = vor.u32 %v11054_v43, %v11051_v20  ;;  %v11063_v61 = vshrl.u32 %v19919_v28, 16  ;;  %v11066_v45 = vshll.u32 %v19919_v28, 16 }
0x1242   :  { %v19942_v15 = vsel %vm17823_vm7, %v10922_v38, %v10929_v17  ;;  %10963 = vst [vmem:[#allocation3 + $0x38] sm:$0xff] %v19934_v32  ;;  %v10970_v60 = vsel %vm18434_vm10, %v10932_v50, %v10969_v54  ;;  %v11078_v18 = vrot.slane %v11076_v23, 4  ;;  %v11082_v55 = vshll.u32 %v19936_v2, 16  ;;  %v19953_v27 = vld [vmem:[#allocation3 + $0x50] sm:$0x11]  ;;  %v16842_v12 = vld [vmem:[#allocation25 + $0x48] sm:$0xff]  }
0x1243   :  { %10971 = vst [vmem:[#allocation3 + $0x58] sm:$0x11] %v10970_v60  ;;  %v11056_v22 = vrot.slane %v11055_v48, 4  ;;  %v11065_v63 = vrot.slane %v11063_v61, 4  ;;  %v11068_v30 = vrot.slane %v11066_v45, 5  ;;  %v11072_v25 = vshll.u32 %v19925_v19, 16 }
0x1244   :  { %v11079_v14 = vor.u32 %v11078_v18, %v11060_v7  ;;  %v11084_v24 = vrot.slane %v11082_v55, 5  ;;  %v11086_v10 = vshrl.u32 %v19925_v19, 16  ;;  %v11097_v26 = vshrl.u32 %v19910_v6, 16  ;;  %v16841_v61 = vld [vmem:[#allocation25 + $0x80] sm:$0xff]   ;;  %v16844_v18 = vld [vmem:[#allocation25 + $0x8] sm:$0xff]  }
0x1245   :  { %v11061_v31 = vsel %vm17867_vm11, %v11056_v22, %v11060_v7  ;;  %v11069_v49 = vor.u32 %v11068_v30, %v11065_v63  ;;  %v11074_v33 = vrot.slane %v11072_v25, 5  ;;  %v11100_v58 = vshll.u32 %v19910_v6, 16  ;;  %v16843_v25 = vld [vmem:[#allocation25 + $0xc8] sm:$0xff]  }
0x1246   :  { %v11080_v56 = vrot.slane %v11079_v14, 4  ;;  %v19956_v5 = vld [vmem:[#allocation3 + $0x28] sm:$0x11]  ;;  %v11088_v62 = vrot.slane %v11086_v10, 4  ;;  %v11099_v42 = vrot.slane %v11097_v26, 4  ;;  %v11106_v46 = vshll.u32 %v19905_v11, 16 }
0x1247   :  { %v11070_v13 = vrot.slane %v11069_v49, 4  ;;  %v11092_v51 = vshll.u32 %v19956_v5, 16  ;;  %v11102_v4 = vrot.slane %v11100_v58, 5  ;;  %v11124_v9 = vshrl.u32 %v19905_v11, 16  ;;  %v16846_v14 = vld [vmem:[#allocation25 + $0x50] sm:$0xff]  }
0x1248   :  { %v11085_v29 = vsel %vm17867_vm11, %v11080_v56, %v11084_v24  ;;  %v11089_v41 = vor.u32 %v11088_v62, %v11074_v33  ;;  %v11108_v16 = vrot.slane %v11106_v46, 5  ;;  %v11130_v57 = vshll.u32 %v19953_v27, 16  ;;  %v16845_v46 = vld [vmem:[#allocation25 + $0x88] sm:$0xff]  }
0x1249   :  { %v13851_v44 = vcombine.low %v11061_v31, %v11085_v29  ;;  %v13852_v37 = vcombine.high %v11061_v31, %v11085_v29  ;;  %v11075_v47 = vsel %vm17867_vm11, %v11070_v13, %v11074_v33  ;;  %v11094_v34 = vrot.slane %v11092_v51, 5  ;;  %v16848_v51 = vld [vmem:[#allocation25 + $0x10] sm:$0xff]  }
0x124a   :  { %v11090_v59 = vrot.slane %v11089_v41, 4  ;;  %v11103_v1 = vor.u32 %v11102_v4, %v11099_v42  ;;  %v11126_v8 = vrot.slane %v11124_v9, 4  ;;  %v11132_v53 = vrot.slane %v11130_v57, 5  ;;  %v19966_v52 = vld [vmem:[#allocation3 + $0x58] sm:$0x11]  ;;  %v16847_v29 = vld [vmem:[#allocation25 + $0xd0] sm:$0xff]  }
0x124b   :  { %11465 = vmatprep.mubr.bf16.mxu0 %v13852_v37  ;;  %v11111_v38 = vshrl.u32 %v19934_v32, 16  ;;  %v11114_v20 = vshll.u32 %v19934_v32, 16  ;;  %v11120_v43 = vshll.u32 %v19942_v15, 16  ;;  %v11134_v17 = vshrl.u32 %v19942_v15, 16  ;;  %v16850_v37 = vld [vmem:[#allocation25 + $0x58] sm:$0xff]  }
0x124c   :  { %v11095_v50 = vsel %vm17867_vm11, %v11090_v59, %v11094_v34  ;;  %11466 = vmatmul.mubr.bf16.vlgmr.msra.gmra.mrb[52].mxu0 %v13851_v44  ;;  %v11104_v0 = vrot.slane %v11103_v1, 4  ;;  %v11127_v7 = vor.u32 %v11126_v8, %v11108_v16  ;;  %v11140_v23 = vshll.u32 %v19966_v52, 16  ;;  %v16849_v59 = vld [vmem:[#allocation25 + $0x90] sm:$0xff]   ;;  %v16851_v1 = vld [vmem:[#allocation25 + $0xd8] sm:$0xff]  }
0x124d   :  { %v13853_v54 = vcombine.low %v11075_v47, %v11095_v50  ;;  %v13854_v48 = vcombine.high %v11075_v47, %v11095_v50  ;;  %14482 = vmatpush3.bf16.msra.mxu0 %v16840_v36  ;;  %v11113_v45 = vrot.slane %v11111_v38, 4  ;;  %v11116_v60 = vrot.slane %v11114_v20, 5  ;;  %v16852_v8 = vld [vmem:[#allocation25 + $0x18] sm:$0xff]   ;;  %v16856_v38 = vld [vmem:[#allocation25 + $0x20] sm:$0xff]   ;;  %v16858_v20 = vld [vmem:[#allocation25 + $0x68] sm:$0xff]  }
0x124e   :  { %v11109_v55 = vsel %vm17867_vm11, %v11104_v0, %v11108_v16  ;;  %v11128_v22 = vrot.slane %v11127_v7, 4  ;;  %v11122_v63 = vrot.slane %v11120_v43, 5  ;;  %v11136_v30 = vrot.slane %v11134_v17, 4  ;;  %14483 = vmatprep.subr.bf16.mxu0 %v16842_v12  ;;  %v16853_v12 = vld [vmem:[#allocation25 + $0x98] sm:$0xff]   ;;  %v16857_v43 = vld [vmem:[#allocation25 + $0xa0] sm:$0xff]   ;;  %v16859_v17 = vld [vmem:[#allocation25 + $0xe8] sm:$0xff]  }
0x124f   :  { %11514 = vmatprep.mubr.bf16.mxu1 %v13854_v48  ;;  %v11117_v24 = vor.u32 %v11116_v60, %v11113_v45  ;;  %v11142_v10 = vrot.slane %v11140_v23, 5  ;;  %v13892_v26 = vcombine.high %v19899_v21, %v19895_v40  ;;  %v13894_v31 = vcombine.high %v19919_v28, %v19925_v19  ;;  %v16860_v50 = vld [vmem:[#allocation25 + $0x28] sm:$0xff]   ;;  %v16862_v0 = vld [vmem:[#allocation25 + $0x70] sm:$0xff]   ;;  %v16866_v48 = vld [vmem:[#allocation25 + $0x78] sm:$0xff]  }
0x1250   :  { %11515 = vmatmul.mubr.bf16.vlgmr.msra.gmra.mrb[56].mxu1 %v13853_v54  ;;  %v11133_v49 = vsel %vm17867_vm11, %v11128_v22, %v11132_v53  ;;  %v11137_v33 = vor.u32 %v11136_v30, %v11122_v63  ;;  %v13891_v58 = vcombine.low %v19899_v21, %v19895_v40  ;;  %v13893_v56 = vcombine.low %v19919_v28, %v19925_v19  ;;  %v16854_v53 = vld [vmem:[#allocation25 + $0x60] sm:$0xff]   ;;  %v16861_v7 = vld [vmem:[#allocation25 + $0xa8] sm:$0xff]   ;;  %v16863_v23 = vld [vmem:[#allocation25 + $0xf0] sm:$0xff]  }
0x1251   :  { %14510 = vmatpush3.bf16.msra.mxu1 %v16841_v61  ;;  %v13856_v62 = vcombine.high %v11109_v55, %v11133_v49  ;;  %v11118_v42 = vrot.slane %v11117_v24, 4  ;;  %14484 = vmatpush3.bf16.msra.mxu0 %v16844_v18  ;;  %v13855_v13 = vcombine.low %v11109_v55, %v11133_v49  ;;  %v13896_v4 = vcombine.high %v19910_v6, %v19905_v11  ;;  %v16864_v54 = vld [vmem:[#allocation25 + $0x30] sm:$0xff]   ;;  %v16867_v45 = vld [vmem:[#allocation25 + $0xf8] sm:$0xff]   ;;  %v16870_v18 = vld [vmem:[#allocation25 + $0x240] sm:$0xff]  }
0x1252   :  { %v11138_v9 = vrot.slane %v11137_v33, 4  ;;  %14511 = vmatprep.subr.bf16.mxu1 %v16843_v25  ;;  %14485 = vmatprep.subr.bf16.mxu0 %v16846_v14  ;;  %v13898_v41 = vcombine.high %v19934_v32, %v19942_v15  ;;  %v13895_v16 = vcombine.low %v19910_v6, %v19905_v11  ;;  %v13897_v57 = vcombine.low %v19934_v32, %v19942_v15  ;;  %v16865_v61 = vld [vmem:[#allocation25 + $0xb0] sm:$0xff]   ;;  %v16868_v60 = vld [vmem:[#allocation25 + $0x38] sm:$0xff]   ;;  %v16871_v22 = vld [vmem:[#allocation25 + $0x2c0] sm:$0xff]  }
0x1253   :  { %11473 = vmatprep.mubr.bf16.mxu0 %v13856_v62  ;;  %v11123_v44 = vsel %vm17867_vm11, %v11118_v42, %v11122_v63  ;;  %v16869_v55 = vld [vmem:[#allocation25 + $0xb8] sm:$0xff]   ;;  %v11861_v63 = vld [vmem:[#allocation3] sm:$0xee]  ;;  %v11875_v25 = vrot.slane %v19895_v40, 5  ;;  %v11879_v33 = vrot.slane %v19925_v19, 5  ;;  %v16878_v40 = vld [vmem:[#allocation25 + $0x250] sm:$0xff]  }
0x1254   :  { %v11143_v47 = vsel %vm17867_vm11, %v11138_v9, %v11142_v10  ;;  %11474 = vmatmul.mubr.bf16.gmra.mrb[56].mxu0 %v13855_v13  ;;  %v16872_v30 = vld [vmem:[#allocation25 + $0x200] sm:$0xff]   ;;  %v16874_v14 = vld [vmem:[#allocation25 + $0x248] sm:$0xff]   ;;  %v13931_v10 = vrot.slane %v11861_v63, 9  ;;  %v16879_v28 = vld [vmem:[#allocation25 + $0x2d0] sm:$0xff]   ;;  %vm17412_vm7 = vmmov 0   ;;  %vm12389_vm11 = vcmask 64512  }
0x1255   :  { %v13858_v34 = vcombine.high %v11123_v44, %v11143_v47  ;;  %14512 = vmatpush3.bf16.msra.mxu1 %v16845_v46  ;;  %v13857_v36 = vcombine.low %v11123_v44, %v11143_v47  ;;  %14486 = vmatpush3.bf16.msra.mxu0 %v16848_v51  ;;  %v16873_v24 = vld [vmem:[#allocation25 + $0x280] sm:$0xff]   ;;  %v16875_v49 = vld [vmem:[#allocation25 + $0x2c8] sm:$0xff]   ;;  %v11881_v42 = vrot.slane %v11875_v25, 4  ;;  %v11884_v19 = vrot.slane %v11879_v33, 4  ;;  %v16883_v44 = vld [vmem:[#allocation25 + $0x2d8] sm:$0xff]  }
0x1256   :  { %14513 = vmatprep.subr.bf16.mxu1 %v16847_v29  ;;  %11795 = vmatprep.mubr.bf16.mxu0 %v13892_v26  ;;  %v11882_v26 = vrot.slane %v19936_v2, 5  ;;  %v16876_v62 = vld [vmem:[#allocation25 + $0x208] sm:$0xff]   ;;  %v11885_v2 = vrot.slane %v19956_v5, 5  ;;  %v20017_v13 = vsel %vm17894_vm15, %v13931_v10, %v11875_v25  ;;  %v16882_v29 = vld [vmem:[#allocation25 + $0x258] sm:$0xff]   ;;  %v16887_v6 = vld [vmem:[#allocation25 + $0x2e0] sm:$0xff]   ;;  %v17411_v10 = vmov 0.0|0.0  }
0x1257   :  { %11522 = vmatprep.mubr.bf16.mxu1 %v13858_v34  ;;  %14487 = vmatprep.subr.bf16.mxu0 %v16850_v37  ;;  %v16884_v47 = vld [vmem:[#allocation25 + $0x218] sm:$0xff]   ;;  %v16886_v34 = vld [vmem:[#allocation25 + $0x260] sm:$0xff]   ;;  %v16894_v32 = vld [vmem:[#allocation25 + $0x270] sm:$0xff]  }
0x1258   :  { %11523 = vmatmul.mubr.bf16.gmra.mrb[60].mxu1 %v13857_v36  ;;  %v20021_v51 = vsel %vm17894_vm15, %v11881_v42, %v11882_v26  ;;  %v20031_v9 = vsel %vm17894_vm15, %v11884_v19, %v11885_v2  ;;  %v16885_v36 = vld [vmem:[#allocation25 + $0x298] sm:$0xff]   ;;  %v12301_v26 = vld [vmem:[%s20434_s28] sm:$0xff]  ;;  %v12308_v46 = vld [vmem:[%s20434_s28 + $0x38] sm:$0xff] }
0x1259   :  { %14514 = vmatpush3.bf16.msra.mxu1 %v16849_v59  ;;  %11844 = vmatprep.mubr.bf16.mxu1 %v13894_v31  ;;  %v11862_v31 = vld [vmem:[#allocation3 + $0x8] sm:$0xee]  ;;  %v13936_v5 = vcombine.high %v20017_v13, %v20021_v51 }
0x125a   :  { %14515 = vmatprep.subr.bf16.mxu1 %v16851_v1  ;;  %14488 = vmatpush3.bf16.msra.mxu0 %v16852_v8  ;;  %v13932_v21 = vrot.slane %v11862_v31, 9  ;;  %v16890_v59 = vld [vmem:[#allocation25 + $0x268] sm:$0xff]   ;;  %v16889_v1 = vld [vmem:[#allocation25 + $0x2a0] sm:$0xff]   ;;  %v12302_v31 = vld [vmem:[%s20434_s28 + $0x8] sm:$0xff] }
0x125b   :  { %14489 = vmatprep.subr.bf16.mxu0 %v16854_v53  ;;  %v16891_v8 = vld [vmem:[#allocation25 + $0x2e8] sm:$0xff]  }
0x125c   :  { %v16892_v53 = vld [vmem:[#allocation25 + $0x228] sm:$0xff]  }
0x125d   :  { %14516 = vmatpush3.bf16.msra.mxu1 %v16853_v12  ;;  %v16895_v12 = vld [vmem:[#allocation25 + $0x2f0] sm:$0xff]  }
0x125e   :  { %14517 = vmatprep.subr.bf16.mxu1 %v16855_v3  ;;  %14490 = vmatpush3.bf16.msra.mxu0 %v16856_v38  ;;  %v16896_v3 = vld [vmem:[#allocation25 + $0x230] sm:$0xff]  }
0x125f   :  { %14491 = vmatprep.subr.bf16.mxu0 %v16858_v20  ;;  %v11863_v38 = vld [vmem:[#allocation3 + $0x30] sm:$0xee] }
0x1260   :  { %v16898_v20 = vld [vmem:[#allocation25 + $0x278] sm:$0xff]  }
0x1261   :  { %14518 = vmatpush3.bf16.msra.mxu1 %v16857_v43  ;;  %v11889_v43 = vrot.slane %v19905_v11, 5 }
0x1262   :  { %14519 = vmatprep.subr.bf16.mxu1 %v16859_v17  ;;  %14492 = vmatpush3.bf16.msra.mxu0 %v16860_v50  ;;  %v16897_v17 = vld [vmem:[#allocation25 + $0x2b0] sm:$0xff]   ;;  %v11864_v50 = vld [vmem:[#allocation3 + $0x38] sm:$0xee] }
0x1263   :  { %14493 = vmatprep.subr.bf16.mxu0 %v16862_v0  ;;  %v16899_v0 = vld [vmem:[#allocation25 + $0x2f8] sm:$0xff]  }
0x1265   :  { %14520 = vmatpush3.bf16.msra.mxu1 %v16861_v7  ;;  %v13933_v7 = vrot.slane %v11863_v38, 9 }
0x1266   :  { %14521 = vmatprep.subr.bf16.mxu1 %v16863_v23  ;;  %14494 = vmatpush3.bf16.msra.mxu0 %v16864_v54  ;;  %v11896_v23 = vrot.slane %v19953_v27, 5  ;;  %v11893_v54 = vrot.slane %v19942_v15, 5  ;;  %v13935_v15 = vcombine.low %v20017_v13, %v20021_v51  ;;  %v12309_v13 = vld [vmem:[%s20434_s28 + $0x40] sm:$0xff] }
0x1267   :  { %14495 = vmatprep.subr.bf16.mxu0 %v16866_v48  ;;  %v16900_v48 = vld [vmem:[#allocation25 + $0x238] sm:$0xff]   ;;  %v11890_v11 = vsel %vm17894_vm15, %v13933_v7, %v11889_v43 }
0x1269   :  { %14522 = vmatpush3.bf16.msra.mxu1 %v16865_v61  ;;  %v11895_v61 = vrot.slane %v11889_v43, 4 }
0x126a   :  { %14523 = vmatprep.subr.bf16.mxu1 %v16867_v45  ;;  %14496 = vmatpush3.bf16.msra.mxu0 %v16868_v60  ;;  %v13934_v45 = vrot.slane %v11864_v50, 9  ;;  %v11899_v60 = vrot.slane %v19966_v52, 5 }
0x126b   :  { %14537 = vmatprep.subr.bf16.mxu0 %v16870_v18  ;;  %v16901_v18 = vld [vmem:[#allocation25 + $0x2b8] sm:$0xff]  }
0x126c   :  { %v11894_v27 = vsel %vm17894_vm15, %v13934_v45, %v11893_v54 }
0x126d   :  { %14524 = vmatpush3.bf16.msra.mxu1 %v16869_v55  ;;  %11796 = vmatmul.mubr.bf16.vlgmr.msra.gmra.mrb[60].mxu0 %v13891_v58  ;;  %v16877_v58 = vld [vmem:[#allocation25 + $0x288] sm:$0xff]   ;;  %v11897_v55 = vsel %vm17894_vm15, %v11895_v61, %v11896_v23 }
0x126e   :  { %14565 = vmatprep.subr.bf16.mxu1 %v16871_v22  ;;  %11803 = vmatprep.mubr.bf16.mxu0 %v13896_v4  ;;  %v20027_v4 = vsel %vm17894_vm15, %v13932_v21, %v11879_v33  ;;  %v11898_v22 = vrot.slane %v11893_v54, 4  ;;  %v13940_v63 = vcombine.high %v11890_v11, %v11897_v55  ;;  %v12303_v33 = vld [vmem:[%s20434_s28 + $0x10] sm:$0xff]  ;;  %v12306_v21 = vld [vmem:[%s20434_s28 + $0x28] sm:$0xff] }
0x126f   :  { %14538 = vmatpush3.bf16.msra.mxu0 %v16872_v30  ;;  %v13938_v37 = vcombine.high %v20027_v4, %v20031_v9  ;;  %v13937_v30 = vcombine.low %v20027_v4, %v20031_v9  ;;  %v20117_v4 = vld [vmem:[#allocation27] sm:$0xff] }
0x1270   :  { %11845 = vmatmul.mubr.bf16.vlgmr.msra.gmra.mrb[64].mxu1 %v13893_v56  ;;  %14539 = vmatprep.subr.bf16.mxu0 %v16874_v14  ;;  %v16880_v56 = vld [vmem:[#allocation25 + $0x210] sm:$0xff]   ;;  %v11900_v52 = vsel %vm17894_vm15, %v11898_v22, %v11899_v60  ;;  %v13939_v14 = vcombine.low %v11890_v11, %v11897_v55  ;;  %vm12742_vm15 = vcmask 1041409  }
0x1271   :  { %11852 = vmatprep.mubr.bf16.mxu1 %v13898_v41  ;;  %14566 = vmatpush3.bf16.msra.mxu1 %v16873_v24  ;;  %v16881_v41 = vld [vmem:[#allocation25 + $0x290] sm:$0xff]   ;;  %v13942_v25 = vcombine.high %v11894_v27, %v11900_v52  ;;  %v13941_v24 = vcombine.low %v11894_v27, %v11900_v52 }
0x1272   :  { %14567 = vmatprep.subr.bf16.mxu1 %v16875_v49  ;;  %v20065_v49 = vpack.c.bf16 %v12302_v31, %v12301_v26 }
0x1273   :  { %14540 = vmatpush3.bf16.msra.mxu0 %v16876_v62  ;;  %v12304_v62 = vld [vmem:[%s20434_s28 + $0x18] sm:$0xff] }
0x1274   :  { %14541 = vmatprep.subr.bf16.mxu0 %v16878_v40  ;;  %v20075_v42 = vpack.c.bf16 %v12304_v62, %v12303_v33  ;;  %v12305_v40 = vld [vmem:[%s20434_s28 + $0x20] sm:$0xff] }
0x1275   :  { %14568 = vmatpush3.bf16.msra.mxu1 %v16877_v58  ;;  %11804 = vmatmul.mubr.bf16.gmra.mrb[64].mxu0 %v13895_v16  ;;  %v16888_v16 = vld [vmem:[#allocation25 + $0x220] sm:$0xff]   ;;  %v20085_v2 = vpack.c.bf16 %v12306_v21, %v12305_v40 }
0x1276   :  { %14569 = vmatprep.subr.bf16.mxu1 %v16879_v28  ;;  %12222 = vmatprep.mubr.bf16.mxu0 %v13936_v5  ;;  %v12307_v58 = vld [vmem:[%s20434_s28 + $0x30] sm:$0xff]  ;;  %v12310_v28 = vld [vmem:[%s20434_s28 + $0x48] sm:$0xff]  ;;  %v12312_v5 = vld [vmem:[%s20434_s28 + $0x58] sm:$0xff] }
0x1277   :  { %14542 = vmatpush3.bf16.msra.mxu0 %v16880_v56  ;;  %v20098_v51 = vpack.c.bf16 %v12308_v46, %v12307_v58  ;;  %v20108_v19 = vpack.c.bf16 %v12310_v28, %v12309_v13  ;;  %v12311_v56 = vld [vmem:[%s20434_s28 + $0x50] sm:$0xff] }
0x1278   :  { %11853 = vmatmul.mubr.bf16.gmra.mrb[68].mxu1 %v13897_v57  ;;  %14543 = vmatprep.subr.bf16.mxu0 %v16882_v29  ;;  %v16893_v57 = vld [vmem:[#allocation25 + $0x2a8] sm:$0xff]   ;;  %v20122_v9 = vpack.c.bf16 %v12312_v5, %v12311_v56 }
0x1279   :  { %14570 = vmatpush3.bf16.msra.mxu1 %v16881_v41  ;;  %12271 = vmatprep.mubr.bf16.mxu1 %v13938_v37  ;;  %v12313_v29 = vld [vmem:[%s20434_s28 + $0x60] sm:$0xff]  ;;  %v12314_v41 = vld [vmem:[%s20434_s28 + $0x68] sm:$0xff]  ;;  %v12315_v37 = vld [vmem:[%s20434_s28 + $0x70] sm:$0xff] }
0x127a   :  { %14571 = vmatprep.subr.bf16.mxu1 %v16883_v44  ;;  %v20132_v44 = vpack.c.bf16 %v12314_v41, %v12313_v29 }
0x127b   :  { %14544 = vmatpush3.bf16.msra.mxu0 %v16884_v47  ;;  %v12316_v47 = vld [vmem:[%s20434_s28 + $0x78] sm:$0xff]  ;;  %s17413_s28 = smov [#allocation34]  }
0x127c   :  { %14545 = vmatprep.subr.bf16.mxu0 %v16886_v34  ;;  %v20142_v34 = vpack.c.bf16 %v12316_v47, %v12315_v37  ;;  %s12911_s29 = sshll.u32 %s17413_s28, 4  ;;  %s12912_s29 = int_to_ptr.vmem [resolvable:$true] %s12911_s29 }
0x127d   :  { %14572 = vmatpush3.bf16.msra.mxu1 %v16885_v36  ;;  %s17340_s25 = scalar_lea.vmem %s12912_s29, 32  ;;  %p17345_p13 = scmp.lt.s32.totalorder %s12912_s29, %s12912_s29 }
0x127e   :  { %14573 = vmatprep.subr.bf16.mxu1 %v16887_v6  ;;  %p17341_p12 = scmp.ne.s32.totalorder %s12912_s29, %s17340_s25  ;;  %p17346_p0 = scmp.lt.s32.totalorder %s17340_s25, %s17340_s25 }
0x127f   :  { %14546 = vmatpush3.bf16.msra.mxu0 %v16888_v16 }
0x1280   :  { %14547 = vmatprep.subr.bf16.mxu0 %v16890_v59  ;;  %p17347_p1 = por %p17346_p0, %p17345_p13 }
0x1281   :  { %14574 = vmatpush3.bf16.msra.mxu1 %v16889_v1 }
0x1282   :  { %14575 = vmatprep.subr.bf16.mxu1 %v16891_v8  ;;  %p17348_p2 = pnand %p17347_p1, %p17341_p12 }
0x1283   :  { %14548 = vmatpush3.bf16.msra.mxu0 %v16892_v53 }
0x1284   :  { %14549 = vmatprep.subr.bf16.mxu0 %v16894_v32 }
0x1285   :  { %14576 = vmatpush3.bf16.msra.mxu1 %v16893_v57 }
0x1286   :  { %14577 = vmatprep.subr.bf16.mxu1 %v16895_v12 }
0x1287   :  { %14550 = vmatpush3.bf16.msra.mxu0 %v16896_v3 }
0x1288   :  { %14551 = vmatprep.subr.bf16.mxu0 %v16898_v20 }
0x1289   :  { %14578 = vmatpush3.bf16.msra.mxu1 %v16897_v17 }
0x128a   :  { %14579 = vmatprep.subr.bf16.mxu1 %v16899_v0 }
0x128b   :  { %14552 = vmatpush3.bf16.msra.mxu0 %v16900_v48 }
0x128c   :  { %15305 = vmatprep.subr.bf16.mxu0 %v17411_v10 }
0x128d   :  { %14580 = vmatpush3.bf16.msra.mxu1 %v16901_v18 }
0x128e   :  { %12223 = vmatmul.mubr.bf16.vlgmr.msra.gmra.mrb[68].mxu0 %v13935_v15  ;;  %14687 = vmatprep.subr.mxu1 %v20384_v39 }
0x128f   :  { %12230 = vmatprep.mubr.bf16.mxu0 %v13940_v63  ;;  %15307 = vmatpush3.bf16.msra.mxu0 %v20065_v49 }
0x1290   :  { %12272 = vmatmul.mubr.bf16.vlgmr.msra.gmra.mrb[72].mxu1 %v13937_v30  ;;  %15308 = vmatprep.subr.bf16.mxu0 %v17411_v10 }
0x1291   :  { %12279 = vmatprep.mubr.bf16.mxu1 %v13942_v25  ;;  %14688 = vmatpush3.msra.mxu1 %v20117_v4 }
0x1292   :  { %15329 = vmatprep.subr.bf16.mxu1 %v17411_v10 }
0x1293   :  { %15310 = vmatpush3.bf16.msra.mxu0 %v20075_v42 }
0x1294   :  { %15311 = vmatprep.subr.bf16.mxu0 %v17411_v10 }
0x1296   :  { %12231 = vmatmul.mubr.bf16.gmra.mrb[72].mxu0 %v13939_v14 }
0x1297   :  { %15313 = vmatpush3.bf16.msra.mxu0 %v20085_v2  ;;  %14684 = vmatprep.mubr.msk.f32.mxu0 %vm17412_vm7, %v20384_v39 }
0x1298   :  { %12280 = vmatmul.mubr.bf16.gmra.mrb[76].mxu1 %v13941_v24  ;;  %15314 = vmatprep.subr.bf16.mxu0 %v17411_v10 }
0x1299   :  { %14689 = vmatprep.mubr.msk.f32.mxu1 %vm17412_vm7, %v20384_v39 }
0x129b   :  { %15316 = vmatpush3.bf16.msra.mxu0 %v20098_v51 }
0x129c   :  { %15317 = vmatprep.subr.bf16.mxu0 %v17411_v10 }
0x129f   :  { %15319 = vmatpush3.bf16.msra.mxu0 %v20108_v19 }
0x12a0   :  { %15320 = vmatprep.subr.bf16.mxu0 %v17411_v10 }
0x12a3   :  { %15322 = vmatpush3.bf16.msra.mxu0 %v20122_v9 }
0x12a4   :  { %15323 = vmatprep.subr.bf16.mxu0 %v17411_v10 }
0x12a7   :  { %15325 = vmatpush3.bf16.msra.mxu0 %v20132_v44 }
0x12a8   :  { %15326 = vmatprep.subr.bf16.mxu0 %v17411_v10 }
0x12ab   :  { %15328 = vmatpush3.bf16.msra.mxu0 %v20142_v34 }
0x12ac   :  { %14727 = vmatprep.subr.mxu0 %v20384_v39 }
0x131f   :  { %v14441_v36 = vpop.f32.mrb[52].mxu0 }
0x1320   :  { %v14442_v6 = vpop.f32.mrb[53].mxu0 }
0x1321   :  { %v14443_v16 = vadd.f32 %v14442_v6, %v14441_v36  ;;  %v14444_v59 = vpop.f32.mrb[54].mxu0 }
0x1322   :  { %v14445_v1 = vpop.f32.mrb[55].mxu0 }
0x1323   :  { %v14469_v8 = vpop.f32.mrb[56].mxu1  ;;  %v14446_v53 = vadd.f32 %v14445_v1, %v14444_v59 }
0x1324   :  { %v14470_v32 = vpop.f32.mrb[57].mxu1 }
0x1325   :  { %v14471_v57 = vadd.f32 %v14470_v32, %v14469_v8  ;;  %v14472_v12 = vpop.f32.mrb[58].mxu1 }
0x1326   :  { %v14473_v3 = vpop.f32.mrb[59].mxu1 }
0x1327   :  { %v11517_v38 = vadd.f32 %v14471_v57, %v14443_v16  ;;  %v14474_v20 = vadd.f32 %v14473_v3, %v14472_v12  ;;  %v14447_v43 = vpop.f32.mrb[56].mxu0 }
0x1328   :  { %v14448_v17 = vpop.f32.mrb[57].mxu0 }
0x1329   :  { %v11520_v50 = vadd.f32 %v14474_v20, %v14446_v53  ;;  %v14449_v0 = vadd.f32 %v14448_v17, %v14447_v43  ;;  %v14450_v7 = vpop.f32.mrb[58].mxu0 }
0x132a   :  { %v14451_v23 = vpop.f32.mrb[59].mxu0 }
0x132b   :  { %v14475_v54 = vpop.f32.mrb[60].mxu1  ;;  %v14452_v48 = vadd.f32 %v14451_v23, %v14450_v7 }
0x132c   :  { %v14476_v61 = vpop.f32.mrb[61].mxu1 }
0x132d   :  { %v14477_v45 = vadd.f32 %v14476_v61, %v14475_v54  ;;  %v14478_v60 = vpop.f32.mrb[62].mxu1 }
0x132e   :  { %v14479_v18 = vpop.f32.mrb[63].mxu1 }
0x132f   :  { %v11525_v11 = vadd.f32 %v14477_v45, %v14449_v0  ;;  %v14480_v55 = vadd.f32 %v14479_v18, %v14478_v60 }
0x1331   :  { %v11528_v22 = vadd.f32 %v14480_v55, %v14452_v48 }
0x1340   :  { %v14497_v15 = vpop.f32.mrb[60].mxu0 }
0x1341   :  { %v14498_v27 = vpop.f32.mrb[61].mxu0 }
0x1342   :  { %v14499_v52 = vadd.f32 %v14498_v27, %v14497_v15  ;;  %v14500_v63 = vpop.f32.mrb[62].mxu0 }
0x1343   :  { %v14525_v30 = vpop.f32.mrb[64].mxu1  ;;  %v14501_v25 = vpop.f32.mrb[63].mxu0 }
0x1344   :  { %v11798_v14 = vadd.f32 %v14499_v52, %v11517_v38  ;;  %v14526_v24 = vpop.f32.mrb[65].mxu1  ;;  %v14502_v26 = vadd.f32 %v14501_v25, %v14500_v63 }
0x1345   :  { %v14527_v31 = vadd.f32 %v14526_v24, %v14525_v30  ;;  %v14528_v33 = vpop.f32.mrb[66].mxu1 }
0x1346   :  { %v11801_v62 = vadd.f32 %v14502_v26, %v11520_v50  ;;  %v14529_v40 = vpop.f32.mrb[67].mxu1 }
0x1347   :  { %v11847_v21 = vadd.f32 %v14527_v31, %v11798_v14  ;;  %v14530_v58 = vadd.f32 %v14529_v40, %v14528_v33 }
0x1348   :  { %v14503_v46 = vpop.f32.mrb[64].mxu0 }
0x1349   :  { %v11850_v13 = vadd.f32 %v14530_v58, %v11801_v62  ;;  %v14504_v28 = vpop.f32.mrb[65].mxu0 }
0x134a   :  { %v14505_v56 = vadd.f32 %v14504_v28, %v14503_v46  ;;  %v14506_v5 = vpop.f32.mrb[66].mxu0 }
0x134b   :  { %v14531_v29 = vpop.f32.mrb[68].mxu1  ;;  %v14507_v41 = vpop.f32.mrb[67].mxu0 }
0x134c   :  { %v11806_v37 = vadd.f32 %v14505_v56, %v11525_v11  ;;  %v14532_v47 = vpop.f32.mrb[69].mxu1  ;;  %v14508_v36 = vadd.f32 %v14507_v41, %v14506_v5 }
0x134d   :  { %v14533_v6 = vadd.f32 %v14532_v47, %v14531_v29  ;;  %v14534_v16 = vpop.f32.mrb[70].mxu1 }
0x134e   :  { %v11809_v59 = vadd.f32 %v14508_v36, %v11528_v22  ;;  %v14535_v1 = vpop.f32.mrb[71].mxu1 }
0x134f   :  { %v11855_v8 = vadd.f32 %v14533_v6, %v11806_v37  ;;  %v14536_v53 = vadd.f32 %v14535_v1, %v14534_v16 }
0x1351   :  { %v11858_v32 = vadd.f32 %v14536_v53, %v11809_v59 }
0x1361   :  { %v14553_v57 = vpop.f32.mrb[68].mxu0 }
0x1362   :  { %v14554_v12 = vpop.f32.mrb[69].mxu0 }
0x1363   :  { %v14581_v3 = vpop.f32.mrb[72].mxu1  ;;  %v14555_v38 = vadd.f32 %v14554_v12, %v14553_v57  ;;  %v14556_v20 = vpop.f32.mrb[70].mxu0 }
0x1364   :  { %v14582_v43 = vpop.f32.mrb[73].mxu1  ;;  %v14557_v17 = vpop.f32.mrb[71].mxu0 }
0x1365   :  { %v14583_v50 = vadd.f32 %v14582_v43, %v14581_v3  ;;  %v14584_v0 = vpop.f32.mrb[74].mxu1  ;;  %v14558_v7 = vadd.f32 %v14557_v17, %v14556_v20 }
0x1366   :  { %v14585_v23 = vpop.f32.mrb[75].mxu1 }
0x1367   :  { %v12274_v54 = vadd.f32 %v14583_v50, %v14555_v38  ;;  %v14586_v48 = vadd.f32 %v14585_v23, %v14584_v0 }
0x1369   :  { %v12288_v61 = vadd.f32 %v12274_v54, %v11847_v21  ;;  %v12277_v45 = vadd.f32 %v14586_v48, %v14558_v7  ;;  %v14559_v60 = vpop.f32.mrb[72].mxu0 }
0x136a   :  { %v14560_v18 = vpop.f32.mrb[73].mxu0 }
0x136b   :  { %v12289_v11 = vadd.f32 %v12277_v45, %v11850_v13  ;;  %v14587_v55 = vpop.f32.mrb[76].mxu1  ;;  %v14561_v22 = vadd.f32 %v14560_v18, %v14559_v60  ;;  %v14562_v15 = vpop.f32.mrb[74].mxu0  ;;  %v12555_v18 = vld [vmem:[#allocation28] sm:$0x1] }
0x136c   :  { %v14588_v27 = vpop.f32.mrb[77].mxu1  ;;  %v14563_v52 = vpop.f32.mrb[75].mxu0 }
0x136d   :  { %v14589_v63 = vadd.f32 %v14588_v27, %v14587_v55  ;;  %v14590_v30 = vpop.f32.mrb[78].mxu1  ;;  %v14564_v25 = vadd.f32 %v14563_v52, %v14562_v15  ;;  %v12292_v31 = vadd.f32 %v12289_v11, %v12288_v61 }
0x136e   :  { %v14591_v14 = vpop.f32.mrb[79].mxu1 }
0x136f   :  { %v12282_v24 = vadd.f32 %v14589_v63, %v14561_v22  ;;  %v14592_v26 = vadd.f32 %v14591_v14, %v14590_v30  ;;  %v12632_v22 = vld [vmem:[#allocation30] sm:$0x1] }
0x1371   :  { %v12290_v33 = vadd.f32 %v12282_v24, %v11855_v8  ;;  %v12285_v62 = vadd.f32 %v14592_v26, %v14564_v25 }
0x1373   :  { %v12293_v40 = vadd.f32 %v12292_v31, %v12290_v33  ;;  %v12291_v21 = vadd.f32 %v12285_v62, %v11858_v32 }
0x1375   :  { %v12294_v58 = vadd.f32 %v12293_v40, %v12291_v21 }
0x1377   :  { %v12295_v46 = vrot.slane %v12294_v58, 4 }
0x1379   :  { %v12296_v28 = vadd.f32 %v12295_v46, %v12294_v58 }
0x137b   :  { %v12297_v13 = vrot.slane %v12296_v28, 2 }
0x137d   :  { %v12298_v56 = vadd.f32 %v12297_v13, %v12296_v28 }
0x137f   :  { %v12299_v5 = vrot.slane %v12298_v56, 1 }
0x1381   :  { %v12300_v29 = vadd.f32 %v12299_v5, %v12298_v56 }
0x1383   :  { %14685 = vmatmul.mubr.f32.vlgmr.msra.gmra.mrb[76].mxu0 %v12300_v29 }
0x1384   :  { %14728 = vmatpush3.msra.mxu0 %v20117_v4  ;;  %14729 = vmatprep.mubr.msk.f32.mxu0 %vm17412_vm7, %v20384_v39 }
0x1385   :  { %14732 = vmatprep.subr.mxu0 %v20384_v39 }
0x1456   :  { %v12383_v41 = vpop.f32.mrb[76].mxu0 }
0x1457   :  { %v12387_v37 = vmul.f32 0.001953125, %v12383_v41  ;;  %v14686_v47 = vpop.f32.mrb[77].mxu0 }
0x1459   :  { %14690 = vmatmul.mubr.msk.f32.vlgmr.msra.gmra.mrb[80].mxu1 %vm12389_vm11, %v12387_v37 }
0x145a   :  { %15331 = vmatpush3.bf16.msra.mxu1 %v20065_v49  ;;  %14724 = vmatprep.mubr.msk.f32.mxu1 %vm17412_vm7, %v20384_v39 }
0x145b   :  { %15332 = vmatprep.subr.bf16.mxu1 %v17411_v10 }
0x145e   :  { %15334 = vmatpush3.bf16.msra.mxu1 %v20075_v42 }
0x145f   :  { %15335 = vmatprep.subr.bf16.mxu1 %v17411_v10 }
0x1462   :  { %15337 = vmatpush3.bf16.msra.mxu1 %v20085_v2 }
0x1463   :  { %15338 = vmatprep.subr.bf16.mxu1 %v17411_v10 }
0x1466   :  { %15340 = vmatpush3.bf16.msra.mxu1 %v20098_v51 }
0x1467   :  { %15341 = vmatprep.subr.bf16.mxu1 %v17411_v10 }
0x146a   :  { %15343 = vmatpush3.bf16.msra.mxu1 %v20108_v19 }
0x146b   :  { %15344 = vmatprep.subr.bf16.mxu1 %v17411_v10 }
0x146e   :  { %15346 = vmatpush3.bf16.msra.mxu1 %v20122_v9 }
0x146f   :  { %15347 = vmatprep.subr.bf16.mxu1 %v17411_v10 }
0x1472   :  { %15349 = vmatpush3.bf16.msra.mxu1 %v20132_v44 }
0x1473   :  { %15350 = vmatprep.subr.bf16.mxu1 %v17411_v10 }
0x1476   :  { %15352 = vmatpush3.bf16.msra.mxu1 %v20142_v34 }
0x1477   :  { %14772 = vmatprep.subr.mxu1 %v20384_v39 }
0x152c   :  { %v12459_v36 = vpop.f32.mrb[80].mxu1 }
0x152d   :  { %v12466_v6 = vrot.slane %v12459_v36, %v18324_v35  ;;  %v14691_v16 = vpop.f32.mrb[81].mxu1 }
0x152f   :  { %v12467_v59 = vsub.f32 %v12288_v61, %v12466_v6  ;;  %v12468_v1 = vsub.f32 %v12289_v11, %v12466_v6  ;;  %v12469_v8 = vsub.f32 %v12290_v33, %v12466_v6  ;;  %v12470_v53 = vsub.f32 %v12291_v21, %v12466_v6  ;;  %v13978_v6 = vld [vmem:[#allocation33] ss:$0 sm:$0xff] }
0x1531   :  { %v12471_v32 = vmul.f32 %v12467_v59, %v12467_v59  ;;  %v12472_v57 = vmul.f32 %v12468_v1, %v12468_v1  ;;  %v12473_v12 = vmul.f32 %v12469_v8, %v12469_v8  ;;  %v12474_v38 = vmul.f32 %v12470_v53, %v12470_v53 }
0x1533   :  { %v12475_v3 = vadd.f32 %v12472_v57, %v12471_v32 }
0x1535   :  { %v12476_v20 = vadd.f32 %v12475_v3, %v12473_v12 }
0x1537   :  { %v12477_v43 = vadd.f32 %v12476_v20, %v12474_v38 }
0x1539   :  { %v12478_v17 = vrot.slane %v12477_v43, 4 }
0x153b   :  { %v12479_v50 = vadd.f32 %v12478_v17, %v12477_v43 }
0x153d   :  { %v12480_v0 = vrot.slane %v12479_v50, 2 }
0x153f   :  { %v12481_v7 = vadd.f32 %v12480_v0, %v12479_v50 }
0x1541   :  { %v12482_v23 = vrot.slane %v12481_v7, 1 }
0x1543   :  { %v12483_v54 = vadd.f32 %v12482_v23, %v12481_v7 }
0x1545   :  { %14725 = vmatmul.mubr.f32.vlgmr.msra.gmra.mrb[82].mxu1 %v12483_v54 }
0x1546   :  { %14774 = vmatprep.mubr.msk.f32.mxu1 %vm17412_vm7, %v20384_v39 }
0x1618   :  { %v12550_v48 = vpop.f32.mrb[82].mxu1 }
0x1619   :  { %v12554_v61 = vmul.f32 0.001953125, %v12550_v48  ;;  %v14726_v45 = vpop.f32.mrb[83].mxu1 }
0x161b   :  { %v12556_v60 = vadd.f32 1e-05, %v12554_v61 }
0x161d   :  { %16908 = vrsqrt.f32 %v12556_v60 }
0x1627   :  { %v16909_v11 = vpop.eup %16908 }
0x1628   :  { %v12558_v55 = vmul.f32 %v16909_v11, %v12555_v18 }
0x162a   :  { %14730 = vmatmul.mubr.msk.f32.vlgmr.msra.gmra.mrb[78].mxu0 %vm12389_vm11, %v12558_v55 }
0x162b   :  { %14733 = vmatpush3.msra.mxu0 %v20117_v4  ;;  %14734 = vmatprep.mubr.msk.f32.mxu0 %vm17412_vm7, %v20384_v39 }
0x162c   :  { %15353 = vmatprep.subr.bf16.mxu0 %v17411_v10 }
0x162e   :  { %14735 = vmatmul.mubr.msk.f32.vlgmr.msra.gmra.mrb[80].mxu0 %vm12389_vm11, %v12632_v22 }
0x162f   :  { %15355 = vmatpush3.bf16.msra.mxu0 %v20065_v49  ;;  %14769 = vmatprep.mubr.msk.f32.mxu0 %vm17412_vm7, %v20384_v39  ;;  %v12816_v39 = vld [vmem:[#allocation31] sm:$0xff] }
0x1630   :  { %15356 = vmatprep.subr.bf16.mxu0 %v17411_v10  ;;  %14773 = vmatpush3.msra.mxu1 %v12816_v39 }
0x1633   :  { %15358 = vmatpush3.bf16.msra.mxu0 %v20075_v42 }
0x1634   :  { %15359 = vmatprep.subr.bf16.mxu0 %v17411_v10 }
0x1637   :  { %15361 = vmatpush3.bf16.msra.mxu0 %v20085_v2 }
0x1638   :  { %15362 = vmatprep.subr.bf16.mxu0 %v17411_v10 }
0x163b   :  { %15364 = vmatpush3.bf16.msra.mxu0 %v20098_v51 }
0x163c   :  { %15365 = vmatprep.subr.bf16.mxu0 %v17411_v10 }
0x163f   :  { %15367 = vmatpush3.bf16.msra.mxu0 %v20108_v19 }
0x1640   :  { %15368 = vmatprep.subr.bf16.mxu0 %v17411_v10 }
0x1643   :  { %15370 = vmatpush3.bf16.msra.mxu0 %v20122_v9 }
0x1644   :  { %15371 = vmatprep.subr.bf16.mxu0 %v17411_v10 }
0x1647   :  { %15373 = vmatpush3.bf16.msra.mxu0 %v20132_v44 }
0x1648   :  { %15374 = vmatprep.subr.bf16.mxu0 %v17411_v10 }
0x164b   :  { %15376 = vmatpush3.bf16.msra.mxu0 %v20142_v34 }
0x16fd   :  { %v12628_v49 = vpop.f32.mrb[78].mxu0 }
0x16fe   :  { %v12709_v42 = vrot.slane %v12628_v49, %v18324_v35  ;;  %v14731_v2 = vpop.f32.mrb[79].mxu0 }
0x1700   :  { %v12710_v51 = vmul.f32 %v12709_v42, %v12467_v59  ;;  %v12711_v4 = vmul.f32 %v12709_v42, %v12468_v1  ;;  %v12712_v15 = vmul.f32 %v12709_v42, %v12469_v8  ;;  %v12713_v27 = vmul.f32 %v12709_v42, %v12470_v53 }
0x1701   :  { %v12702_v19 = vpop.f32.mrb[80].mxu0 }
0x1702   :  { %v12717_v9 = vrot.slane %v12702_v19, %v18324_v35  ;;  %v14736_v52 = vpop.f32.mrb[81].mxu0 }
0x1704   :  { %v12718_v63 = vadd.f32 %v12717_v9, %v12710_v51  ;;  %v12719_v44 = vadd.f32 %v12717_v9, %v12711_v4  ;;  %v12720_v30 = vadd.f32 %v12717_v9, %v12712_v15  ;;  %v12721_v10 = vadd.f32 %v12717_v9, %v12713_v27 }
0x1706   :  { %v12722_v25 = vmax.f32 %v12718_v63, 0.0  ;;  %v12723_v34 = vmax.f32 %v12719_v44, 0.0  ;;  %v12724_v14 = vmax.f32 %v12720_v30, 0.0  ;;  %v12725_v24 = vmax.f32 %v12721_v10, 0.0 }
0x1708   :  { %v12726_v26 = vadd.f32 %v12723_v34, %v12722_v25  ;;  %v12733_v31 = vadd.f32 %v12725_v24, %v12724_v14 }
0x170a   :  { %v12727_v33 = vrot.slane %v12726_v26, 4  ;;  %v12734_v62 = vrot.slane %v12733_v31, 4 }
0x170c   :  { %v12728_v40 = vadd.f32 %v12727_v33, %v12726_v26  ;;  %v12735_v21 = vadd.f32 %v12734_v62, %v12733_v31 }
0x170e   :  { %v12729_v58 = vrot.slane %v12728_v40, 2  ;;  %v12736_v46 = vrot.slane %v12735_v21, 2 }
0x1710   :  { %v12730_v28 = vadd.f32 %v12729_v58, %v12728_v40  ;;  %v12737_v13 = vadd.f32 %v12736_v46, %v12735_v21 }
0x1712   :  { %v12731_v35 = vrot.slane %v12730_v28, 1  ;;  %v12738_v56 = vrot.slane %v12737_v13, 1 }
0x1714   :  { %v12732_v5 = vadd.f32 %v12731_v35, %v12730_v28  ;;  %v12739_v29 = vadd.f32 %v12738_v56, %v12737_v13 }
0x1716   :  { %v12743_v41 = vsel %vm12742_vm15, %v12739_v29, %v12732_v5 }
0x1717   :  { %14770 = vmatmul.mubr.f32.vlgmr.msra.gmra.mrb[82].mxu0 %v12743_v41 }
0x17ea   :  { %v12811_v37 = vpop.f32.mrb[82].mxu0 }
0x17eb   :  { %v12815_v47 = vmul.f32 0.00390625, %v12811_v37  ;;  %v14771_v36 = vpop.f32.mrb[83].mxu0 }
0x17ed   :  { %14775 = vmatmul.mubr.msk.f32.vlgmr.msra.gmra.mrb[84].mxu1 %vm12389_vm11, %v12815_v47 }
0x18c0   :  { %v12893_v16 = vpop.f32.mrb[84].mxu1 }
0x18c1   :  { %v12894_v59 = vadd.f32 %v13978_v6, %v12893_v16  ;;  %v14776_v1 = vpop.f32.mrb[85].mxu1 }
0x18c3   :  { %v13980_v8 = vmul.f32 -1.442695, %v12894_v59 }
0x18c5   :  { %16910 = vpow2.f32 %v13980_v8 }
0x18cf   :  { %v16911_v53 = vpop.eup %16910 }
0x18d0   :  { %v12900_v32 = vadd.f32 1.0, %v16911_v53 }
0x18d2   :  { %16912 = vrcp.f32 %v12900_v32 }
0x18dc   :  { %v16913_v57 = vpop.eup %16912 }
0x18dd   :  { %12904 = vst.msk [vmem:[#allocation34] sm:$0x3] %vm12903_vm0, %v16913_v57 }
0x18de   :  { %17351 = shalt.err (!%p17348_p2)
}
0x18df   :  { %s20435_s22 = sld [smem:[#allocation74_spill]] }
0x18e5   :  { %s17352_s12 = scalar_lea.hbm %s20435_s22, 32 }
0x18e6   :  { %p17353_p3 = scmp.ne.s32.totalorder %s20435_s22, %s17352_s12  ;;  %p17356_p4 = scmp.lt.u32.totalorder %s17352_s12, %s20435_s22 }
0x18e8   :  { %p17358_p5 = pnand %p17356_p4, %p17353_p3 }
0x18ea   :  { %17361 = shalt.err (!%p17358_p5)
}
0x18eb   :  { %12914 = dma.vmem_to_hbm [thread:$0]  %s12912_s29, 32, %s20435_s22, [#allocation6]  }
0x18ec   :  { %17382 = dma.done.wait [#allocation6], 32  }
0x18ed   :  { %17383 = vsyncadd [#allocation6], 4294967264 }
0x18ee   :  { %12918 = vsyncpa [#allocation5], 1 }
0x18ef   :  { %12919 = vsyncpa [#allocation8], 1 }
0x18f0   :  { %12920 = vsyncpa [#allocation11], 1 }
0x18f1   :  { %12921 = vsyncpa [#allocation14], 1 }
0x18f2   :  { %12922 = vsyncpa [#allocation17], 1 }
0x18f3   :  { %12923 = vsyncpa [#allocation20], 1 }
0x18f4   :  { %12924 = vsyncpa [#allocation23], 1 }
0x18f5   :  { %12925 = vsyncpa [#allocation26], 1 }
0x18f6   :  { %12926 = vsyncpa [#allocation29], 1 }
0x18f7   :  { %12927 = vsyncpa [#allocation32], 1 }
0x18f8   :  { %12928 = vsyncpa [#allocation6], 1 }

</bundles_post_ra>
